<compile_context>
chip_gen: v7x
topology: tpu7x:2x2x1
jax: 0.10.0
libtpu: 0.0.40
codegen_flags: <defaults>
</compile_context>

<pallas_src>
import functools

import jax
import jax.numpy as jnp
from jax import lax
from jax.experimental import pallas as pl
from jax.experimental.pallas import tpu as pltpu


# ----------------------------- helpers --------------------------------------

def _round_up(x, m):
    return ((x + m - 1) // m) * m


def _pad2d(x, rows, cols):
    pr, pc = rows - x.shape[0], cols - x.shape[1]
    if pr == 0 and pc == 0:
        return x
    return jnp.pad(x, ((0, pr), (0, pc)))


# ----------------------------- Pallas kernels --------------------------------

def _mm_epilogue(acc, s_ref, c_ref, r_ref, o_ref, act):
    """y = acc * scale + bias [+ residual]; optional relu / sigmoid; store."""
    y = acc * s_ref[...] + c_ref[...]
    if r_ref is not None:
        y = y + r_ref[...].astype(jnp.float32)
    if act == "relu":
        y = jnp.maximum(y, 0.0)
    elif act == "sigmoid":
        y = jax.nn.sigmoid(y)
    o_ref[...] = y.astype(o_ref.dtype)


def _mm_single_kernel(*refs, act, has_residual):
    # Single K step: no accumulator scratch, epilogue applied directly.
    if has_residual:
        a_ref, b_ref, s_ref, c_ref, r_ref, o_ref = refs
    else:
        a_ref, b_ref, s_ref, c_ref, o_ref = refs
        r_ref = None
    acc = jnp.dot(a_ref[...], b_ref[...], preferred_element_type=jnp.float32)
    _mm_epilogue(acc, s_ref, c_ref, r_ref, o_ref, act)


def _mm_multi_kernel(*refs, act, has_residual):
    # K is a reduction grid axis (last, "arbitrary"); f32 accumulator scratch.
    if has_residual:
        a_ref, b_ref, s_ref, c_ref, r_ref, o_ref, acc_ref = refs
    else:
        a_ref, b_ref, s_ref, c_ref, o_ref, acc_ref = refs
        r_ref = None

    @pl.when(pl.program_id(2) == 0)
    def _():
        acc_ref[...] = jnp.zeros_like(acc_ref)

    acc_ref[...] += jnp.dot(a_ref[...], b_ref[...],
                            preferred_element_type=jnp.float32)

    @pl.when(pl.program_id(2) == pl.num_programs(2) - 1)
    def _():
        _mm_epilogue(acc_ref[...], s_ref, c_ref, r_ref, o_ref, act)


def _max_reduce_kernel(x_ref, o_ref):
    # x: (k*k, rows, C) stacked window taps -> max over taps
    o_ref[...] = jnp.max(x_ref[...], axis=0)


def _mean_reduce_kernel(x_ref, o_ref):
    # x: (N, H*W, C) -> mean over spatial axis (f32 accumulation)
    o_ref[...] = jnp.mean(x_ref[...].astype(jnp.float32), axis=1)


# ----------------------------- Pallas wrappers -------------------------------

_TM, _TN, _TK = 256, 256, 512   # conservative caps: fits v5e/v6e/v7x VMEM


def fused_matmul(a, b, scale, bias, residual=None, act=None,
                 out_dtype=jnp.bfloat16):
    """act((a @ b) * scale + bias [+ residual]); bf16 MXU inputs, f32 accum.

    a: (M, K), b: (K, N), scale/bias: (N,), residual: (M, N) or None.
    """
    M, K = a.shape
    Kb, N = b.shape
    assert K == Kb

    tm = min(_TM, _round_up(M, 8))
    tn = min(_TN, _round_up(N, 128))
    Kp = _round_up(K, 128)
    if Kp % _TK == 0:
        tk = _TK
    elif Kp % 384 == 0:
        tk = 384
    elif Kp % 256 == 0:
        tk = 256
    else:
        tk = 128
    Mp, Np = _round_up(M, tm), _round_up(N, tn)
    nk = Kp // tk

    a_p = _pad2d(a.astype(jnp.bfloat16), Mp, Kp)
    b_p = _pad2d(b.astype(jnp.bfloat16), Kp, Np)
    s_p = _pad2d(scale.reshape(1, -1).astype(jnp.float32), 1, Np)
    c_p = _pad2d(bias.reshape(1, -1).astype(jnp.float32), 1, Np)

    operands = [a_p, b_p, s_p, c_p]
    has_res = residual is not None
    if has_res:
        operands.append(_pad2d(residual.astype(jnp.bfloat16), Mp, Np))

    bytes_accessed = sum(int(x.size) * x.dtype.itemsize for x in operands) \
        + Mp * Np * jnp.dtype(out_dtype).itemsize
    cost = pl.CostEstimate(
        flops=2 * Mp * Np * Kp,
        transcendentals=(Mp * Np if act == "sigmoid" else 0),
        bytes_accessed=bytes_accessed)

    if nk == 1:
        grid = (Mp // tm, Np // tn)
        in_specs = [pl.BlockSpec((tm, Kp), lambda i, j: (i, 0)),
                    pl.BlockSpec((Kp, tn), lambda i, j: (0, j)),
                    pl.BlockSpec((1, tn), lambda i, j: (0, j)),
                    pl.BlockSpec((1, tn), lambda i, j: (0, j))]
        if has_res:
            in_specs.append(pl.BlockSpec((tm, tn), lambda i, j: (i, j)))
        out_spec = pl.BlockSpec((tm, tn), lambda i, j: (i, j))
        scratch = []
        dims = ("parallel", "parallel")
        kernel = functools.partial(_mm_single_kernel, act=act,
                                   has_residual=has_res)
    else:
        grid = (Mp // tm, Np // tn, nk)
        in_specs = [pl.BlockSpec((tm, tk), lambda i, j, k: (i, k)),
                    pl.BlockSpec((tk, tn), lambda i, j, k: (k, j)),
                    pl.BlockSpec((1, tn), lambda i, j, k: (0, j)),
                    pl.BlockSpec((1, tn), lambda i, j, k: (0, j))]
        if has_res:
            in_specs.append(pl.BlockSpec((tm, tn), lambda i, j, k: (i, j)))
        out_spec = pl.BlockSpec((tm, tn), lambda i, j, k: (i, j))
        scratch = [pltpu.VMEM((tm, tn), jnp.float32)]
        dims = ("parallel", "parallel", "arbitrary")
        kernel = functools.partial(_mm_multi_kernel, act=act,
                                   has_residual=has_res)

    out = pl.pallas_call(
        kernel,
        out_shape=jax.ShapeDtypeStruct((Mp, Np), out_dtype),
        grid_spec=pltpu.PrefetchScalarGridSpec(
            num_scalar_prefetch=0,
            grid=grid,
            in_specs=in_specs,
            out_specs=out_spec,
            scratch_shapes=scratch),
        compiler_params=pltpu.CompilerParams(dimension_semantics=dims),
        cost_estimate=cost,
    )(*operands)
    return out[:M, :N]


def conv2d_bn(x, w, bn, stride, pad, act="relu", residual=None):
    """Conv (im2col -> fused MXU matmul) with eval-mode BatchNorm folded into
    the matmul epilogue, plus optional ReLU and residual add.

    x: (N, H, W, Cin) NHWC bf16; w: (Cout, Cin, kh, kw) (PyTorch layout).
    """
    N, H, W, Cin = x.shape
    Cout, _, kh, kw = w.shape
    Ho = (H + 2 * pad - kh) // stride + 1
    Wo = (W + 2 * pad - kw) // stride + 1

    if kh == 1 and kw == 1:            # 1x1 conv: no im2col blow-up at all
        xs = x if stride == 1 else x[:, ::stride, ::stride, :]
        a = xs.reshape(N * Ho * Wo, Cin)
    else:
        xp = jnp.pad(x, ((0, 0), (pad, pad), (pad, pad), (0, 0)))
        taps = []
        for i in range(kh):
            for j in range(kw):
                taps.append(lax.slice(
                    xp, (0, i, j, 0),
                    (N, i + stride * (Ho - 1) + 1,
                     j + stride * (Wo - 1) + 1, Cin),
                    (1, stride, stride, 1)))
        a = jnp.concatenate(taps, axis=-1).reshape(N * Ho * Wo, kh * kw * Cin)

    wm = jnp.transpose(w, (2, 3, 1, 0)).reshape(kh * kw * Cin, Cout)
    gamma, beta, mean, var = bn
    scale = gamma / jnp.sqrt(var + 1e-5)
    bias = beta - mean * scale
    res2d = residual.reshape(N * Ho * Wo, Cout) if residual is not None else None
    y = fused_matmul(a, wm, scale, bias, residual=res2d, act=act)
    return y.reshape(N, Ho, Wo, Cout)


def maxpool2d(x, ksize, stride, pad):
    N, H, W, C = x.shape
    Ho = (H + 2 * pad - ksize) // stride + 1
    Wo = (W + 2 * pad - ksize) // stride + 1
    xp = jnp.pad(x, ((0, 0), (pad, pad), (pad, pad), (0, 0)),
                 constant_values=-jnp.inf)
    taps = []
    for i in range(ksize):
        for j in range(ksize):
            taps.append(lax.slice(
                xp, (0, i, j, 0),
                (N, i + stride * (Ho - 1) + 1, j + stride * (Wo - 1) + 1, C),
                (1, stride, stride, 1)).reshape(N * Ho * Wo, C))
    stacked = jnp.stack(taps, axis=0)                     # (k*k, M, C)
    M = N * Ho * Wo
    rows = min(1024, _round_up(M, 8))
    Mp = _round_up(M, rows)
    if Mp != M:
        stacked = jnp.pad(stacked, ((0, 0), (0, Mp - M), (0, 0)))
    out = pl.pallas_call(
        _max_reduce_kernel,
        out_shape=jax.ShapeDtypeStruct((Mp, C), x.dtype),
        grid=(Mp // rows,),
        in_specs=[pl.BlockSpec((ksize * ksize, rows, C), lambda i: (0, i, 0))],
        out_specs=pl.BlockSpec((rows, C), lambda i: (i, 0)),
        compiler_params=pltpu.CompilerParams(
            dimension_semantics=("parallel",)),
    )(stacked)
    return out[:M].reshape(N, Ho, Wo, C)


def global_avgpool(x):
    # Input here is (N, H/32, W/32, 2048) -> tiny; single un-gridded reduction.
    N, H, W, C = x.shape
    return pl.pallas_call(
        _mean_reduce_kernel,
        out_shape=jax.ShapeDtypeStruct((N, C), jnp.float32),
    )(x.reshape(N, H * W, C))


# ----------------------------- ResNet50 model --------------------------------

class _Rng:
    def __init__(self, key):
        self.key = key

    def next(self):
        self.key, k = jax.random.split(self.key)
        return k


def _conv_w(rng, cout, cin, k):
    fan_in = cin * k * k
    return jax.random.normal(rng.next(), (cout, cin, k, k), jnp.float32) \
        * jnp.sqrt(2.0 / fan_in)


def _bn_p(rng, c):
    gamma = 1.0 + 0.1 * jax.random.normal(rng.next(), (c,), jnp.float32)
    beta = 0.1 * jax.random.normal(rng.next(), (c,), jnp.float32)
    mean = 0.1 * jax.random.normal(rng.next(), (c,), jnp.float32)
    var = 1.0 + 0.1 * jnp.abs(jax.random.normal(rng.next(), (c,), jnp.float32))
    return (gamma, beta, mean, var)


def init_resnet50(key):
    rng = _Rng(key)
    params = {}
    params["conv1_w"] = _conv_w(rng, 64, 3, 7)
    params["bn1"] = _bn_p(rng, 64)
    layer_cfg = [(64, 3), (128, 4), (256, 6), (512, 3)]
    in_c = 64
    layers = []
    for width, nblocks in layer_cfg:
        blocks = []
        for b in range(nblocks):
            p = {}
            p["conv1_w"] = _conv_w(rng, width, in_c, 1)
            p["bn1"] = _bn_p(rng, width)
            p["conv2_w"] = _conv_w(rng, width, width, 3)
            p["bn2"] = _bn_p(rng, width)
            p["conv3_w"] = _conv_w(rng, width * 4, width, 1)
            p["bn3"] = _bn_p(rng, width * 4)
            if b == 0:
                p["down_w"] = _conv_w(rng, width * 4, in_c, 1)
                p["down_bn"] = _bn_p(rng, width * 4)
            blocks.append(p)
            in_c = width * 4
        layers.append(blocks)
    params["layers"] = layers
    params["fc_w"] = jax.random.normal(rng.next(), (1, 2048), jnp.float32) \
        * (1.0 / jnp.sqrt(2048.0))
    params["fc_b"] = jnp.zeros((1,), jnp.float32)
    return params


def bottleneck(x, p, stride):
    if "down_w" in p:
        identity = conv2d_bn(x, p["down_w"], p["down_bn"], stride, 0, act=None)
    else:
        identity = x
    out = conv2d_bn(x, p["conv1_w"], p["bn1"], 1, 0, act="relu")
    out = conv2d_bn(out, p["conv2_w"], p["bn2"], stride, 1, act="relu")
    # conv3 + BN3 + residual add + ReLU all fused in one matmul epilogue.
    return conv2d_bn(out, p["conv3_w"], p["bn3"], 1, 0, act="relu",
                     residual=identity)


def resnet50_forward(params, x_nchw):
    """x_nchw: (N, 1, H, W), PyTorch layout; returns (N, 1) sigmoid output."""
    x = jnp.tile(x_nchw, (1, 3, 1, 1))                     # torch x.repeat(1,3,1,1)
    x = jnp.transpose(x, (0, 2, 3, 1)).astype(jnp.bfloat16)  # NCHW -> NHWC bf16
    x = conv2d_bn(x, params["conv1_w"], params["bn1"], 2, 3, act="relu")
    x = maxpool2d(x, 3, 2, 1)
    layer_strides = [1, 2, 2, 2]
    for li, blocks in enumerate(params["layers"]):
        for bi, p in enumerate(blocks):
            s = layer_strides[li] if bi == 0 else 1
            x = bottleneck(x, p, s)
    pooled = global_avgpool(x)                             # (N, 2048) f32
    # fc (Linear(2048, 1)) + Sigmoid fused into the matmul epilogue.
    return fused_matmul(pooled, params["fc_w"].T,
                        jnp.ones((1,), jnp.float32), params["fc_b"],
                        act="sigmoid", out_dtype=jnp.float32)


# --------------------------------- main ---------------------------------------

if __name__ == "__main__":
    key = jax.random.PRNGKey(0)
    pkey, xkey = jax.random.split(key)
    params = init_resnet50(pkey)
    x = jax.random.normal(xkey, (2, 1, 16, 16), jnp.float32)

    fwd = jax.jit(resnet50_forward)
    out = jax.block_until_ready(fwd(params, x))

    assert out.shape == (2, 1), out.shape
    assert bool(jnp.all(jnp.isfinite(out)))
    assert bool(jnp.all((out >= 0.0) & (out <= 1.0)))
    print("KERNEL_OK")
</pallas_src>

<mosaic_0001>
module attributes {stable_mosaic.version = 11 : i64} {
  func.func @_mm_single_kernel(%arg0: i32, %arg1: i32, %arg2: memref<128x256xbf16, #tpu.memory_space<vmem>>, %arg3: memref<256x128xbf16, #tpu.memory_space<vmem>>, %arg4: memref<1x128xf32, #tpu.memory_space<vmem>>, %arg5: memref<1x128xf32, #tpu.memory_space<vmem>>, %arg6: memref<128x128xbf16, #tpu.memory_space<vmem>>) attributes {dimension_semantics = [#tpu.dimension_semantics<parallel>, #tpu.dimension_semantics<parallel>], iteration_bounds = array<i64: 1, 1>, scalar_prefetch = 0 : i64, scratch_operands = 0 : i64, tpu.core_type = #tpu.core_type<tc>, window_params = [{transform_indices = @transform_0, window_bounds = array<i64: 128, 256>}, {transform_indices = @transform_1, window_bounds = array<i64: 256, 128>}, {transform_indices = @transform_2, window_bounds = array<i64: 1, 128>}, {transform_indices = @transform_3, window_bounds = array<i64: 1, 128>}, {transform_indices = @transform_4, window_bounds = array<i64: 128, 128>}]} {
    %c0 = arith.constant 0 : index
    %c0_0 = arith.constant 0 : index
    %0 = vector.load %arg2[%c0, %c0_0] : memref<128x256xbf16, #tpu.memory_space<vmem>>, vector<128x256xbf16>
    %c0_1 = arith.constant 0 : index
    %c0_2 = arith.constant 0 : index
    %1 = vector.load %arg3[%c0_1, %c0_2] : memref<256x128xbf16, #tpu.memory_space<vmem>>, vector<256x128xbf16>
    %cst = arith.constant dense<0.000000e+00> : vector<128x128xf32>
    %2 = tpu.matmul %0, %1, %cst {dimension_numbers = #tpu.dot_dimension_numbers<[1], [0], [0], [1], [0, 0, 1, 1], [], []>} : vector<128x256xbf16>, vector<256x128xbf16>, vector<128x128xf32> -> vector<128x128xf32>
    %c0_3 = arith.constant 0 : index
    %c0_4 = arith.constant 0 : index
    %3 = vector.load %arg4[%c0_3, %c0_4] : memref<1x128xf32, #tpu.memory_space<vmem>>, vector<1x128xf32>
    %4 = vector.broadcast %3 : vector<1x128xf32> to vector<128x128xf32>
    %5 = arith.mulf %2, %4 : vector<128x128xf32>
    %c0_5 = arith.constant 0 : index
    %c0_6 = arith.constant 0 : index
    %6 = vector.load %arg5[%c0_5, %c0_6] : memref<1x128xf32, #tpu.memory_space<vmem>>, vector<1x128xf32>
    %7 = vector.broadcast %6 : vector<1x128xf32> to vector<128x128xf32>
    %8 = arith.addf %5, %7 : vector<128x128xf32>
    %cst_7 = arith.constant 0.000000e+00 : f32
    %9 = vector.broadcast %cst_7 : f32 to vector<128x128xf32>
    %10 = arith.maximumf %8, %9 : vector<128x128xf32>
    %11 = arith.truncf %10 : vector<128x128xf32> to vector<128x128xbf16>
    %c0_8 = arith.constant 0 : index
    %c0_9 = arith.constant 0 : index
    %12 = vector.load %arg6[%c0_8, %c0_9] : memref<128x128xbf16, #tpu.memory_space<vmem>>, vector<128x128xbf16>
    tpu.vector_store %arg6[%c0_8, %c0_9], %11 {strides = array<i32>} : memref<128x128xbf16, #tpu.memory_space<vmem>>, vector<128x128xbf16>,
    return
  }
  func.func @transform_0(%arg0: i32, %arg1: i32) -> (i32, i32) {
    %c0_i32 = arith.constant 0 : i32
    %c0_i32_0 = arith.constant 0 : i32
    return %arg0, %c0_i32 : i32, i32
  }
  func.func @transform_1(%arg0: i32, %arg1: i32) -> (i32, i32) {
    %c0_i32 = arith.constant 0 : i32
    %c0_i32_0 = arith.constant 0 : i32
    return %c0_i32, %arg1 : i32, i32
  }
  func.func @transform_2(%arg0: i32, %arg1: i32) -> (i32, i32) {
    %c0_i32 = arith.constant 0 : i32
    %c0_i32_0 = arith.constant 0 : i32
    return %c0_i32, %arg1 : i32, i32
  }
  func.func @transform_3(%arg0: i32, %arg1: i32) -> (i32, i32) {
    %c0_i32 = arith.constant 0 : i32
    %c0_i32_0 = arith.constant 0 : i32
    return %c0_i32, %arg1 : i32, i32
  }
  func.func @transform_4(%arg0: i32, %arg1: i32) -> (i32, i32) {
    %c0_i32 = arith.constant 0 : i32
    return %arg0, %arg1 : i32, i32
  }
}

module attributes {stable_mosaic.version = 11 : i64} {
  func.func @_mm_single_kernel(%arg0: i32, %arg1: i32, %arg2: memref<32x128xbf16, #tpu.memory_space<vmem>>, %arg3: memref<128x128xbf16, #tpu.memory_space<vmem>>, %arg4: memref<1x128xf32, #tpu.memory_space<vmem>>, %arg5: memref<1x128xf32, #tpu.memory_space<vmem>>, %arg6: memref<32x128xbf16, #tpu.memory_space<vmem>>) attributes {dimension_semantics = [#tpu.dimension_semantics<parallel>, #tpu.dimension_semantics<parallel>], iteration_bounds = array<i64: 1, 1>, scalar_prefetch = 0 : i64, scratch_operands = 0 : i64, tpu.core_type = #tpu.core_type<tc>, window_params = [{transform_indices = @transform_0, window_bounds = array<i64: 32, 128>}, {transform_indices = @transform_1, window_bounds = array<i64: 128, 128>}, {transform_indices = @transform_2, window_bounds = array<i64: 1, 128>}, {transform_indices = @transform_3, window_bounds = array<i64: 1, 128>}, {transform_indices = @transform_4, window_bounds = array<i64: 32, 128>}]} {
    %c0 = arith.constant 0 : index
    %c0_0 = arith.constant 0 : index
    %0 = vector.load %arg2[%c0, %c0_0] : memref<32x128xbf16, #tpu.memory_space<vmem>>, vector<32x128xbf16>
    %c0_1 = arith.constant 0 : index
    %c0_2 = arith.constant 0 : index
    %1 = vector.load %arg3[%c0_1, %c0_2] : memref<128x128xbf16, #tpu.memory_space<vmem>>, vector<128x128xbf16>
    %cst = arith.constant dense<0.000000e+00> : vector<32x128xf32>
    %2 = tpu.matmul %0, %1, %cst {dimension_numbers = #tpu.dot_dimension_numbers<[1], [0], [0], [1], [0, 0, 1, 1], [], []>} : vector<32x128xbf16>, vector<128x128xbf16>, vector<32x128xf32> -> vector<32x128xf32>
    %c0_3 = arith.constant 0 : index
    %c0_4 = arith.constant 0 : index
    %3 = vector.load %arg4[%c0_3, %c0_4] : memref<1x128xf32, #tpu.memory_space<vmem>>, vector<1x128xf32>
    %4 = vector.broadcast %3 : vector<1x128xf32> to vector<32x128xf32>
    %5 = arith.mulf %2, %4 : vector<32x128xf32>
    %c0_5 = arith.constant 0 : index
    %c0_6 = arith.constant 0 : index
    %6 = vector.load %arg5[%c0_5, %c0_6] : memref<1x128xf32, #tpu.memory_space<vmem>>, vector<1x128xf32>
    %7 = vector.broadcast %6 : vector<1x128xf32> to vector<32x128xf32>
    %8 = arith.addf %5, %7 : vector<32x128xf32>
    %cst_7 = arith.constant 0.000000e+00 : f32
    %9 = vector.broadcast %cst_7 : f32 to vector<32x128xf32>
    %10 = arith.maximumf %8, %9 : vector<32x128xf32>
    %11 = arith.truncf %10 : vector<32x128xf32> to vector<32x128xbf16>
    %c0_8 = arith.constant 0 : index
    %c0_9 = arith.constant 0 : index
    %12 = vector.load %arg6[%c0_8, %c0_9] : memref<32x128xbf16, #tpu.memory_space<vmem>>, vector<32x128xbf16>
    tpu.vector_store %arg6[%c0_8, %c0_9], %11 {strides = array<i32>} : memref<32x128xbf16, #tpu.memory_space<vmem>>, vector<32x128xbf16>,
    return
  }
  func.func @transform_0(%arg0: i32, %arg1: i32) -> (i32, i32) {
    %c0_i32 = arith.constant 0 : i32
    %c0_i32_0 = arith.constant 0 : i32
    return %arg0, %c0_i32 : i32, i32
  }
  func.func @transform_1(%arg0: i32, %arg1: i32) -> (i32, i32) {
    %c0_i32 = arith.constant 0 : i32
    %c0_i32_0 = arith.constant 0 : i32
    return %c0_i32, %arg1 : i32, i32
  }
  func.func @transform_2(%arg0: i32, %arg1: i32) -> (i32, i32) {
    %c0_i32 = arith.constant 0 : i32
    %c0_i32_0 = arith.constant 0 : i32
    return %c0_i32, %arg1 : i32, i32
  }
  func.func @transform_3(%arg0: i32, %arg1: i32) -> (i32, i32) {
    %c0_i32 = arith.constant 0 : i32
    %c0_i32_0 = arith.constant 0 : i32
    return %c0_i32, %arg1 : i32, i32
  }
  func.func @transform_4(%arg0: i32, %arg1: i32) -> (i32, i32) {
    %c0_i32 = arith.constant 0 : i32
    return %arg0, %arg1 : i32, i32
  }
}

module attributes {stable_mosaic.version = 11 : i64} {
  func.func @_max_reduce_kernel(%arg0: i32, %arg1: memref<9x32x64xbf16, #tpu.memory_space<vmem>>, %arg2: memref<32x64xbf16, #tpu.memory_space<vmem>>) attributes {dimension_semantics = [#tpu.dimension_semantics<parallel>], iteration_bounds = array<i64: 1>, scalar_prefetch = 0 : i64, scratch_operands = 0 : i64, tpu.core_type = #tpu.core_type<tc>, window_params = [{transform_indices = @transform_0, window_bounds = array<i64: 9, 32, 64>}, {transform_indices = @transform_1, window_bounds = array<i64: 32, 64>}]} {
    %c0 = arith.constant 0 : index
    %c0_0 = arith.constant 0 : index
    %c0_1 = arith.constant 0 : index
    %0 = vector.load %arg1[%c0, %c0_0, %c0_1] : memref<9x32x64xbf16, #tpu.memory_space<vmem>>, vector<9x32x64xbf16>
    %cst = arith.constant dense<0xFF80> : vector<32x64xbf16>
    %1 = vector.multi_reduction <maximumf>, %0, %cst [0] : vector<9x32x64xbf16> to vector<32x64xbf16>
    %c0_2 = arith.constant 0 : index
    %c0_3 = arith.constant 0 : index
    %2 = vector.load %arg2[%c0_2, %c0_3] : memref<32x64xbf16, #tpu.memory_space<vmem>>, vector<32x64xbf16>
    tpu.vector_store %arg2[%c0_2, %c0_3], %1 {strides = array<i32>} : memref<32x64xbf16, #tpu.memory_space<vmem>>, vector<32x64xbf16>,
    return
  }
  func.func @transform_0(%arg0: i32) -> (i32, i32, i32) {
    %c0_i32 = arith.constant 0 : i32
    %c0_i32_0 = arith.constant 0 : i32
    %c0_i32_1 = arith.constant 0 : i32
    return %c0_i32, %arg0, %c0_i32_0 : i32, i32, i32
  }
  func.func @transform_1(%arg0: i32) -> (i32, i32) {
    %c0_i32 = arith.constant 0 : i32
    %c0_i32_0 = arith.constant 0 : i32
    return %arg0, %c0_i32 : i32, i32
  }
}

module attributes {stable_mosaic.version = 11 : i64} {
  func.func @_mm_single_kernel(%arg0: i32, %arg1: i32, %arg2: memref<32x128xbf16, #tpu.memory_space<vmem>>, %arg3: memref<128x256xbf16, #tpu.memory_space<vmem>>, %arg4: memref<1x256xf32, #tpu.memory_space<vmem>>, %arg5: memref<1x256xf32, #tpu.memory_space<vmem>>, %arg6: memref<32x256xbf16, #tpu.memory_space<vmem>>, %arg7: memref<32x256xbf16, #tpu.memory_space<vmem>>) attributes {dimension_semantics = [#tpu.dimension_semantics<parallel>, #tpu.dimension_semantics<parallel>], iteration_bounds = array<i64: 1, 1>, scalar_prefetch = 0 : i64, scratch_operands = 0 : i64, tpu.core_type = #tpu.core_type<tc>, window_params = [{transform_indices = @transform_0, window_bounds = array<i64: 32, 128>}, {transform_indices = @transform_1, window_bounds = array<i64: 128, 256>}, {transform_indices = @transform_2, window_bounds = array<i64: 1, 256>}, {transform_indices = @transform_3, window_bounds = array<i64: 1, 256>}, {transform_indices = @transform_4, window_bounds = array<i64: 32, 256>}, {transform_indices = @transform_5, window_bounds = array<i64: 32, 256>}]} {
    %c0 = arith.constant 0 : index
    %c0_0 = arith.constant 0 : index
    %0 = vector.load %arg2[%c0, %c0_0] : memref<32x128xbf16, #tpu.memory_space<vmem>>, vector<32x128xbf16>
    %c0_1 = arith.constant 0 : index
    %c0_2 = arith.constant 0 : index
    %1 = vector.load %arg3[%c0_1, %c0_2] : memref<128x256xbf16, #tpu.memory_space<vmem>>, vector<128x256xbf16>
    %cst = arith.constant dense<0.000000e+00> : vector<32x256xf32>
    %2 = tpu.matmul %0, %1, %cst {dimension_numbers = #tpu.dot_dimension_numbers<[1], [0], [0], [1], [0, 0, 1, 1], [], []>} : vector<32x128xbf16>, vector<128x256xbf16>, vector<32x256xf32> -> vector<32x256xf32>
    %c0_3 = arith.constant 0 : index
    %c0_4 = arith.constant 0 : index
    %3 = vector.load %arg4[%c0_3, %c0_4] : memref<1x256xf32, #tpu.memory_space<vmem>>, vector<1x256xf32>
    %4 = vector.broadcast %3 : vector<1x256xf32> to vector<32x256xf32>
    %5 = arith.mulf %2, %4 : vector<32x256xf32>
    %c0_5 = arith.constant 0 : index
    %c0_6 = arith.constant 0 : index
    %6 = vector.load %arg5[%c0_5, %c0_6] : memref<1x256xf32, #tpu.memory_space<vmem>>, vector<1x256xf32>
    %7 = vector.broadcast %6 : vector<1x256xf32> to vector<32x256xf32>
    %8 = arith.addf %5, %7 : vector<32x256xf32>
    %c0_7 = arith.constant 0 : index
    %c0_8 = arith.constant 0 : index
    %9 = vector.load %arg6[%c0_7, %c0_8] : memref<32x256xbf16, #tpu.memory_space<vmem>>, vector<32x256xbf16>
    %10 = arith.extf %9 : vector<32x256xbf16> to vector<32x256xf32>
    %11 = arith.addf %8, %10 : vector<32x256xf32>
    %cst_9 = arith.constant 0.000000e+00 : f32
    %12 = vector.broadcast %cst_9 : f32 to vector<32x256xf32>
    %13 = arith.maximumf %11, %12 : vector<32x256xf32>
    %14 = arith.truncf %13 : vector<32x256xf32> to vector<32x256xbf16>
    %c0_10 = arith.constant 0 : index
    %c0_11 = arith.constant 0 : index
    %15 = vector.load %arg7[%c0_10, %c0_11] : memref<32x256xbf16, #tpu.memory_space<vmem>>, vector<32x256xbf16>
    tpu.vector_store %arg7[%c0_10, %c0_11], %14 {strides = array<i32>} : memref<32x256xbf16, #tpu.memory_space<vmem>>, vector<32x256xbf16>,
    return
  }
  func.func @transform_0(%arg0: i32, %arg1: i32) -> (i32, i32) {
    %c0_i32 = arith.constant 0 : i32
    %c0_i32_0 = arith.constant 0 : i32
    return %arg0, %c0_i32 : i32, i32
  }
  func.func @transform_1(%arg0: i32, %arg1: i32) -> (i32, i32) {
    %c0_i32 = arith.constant 0 : i32
    %c0_i32_0 = arith.constant 0 : i32
    return %c0_i32, %arg1 : i32, i32
  }
  func.func @transform_2(%arg0: i32, %arg1: i32) -> (i32, i32) {
    %c0_i32 = arith.constant 0 : i32
    %c0_i32_0 = arith.constant 0 : i32
    return %c0_i32, %arg1 : i32, i32
  }
  func.func @transform_3(%arg0: i32, %arg1: i32) -> (i32, i32) {
    %c0_i32 = arith.constant 0 : i32
    %c0_i32_0 = arith.constant 0 : i32
    return %c0_i32, %arg1 : i32, i32
  }
  func.func @transform_4(%arg0: i32, %arg1: i32) -> (i32, i32) {
    %c0_i32 = arith.constant 0 : i32
    return %arg0, %arg1 : i32, i32
  }
  func.func @transform_5(%arg0: i32, %arg1: i32) -> (i32, i32) {
    %c0_i32 = arith.constant 0 : i32
    return %arg0, %arg1 : i32, i32
  }
}

module attributes {stable_mosaic.version = 11 : i64} {
  func.func @_mm_multi_kernel(%arg0: i32, %arg1: i32, %arg2: i32, %arg3: memref<32x128xbf16, #tpu.memory_space<vmem>>, %arg4: memref<128x128xbf16, #tpu.memory_space<vmem>>, %arg5: memref<1x128xf32, #tpu.memory_space<vmem>>, %arg6: memref<1x128xf32, #tpu.memory_space<vmem>>, %arg7: memref<32x128xbf16, #tpu.memory_space<vmem>>, %arg8: memref<32x128xf32, #tpu.memory_space<vmem>>) attributes {dimension_semantics = [#tpu.dimension_semantics<parallel>, #tpu.dimension_semantics<parallel>, #tpu.dimension_semantics<arbitrary>], iteration_bounds = array<i64: 1, 1, 5>, scalar_prefetch = 0 : i64, scratch_operands = 1 : i64, tpu.core_type = #tpu.core_type<tc>, window_params = [{transform_indices = @transform_0, window_bounds = array<i64: 32, 128>}, {transform_indices = @transform_1, window_bounds = array<i64: 128, 128>}, {transform_indices = @transform_2, window_bounds = array<i64: 1, 128>}, {transform_indices = @transform_3, window_bounds = array<i64: 1, 128>}, {transform_indices = @transform_4, window_bounds = array<i64: 32, 128>}]} {
    %c0_i32 = arith.constant 0 : i32
    %0 = arith.cmpi eq, %arg2, %c0_i32 : i32
    %1 = arith.extui %0 : i1 to i32
    %c0_i32_0 = arith.constant 0 : i32
    %2 = arith.cmpi ne, %1, %c0_i32_0 : i32
    scf.if %2 {
      %cst_9 = arith.constant 0.000000e+00 : f32
      %12 = vector.broadcast %cst_9 : f32 to vector<32x128xf32>
      %c0_10 = arith.constant 0 : index
      %c0_11 = arith.constant 0 : index
      %13 = vector.load %arg8[%c0_10, %c0_11] : memref<32x128xf32, #tpu.memory_space<vmem>>, vector<32x128xf32>
      tpu.vector_store %arg8[%c0_10, %c0_11], %12 {strides = array<i32>} : memref<32x128xf32, #tpu.memory_space<vmem>>, vector<32x128xf32>,
    } else {
    }
    %c0 = arith.constant 0 : index
    %c0_1 = arith.constant 0 : index
    %3 = vector.load %arg8[%c0, %c0_1] : memref<32x128xf32, #tpu.memory_space<vmem>>, vector<32x128xf32>
    %c0_2 = arith.constant 0 : index
    %c0_3 = arith.constant 0 : index
    %4 = vector.load %arg3[%c0_2, %c0_3] : memref<32x128xbf16, #tpu.memory_space<vmem>>, vector<32x128xbf16>
    %c0_4 = arith.constant 0 : index
    %c0_5 = arith.constant 0 : index
    %5 = vector.load %arg4[%c0_4, %c0_5] : memref<128x128xbf16, #tpu.memory_space<vmem>>, vector<128x128xbf16>
    %cst = arith.constant dense<0.000000e+00> : vector<32x128xf32>
    %6 = tpu.matmul %4, %5, %cst {dimension_numbers = #tpu.dot_dimension_numbers<[1], [0], [0], [1], [0, 0, 1, 1], [], []>} : vector<32x128xbf16>, vector<128x128xbf16>, vector<32x128xf32> -> vector<32x128xf32>
    %7 = arith.addf %3, %6 : vector<32x128xf32>
    %c0_6 = arith.constant 0 : index
    %c0_7 = arith.constant 0 : index
    %8 = vector.load %arg8[%c0_6, %c0_7] : memref<32x128xf32, #tpu.memory_space<vmem>>, vector<32x128xf32>
    tpu.vector_store %arg8[%c0_6, %c0_7], %7 {strides = array<i32>} : memref<32x128xf32, #tpu.memory_space<vmem>>, vector<32x128xf32>,
    %c4_i32 = arith.constant 4 : i32
    %9 = arith.cmpi eq, %arg2, %c4_i32 : i32
    %10 = arith.extui %9 : i1 to i32
    %c0_i32_8 = arith.constant 0 : i32
    %11 = arith.cmpi ne, %10, %c0_i32_8 : i32
    scf.if %11 {
      %c0_9 = arith.constant 0 : index
      %c0_10 = arith.constant 0 : index
      %12 = vector.load %arg8[%c0_9, %c0_10] : memref<32x128xf32, #tpu.memory_space<vmem>>, vector<32x128xf32>
      %c0_11 = arith.constant 0 : index
      %c0_12 = arith.constant 0 : index
      %13 = vector.load %arg5[%c0_11, %c0_12] : memref<1x128xf32, #tpu.memory_space<vmem>>, vector<1x128xf32>
      %14 = vector.broadcast %13 : vector<1x128xf32> to vector<32x128xf32>
      %15 = arith.mulf %12, %14 : vector<32x128xf32>
      %c0_13 = arith.constant 0 : index
      %c0_14 = arith.constant 0 : index
      %16 = vector.load %arg6[%c0_13, %c0_14] : memref<1x128xf32, #tpu.memory_space<vmem>>, vector<1x128xf32>
      %17 = vector.broadcast %16 : vector<1x128xf32> to vector<32x128xf32>
      %18 = arith.addf %15, %17 : vector<32x128xf32>
      %cst_15 = arith.constant 0.000000e+00 : f32
      %19 = vector.broadcast %cst_15 : f32 to vector<32x128xf32>
      %20 = arith.maximumf %18, %19 : vector<32x128xf32>
      %21 = arith.truncf %20 : vector<32x128xf32> to vector<32x128xbf16>
      %c0_16 = arith.constant 0 : index
      %c0_17 = arith.constant 0 : index
      %22 = vector.load %arg7[%c0_16, %c0_17] : memref<32x128xbf16, #tpu.memory_space<vmem>>, vector<32x128xbf16>
      tpu.vector_store %arg7[%c0_16, %c0_17], %21 {strides = array<i32>} : memref<32x128xbf16, #tpu.memory_space<vmem>>, vector<32x128xbf16>,
    } else {
    }
    return
  }
  func.func @transform_0(%arg0: i32, %arg1: i32, %arg2: i32) -> (i32, i32) {
    %c0_i32 = arith.constant 0 : i32
    return %arg0, %arg2 : i32, i32
  }
  func.func @transform_1(%arg0: i32, %arg1: i32, %arg2: i32) -> (i32, i32) {
    %c0_i32 = arith.constant 0 : i32
    return %arg2, %arg1 : i32, i32
  }
  func.func @transform_2(%arg0: i32, %arg1: i32, %arg2: i32) -> (i32, i32) {
    %c0_i32 = arith.constant 0 : i32
    %c0_i32_0 = arith.constant 0 : i32
    return %c0_i32, %arg1 : i32, i32
  }
  func.func @transform_3(%arg0: i32, %arg1: i32, %arg2: i32) -> (i32, i32) {
    %c0_i32 = arith.constant 0 : i32
    %c0_i32_0 = arith.constant 0 : i32
    return %c0_i32, %arg1 : i32, i32
  }
  func.func @transform_4(%arg0: i32, %arg1: i32, %arg2: i32) -> (i32, i32) {
    %c0_i32 = arith.constant 0 : i32
    return %arg0, %arg1 : i32, i32
  }
}

module attributes {stable_mosaic.version = 11 : i64} {
  func.func @_mm_single_kernel(%arg0: i32, %arg1: i32, %arg2: memref<32x128xbf16, #tpu.memory_space<vmem>>, %arg3: memref<128x256xbf16, #tpu.memory_space<vmem>>, %arg4: memref<1x256xf32, #tpu.memory_space<vmem>>, %arg5: memref<1x256xf32, #tpu.memory_space<vmem>>, %arg6: memref<32x256xbf16, #tpu.memory_space<vmem>>) attributes {dimension_semantics = [#tpu.dimension_semantics<parallel>, #tpu.dimension_semantics<parallel>], iteration_bounds = array<i64: 1, 1>, scalar_prefetch = 0 : i64, scratch_operands = 0 : i64, tpu.core_type = #tpu.core_type<tc>, window_params = [{transform_indices = @transform_0, window_bounds = array<i64: 32, 128>}, {transform_indices = @transform_1, window_bounds = array<i64: 128, 256>}, {transform_indices = @transform_2, window_bounds = array<i64: 1, 256>}, {transform_indices = @transform_3, window_bounds = array<i64: 1, 256>}, {transform_indices = @transform_4, window_bounds = array<i64: 32, 256>}]} {
    %c0 = arith.constant 0 : index
    %c0_0 = arith.constant 0 : index
    %0 = vector.load %arg2[%c0, %c0_0] : memref<32x128xbf16, #tpu.memory_space<vmem>>, vector<32x128xbf16>
    %c0_1 = arith.constant 0 : index
    %c0_2 = arith.constant 0 : index
    %1 = vector.load %arg3[%c0_1, %c0_2] : memref<128x256xbf16, #tpu.memory_space<vmem>>, vector<128x256xbf16>
    %cst = arith.constant dense<0.000000e+00> : vector<32x256xf32>
    %2 = tpu.matmul %0, %1, %cst {dimension_numbers = #tpu.dot_dimension_numbers<[1], [0], [0], [1], [0, 0, 1, 1], [], []>} : vector<32x128xbf16>, vector<128x256xbf16>, vector<32x256xf32> -> vector<32x256xf32>
    %c0_3 = arith.constant 0 : index
    %c0_4 = arith.constant 0 : index
    %3 = vector.load %arg4[%c0_3, %c0_4] : memref<1x256xf32, #tpu.memory_space<vmem>>, vector<1x256xf32>
    %4 = vector.broadcast %3 : vector<1x256xf32> to vector<32x256xf32>
    %5 = arith.mulf %2, %4 : vector<32x256xf32>
    %c0_5 = arith.constant 0 : index
    %c0_6 = arith.constant 0 : index
    %6 = vector.load %arg5[%c0_5, %c0_6] : memref<1x256xf32, #tpu.memory_space<vmem>>, vector<1x256xf32>
    %7 = vector.broadcast %6 : vector<1x256xf32> to vector<32x256xf32>
    %8 = arith.addf %5, %7 : vector<32x256xf32>
    %9 = arith.truncf %8 : vector<32x256xf32> to vector<32x256xbf16>
    %c0_7 = arith.constant 0 : index
    %c0_8 = arith.constant 0 : index
    %10 = vector.load %arg6[%c0_7, %c0_8] : memref<32x256xbf16, #tpu.memory_space<vmem>>, vector<32x256xbf16>
    tpu.vector_store %arg6[%c0_7, %c0_8], %9 {strides = array<i32>} : memref<32x256xbf16, #tpu.memory_space<vmem>>, vector<32x256xbf16>,
    return
  }
  func.func @transform_0(%arg0: i32, %arg1: i32) -> (i32, i32) {
    %c0_i32 = arith.constant 0 : i32
    %c0_i32_0 = arith.constant 0 : i32
    return %arg0, %c0_i32 : i32, i32
  }
  func.func @transform_1(%arg0: i32, %arg1: i32) -> (i32, i32) {
    %c0_i32 = arith.constant 0 : i32
    %c0_i32_0 = arith.constant 0 : i32
    return %c0_i32, %arg1 : i32, i32
  }
  func.func @transform_2(%arg0: i32, %arg1: i32) -> (i32, i32) {
    %c0_i32 = arith.constant 0 : i32
    %c0_i32_0 = arith.constant 0 : i32
    return %c0_i32, %arg1 : i32, i32
  }
  func.func @transform_3(%arg0: i32, %arg1: i32) -> (i32, i32) {
    %c0_i32 = arith.constant 0 : i32
    %c0_i32_0 = arith.constant 0 : i32
    return %c0_i32, %arg1 : i32, i32
  }
  func.func @transform_4(%arg0: i32, %arg1: i32) -> (i32, i32) {
    %c0_i32 = arith.constant 0 : i32
    return %arg0, %arg1 : i32, i32
  }
}

module attributes {stable_mosaic.version = 11 : i64} {
  func.func @_mm_single_kernel(%arg0: i32, %arg1: i32, %arg2: memref<32x256xbf16, #tpu.memory_space<vmem>>, %arg3: memref<256x128xbf16, #tpu.memory_space<vmem>>, %arg4: memref<1x128xf32, #tpu.memory_space<vmem>>, %arg5: memref<1x128xf32, #tpu.memory_space<vmem>>, %arg6: memref<32x128xbf16, #tpu.memory_space<vmem>>) attributes {dimension_semantics = [#tpu.dimension_semantics<parallel>, #tpu.dimension_semantics<parallel>], iteration_bounds = array<i64: 1, 1>, scalar_prefetch = 0 : i64, scratch_operands = 0 : i64, tpu.core_type = #tpu.core_type<tc>, window_params = [{transform_indices = @transform_0, window_bounds = array<i64: 32, 256>}, {transform_indices = @transform_1, window_bounds = array<i64: 256, 128>}, {transform_indices = @transform_2, window_bounds = array<i64: 1, 128>}, {transform_indices = @transform_3, window_bounds = array<i64: 1, 128>}, {transform_indices = @transform_4, window_bounds = array<i64: 32, 128>}]} {
    %c0 = arith.constant 0 : index
    %c0_0 = arith.constant 0 : index
    %0 = vector.load %arg2[%c0, %c0_0] : memref<32x256xbf16, #tpu.memory_space<vmem>>, vector<32x256xbf16>
    %c0_1 = arith.constant 0 : index
    %c0_2 = arith.constant 0 : index
    %1 = vector.load %arg3[%c0_1, %c0_2] : memref<256x128xbf16, #tpu.memory_space<vmem>>, vector<256x128xbf16>
    %cst = arith.constant dense<0.000000e+00> : vector<32x128xf32>
    %2 = tpu.matmul %0, %1, %cst {dimension_numbers = #tpu.dot_dimension_numbers<[1], [0], [0], [1], [0, 0, 1, 1], [], []>} : vector<32x256xbf16>, vector<256x128xbf16>, vector<32x128xf32> -> vector<32x128xf32>
    %c0_3 = arith.constant 0 : index
    %c0_4 = arith.constant 0 : index
    %3 = vector.load %arg4[%c0_3, %c0_4] : memref<1x128xf32, #tpu.memory_space<vmem>>, vector<1x128xf32>
    %4 = vector.broadcast %3 : vector<1x128xf32> to vector<32x128xf32>
    %5 = arith.mulf %2, %4 : vector<32x128xf32>
    %c0_5 = arith.constant 0 : index
    %c0_6 = arith.constant 0 : index
    %6 = vector.load %arg5[%c0_5, %c0_6] : memref<1x128xf32, #tpu.memory_space<vmem>>, vector<1x128xf32>
    %7 = vector.broadcast %6 : vector<1x128xf32> to vector<32x128xf32>
    %8 = arith.addf %5, %7 : vector<32x128xf32>
    %cst_7 = arith.constant 0.000000e+00 : f32
    %9 = vector.broadcast %cst_7 : f32 to vector<32x128xf32>
    %10 = arith.maximumf %8, %9 : vector<32x128xf32>
    %11 = arith.truncf %10 : vector<32x128xf32> to vector<32x128xbf16>
    %c0_8 = arith.constant 0 : index
    %c0_9 = arith.constant 0 : index
    %12 = vector.load %arg6[%c0_8, %c0_9] : memref<32x128xbf16, #tpu.memory_space<vmem>>, vector<32x128xbf16>
    tpu.vector_store %arg6[%c0_8, %c0_9], %11 {strides = array<i32>} : memref<32x128xbf16, #tpu.memory_space<vmem>>, vector<32x128xbf16>,
    return
  }
  func.func @transform_0(%arg0: i32, %arg1: i32) -> (i32, i32) {
    %c0_i32 = arith.constant 0 : i32
    %c0_i32_0 = arith.constant 0 : i32
    return %arg0, %c0_i32 : i32, i32
  }
  func.func @transform_1(%arg0: i32, %arg1: i32) -> (i32, i32) {
    %c0_i32 = arith.constant 0 : i32
    %c0_i32_0 = arith.constant 0 : i32
    return %c0_i32, %arg1 : i32, i32
  }
  func.func @transform_2(%arg0: i32, %arg1: i32) -> (i32, i32) {
    %c0_i32 = arith.constant 0 : i32
    %c0_i32_0 = arith.constant 0 : i32
    return %c0_i32, %arg1 : i32, i32
  }
  func.func @transform_3(%arg0: i32, %arg1: i32) -> (i32, i32) {
    %c0_i32 = arith.constant 0 : i32
    %c0_i32_0 = arith.constant 0 : i32
    return %c0_i32, %arg1 : i32, i32
  }
  func.func @transform_4(%arg0: i32, %arg1: i32) -> (i32, i32) {
    %c0_i32 = arith.constant 0 : i32
    return %arg0, %arg1 : i32, i32
  }
}

module attributes {stable_mosaic.version = 11 : i64} {
  func.func @_mm_multi_kernel(%arg0: i32, %arg1: i32, %arg2: i32, %arg3: memref<8x384xbf16, #tpu.memory_space<vmem>>, %arg4: memref<384x128xbf16, #tpu.memory_space<vmem>>, %arg5: memref<1x128xf32, #tpu.memory_space<vmem>>, %arg6: memref<1x128xf32, #tpu.memory_space<vmem>>, %arg7: memref<8x128xbf16, #tpu.memory_space<vmem>>, %arg8: memref<8x128xf32, #tpu.memory_space<vmem>>) attributes {dimension_semantics = [#tpu.dimension_semantics<parallel>, #tpu.dimension_semantics<parallel>, #tpu.dimension_semantics<arbitrary>], iteration_bounds = array<i64: 1, 1, 3>, scalar_prefetch = 0 : i64, scratch_operands = 1 : i64, tpu.core_type = #tpu.core_type<tc>, window_params = [{transform_indices = @transform_0, window_bounds = array<i64: 8, 384>}, {transform_indices = @transform_1, window_bounds = array<i64: 384, 128>}, {transform_indices = @transform_2, window_bounds = array<i64: 1, 128>}, {transform_indices = @transform_3, window_bounds = array<i64: 1, 128>}, {transform_indices = @transform_4, window_bounds = array<i64: 8, 128>}]} {
    %c0_i32 = arith.constant 0 : i32
    %0 = arith.cmpi eq, %arg2, %c0_i32 : i32
    %1 = arith.extui %0 : i1 to i32
    %c0_i32_0 = arith.constant 0 : i32
    %2 = arith.cmpi ne, %1, %c0_i32_0 : i32
    scf.if %2 {
      %cst_9 = arith.constant 0.000000e+00 : f32
      %12 = vector.broadcast %cst_9 : f32 to vector<8x128xf32>
      %c0_10 = arith.constant 0 : index
      %c0_11 = arith.constant 0 : index
      %13 = vector.load %arg8[%c0_10, %c0_11] : memref<8x128xf32, #tpu.memory_space<vmem>>, vector<8x128xf32>
      tpu.vector_store %arg8[%c0_10, %c0_11], %12 {strides = array<i32>} : memref<8x128xf32, #tpu.memory_space<vmem>>, vector<8x128xf32>,
    } else {
    }
    %c0 = arith.constant 0 : index
    %c0_1 = arith.constant 0 : index
    %3 = vector.load %arg8[%c0, %c0_1] : memref<8x128xf32, #tpu.memory_space<vmem>>, vector<8x128xf32>
    %c0_2 = arith.constant 0 : index
    %c0_3 = arith.constant 0 : index
    %4 = vector.load %arg3[%c0_2, %c0_3] : memref<8x384xbf16, #tpu.memory_space<vmem>>, vector<8x384xbf16>
    %c0_4 = arith.constant 0 : index
    %c0_5 = arith.constant 0 : index
    %5 = vector.load %arg4[%c0_4, %c0_5] : memref<384x128xbf16, #tpu.memory_space<vmem>>, vector<384x128xbf16>
    %cst = arith.constant dense<0.000000e+00> : vector<8x128xf32>
    %6 = tpu.matmul %4, %5, %cst {dimension_numbers = #tpu.dot_dimension_numbers<[1], [0], [0], [1], [0, 0, 1, 1], [], []>} : vector<8x384xbf16>, vector<384x128xbf16>, vector<8x128xf32> -> vector<8x128xf32>
    %7 = arith.addf %3, %6 : vector<8x128xf32>
    %c0_6 = arith.constant 0 : index
    %c0_7 = arith.constant 0 : index
    %8 = vector.load %arg8[%c0_6, %c0_7] : memref<8x128xf32, #tpu.memory_space<vmem>>, vector<8x128xf32>
    tpu.vector_store %arg8[%c0_6, %c0_7], %7 {strides = array<i32>} : memref<8x128xf32, #tpu.memory_space<vmem>>, vector<8x128xf32>,
    %c2_i32 = arith.constant 2 : i32
    %9 = arith.cmpi eq, %arg2, %c2_i32 : i32
    %10 = arith.extui %9 : i1 to i32
    %c0_i32_8 = arith.constant 0 : i32
    %11 = arith.cmpi ne, %10, %c0_i32_8 : i32
    scf.if %11 {
      %c0_9 = arith.constant 0 : index
      %c0_10 = arith.constant 0 : index
      %12 = vector.load %arg8[%c0_9, %c0_10] : memref<8x128xf32, #tpu.memory_space<vmem>>, vector<8x128xf32>
      %c0_11 = arith.constant 0 : index
      %c0_12 = arith.constant 0 : index
      %13 = vector.load %arg5[%c0_11, %c0_12] : memref<1x128xf32, #tpu.memory_space<vmem>>, vector<1x128xf32>
      %14 = vector.broadcast %13 : vector<1x128xf32> to vector<8x128xf32>
      %15 = arith.mulf %12, %14 : vector<8x128xf32>
      %c0_13 = arith.constant 0 : index
      %c0_14 = arith.constant 0 : index
      %16 = vector.load %arg6[%c0_13, %c0_14] : memref<1x128xf32, #tpu.memory_space<vmem>>, vector<1x128xf32>
      %17 = vector.broadcast %16 : vector<1x128xf32> to vector<8x128xf32>
      %18 = arith.addf %15, %17 : vector<8x128xf32>
      %cst_15 = arith.constant 0.000000e+00 : f32
      %19 = vector.broadcast %cst_15 : f32 to vector<8x128xf32>
      %20 = arith.maximumf %18, %19 : vector<8x128xf32>
      %21 = arith.truncf %20 : vector<8x128xf32> to vector<8x128xbf16>
      %c0_16 = arith.constant 0 : index
      %c0_17 = arith.constant 0 : index
      %22 = vector.load %arg7[%c0_16, %c0_17] : memref<8x128xbf16, #tpu.memory_space<vmem>>, vector<8x128xbf16>
      tpu.vector_store %arg7[%c0_16, %c0_17], %21 {strides = array<i32>} : memref<8x128xbf16, #tpu.memory_space<vmem>>, vector<8x128xbf16>,
    } else {
    }
    return
  }
  func.func @transform_0(%arg0: i32, %arg1: i32, %arg2: i32) -> (i32, i32) {
    %c0_i32 = arith.constant 0 : i32
    return %arg0, %arg2 : i32, i32
  }
  func.func @transform_1(%arg0: i32, %arg1: i32, %arg2: i32) -> (i32, i32) {
    %c0_i32 = arith.constant 0 : i32
    return %arg2, %arg1 : i32, i32
  }
  func.func @transform_2(%arg0: i32, %arg1: i32, %arg2: i32) -> (i32, i32) {
    %c0_i32 = arith.constant 0 : i32
    %c0_i32_0 = arith.constant 0 : i32
    return %c0_i32, %arg1 : i32, i32
  }
  func.func @transform_3(%arg0: i32, %arg1: i32, %arg2: i32) -> (i32, i32) {
    %c0_i32 = arith.constant 0 : i32
    %c0_i32_0 = arith.constant 0 : i32
    return %c0_i32, %arg1 : i32, i32
  }
  func.func @transform_4(%arg0: i32, %arg1: i32, %arg2: i32) -> (i32, i32) {
    %c0_i32 = arith.constant 0 : i32
    return %arg0, %arg1 : i32, i32
  }
}

module attributes {stable_mosaic.version = 11 : i64} {
  func.func @_mm_single_kernel(%arg0: i32, %arg1: i32, %arg2: memref<8x256xbf16, #tpu.memory_space<vmem>>, %arg3: memref<256x256xbf16, #tpu.memory_space<vmem>>, %arg4: memref<1x256xf32, #tpu.memory_space<vmem>>, %arg5: memref<1x256xf32, #tpu.memory_space<vmem>>, %arg6: memref<8x256xbf16, #tpu.memory_space<vmem>>) attributes {dimension_semantics = [#tpu.dimension_semantics<parallel>, #tpu.dimension_semantics<parallel>], iteration_bounds = array<i64: 1, 2>, scalar_prefetch = 0 : i64, scratch_operands = 0 : i64, tpu.core_type = #tpu.core_type<tc>, window_params = [{transform_indices = @transform_0, window_bounds = array<i64: 8, 256>}, {transform_indices = @transform_1, window_bounds = array<i64: 256, 256>}, {transform_indices = @transform_2, window_bounds = array<i64: 1, 256>}, {transform_indices = @transform_3, window_bounds = array<i64: 1, 256>}, {transform_indices = @transform_4, window_bounds = array<i64: 8, 256>}]} {
    %c0 = arith.constant 0 : index
    %c0_0 = arith.constant 0 : index
    %0 = vector.load %arg2[%c0, %c0_0] : memref<8x256xbf16, #tpu.memory_space<vmem>>, vector<8x256xbf16>
    %c0_1 = arith.constant 0 : index
    %c0_2 = arith.constant 0 : index
    %1 = vector.load %arg3[%c0_1, %c0_2] : memref<256x256xbf16, #tpu.memory_space<vmem>>, vector<256x256xbf16>
    %cst = arith.constant dense<0.000000e+00> : vector<8x256xf32>
    %2 = tpu.matmul %0, %1, %cst {dimension_numbers = #tpu.dot_dimension_numbers<[1], [0], [0], [1], [0, 0, 1, 1], [], []>} : vector<8x256xbf16>, vector<256x256xbf16>, vector<8x256xf32> -> vector<8x256xf32>
    %c0_3 = arith.constant 0 : index
    %c0_4 = arith.constant 0 : index
    %3 = vector.load %arg4[%c0_3, %c0_4] : memref<1x256xf32, #tpu.memory_space<vmem>>, vector<1x256xf32>
    %4 = vector.broadcast %3 : vector<1x256xf32> to vector<8x256xf32>
    %5 = arith.mulf %2, %4 : vector<8x256xf32>
    %c0_5 = arith.constant 0 : index
    %c0_6 = arith.constant 0 : index
    %6 = vector.load %arg5[%c0_5, %c0_6] : memref<1x256xf32, #tpu.memory_space<vmem>>, vector<1x256xf32>
    %7 = vector.broadcast %6 : vector<1x256xf32> to vector<8x256xf32>
    %8 = arith.addf %5, %7 : vector<8x256xf32>
    %9 = arith.truncf %8 : vector<8x256xf32> to vector<8x256xbf16>
    %c0_7 = arith.constant 0 : index
    %c0_8 = arith.constant 0 : index
    %10 = vector.load %arg6[%c0_7, %c0_8] : memref<8x256xbf16, #tpu.memory_space<vmem>>, vector<8x256xbf16>
    tpu.vector_store %arg6[%c0_7, %c0_8], %9 {strides = array<i32>} : memref<8x256xbf16, #tpu.memory_space<vmem>>, vector<8x256xbf16>,
    return
  }
  func.func @transform_0(%arg0: i32, %arg1: i32) -> (i32, i32) {
    %c0_i32 = arith.constant 0 : i32
    %c0_i32_0 = arith.constant 0 : i32
    return %arg0, %c0_i32 : i32, i32
  }
  func.func @transform_1(%arg0: i32, %arg1: i32) -> (i32, i32) {
    %c0_i32 = arith.constant 0 : i32
    %c0_i32_0 = arith.constant 0 : i32
    return %c0_i32, %arg1 : i32, i32
  }
  func.func @transform_2(%arg0: i32, %arg1: i32) -> (i32, i32) {
    %c0_i32 = arith.constant 0 : i32
    %c0_i32_0 = arith.constant 0 : i32
    return %c0_i32, %arg1 : i32, i32
  }
  func.func @transform_3(%arg0: i32, %arg1: i32) -> (i32, i32) {
    %c0_i32 = arith.constant 0 : i32
    %c0_i32_0 = arith.constant 0 : i32
    return %c0_i32, %arg1 : i32, i32
  }
  func.func @transform_4(%arg0: i32, %arg1: i32) -> (i32, i32) {
    %c0_i32 = arith.constant 0 : i32
    return %arg0, %arg1 : i32, i32
  }
}

module attributes {stable_mosaic.version = 11 : i64} {
  func.func @_mm_single_kernel(%arg0: i32, %arg1: i32, %arg2: memref<8x128xbf16, #tpu.memory_space<vmem>>, %arg3: memref<128x256xbf16, #tpu.memory_space<vmem>>, %arg4: memref<1x256xf32, #tpu.memory_space<vmem>>, %arg5: memref<1x256xf32, #tpu.memory_space<vmem>>, %arg6: memref<8x256xbf16, #tpu.memory_space<vmem>>, %arg7: memref<8x256xbf16, #tpu.memory_space<vmem>>) attributes {dimension_semantics = [#tpu.dimension_semantics<parallel>, #tpu.dimension_semantics<parallel>], iteration_bounds = array<i64: 1, 2>, scalar_prefetch = 0 : i64, scratch_operands = 0 : i64, tpu.core_type = #tpu.core_type<tc>, window_params = [{transform_indices = @transform_0, window_bounds = array<i64: 8, 128>}, {transform_indices = @transform_1, window_bounds = array<i64: 128, 256>}, {transform_indices = @transform_2, window_bounds = array<i64: 1, 256>}, {transform_indices = @transform_3, window_bounds = array<i64: 1, 256>}, {transform_indices = @transform_4, window_bounds = array<i64: 8, 256>}, {transform_indices = @transform_5, window_bounds = array<i64: 8, 256>}]} {
    %c0 = arith.constant 0 : index
    %c0_0 = arith.constant 0 : index
    %0 = vector.load %arg2[%c0, %c0_0] : memref<8x128xbf16, #tpu.memory_space<vmem>>, vector<8x128xbf16>
    %c0_1 = arith.constant 0 : index
    %c0_2 = arith.constant 0 : index
    %1 = vector.load %arg3[%c0_1, %c0_2] : memref<128x256xbf16, #tpu.memory_space<vmem>>, vector<128x256xbf16>
    %cst = arith.constant dense<0.000000e+00> : vector<8x256xf32>
    %2 = tpu.matmul %0, %1, %cst {dimension_numbers = #tpu.dot_dimension_numbers<[1], [0], [0], [1], [0, 0, 1, 1], [], []>} : vector<8x128xbf16>, vector<128x256xbf16>, vector<8x256xf32> -> vector<8x256xf32>
    %c0_3 = arith.constant 0 : index
    %c0_4 = arith.constant 0 : index
    %3 = vector.load %arg4[%c0_3, %c0_4] : memref<1x256xf32, #tpu.memory_space<vmem>>, vector<1x256xf32>
    %4 = vector.broadcast %3 : vector<1x256xf32> to vector<8x256xf32>
    %5 = arith.mulf %2, %4 : vector<8x256xf32>
    %c0_5 = arith.constant 0 : index
    %c0_6 = arith.constant 0 : index
    %6 = vector.load %arg5[%c0_5, %c0_6] : memref<1x256xf32, #tpu.memory_space<vmem>>, vector<1x256xf32>
    %7 = vector.broadcast %6 : vector<1x256xf32> to vector<8x256xf32>
    %8 = arith.addf %5, %7 : vector<8x256xf32>
    %c0_7 = arith.constant 0 : index
    %c0_8 = arith.constant 0 : index
    %9 = vector.load %arg6[%c0_7, %c0_8] : memref<8x256xbf16, #tpu.memory_space<vmem>>, vector<8x256xbf16>
    %10 = arith.extf %9 : vector<8x256xbf16> to vector<8x256xf32>
    %11 = arith.addf %8, %10 : vector<8x256xf32>
    %cst_9 = arith.constant 0.000000e+00 : f32
    %12 = vector.broadcast %cst_9 : f32 to vector<8x256xf32>
    %13 = arith.maximumf %11, %12 : vector<8x256xf32>
    %14 = arith.truncf %13 : vector<8x256xf32> to vector<8x256xbf16>
    %c0_10 = arith.constant 0 : index
    %c0_11 = arith.constant 0 : index
    %15 = vector.load %arg7[%c0_10, %c0_11] : memref<8x256xbf16, #tpu.memory_space<vmem>>, vector<8x256xbf16>
    tpu.vector_store %arg7[%c0_10, %c0_11], %14 {strides = array<i32>} : memref<8x256xbf16, #tpu.memory_space<vmem>>, vector<8x256xbf16>,
    return
  }
  func.func @transform_0(%arg0: i32, %arg1: i32) -> (i32, i32) {
    %c0_i32 = arith.constant 0 : i32
    %c0_i32_0 = arith.constant 0 : i32
    return %arg0, %c0_i32 : i32, i32
  }
  func.func @transform_1(%arg0: i32, %arg1: i32) -> (i32, i32) {
    %c0_i32 = arith.constant 0 : i32
    %c0_i32_0 = arith.constant 0 : i32
    return %c0_i32, %arg1 : i32, i32
  }
  func.func @transform_2(%arg0: i32, %arg1: i32) -> (i32, i32) {
    %c0_i32 = arith.constant 0 : i32
    %c0_i32_0 = arith.constant 0 : i32
    return %c0_i32, %arg1 : i32, i32
  }
  func.func @transform_3(%arg0: i32, %arg1: i32) -> (i32, i32) {
    %c0_i32 = arith.constant 0 : i32
    %c0_i32_0 = arith.constant 0 : i32
    return %c0_i32, %arg1 : i32, i32
  }
  func.func @transform_4(%arg0: i32, %arg1: i32) -> (i32, i32) {
    %c0_i32 = arith.constant 0 : i32
    return %arg0, %arg1 : i32, i32
  }
  func.func @transform_5(%arg0: i32, %arg1: i32) -> (i32, i32) {
    %c0_i32 = arith.constant 0 : i32
    return %arg0, %arg1 : i32, i32
  }
}

module attributes {stable_mosaic.version = 11 : i64} {
  func.func @_mm_single_kernel(%arg0: i32, %arg1: i32, %arg2: memref<8x512xbf16, #tpu.memory_space<vmem>>, %arg3: memref<512x128xbf16, #tpu.memory_space<vmem>>, %arg4: memref<1x128xf32, #tpu.memory_space<vmem>>, %arg5: memref<1x128xf32, #tpu.memory_space<vmem>>, %arg6: memref<8x128xbf16, #tpu.memory_space<vmem>>) attributes {dimension_semantics = [#tpu.dimension_semantics<parallel>, #tpu.dimension_semantics<parallel>], iteration_bounds = array<i64: 1, 1>, scalar_prefetch = 0 : i64, scratch_operands = 0 : i64, tpu.core_type = #tpu.core_type<tc>, window_params = [{transform_indices = @transform_0, window_bounds = array<i64: 8, 512>}, {transform_indices = @transform_1, window_bounds = array<i64: 512, 128>}, {transform_indices = @transform_2, window_bounds = array<i64: 1, 128>}, {transform_indices = @transform_3, window_bounds = array<i64: 1, 128>}, {transform_indices = @transform_4, window_bounds = array<i64: 8, 128>}]} {
    %c0 = arith.constant 0 : index
    %c0_0 = arith.constant 0 : index
    %0 = vector.load %arg2[%c0, %c0_0] : memref<8x512xbf16, #tpu.memory_space<vmem>>, vector<8x512xbf16>
    %c0_1 = arith.constant 0 : index
    %c0_2 = arith.constant 0 : index
    %1 = vector.load %arg3[%c0_1, %c0_2] : memref<512x128xbf16, #tpu.memory_space<vmem>>, vector<512x128xbf16>
    %cst = arith.constant dense<0.000000e+00> : vector<8x128xf32>
    %2 = tpu.matmul %0, %1, %cst {dimension_numbers = #tpu.dot_dimension_numbers<[1], [0], [0], [1], [0, 0, 1, 1], [], []>} : vector<8x512xbf16>, vector<512x128xbf16>, vector<8x128xf32> -> vector<8x128xf32>
    %c0_3 = arith.constant 0 : index
    %c0_4 = arith.constant 0 : index
    %3 = vector.load %arg4[%c0_3, %c0_4] : memref<1x128xf32, #tpu.memory_space<vmem>>, vector<1x128xf32>
    %4 = vector.broadcast %3 : vector<1x128xf32> to vector<8x128xf32>
    %5 = arith.mulf %2, %4 : vector<8x128xf32>
    %c0_5 = arith.constant 0 : index
    %c0_6 = arith.constant 0 : index
    %6 = vector.load %arg5[%c0_5, %c0_6] : memref<1x128xf32, #tpu.memory_space<vmem>>, vector<1x128xf32>
    %7 = vector.broadcast %6 : vector<1x128xf32> to vector<8x128xf32>
    %8 = arith.addf %5, %7 : vector<8x128xf32>
    %cst_7 = arith.constant 0.000000e+00 : f32
    %9 = vector.broadcast %cst_7 : f32 to vector<8x128xf32>
    %10 = arith.maximumf %8, %9 : vector<8x128xf32>
    %11 = arith.truncf %10 : vector<8x128xf32> to vector<8x128xbf16>
    %c0_8 = arith.constant 0 : index
    %c0_9 = arith.constant 0 : index
    %12 = vector.load %arg6[%c0_8, %c0_9] : memref<8x128xbf16, #tpu.memory_space<vmem>>, vector<8x128xbf16>
    tpu.vector_store %arg6[%c0_8, %c0_9], %11 {strides = array<i32>} : memref<8x128xbf16, #tpu.memory_space<vmem>>, vector<8x128xbf16>,
    return
  }
  func.func @transform_0(%arg0: i32, %arg1: i32) -> (i32, i32) {
    %c0_i32 = arith.constant 0 : i32
    %c0_i32_0 = arith.constant 0 : i32
    return %arg0, %c0_i32 : i32, i32
  }
  func.func @transform_1(%arg0: i32, %arg1: i32) -> (i32, i32) {
    %c0_i32 = arith.constant 0 : i32
    %c0_i32_0 = arith.constant 0 : i32
    return %c0_i32, %arg1 : i32, i32
  }
  func.func @transform_2(%arg0: i32, %arg1: i32) -> (i32, i32) {
    %c0_i32 = arith.constant 0 : i32
    %c0_i32_0 = arith.constant 0 : i32
    return %c0_i32, %arg1 : i32, i32
  }
  func.func @transform_3(%arg0: i32, %arg1: i32) -> (i32, i32) {
    %c0_i32 = arith.constant 0 : i32
    %c0_i32_0 = arith.constant 0 : i32
    return %c0_i32, %arg1 : i32, i32
  }
  func.func @transform_4(%arg0: i32, %arg1: i32) -> (i32, i32) {
    %c0_i32 = arith.constant 0 : i32
    return %arg0, %arg1 : i32, i32
  }
}

module attributes {stable_mosaic.version = 11 : i64} {
  func.func @_mm_single_kernel(%arg0: i32, %arg1: i32, %arg2: memref<8x512xbf16, #tpu.memory_space<vmem>>, %arg3: memref<512x256xbf16, #tpu.memory_space<vmem>>, %arg4: memref<1x256xf32, #tpu.memory_space<vmem>>, %arg5: memref<1x256xf32, #tpu.memory_space<vmem>>, %arg6: memref<8x256xbf16, #tpu.memory_space<vmem>>) attributes {dimension_semantics = [#tpu.dimension_semantics<parallel>, #tpu.dimension_semantics<parallel>], iteration_bounds = array<i64: 1, 1>, scalar_prefetch = 0 : i64, scratch_operands = 0 : i64, tpu.core_type = #tpu.core_type<tc>, window_params = [{transform_indices = @transform_0, window_bounds = array<i64: 8, 512>}, {transform_indices = @transform_1, window_bounds = array<i64: 512, 256>}, {transform_indices = @transform_2, window_bounds = array<i64: 1, 256>}, {transform_indices = @transform_3, window_bounds = array<i64: 1, 256>}, {transform_indices = @transform_4, window_bounds = array<i64: 8, 256>}]} {
    %c0 = arith.constant 0 : index
    %c0_0 = arith.constant 0 : index
    %0 = vector.load %arg2[%c0, %c0_0] : memref<8x512xbf16, #tpu.memory_space<vmem>>, vector<8x512xbf16>
    %c0_1 = arith.constant 0 : index
    %c0_2 = arith.constant 0 : index
    %1 = vector.load %arg3[%c0_1, %c0_2] : memref<512x256xbf16, #tpu.memory_space<vmem>>, vector<512x256xbf16>
    %cst = arith.constant dense<0.000000e+00> : vector<8x256xf32>
    %2 = tpu.matmul %0, %1, %cst {dimension_numbers = #tpu.dot_dimension_numbers<[1], [0], [0], [1], [0, 0, 1, 1], [], []>} : vector<8x512xbf16>, vector<512x256xbf16>, vector<8x256xf32> -> vector<8x256xf32>
    %c0_3 = arith.constant 0 : index
    %c0_4 = arith.constant 0 : index
    %3 = vector.load %arg4[%c0_3, %c0_4] : memref<1x256xf32, #tpu.memory_space<vmem>>, vector<1x256xf32>
    %4 = vector.broadcast %3 : vector<1x256xf32> to vector<8x256xf32>
    %5 = arith.mulf %2, %4 : vector<8x256xf32>
    %c0_5 = arith.constant 0 : index
    %c0_6 = arith.constant 0 : index
    %6 = vector.load %arg5[%c0_5, %c0_6] : memref<1x256xf32, #tpu.memory_space<vmem>>, vector<1x256xf32>
    %7 = vector.broadcast %6 : vector<1x256xf32> to vector<8x256xf32>
    %8 = arith.addf %5, %7 : vector<8x256xf32>
    %cst_7 = arith.constant 0.000000e+00 : f32
    %9 = vector.broadcast %cst_7 : f32 to vector<8x256xf32>
    %10 = arith.maximumf %8, %9 : vector<8x256xf32>
    %11 = arith.truncf %10 : vector<8x256xf32> to vector<8x256xbf16>
    %c0_8 = arith.constant 0 : index
    %c0_9 = arith.constant 0 : index
    %12 = vector.load %arg6[%c0_8, %c0_9] : memref<8x256xbf16, #tpu.memory_space<vmem>>, vector<8x256xbf16>
    tpu.vector_store %arg6[%c0_8, %c0_9], %11 {strides = array<i32>} : memref<8x256xbf16, #tpu.memory_space<vmem>>, vector<8x256xbf16>,
    return
  }
  func.func @transform_0(%arg0: i32, %arg1: i32) -> (i32, i32) {
    %c0_i32 = arith.constant 0 : i32
    %c0_i32_0 = arith.constant 0 : i32
    return %arg0, %c0_i32 : i32, i32
  }
  func.func @transform_1(%arg0: i32, %arg1: i32) -> (i32, i32) {
    %c0_i32 = arith.constant 0 : i32
    %c0_i32_0 = arith.constant 0 : i32
    return %c0_i32, %arg1 : i32, i32
  }
  func.func @transform_2(%arg0: i32, %arg1: i32) -> (i32, i32) {
    %c0_i32 = arith.constant 0 : i32
    %c0_i32_0 = arith.constant 0 : i32
    return %c0_i32, %arg1 : i32, i32
  }
  func.func @transform_3(%arg0: i32, %arg1: i32) -> (i32, i32) {
    %c0_i32 = arith.constant 0 : i32
    %c0_i32_0 = arith.constant 0 : i32
    return %c0_i32, %arg1 : i32, i32
  }
  func.func @transform_4(%arg0: i32, %arg1: i32) -> (i32, i32) {
    %c0_i32 = arith.constant 0 : i32
    return %arg0, %arg1 : i32, i32
  }
}

module attributes {stable_mosaic.version = 11 : i64} {
  func.func @_mm_multi_kernel(%arg0: i32, %arg1: i32, %arg2: i32, %arg3: memref<8x384xbf16, #tpu.memory_space<vmem>>, %arg4: memref<384x256xbf16, #tpu.memory_space<vmem>>, %arg5: memref<1x256xf32, #tpu.memory_space<vmem>>, %arg6: memref<1x256xf32, #tpu.memory_space<vmem>>, %arg7: memref<8x256xbf16, #tpu.memory_space<vmem>>, %arg8: memref<8x256xf32, #tpu.memory_space<vmem>>) attributes {dimension_semantics = [#tpu.dimension_semantics<parallel>, #tpu.dimension_semantics<parallel>, #tpu.dimension_semantics<arbitrary>], iteration_bounds = array<i64: 1, 1, 6>, scalar_prefetch = 0 : i64, scratch_operands = 1 : i64, tpu.core_type = #tpu.core_type<tc>, window_params = [{transform_indices = @transform_0, window_bounds = array<i64: 8, 384>}, {transform_indices = @transform_1, window_bounds = array<i64: 384, 256>}, {transform_indices = @transform_2, window_bounds = array<i64: 1, 256>}, {transform_indices = @transform_3, window_bounds = array<i64: 1, 256>}, {transform_indices = @transform_4, window_bounds = array<i64: 8, 256>}]} {
    %c0_i32 = arith.constant 0 : i32
    %0 = arith.cmpi eq, %arg2, %c0_i32 : i32
    %1 = arith.extui %0 : i1 to i32
    %c0_i32_0 = arith.constant 0 : i32
    %2 = arith.cmpi ne, %1, %c0_i32_0 : i32
    scf.if %2 {
      %cst_9 = arith.constant 0.000000e+00 : f32
      %12 = vector.broadcast %cst_9 : f32 to vector<8x256xf32>
      %c0_10 = arith.constant 0 : index
      %c0_11 = arith.constant 0 : index
      %13 = vector.load %arg8[%c0_10, %c0_11] : memref<8x256xf32, #tpu.memory_space<vmem>>, vector<8x256xf32>
      tpu.vector_store %arg8[%c0_10, %c0_11], %12 {strides = array<i32>} : memref<8x256xf32, #tpu.memory_space<vmem>>, vector<8x256xf32>,
    } else {
    }
    %c0 = arith.constant 0 : index
    %c0_1 = arith.constant 0 : index
    %3 = vector.load %arg8[%c0, %c0_1] : memref<8x256xf32, #tpu.memory_space<vmem>>, vector<8x256xf32>
    %c0_2 = arith.constant 0 : index
    %c0_3 = arith.constant 0 : index
    %4 = vector.load %arg3[%c0_2, %c0_3] : memref<8x384xbf16, #tpu.memory_space<vmem>>, vector<8x384xbf16>
    %c0_4 = arith.constant 0 : index
    %c0_5 = arith.constant 0 : index
    %5 = vector.load %arg4[%c0_4, %c0_5] : memref<384x256xbf16, #tpu.memory_space<vmem>>, vector<384x256xbf16>
    %cst = arith.constant dense<0.000000e+00> : vector<8x256xf32>
    %6 = tpu.matmul %4, %5, %cst {dimension_numbers = #tpu.dot_dimension_numbers<[1], [0], [0], [1], [0, 0, 1, 1], [], []>} : vector<8x384xbf16>, vector<384x256xbf16>, vector<8x256xf32> -> vector<8x256xf32>
    %7 = arith.addf %3, %6 : vector<8x256xf32>
    %c0_6 = arith.constant 0 : index
    %c0_7 = arith.constant 0 : index
    %8 = vector.load %arg8[%c0_6, %c0_7] : memref<8x256xf32, #tpu.memory_space<vmem>>, vector<8x256xf32>
    tpu.vector_store %arg8[%c0_6, %c0_7], %7 {strides = array<i32>} : memref<8x256xf32, #tpu.memory_space<vmem>>, vector<8x256xf32>,
    %c5_i32 = arith.constant 5 : i32
    %9 = arith.cmpi eq, %arg2, %c5_i32 : i32
    %10 = arith.extui %9 : i1 to i32
    %c0_i32_8 = arith.constant 0 : i32
    %11 = arith.cmpi ne, %10, %c0_i32_8 : i32
    scf.if %11 {
      %c0_9 = arith.constant 0 : index
      %c0_10 = arith.constant 0 : index
      %12 = vector.load %arg8[%c0_9, %c0_10] : memref<8x256xf32, #tpu.memory_space<vmem>>, vector<8x256xf32>
      %c0_11 = arith.constant 0 : index
      %c0_12 = arith.constant 0 : index
      %13 = vector.load %arg5[%c0_11, %c0_12] : memref<1x256xf32, #tpu.memory_space<vmem>>, vector<1x256xf32>
      %14 = vector.broadcast %13 : vector<1x256xf32> to vector<8x256xf32>
      %15 = arith.mulf %12, %14 : vector<8x256xf32>
      %c0_13 = arith.constant 0 : index
      %c0_14 = arith.constant 0 : index
      %16 = vector.load %arg6[%c0_13, %c0_14] : memref<1x256xf32, #tpu.memory_space<vmem>>, vector<1x256xf32>
      %17 = vector.broadcast %16 : vector<1x256xf32> to vector<8x256xf32>
      %18 = arith.addf %15, %17 : vector<8x256xf32>
      %cst_15 = arith.constant 0.000000e+00 : f32
      %19 = vector.broadcast %cst_15 : f32 to vector<8x256xf32>
      %20 = arith.maximumf %18, %19 : vector<8x256xf32>
      %21 = arith.truncf %20 : vector<8x256xf32> to vector<8x256xbf16>
      %c0_16 = arith.constant 0 : index
      %c0_17 = arith.constant 0 : index
      %22 = vector.load %arg7[%c0_16, %c0_17] : memref<8x256xbf16, #tpu.memory_space<vmem>>, vector<8x256xbf16>
      tpu.vector_store %arg7[%c0_16, %c0_17], %21 {strides = array<i32>} : memref<8x256xbf16, #tpu.memory_space<vmem>>, vector<8x256xbf16>,
    } else {
    }
    return
  }
  func.func @transform_0(%arg0: i32, %arg1: i32, %arg2: i32) -> (i32, i32) {
    %c0_i32 = arith.constant 0 : i32
    return %arg0, %arg2 : i32, i32
  }
  func.func @transform_1(%arg0: i32, %arg1: i32, %arg2: i32) -> (i32, i32) {
    %c0_i32 = arith.constant 0 : i32
    return %arg2, %arg1 : i32, i32
  }
  func.func @transform_2(%arg0: i32, %arg1: i32, %arg2: i32) -> (i32, i32) {
    %c0_i32 = arith.constant 0 : i32
    %c0_i32_0 = arith.constant 0 : i32
    return %c0_i32, %arg1 : i32, i32
  }
  func.func @transform_3(%arg0: i32, %arg1: i32, %arg2: i32) -> (i32, i32) {
    %c0_i32 = arith.constant 0 : i32
    %c0_i32_0 = arith.constant 0 : i32
    return %c0_i32, %arg1 : i32, i32
  }
  func.func @transform_4(%arg0: i32, %arg1: i32, %arg2: i32) -> (i32, i32) {
    %c0_i32 = arith.constant 0 : i32
    return %arg0, %arg1 : i32, i32
  }
}

module attributes {stable_mosaic.version = 11 : i64} {
  func.func @_mm_single_kernel(%arg0: i32, %arg1: i32, %arg2: memref<8x512xbf16, #tpu.memory_space<vmem>>, %arg3: memref<512x256xbf16, #tpu.memory_space<vmem>>, %arg4: memref<1x256xf32, #tpu.memory_space<vmem>>, %arg5: memref<1x256xf32, #tpu.memory_space<vmem>>, %arg6: memref<8x256xbf16, #tpu.memory_space<vmem>>) attributes {dimension_semantics = [#tpu.dimension_semantics<parallel>, #tpu.dimension_semantics<parallel>], iteration_bounds = array<i64: 1, 4>, scalar_prefetch = 0 : i64, scratch_operands = 0 : i64, tpu.core_type = #tpu.core_type<tc>, window_params = [{transform_indices = @transform_0, window_bounds = array<i64: 8, 512>}, {transform_indices = @transform_1, window_bounds = array<i64: 512, 256>}, {transform_indices = @transform_2, window_bounds = array<i64: 1, 256>}, {transform_indices = @transform_3, window_bounds = array<i64: 1, 256>}, {transform_indices = @transform_4, window_bounds = array<i64: 8, 256>}]} {
    %c0 = arith.constant 0 : index
    %c0_0 = arith.constant 0 : index
    %0 = vector.load %arg2[%c0, %c0_0] : memref<8x512xbf16, #tpu.memory_space<vmem>>, vector<8x512xbf16>
    %c0_1 = arith.constant 0 : index
    %c0_2 = arith.constant 0 : index
    %1 = vector.load %arg3[%c0_1, %c0_2] : memref<512x256xbf16, #tpu.memory_space<vmem>>, vector<512x256xbf16>
    %cst = arith.constant dense<0.000000e+00> : vector<8x256xf32>
    %2 = tpu.matmul %0, %1, %cst {dimension_numbers = #tpu.dot_dimension_numbers<[1], [0], [0], [1], [0, 0, 1, 1], [], []>} : vector<8x512xbf16>, vector<512x256xbf16>, vector<8x256xf32> -> vector<8x256xf32>
    %c0_3 = arith.constant 0 : index
    %c0_4 = arith.constant 0 : index
    %3 = vector.load %arg4[%c0_3, %c0_4] : memref<1x256xf32, #tpu.memory_space<vmem>>, vector<1x256xf32>
    %4 = vector.broadcast %3 : vector<1x256xf32> to vector<8x256xf32>
    %5 = arith.mulf %2, %4 : vector<8x256xf32>
    %c0_5 = arith.constant 0 : index
    %c0_6 = arith.constant 0 : index
    %6 = vector.load %arg5[%c0_5, %c0_6] : memref<1x256xf32, #tpu.memory_space<vmem>>, vector<1x256xf32>
    %7 = vector.broadcast %6 : vector<1x256xf32> to vector<8x256xf32>
    %8 = arith.addf %5, %7 : vector<8x256xf32>
    %9 = arith.truncf %8 : vector<8x256xf32> to vector<8x256xbf16>
    %c0_7 = arith.constant 0 : index
    %c0_8 = arith.constant 0 : index
    %10 = vector.load %arg6[%c0_7, %c0_8] : memref<8x256xbf16, #tpu.memory_space<vmem>>, vector<8x256xbf16>
    tpu.vector_store %arg6[%c0_7, %c0_8], %9 {strides = array<i32>} : memref<8x256xbf16, #tpu.memory_space<vmem>>, vector<8x256xbf16>,
    return
  }
  func.func @transform_0(%arg0: i32, %arg1: i32) -> (i32, i32) {
    %c0_i32 = arith.constant 0 : i32
    %c0_i32_0 = arith.constant 0 : i32
    return %arg0, %c0_i32 : i32, i32
  }
  func.func @transform_1(%arg0: i32, %arg1: i32) -> (i32, i32) {
    %c0_i32 = arith.constant 0 : i32
    %c0_i32_0 = arith.constant 0 : i32
    return %c0_i32, %arg1 : i32, i32
  }
  func.func @transform_2(%arg0: i32, %arg1: i32) -> (i32, i32) {
    %c0_i32 = arith.constant 0 : i32
    %c0_i32_0 = arith.constant 0 : i32
    return %c0_i32, %arg1 : i32, i32
  }
  func.func @transform_3(%arg0: i32, %arg1: i32) -> (i32, i32) {
    %c0_i32 = arith.constant 0 : i32
    %c0_i32_0 = arith.constant 0 : i32
    return %c0_i32, %arg1 : i32, i32
  }
  func.func @transform_4(%arg0: i32, %arg1: i32) -> (i32, i32) {
    %c0_i32 = arith.constant 0 : i32
    return %arg0, %arg1 : i32, i32
  }
}

module attributes {stable_mosaic.version = 11 : i64} {
  func.func @_mm_single_kernel(%arg0: i32, %arg1: i32, %arg2: memref<8x256xbf16, #tpu.memory_space<vmem>>, %arg3: memref<256x256xbf16, #tpu.memory_space<vmem>>, %arg4: memref<1x256xf32, #tpu.memory_space<vmem>>, %arg5: memref<1x256xf32, #tpu.memory_space<vmem>>, %arg6: memref<8x256xbf16, #tpu.memory_space<vmem>>, %arg7: memref<8x256xbf16, #tpu.memory_space<vmem>>) attributes {dimension_semantics = [#tpu.dimension_semantics<parallel>, #tpu.dimension_semantics<parallel>], iteration_bounds = array<i64: 1, 4>, scalar_prefetch = 0 : i64, scratch_operands = 0 : i64, tpu.core_type = #tpu.core_type<tc>, window_params = [{transform_indices = @transform_0, window_bounds = array<i64: 8, 256>}, {transform_indices = @transform_1, window_bounds = array<i64: 256, 256>}, {transform_indices = @transform_2, window_bounds = array<i64: 1, 256>}, {transform_indices = @transform_3, window_bounds = array<i64: 1, 256>}, {transform_indices = @transform_4, window_bounds = array<i64: 8, 256>}, {transform_indices = @transform_5, window_bounds = array<i64: 8, 256>}]} {
    %c0 = arith.constant 0 : index
    %c0_0 = arith.constant 0 : index
    %0 = vector.load %arg2[%c0, %c0_0] : memref<8x256xbf16, #tpu.memory_space<vmem>>, vector<8x256xbf16>
    %c0_1 = arith.constant 0 : index
    %c0_2 = arith.constant 0 : index
    %1 = vector.load %arg3[%c0_1, %c0_2] : memref<256x256xbf16, #tpu.memory_space<vmem>>, vector<256x256xbf16>
    %cst = arith.constant dense<0.000000e+00> : vector<8x256xf32>
    %2 = tpu.matmul %0, %1, %cst {dimension_numbers = #tpu.dot_dimension_numbers<[1], [0], [0], [1], [0, 0, 1, 1], [], []>} : vector<8x256xbf16>, vector<256x256xbf16>, vector<8x256xf32> -> vector<8x256xf32>
    %c0_3 = arith.constant 0 : index
    %c0_4 = arith.constant 0 : index
    %3 = vector.load %arg4[%c0_3, %c0_4] : memref<1x256xf32, #tpu.memory_space<vmem>>, vector<1x256xf32>
    %4 = vector.broadcast %3 : vector<1x256xf32> to vector<8x256xf32>
    %5 = arith.mulf %2, %4 : vector<8x256xf32>
    %c0_5 = arith.constant 0 : index
    %c0_6 = arith.constant 0 : index
    %6 = vector.load %arg5[%c0_5, %c0_6] : memref<1x256xf32, #tpu.memory_space<vmem>>, vector<1x256xf32>
    %7 = vector.broadcast %6 : vector<1x256xf32> to vector<8x256xf32>
    %8 = arith.addf %5, %7 : vector<8x256xf32>
    %c0_7 = arith.constant 0 : index
    %c0_8 = arith.constant 0 : index
    %9 = vector.load %arg6[%c0_7, %c0_8] : memref<8x256xbf16, #tpu.memory_space<vmem>>, vector<8x256xbf16>
    %10 = arith.extf %9 : vector<8x256xbf16> to vector<8x256xf32>
    %11 = arith.addf %8, %10 : vector<8x256xf32>
    %cst_9 = arith.constant 0.000000e+00 : f32
    %12 = vector.broadcast %cst_9 : f32 to vector<8x256xf32>
    %13 = arith.maximumf %11, %12 : vector<8x256xf32>
    %14 = arith.truncf %13 : vector<8x256xf32> to vector<8x256xbf16>
    %c0_10 = arith.constant 0 : index
    %c0_11 = arith.constant 0 : index
    %15 = vector.load %arg7[%c0_10, %c0_11] : memref<8x256xbf16, #tpu.memory_space<vmem>>, vector<8x256xbf16>
    tpu.vector_store %arg7[%c0_10, %c0_11], %14 {strides = array<i32>} : memref<8x256xbf16, #tpu.memory_space<vmem>>, vector<8x256xbf16>,
    return
  }
  func.func @transform_0(%arg0: i32, %arg1: i32) -> (i32, i32) {
    %c0_i32 = arith.constant 0 : i32
    %c0_i32_0 = arith.constant 0 : i32
    return %arg0, %c0_i32 : i32, i32
  }
  func.func @transform_1(%arg0: i32, %arg1: i32) -> (i32, i32) {
    %c0_i32 = arith.constant 0 : i32
    %c0_i32_0 = arith.constant 0 : i32
    return %c0_i32, %arg1 : i32, i32
  }
  func.func @transform_2(%arg0: i32, %arg1: i32) -> (i32, i32) {
    %c0_i32 = arith.constant 0 : i32
    %c0_i32_0 = arith.constant 0 : i32
    return %c0_i32, %arg1 : i32, i32
  }
  func.func @transform_3(%arg0: i32, %arg1: i32) -> (i32, i32) {
    %c0_i32 = arith.constant 0 : i32
    %c0_i32_0 = arith.constant 0 : i32
    return %c0_i32, %arg1 : i32, i32
  }
  func.func @transform_4(%arg0: i32, %arg1: i32) -> (i32, i32) {
    %c0_i32 = arith.constant 0 : i32
    return %arg0, %arg1 : i32, i32
  }
  func.func @transform_5(%arg0: i32, %arg1: i32) -> (i32, i32) {
    %c0_i32 = arith.constant 0 : i32
    return %arg0, %arg1 : i32, i32
  }
}

module attributes {stable_mosaic.version = 11 : i64} {
  func.func @_mm_multi_kernel(%arg0: i32, %arg1: i32, %arg2: i32, %arg3: memref<8x512xbf16, #tpu.memory_space<vmem>>, %arg4: memref<512x256xbf16, #tpu.memory_space<vmem>>, %arg5: memref<1x256xf32, #tpu.memory_space<vmem>>, %arg6: memref<1x256xf32, #tpu.memory_space<vmem>>, %arg7: memref<8x256xbf16, #tpu.memory_space<vmem>>, %arg8: memref<8x256xf32, #tpu.memory_space<vmem>>) attributes {dimension_semantics = [#tpu.dimension_semantics<parallel>, #tpu.dimension_semantics<parallel>, #tpu.dimension_semantics<arbitrary>], iteration_bounds = array<i64: 1, 1, 2>, scalar_prefetch = 0 : i64, scratch_operands = 1 : i64, tpu.core_type = #tpu.core_type<tc>, window_params = [{transform_indices = @transform_0, window_bounds = array<i64: 8, 512>}, {transform_indices = @transform_1, window_bounds = array<i64: 512, 256>}, {transform_indices = @transform_2, window_bounds = array<i64: 1, 256>}, {transform_indices = @transform_3, window_bounds = array<i64: 1, 256>}, {transform_indices = @transform_4, window_bounds = array<i64: 8, 256>}]} {
    %c0_i32 = arith.constant 0 : i32
    %0 = arith.cmpi eq, %arg2, %c0_i32 : i32
    %1 = arith.extui %0 : i1 to i32
    %c0_i32_0 = arith.constant 0 : i32
    %2 = arith.cmpi ne, %1, %c0_i32_0 : i32
    scf.if %2 {
      %cst_9 = arith.constant 0.000000e+00 : f32
      %12 = vector.broadcast %cst_9 : f32 to vector<8x256xf32>
      %c0_10 = arith.constant 0 : index
      %c0_11 = arith.constant 0 : index
      %13 = vector.load %arg8[%c0_10, %c0_11] : memref<8x256xf32, #tpu.memory_space<vmem>>, vector<8x256xf32>
      tpu.vector_store %arg8[%c0_10, %c0_11], %12 {strides = array<i32>} : memref<8x256xf32, #tpu.memory_space<vmem>>, vector<8x256xf32>,
    } else {
    }
    %c0 = arith.constant 0 : index
    %c0_1 = arith.constant 0 : index
    %3 = vector.load %arg8[%c0, %c0_1] : memref<8x256xf32, #tpu.memory_space<vmem>>, vector<8x256xf32>
    %c0_2 = arith.constant 0 : index
    %c0_3 = arith.constant 0 : index
    %4 = vector.load %arg3[%c0_2, %c0_3] : memref<8x512xbf16, #tpu.memory_space<vmem>>, vector<8x512xbf16>
    %c0_4 = arith.constant 0 : index
    %c0_5 = arith.constant 0 : index
    %5 = vector.load %arg4[%c0_4, %c0_5] : memref<512x256xbf16, #tpu.memory_space<vmem>>, vector<512x256xbf16>
    %cst = arith.constant dense<0.000000e+00> : vector<8x256xf32>
    %6 = tpu.matmul %4, %5, %cst {dimension_numbers = #tpu.dot_dimension_numbers<[1], [0], [0], [1], [0, 0, 1, 1], [], []>} : vector<8x512xbf16>, vector<512x256xbf16>, vector<8x256xf32> -> vector<8x256xf32>
    %7 = arith.addf %3, %6 : vector<8x256xf32>
    %c0_6 = arith.constant 0 : index
    %c0_7 = arith.constant 0 : index
    %8 = vector.load %arg8[%c0_6, %c0_7] : memref<8x256xf32, #tpu.memory_space<vmem>>, vector<8x256xf32>
    tpu.vector_store %arg8[%c0_6, %c0_7], %7 {strides = array<i32>} : memref<8x256xf32, #tpu.memory_space<vmem>>, vector<8x256xf32>,
    %c1_i32 = arith.constant 1 : i32
    %9 = arith.cmpi eq, %arg2, %c1_i32 : i32
    %10 = arith.extui %9 : i1 to i32
    %c0_i32_8 = arith.constant 0 : i32
    %11 = arith.cmpi ne, %10, %c0_i32_8 : i32
    scf.if %11 {
      %c0_9 = arith.constant 0 : index
      %c0_10 = arith.constant 0 : index
      %12 = vector.load %arg8[%c0_9, %c0_10] : memref<8x256xf32, #tpu.memory_space<vmem>>, vector<8x256xf32>
      %c0_11 = arith.constant 0 : index
      %c0_12 = arith.constant 0 : index
      %13 = vector.load %arg5[%c0_11, %c0_12] : memref<1x256xf32, #tpu.memory_space<vmem>>, vector<1x256xf32>
      %14 = vector.broadcast %13 : vector<1x256xf32> to vector<8x256xf32>
      %15 = arith.mulf %12, %14 : vector<8x256xf32>
      %c0_13 = arith.constant 0 : index
      %c0_14 = arith.constant 0 : index
      %16 = vector.load %arg6[%c0_13, %c0_14] : memref<1x256xf32, #tpu.memory_space<vmem>>, vector<1x256xf32>
      %17 = vector.broadcast %16 : vector<1x256xf32> to vector<8x256xf32>
      %18 = arith.addf %15, %17 : vector<8x256xf32>
      %cst_15 = arith.constant 0.000000e+00 : f32
      %19 = vector.broadcast %cst_15 : f32 to vector<8x256xf32>
      %20 = arith.maximumf %18, %19 : vector<8x256xf32>
      %21 = arith.truncf %20 : vector<8x256xf32> to vector<8x256xbf16>
      %c0_16 = arith.constant 0 : index
      %c0_17 = arith.constant 0 : index
      %22 = vector.load %arg7[%c0_16, %c0_17] : memref<8x256xbf16, #tpu.memory_space<vmem>>, vector<8x256xbf16>
      tpu.vector_store %arg7[%c0_16, %c0_17], %21 {strides = array<i32>} : memref<8x256xbf16, #tpu.memory_space<vmem>>, vector<8x256xbf16>,
    } else {
    }
    return
  }
  func.func @transform_0(%arg0: i32, %arg1: i32, %arg2: i32) -> (i32, i32) {
    %c0_i32 = arith.constant 0 : i32
    return %arg0, %arg2 : i32, i32
  }
  func.func @transform_1(%arg0: i32, %arg1: i32, %arg2: i32) -> (i32, i32) {
    %c0_i32 = arith.constant 0 : i32
    return %arg2, %arg1 : i32, i32
  }
  func.func @transform_2(%arg0: i32, %arg1: i32, %arg2: i32) -> (i32, i32) {
    %c0_i32 = arith.constant 0 : i32
    %c0_i32_0 = arith.constant 0 : i32
    return %c0_i32, %arg1 : i32, i32
  }
  func.func @transform_3(%arg0: i32, %arg1: i32, %arg2: i32) -> (i32, i32) {
    %c0_i32 = arith.constant 0 : i32
    %c0_i32_0 = arith.constant 0 : i32
    return %c0_i32, %arg1 : i32, i32
  }
  func.func @transform_4(%arg0: i32, %arg1: i32, %arg2: i32) -> (i32, i32) {
    %c0_i32 = arith.constant 0 : i32
    return %arg0, %arg1 : i32, i32
  }
}

module attributes {stable_mosaic.version = 11 : i64} {
  func.func @_mm_multi_kernel(%arg0: i32, %arg1: i32, %arg2: i32, %arg3: memref<8x512xbf16, #tpu.memory_space<vmem>>, %arg4: memref<512x256xbf16, #tpu.memory_space<vmem>>, %arg5: memref<1x256xf32, #tpu.memory_space<vmem>>, %arg6: memref<1x256xf32, #tpu.memory_space<vmem>>, %arg7: memref<8x256xbf16, #tpu.memory_space<vmem>>, %arg8: memref<8x256xf32, #tpu.memory_space<vmem>>) attributes {dimension_semantics = [#tpu.dimension_semantics<parallel>, #tpu.dimension_semantics<parallel>, #tpu.dimension_semantics<arbitrary>], iteration_bounds = array<i64: 1, 2, 2>, scalar_prefetch = 0 : i64, scratch_operands = 1 : i64, tpu.core_type = #tpu.core_type<tc>, window_params = [{transform_indices = @transform_0, window_bounds = array<i64: 8, 512>}, {transform_indices = @transform_1, window_bounds = array<i64: 512, 256>}, {transform_indices = @transform_2, window_bounds = array<i64: 1, 256>}, {transform_indices = @transform_3, window_bounds = array<i64: 1, 256>}, {transform_indices = @transform_4, window_bounds = array<i64: 8, 256>}]} {
    %c0_i32 = arith.constant 0 : i32
    %0 = arith.cmpi eq, %arg2, %c0_i32 : i32
    %1 = arith.extui %0 : i1 to i32
    %c0_i32_0 = arith.constant 0 : i32
    %2 = arith.cmpi ne, %1, %c0_i32_0 : i32
    scf.if %2 {
      %cst_9 = arith.constant 0.000000e+00 : f32
      %12 = vector.broadcast %cst_9 : f32 to vector<8x256xf32>
      %c0_10 = arith.constant 0 : index
      %c0_11 = arith.constant 0 : index
      %13 = vector.load %arg8[%c0_10, %c0_11] : memref<8x256xf32, #tpu.memory_space<vmem>>, vector<8x256xf32>
      tpu.vector_store %arg8[%c0_10, %c0_11], %12 {strides = array<i32>} : memref<8x256xf32, #tpu.memory_space<vmem>>, vector<8x256xf32>,
    } else {
    }
    %c0 = arith.constant 0 : index
    %c0_1 = arith.constant 0 : index
    %3 = vector.load %arg8[%c0, %c0_1] : memref<8x256xf32, #tpu.memory_space<vmem>>, vector<8x256xf32>
    %c0_2 = arith.constant 0 : index
    %c0_3 = arith.constant 0 : index
    %4 = vector.load %arg3[%c0_2, %c0_3] : memref<8x512xbf16, #tpu.memory_space<vmem>>, vector<8x512xbf16>
    %c0_4 = arith.constant 0 : index
    %c0_5 = arith.constant 0 : index
    %5 = vector.load %arg4[%c0_4, %c0_5] : memref<512x256xbf16, #tpu.memory_space<vmem>>, vector<512x256xbf16>
    %cst = arith.constant dense<0.000000e+00> : vector<8x256xf32>
    %6 = tpu.matmul %4, %5, %cst {dimension_numbers = #tpu.dot_dimension_numbers<[1], [0], [0], [1], [0, 0, 1, 1], [], []>} : vector<8x512xbf16>, vector<512x256xbf16>, vector<8x256xf32> -> vector<8x256xf32>
    %7 = arith.addf %3, %6 : vector<8x256xf32>
    %c0_6 = arith.constant 0 : index
    %c0_7 = arith.constant 0 : index
    %8 = vector.load %arg8[%c0_6, %c0_7] : memref<8x256xf32, #tpu.memory_space<vmem>>, vector<8x256xf32>
    tpu.vector_store %arg8[%c0_6, %c0_7], %7 {strides = array<i32>} : memref<8x256xf32, #tpu.memory_space<vmem>>, vector<8x256xf32>,
    %c1_i32 = arith.constant 1 : i32
    %9 = arith.cmpi eq, %arg2, %c1_i32 : i32
    %10 = arith.extui %9 : i1 to i32
    %c0_i32_8 = arith.constant 0 : i32
    %11 = arith.cmpi ne, %10, %c0_i32_8 : i32
    scf.if %11 {
      %c0_9 = arith.constant 0 : index
      %c0_10 = arith.constant 0 : index
      %12 = vector.load %arg8[%c0_9, %c0_10] : memref<8x256xf32, #tpu.memory_space<vmem>>, vector<8x256xf32>
      %c0_11 = arith.constant 0 : index
      %c0_12 = arith.constant 0 : index
      %13 = vector.load %arg5[%c0_11, %c0_12] : memref<1x256xf32, #tpu.memory_space<vmem>>, vector<1x256xf32>
      %14 = vector.broadcast %13 : vector<1x256xf32> to vector<8x256xf32>
      %15 = arith.mulf %12, %14 : vector<8x256xf32>
      %c0_13 = arith.constant 0 : index
      %c0_14 = arith.constant 0 : index
      %16 = vector.load %arg6[%c0_13, %c0_14] : memref<1x256xf32, #tpu.memory_space<vmem>>, vector<1x256xf32>
      %17 = vector.broadcast %16 : vector<1x256xf32> to vector<8x256xf32>
      %18 = arith.addf %15, %17 : vector<8x256xf32>
      %cst_15 = arith.constant 0.000000e+00 : f32
      %19 = vector.broadcast %cst_15 : f32 to vector<8x256xf32>
      %20 = arith.maximumf %18, %19 : vector<8x256xf32>
      %21 = arith.truncf %20 : vector<8x256xf32> to vector<8x256xbf16>
      %c0_16 = arith.constant 0 : index
      %c0_17 = arith.constant 0 : index
      %22 = vector.load %arg7[%c0_16, %c0_17] : memref<8x256xbf16, #tpu.memory_space<vmem>>, vector<8x256xbf16>
      tpu.vector_store %arg7[%c0_16, %c0_17], %21 {strides = array<i32>} : memref<8x256xbf16, #tpu.memory_space<vmem>>, vector<8x256xbf16>,
    } else {
    }
    return
  }
  func.func @transform_0(%arg0: i32, %arg1: i32, %arg2: i32) -> (i32, i32) {
    %c0_i32 = arith.constant 0 : i32
    return %arg0, %arg2 : i32, i32
  }
  func.func @transform_1(%arg0: i32, %arg1: i32, %arg2: i32) -> (i32, i32) {
    %c0_i32 = arith.constant 0 : i32
    return %arg2, %arg1 : i32, i32
  }
  func.func @transform_2(%arg0: i32, %arg1: i32, %arg2: i32) -> (i32, i32) {
    %c0_i32 = arith.constant 0 : i32
    %c0_i32_0 = arith.constant 0 : i32
    return %c0_i32, %arg1 : i32, i32
  }
  func.func @transform_3(%arg0: i32, %arg1: i32, %arg2: i32) -> (i32, i32) {
    %c0_i32 = arith.constant 0 : i32
    %c0_i32_0 = arith.constant 0 : i32
    return %c0_i32, %arg1 : i32, i32
  }
  func.func @transform_4(%arg0: i32, %arg1: i32, %arg2: i32) -> (i32, i32) {
    %c0_i32 = arith.constant 0 : i32
    return %arg0, %arg1 : i32, i32
  }
}

module attributes {stable_mosaic.version = 11 : i64} {
  func.func @_mm_multi_kernel(%arg0: i32, %arg1: i32, %arg2: i32, %arg3: memref<8x512xbf16, #tpu.memory_space<vmem>>, %arg4: memref<512x256xbf16, #tpu.memory_space<vmem>>, %arg5: memref<1x256xf32, #tpu.memory_space<vmem>>, %arg6: memref<1x256xf32, #tpu.memory_space<vmem>>, %arg7: memref<8x256xbf16, #tpu.memory_space<vmem>>, %arg8: memref<8x256xf32, #tpu.memory_space<vmem>>) attributes {dimension_semantics = [#tpu.dimension_semantics<parallel>, #tpu.dimension_semantics<parallel>, #tpu.dimension_semantics<arbitrary>], iteration_bounds = array<i64: 1, 2, 9>, scalar_prefetch = 0 : i64, scratch_operands = 1 : i64, tpu.core_type = #tpu.core_type<tc>, window_params = [{transform_indices = @transform_0, window_bounds = array<i64: 8, 512>}, {transform_indices = @transform_1, window_bounds = array<i64: 512, 256>}, {transform_indices = @transform_2, window_bounds = array<i64: 1, 256>}, {transform_indices = @transform_3, window_bounds = array<i64: 1, 256>}, {transform_indices = @transform_4, window_bounds = array<i64: 8, 256>}]} {
    %c0_i32 = arith.constant 0 : i32
    %0 = arith.cmpi eq, %arg2, %c0_i32 : i32
    %1 = arith.extui %0 : i1 to i32
    %c0_i32_0 = arith.constant 0 : i32
    %2 = arith.cmpi ne, %1, %c0_i32_0 : i32
    scf.if %2 {
      %cst_9 = arith.constant 0.000000e+00 : f32
      %12 = vector.broadcast %cst_9 : f32 to vector<8x256xf32>
      %c0_10 = arith.constant 0 : index
      %c0_11 = arith.constant 0 : index
      %13 = vector.load %arg8[%c0_10, %c0_11] : memref<8x256xf32, #tpu.memory_space<vmem>>, vector<8x256xf32>
      tpu.vector_store %arg8[%c0_10, %c0_11], %12 {strides = array<i32>} : memref<8x256xf32, #tpu.memory_space<vmem>>, vector<8x256xf32>,
    } else {
    }
    %c0 = arith.constant 0 : index
    %c0_1 = arith.constant 0 : index
    %3 = vector.load %arg8[%c0, %c0_1] : memref<8x256xf32, #tpu.memory_space<vmem>>, vector<8x256xf32>
    %c0_2 = arith.constant 0 : index
    %c0_3 = arith.constant 0 : index
    %4 = vector.load %arg3[%c0_2, %c0_3] : memref<8x512xbf16, #tpu.memory_space<vmem>>, vector<8x512xbf16>
    %c0_4 = arith.constant 0 : index
    %c0_5 = arith.constant 0 : index
    %5 = vector.load %arg4[%c0_4, %c0_5] : memref<512x256xbf16, #tpu.memory_space<vmem>>, vector<512x256xbf16>
    %cst = arith.constant dense<0.000000e+00> : vector<8x256xf32>
    %6 = tpu.matmul %4, %5, %cst {dimension_numbers = #tpu.dot_dimension_numbers<[1], [0], [0], [1], [0, 0, 1, 1], [], []>} : vector<8x512xbf16>, vector<512x256xbf16>, vector<8x256xf32> -> vector<8x256xf32>
    %7 = arith.addf %3, %6 : vector<8x256xf32>
    %c0_6 = arith.constant 0 : index
    %c0_7 = arith.constant 0 : index
    %8 = vector.load %arg8[%c0_6, %c0_7] : memref<8x256xf32, #tpu.memory_space<vmem>>, vector<8x256xf32>
    tpu.vector_store %arg8[%c0_6, %c0_7], %7 {strides = array<i32>} : memref<8x256xf32, #tpu.memory_space<vmem>>, vector<8x256xf32>,
    %c8_i32 = arith.constant 8 : i32
    %9 = arith.cmpi eq, %arg2, %c8_i32 : i32
    %10 = arith.extui %9 : i1 to i32
    %c0_i32_8 = arith.constant 0 : i32
    %11 = arith.cmpi ne, %10, %c0_i32_8 : i32
    scf.if %11 {
      %c0_9 = arith.constant 0 : index
      %c0_10 = arith.constant 0 : index
      %12 = vector.load %arg8[%c0_9, %c0_10] : memref<8x256xf32, #tpu.memory_space<vmem>>, vector<8x256xf32>
      %c0_11 = arith.constant 0 : index
      %c0_12 = arith.constant 0 : index
      %13 = vector.load %arg5[%c0_11, %c0_12] : memref<1x256xf32, #tpu.memory_space<vmem>>, vector<1x256xf32>
      %14 = vector.broadcast %13 : vector<1x256xf32> to vector<8x256xf32>
      %15 = arith.mulf %12, %14 : vector<8x256xf32>
      %c0_13 = arith.constant 0 : index
      %c0_14 = arith.constant 0 : index
      %16 = vector.load %arg6[%c0_13, %c0_14] : memref<1x256xf32, #tpu.memory_space<vmem>>, vector<1x256xf32>
      %17 = vector.broadcast %16 : vector<1x256xf32> to vector<8x256xf32>
      %18 = arith.addf %15, %17 : vector<8x256xf32>
      %cst_15 = arith.constant 0.000000e+00 : f32
      %19 = vector.broadcast %cst_15 : f32 to vector<8x256xf32>
      %20 = arith.maximumf %18, %19 : vector<8x256xf32>
      %21 = arith.truncf %20 : vector<8x256xf32> to vector<8x256xbf16>
      %c0_16 = arith.constant 0 : index
      %c0_17 = arith.constant 0 : index
      %22 = vector.load %arg7[%c0_16, %c0_17] : memref<8x256xbf16, #tpu.memory_space<vmem>>, vector<8x256xbf16>
      tpu.vector_store %arg7[%c0_16, %c0_17], %21 {strides = array<i32>} : memref<8x256xbf16, #tpu.memory_space<vmem>>, vector<8x256xbf16>,
    } else {
    }
    return
  }
  func.func @transform_0(%arg0: i32, %arg1: i32, %arg2: i32) -> (i32, i32) {
    %c0_i32 = arith.constant 0 : i32
    return %arg0, %arg2 : i32, i32
  }
  func.func @transform_1(%arg0: i32, %arg1: i32, %arg2: i32) -> (i32, i32) {
    %c0_i32 = arith.constant 0 : i32
    return %arg2, %arg1 : i32, i32
  }
  func.func @transform_2(%arg0: i32, %arg1: i32, %arg2: i32) -> (i32, i32) {
    %c0_i32 = arith.constant 0 : i32
    %c0_i32_0 = arith.constant 0 : i32
    return %c0_i32, %arg1 : i32, i32
  }
  func.func @transform_3(%arg0: i32, %arg1: i32, %arg2: i32) -> (i32, i32) {
    %c0_i32 = arith.constant 0 : i32
    %c0_i32_0 = arith.constant 0 : i32
    return %c0_i32, %arg1 : i32, i32
  }
  func.func @transform_4(%arg0: i32, %arg1: i32, %arg2: i32) -> (i32, i32) {
    %c0_i32 = arith.constant 0 : i32
    return %arg0, %arg1 : i32, i32
  }
}

module attributes {stable_mosaic.version = 11 : i64} {
  func.func @_mm_multi_kernel(%arg0: i32, %arg1: i32, %arg2: i32, %arg3: memref<8x512xbf16, #tpu.memory_space<vmem>>, %arg4: memref<512x256xbf16, #tpu.memory_space<vmem>>, %arg5: memref<1x256xf32, #tpu.memory_space<vmem>>, %arg6: memref<1x256xf32, #tpu.memory_space<vmem>>, %arg7: memref<8x256xbf16, #tpu.memory_space<vmem>>, %arg8: memref<8x256xf32, #tpu.memory_space<vmem>>) attributes {dimension_semantics = [#tpu.dimension_semantics<parallel>, #tpu.dimension_semantics<parallel>, #tpu.dimension_semantics<arbitrary>], iteration_bounds = array<i64: 1, 8, 2>, scalar_prefetch = 0 : i64, scratch_operands = 1 : i64, tpu.core_type = #tpu.core_type<tc>, window_params = [{transform_indices = @transform_0, window_bounds = array<i64: 8, 512>}, {transform_indices = @transform_1, window_bounds = array<i64: 512, 256>}, {transform_indices = @transform_2, window_bounds = array<i64: 1, 256>}, {transform_indices = @transform_3, window_bounds = array<i64: 1, 256>}, {transform_indices = @transform_4, window_bounds = array<i64: 8, 256>}]} {
    %c0_i32 = arith.constant 0 : i32
    %0 = arith.cmpi eq, %arg2, %c0_i32 : i32
    %1 = arith.extui %0 : i1 to i32
    %c0_i32_0 = arith.constant 0 : i32
    %2 = arith.cmpi ne, %1, %c0_i32_0 : i32
    scf.if %2 {
      %cst_9 = arith.constant 0.000000e+00 : f32
      %12 = vector.broadcast %cst_9 : f32 to vector<8x256xf32>
      %c0_10 = arith.constant 0 : index
      %c0_11 = arith.constant 0 : index
      %13 = vector.load %arg8[%c0_10, %c0_11] : memref<8x256xf32, #tpu.memory_space<vmem>>, vector<8x256xf32>
      tpu.vector_store %arg8[%c0_10, %c0_11], %12 {strides = array<i32>} : memref<8x256xf32, #tpu.memory_space<vmem>>, vector<8x256xf32>,
    } else {
    }
    %c0 = arith.constant 0 : index
    %c0_1 = arith.constant 0 : index
    %3 = vector.load %arg8[%c0, %c0_1] : memref<8x256xf32, #tpu.memory_space<vmem>>, vector<8x256xf32>
    %c0_2 = arith.constant 0 : index
    %c0_3 = arith.constant 0 : index
    %4 = vector.load %arg3[%c0_2, %c0_3] : memref<8x512xbf16, #tpu.memory_space<vmem>>, vector<8x512xbf16>
    %c0_4 = arith.constant 0 : index
    %c0_5 = arith.constant 0 : index
    %5 = vector.load %arg4[%c0_4, %c0_5] : memref<512x256xbf16, #tpu.memory_space<vmem>>, vector<512x256xbf16>
    %cst = arith.constant dense<0.000000e+00> : vector<8x256xf32>
    %6 = tpu.matmul %4, %5, %cst {dimension_numbers = #tpu.dot_dimension_numbers<[1], [0], [0], [1], [0, 0, 1, 1], [], []>} : vector<8x512xbf16>, vector<512x256xbf16>, vector<8x256xf32> -> vector<8x256xf32>
    %7 = arith.addf %3, %6 : vector<8x256xf32>
    %c0_6 = arith.constant 0 : index
    %c0_7 = arith.constant 0 : index
    %8 = vector.load %arg8[%c0_6, %c0_7] : memref<8x256xf32, #tpu.memory_space<vmem>>, vector<8x256xf32>
    tpu.vector_store %arg8[%c0_6, %c0_7], %7 {strides = array<i32>} : memref<8x256xf32, #tpu.memory_space<vmem>>, vector<8x256xf32>,
    %c1_i32 = arith.constant 1 : i32
    %9 = arith.cmpi eq, %arg2, %c1_i32 : i32
    %10 = arith.extui %9 : i1 to i32
    %c0_i32_8 = arith.constant 0 : i32
    %11 = arith.cmpi ne, %10, %c0_i32_8 : i32
    scf.if %11 {
      %c0_9 = arith.constant 0 : index
      %c0_10 = arith.constant 0 : index
      %12 = vector.load %arg8[%c0_9, %c0_10] : memref<8x256xf32, #tpu.memory_space<vmem>>, vector<8x256xf32>
      %c0_11 = arith.constant 0 : index
      %c0_12 = arith.constant 0 : index
      %13 = vector.load %arg5[%c0_11, %c0_12] : memref<1x256xf32, #tpu.memory_space<vmem>>, vector<1x256xf32>
      %14 = vector.broadcast %13 : vector<1x256xf32> to vector<8x256xf32>
      %15 = arith.mulf %12, %14 : vector<8x256xf32>
      %c0_13 = arith.constant 0 : index
      %c0_14 = arith.constant 0 : index
      %16 = vector.load %arg6[%c0_13, %c0_14] : memref<1x256xf32, #tpu.memory_space<vmem>>, vector<1x256xf32>
      %17 = vector.broadcast %16 : vector<1x256xf32> to vector<8x256xf32>
      %18 = arith.addf %15, %17 : vector<8x256xf32>
      %19 = arith.truncf %18 : vector<8x256xf32> to vector<8x256xbf16>
      %c0_15 = arith.constant 0 : index
      %c0_16 = arith.constant 0 : index
      %20 = vector.load %arg7[%c0_15, %c0_16] : memref<8x256xbf16, #tpu.memory_space<vmem>>, vector<8x256xbf16>
      tpu.vector_store %arg7[%c0_15, %c0_16], %19 {strides = array<i32>} : memref<8x256xbf16, #tpu.memory_space<vmem>>, vector<8x256xbf16>,
    } else {
    }
    return
  }
  func.func @transform_0(%arg0: i32, %arg1: i32, %arg2: i32) -> (i32, i32) {
    %c0_i32 = arith.constant 0 : i32
    return %arg0, %arg2 : i32, i32
  }
  func.func @transform_1(%arg0: i32, %arg1: i32, %arg2: i32) -> (i32, i32) {
    %c0_i32 = arith.constant 0 : i32
    return %arg2, %arg1 : i32, i32
  }
  func.func @transform_2(%arg0: i32, %arg1: i32, %arg2: i32) -> (i32, i32) {
    %c0_i32 = arith.constant 0 : i32
    %c0_i32_0 = arith.constant 0 : i32
    return %c0_i32, %arg1 : i32, i32
  }
  func.func @transform_3(%arg0: i32, %arg1: i32, %arg2: i32) -> (i32, i32) {
    %c0_i32 = arith.constant 0 : i32
    %c0_i32_0 = arith.constant 0 : i32
    return %c0_i32, %arg1 : i32, i32
  }
  func.func @transform_4(%arg0: i32, %arg1: i32, %arg2: i32) -> (i32, i32) {
    %c0_i32 = arith.constant 0 : i32
    return %arg0, %arg1 : i32, i32
  }
}

module attributes {stable_mosaic.version = 11 : i64} {
  func.func @_mm_single_kernel(%arg0: i32, %arg1: i32, %arg2: memref<8x512xbf16, #tpu.memory_space<vmem>>, %arg3: memref<512x256xbf16, #tpu.memory_space<vmem>>, %arg4: memref<1x256xf32, #tpu.memory_space<vmem>>, %arg5: memref<1x256xf32, #tpu.memory_space<vmem>>, %arg6: memref<8x256xbf16, #tpu.memory_space<vmem>>, %arg7: memref<8x256xbf16, #tpu.memory_space<vmem>>) attributes {dimension_semantics = [#tpu.dimension_semantics<parallel>, #tpu.dimension_semantics<parallel>], iteration_bounds = array<i64: 1, 8>, scalar_prefetch = 0 : i64, scratch_operands = 0 : i64, tpu.core_type = #tpu.core_type<tc>, window_params = [{transform_indices = @transform_0, window_bounds = array<i64: 8, 512>}, {transform_indices = @transform_1, window_bounds = array<i64: 512, 256>}, {transform_indices = @transform_2, window_bounds = array<i64: 1, 256>}, {transform_indices = @transform_3, window_bounds = array<i64: 1, 256>}, {transform_indices = @transform_4, window_bounds = array<i64: 8, 256>}, {transform_indices = @transform_5, window_bounds = array<i64: 8, 256>}]} {
    %c0 = arith.constant 0 : index
    %c0_0 = arith.constant 0 : index
    %0 = vector.load %arg2[%c0, %c0_0] : memref<8x512xbf16, #tpu.memory_space<vmem>>, vector<8x512xbf16>
    %c0_1 = arith.constant 0 : index
    %c0_2 = arith.constant 0 : index
    %1 = vector.load %arg3[%c0_1, %c0_2] : memref<512x256xbf16, #tpu.memory_space<vmem>>, vector<512x256xbf16>
    %cst = arith.constant dense<0.000000e+00> : vector<8x256xf32>
    %2 = tpu.matmul %0, %1, %cst {dimension_numbers = #tpu.dot_dimension_numbers<[1], [0], [0], [1], [0, 0, 1, 1], [], []>} : vector<8x512xbf16>, vector<512x256xbf16>, vector<8x256xf32> -> vector<8x256xf32>
    %c0_3 = arith.constant 0 : index
    %c0_4 = arith.constant 0 : index
    %3 = vector.load %arg4[%c0_3, %c0_4] : memref<1x256xf32, #tpu.memory_space<vmem>>, vector<1x256xf32>
    %4 = vector.broadcast %3 : vector<1x256xf32> to vector<8x256xf32>
    %5 = arith.mulf %2, %4 : vector<8x256xf32>
    %c0_5 = arith.constant 0 : index
    %c0_6 = arith.constant 0 : index
    %6 = vector.load %arg5[%c0_5, %c0_6] : memref<1x256xf32, #tpu.memory_space<vmem>>, vector<1x256xf32>
    %7 = vector.broadcast %6 : vector<1x256xf32> to vector<8x256xf32>
    %8 = arith.addf %5, %7 : vector<8x256xf32>
    %c0_7 = arith.constant 0 : index
    %c0_8 = arith.constant 0 : index
    %9 = vector.load %arg6[%c0_7, %c0_8] : memref<8x256xbf16, #tpu.memory_space<vmem>>, vector<8x256xbf16>
    %10 = arith.extf %9 : vector<8x256xbf16> to vector<8x256xf32>
    %11 = arith.addf %8, %10 : vector<8x256xf32>
    %cst_9 = arith.constant 0.000000e+00 : f32
    %12 = vector.broadcast %cst_9 : f32 to vector<8x256xf32>
    %13 = arith.maximumf %11, %12 : vector<8x256xf32>
    %14 = arith.truncf %13 : vector<8x256xf32> to vector<8x256xbf16>
    %c0_10 = arith.constant 0 : index
    %c0_11 = arith.constant 0 : index
    %15 = vector.load %arg7[%c0_10, %c0_11] : memref<8x256xbf16, #tpu.memory_space<vmem>>, vector<8x256xbf16>
    tpu.vector_store %arg7[%c0_10, %c0_11], %14 {strides = array<i32>} : memref<8x256xbf16, #tpu.memory_space<vmem>>, vector<8x256xbf16>,
    return
  }
  func.func @transform_0(%arg0: i32, %arg1: i32) -> (i32, i32) {
    %c0_i32 = arith.constant 0 : i32
    %c0_i32_0 = arith.constant 0 : i32
    return %arg0, %c0_i32 : i32, i32
  }
  func.func @transform_1(%arg0: i32, %arg1: i32) -> (i32, i32) {
    %c0_i32 = arith.constant 0 : i32
    %c0_i32_0 = arith.constant 0 : i32
    return %c0_i32, %arg1 : i32, i32
  }
  func.func @transform_2(%arg0: i32, %arg1: i32) -> (i32, i32) {
    %c0_i32 = arith.constant 0 : i32
    %c0_i32_0 = arith.constant 0 : i32
    return %c0_i32, %arg1 : i32, i32
  }
  func.func @transform_3(%arg0: i32, %arg1: i32) -> (i32, i32) {
    %c0_i32 = arith.constant 0 : i32
    %c0_i32_0 = arith.constant 0 : i32
    return %c0_i32, %arg1 : i32, i32
  }
  func.func @transform_4(%arg0: i32, %arg1: i32) -> (i32, i32) {
    %c0_i32 = arith.constant 0 : i32
    return %arg0, %arg1 : i32, i32
  }
  func.func @transform_5(%arg0: i32, %arg1: i32) -> (i32, i32) {
    %c0_i32 = arith.constant 0 : i32
    return %arg0, %arg1 : i32, i32
  }
}

module attributes {stable_mosaic.version = 11 : i64} {
  func.func @_mm_multi_kernel(%arg0: i32, %arg1: i32, %arg2: i32, %arg3: memref<8x512xbf16, #tpu.memory_space<vmem>>, %arg4: memref<512x256xbf16, #tpu.memory_space<vmem>>, %arg5: memref<1x256xf32, #tpu.memory_space<vmem>>, %arg6: memref<1x256xf32, #tpu.memory_space<vmem>>, %arg7: memref<8x256xbf16, #tpu.memory_space<vmem>>, %arg8: memref<8x256xf32, #tpu.memory_space<vmem>>) attributes {dimension_semantics = [#tpu.dimension_semantics<parallel>, #tpu.dimension_semantics<parallel>, #tpu.dimension_semantics<arbitrary>], iteration_bounds = array<i64: 1, 2, 4>, scalar_prefetch = 0 : i64, scratch_operands = 1 : i64, tpu.core_type = #tpu.core_type<tc>, window_params = [{transform_indices = @transform_0, window_bounds = array<i64: 8, 512>}, {transform_indices = @transform_1, window_bounds = array<i64: 512, 256>}, {transform_indices = @transform_2, window_bounds = array<i64: 1, 256>}, {transform_indices = @transform_3, window_bounds = array<i64: 1, 256>}, {transform_indices = @transform_4, window_bounds = array<i64: 8, 256>}]} {
    %c0_i32 = arith.constant 0 : i32
    %0 = arith.cmpi eq, %arg2, %c0_i32 : i32
    %1 = arith.extui %0 : i1 to i32
    %c0_i32_0 = arith.constant 0 : i32
    %2 = arith.cmpi ne, %1, %c0_i32_0 : i32
    scf.if %2 {
      %cst_9 = arith.constant 0.000000e+00 : f32
      %12 = vector.broadcast %cst_9 : f32 to vector<8x256xf32>
      %c0_10 = arith.constant 0 : index
      %c0_11 = arith.constant 0 : index
      %13 = vector.load %arg8[%c0_10, %c0_11] : memref<8x256xf32, #tpu.memory_space<vmem>>, vector<8x256xf32>
      tpu.vector_store %arg8[%c0_10, %c0_11], %12 {strides = array<i32>} : memref<8x256xf32, #tpu.memory_space<vmem>>, vector<8x256xf32>,
    } else {
    }
    %c0 = arith.constant 0 : index
    %c0_1 = arith.constant 0 : index
    %3 = vector.load %arg8[%c0, %c0_1] : memref<8x256xf32, #tpu.memory_space<vmem>>, vector<8x256xf32>
    %c0_2 = arith.constant 0 : index
    %c0_3 = arith.constant 0 : index
    %4 = vector.load %arg3[%c0_2, %c0_3] : memref<8x512xbf16, #tpu.memory_space<vmem>>, vector<8x512xbf16>
    %c0_4 = arith.constant 0 : index
    %c0_5 = arith.constant 0 : index
    %5 = vector.load %arg4[%c0_4, %c0_5] : memref<512x256xbf16, #tpu.memory_space<vmem>>, vector<512x256xbf16>
    %cst = arith.constant dense<0.000000e+00> : vector<8x256xf32>
    %6 = tpu.matmul %4, %5, %cst {dimension_numbers = #tpu.dot_dimension_numbers<[1], [0], [0], [1], [0, 0, 1, 1], [], []>} : vector<8x512xbf16>, vector<512x256xbf16>, vector<8x256xf32> -> vector<8x256xf32>
    %7 = arith.addf %3, %6 : vector<8x256xf32>
    %c0_6 = arith.constant 0 : index
    %c0_7 = arith.constant 0 : index
    %8 = vector.load %arg8[%c0_6, %c0_7] : memref<8x256xf32, #tpu.memory_space<vmem>>, vector<8x256xf32>
    tpu.vector_store %arg8[%c0_6, %c0_7], %7 {strides = array<i32>} : memref<8x256xf32, #tpu.memory_space<vmem>>, vector<8x256xf32>,
    %c3_i32 = arith.constant 3 : i32
    %9 = arith.cmpi eq, %arg2, %c3_i32 : i32
    %10 = arith.extui %9 : i1 to i32
    %c0_i32_8 = arith.constant 0 : i32
    %11 = arith.cmpi ne, %10, %c0_i32_8 : i32
    scf.if %11 {
      %c0_9 = arith.constant 0 : index
      %c0_10 = arith.constant 0 : index
      %12 = vector.load %arg8[%c0_9, %c0_10] : memref<8x256xf32, #tpu.memory_space<vmem>>, vector<8x256xf32>
      %c0_11 = arith.constant 0 : index
      %c0_12 = arith.constant 0 : index
      %13 = vector.load %arg5[%c0_11, %c0_12] : memref<1x256xf32, #tpu.memory_space<vmem>>, vector<1x256xf32>
      %14 = vector.broadcast %13 : vector<1x256xf32> to vector<8x256xf32>
      %15 = arith.mulf %12, %14 : vector<8x256xf32>
      %c0_13 = arith.constant 0 : index
      %c0_14 = arith.constant 0 : index
      %16 = vector.load %arg6[%c0_13, %c0_14] : memref<1x256xf32, #tpu.memory_space<vmem>>, vector<1x256xf32>
      %17 = vector.broadcast %16 : vector<1x256xf32> to vector<8x256xf32>
      %18 = arith.addf %15, %17 : vector<8x256xf32>
      %cst_15 = arith.constant 0.000000e+00 : f32
      %19 = vector.broadcast %cst_15 : f32 to vector<8x256xf32>
      %20 = arith.maximumf %18, %19 : vector<8x256xf32>
      %21 = arith.truncf %20 : vector<8x256xf32> to vector<8x256xbf16>
      %c0_16 = arith.constant 0 : index
      %c0_17 = arith.constant 0 : index
      %22 = vector.load %arg7[%c0_16, %c0_17] : memref<8x256xbf16, #tpu.memory_space<vmem>>, vector<8x256xbf16>
      tpu.vector_store %arg7[%c0_16, %c0_17], %21 {strides = array<i32>} : memref<8x256xbf16, #tpu.memory_space<vmem>>, vector<8x256xbf16>,
    } else {
    }
    return
  }
  func.func @transform_0(%arg0: i32, %arg1: i32, %arg2: i32) -> (i32, i32) {
    %c0_i32 = arith.constant 0 : i32
    return %arg0, %arg2 : i32, i32
  }
  func.func @transform_1(%arg0: i32, %arg1: i32, %arg2: i32) -> (i32, i32) {
    %c0_i32 = arith.constant 0 : i32
    return %arg2, %arg1 : i32, i32
  }
  func.func @transform_2(%arg0: i32, %arg1: i32, %arg2: i32) -> (i32, i32) {
    %c0_i32 = arith.constant 0 : i32
    %c0_i32_0 = arith.constant 0 : i32
    return %c0_i32, %arg1 : i32, i32
  }
  func.func @transform_3(%arg0: i32, %arg1: i32, %arg2: i32) -> (i32, i32) {
    %c0_i32 = arith.constant 0 : i32
    %c0_i32_0 = arith.constant 0 : i32
    return %c0_i32, %arg1 : i32, i32
  }
  func.func @transform_4(%arg0: i32, %arg1: i32, %arg2: i32) -> (i32, i32) {
    %c0_i32 = arith.constant 0 : i32
    return %arg0, %arg1 : i32, i32
  }
}

module attributes {stable_mosaic.version = 11 : i64} {
  func.func @_mean_reduce_kernel(%arg0: memref<2x1x2048xbf16, #tpu.memory_space<vmem>>, %arg1: memref<2x2048xf32, #tpu.memory_space<vmem>>) attributes {dimension_semantics = [], scalar_prefetch = 0 : i64, scratch_operands = 0 : i64, tpu.core_type = #tpu.core_type<tc>} {
    %c0 = arith.constant 0 : index
    %c0_0 = arith.constant 0 : index
    %c0_1 = arith.constant 0 : index
    %0 = vector.load %arg0[%c0, %c0_0, %c0_1] : memref<2x1x2048xbf16, #tpu.memory_space<vmem>>, vector<2x1x2048xbf16>
    %1 = arith.extf %0 : vector<2x1x2048xbf16> to vector<2x1x2048xf32>
    %cst = arith.constant dense<0.000000e+00> : vector<2x2048xf32>
    %2 = vector.multi_reduction <add>, %1, %cst [1] : vector<2x1x2048xf32> to vector<2x2048xf32>
    %cst_2 = arith.constant 1.000000e+00 : f32
    %3 = vector.broadcast %cst_2 : f32 to vector<2x2048xf32>
    %4 = arith.divf %2, %3 : vector<2x2048xf32>
    %c0_3 = arith.constant 0 : index
    %c0_4 = arith.constant 0 : index
    %5 = vector.load %arg1[%c0_3, %c0_4] : memref<2x2048xf32, #tpu.memory_space<vmem>>, vector<2x2048xf32>
    tpu.vector_store %arg1[%c0_3, %c0_4], %4 {strides = array<i32>} : memref<2x2048xf32, #tpu.memory_space<vmem>>, vector<2x2048xf32>,
    return
  }
}

module attributes {stable_mosaic.version = 11 : i64} {
  func.func @_mm_multi_kernel(%arg0: i32, %arg1: i32, %arg2: i32, %arg3: memref<8x512xbf16, #tpu.memory_space<vmem>>, %arg4: memref<512x128xbf16, #tpu.memory_space<vmem>>, %arg5: memref<1x128xf32, #tpu.memory_space<vmem>>, %arg6: memref<1x128xf32, #tpu.memory_space<vmem>>, %arg7: memref<8x128xf32, #tpu.memory_space<vmem>>, %arg8: memref<8x128xf32, #tpu.memory_space<vmem>>) attributes {dimension_semantics = [#tpu.dimension_semantics<parallel>, #tpu.dimension_semantics<parallel>, #tpu.dimension_semantics<arbitrary>], iteration_bounds = array<i64: 1, 1, 4>, scalar_prefetch = 0 : i64, scratch_operands = 1 : i64, tpu.core_type = #tpu.core_type<tc>, window_params = [{transform_indices = @transform_0, window_bounds = array<i64: 8, 512>}, {transform_indices = @transform_1, window_bounds = array<i64: 512, 128>}, {transform_indices = @transform_2, window_bounds = array<i64: 1, 128>}, {transform_indices = @transform_3, window_bounds = array<i64: 1, 128>}, {transform_indices = @transform_4, window_bounds = array<i64: 8, 128>}]} {
    %c0_i32 = arith.constant 0 : i32
    %0 = arith.cmpi eq, %arg2, %c0_i32 : i32
    %1 = arith.extui %0 : i1 to i32
    %c0_i32_0 = arith.constant 0 : i32
    %2 = arith.cmpi ne, %1, %c0_i32_0 : i32
    scf.if %2 {
      %cst_9 = arith.constant 0.000000e+00 : f32
      %12 = vector.broadcast %cst_9 : f32 to vector<8x128xf32>
      %c0_10 = arith.constant 0 : index
      %c0_11 = arith.constant 0 : index
      %13 = vector.load %arg8[%c0_10, %c0_11] : memref<8x128xf32, #tpu.memory_space<vmem>>, vector<8x128xf32>
      tpu.vector_store %arg8[%c0_10, %c0_11], %12 {strides = array<i32>} : memref<8x128xf32, #tpu.memory_space<vmem>>, vector<8x128xf32>,
    } else {
    }
    %c0 = arith.constant 0 : index
    %c0_1 = arith.constant 0 : index
    %3 = vector.load %arg8[%c0, %c0_1] : memref<8x128xf32, #tpu.memory_space<vmem>>, vector<8x128xf32>
    %c0_2 = arith.constant 0 : index
    %c0_3 = arith.constant 0 : index
    %4 = vector.load %arg3[%c0_2, %c0_3] : memref<8x512xbf16, #tpu.memory_space<vmem>>, vector<8x512xbf16>
    %c0_4 = arith.constant 0 : index
    %c0_5 = arith.constant 0 : index
    %5 = vector.load %arg4[%c0_4, %c0_5] : memref<512x128xbf16, #tpu.memory_space<vmem>>, vector<512x128xbf16>
    %cst = arith.constant dense<0.000000e+00> : vector<8x128xf32>
    %6 = tpu.matmul %4, %5, %cst {dimension_numbers = #tpu.dot_dimension_numbers<[1], [0], [0], [1], [0, 0, 1, 1], [], []>} : vector<8x512xbf16>, vector<512x128xbf16>, vector<8x128xf32> -> vector<8x128xf32>
    %7 = arith.addf %3, %6 : vector<8x128xf32>
    %c0_6 = arith.constant 0 : index
    %c0_7 = arith.constant 0 : index
    %8 = vector.load %arg8[%c0_6, %c0_7] : memref<8x128xf32, #tpu.memory_space<vmem>>, vector<8x128xf32>
    tpu.vector_store %arg8[%c0_6, %c0_7], %7 {strides = array<i32>} : memref<8x128xf32, #tpu.memory_space<vmem>>, vector<8x128xf32>,
    %c3_i32 = arith.constant 3 : i32
    %9 = arith.cmpi eq, %arg2, %c3_i32 : i32
    %10 = arith.extui %9 : i1 to i32
    %c0_i32_8 = arith.constant 0 : i32
    %11 = arith.cmpi ne, %10, %c0_i32_8 : i32
    scf.if %11 {
      %c0_9 = arith.constant 0 : index
      %c0_10 = arith.constant 0 : index
      %12 = vector.load %arg8[%c0_9, %c0_10] : memref<8x128xf32, #tpu.memory_space<vmem>>, vector<8x128xf32>
      %c0_11 = arith.constant 0 : index
      %c0_12 = arith.constant 0 : index
      %13 = vector.load %arg5[%c0_11, %c0_12] : memref<1x128xf32, #tpu.memory_space<vmem>>, vector<1x128xf32>
      %14 = vector.broadcast %13 : vector<1x128xf32> to vector<8x128xf32>
      %15 = arith.mulf %12, %14 : vector<8x128xf32>
      %c0_13 = arith.constant 0 : index
      %c0_14 = arith.constant 0 : index
      %16 = vector.load %arg6[%c0_13, %c0_14] : memref<1x128xf32, #tpu.memory_space<vmem>>, vector<1x128xf32>
      %17 = vector.broadcast %16 : vector<1x128xf32> to vector<8x128xf32>
      %18 = arith.addf %15, %17 : vector<8x128xf32>
      %19 = arith.negf %18 : vector<8x128xf32>
      %20 = math.exp %19 : vector<8x128xf32>
      %cst_15 = arith.constant 1.000000e+00 : f32
      %21 = vector.broadcast %cst_15 : f32 to vector<8x128xf32>
      %22 = arith.addf %21, %20 : vector<8x128xf32>
      %23 = arith.divf %21, %22 : vector<8x128xf32>
      %c0_16 = arith.constant 0 : index
      %c0_17 = arith.constant 0 : index
      %24 = vector.load %arg7[%c0_16, %c0_17] : memref<8x128xf32, #tpu.memory_space<vmem>>, vector<8x128xf32>
      tpu.vector_store %arg7[%c0_16, %c0_17], %23 {strides = array<i32>} : memref<8x128xf32, #tpu.memory_space<vmem>>, vector<8x128xf32>,
    } else {
    }
    return
  }
  func.func @transform_0(%arg0: i32, %arg1: i32, %arg2: i32) -> (i32, i32) {
    %c0_i32 = arith.constant 0 : i32
    return %arg0, %arg2 : i32, i32
  }
  func.func @transform_1(%arg0: i32, %arg1: i32, %arg2: i32) -> (i32, i32) {
    %c0_i32 = arith.constant 0 : i32
    return %arg2, %arg1 : i32, i32
  }
  func.func @transform_2(%arg0: i32, %arg1: i32, %arg2: i32) -> (i32, i32) {
    %c0_i32 = arith.constant 0 : i32
    %c0_i32_0 = arith.constant 0 : i32
    return %c0_i32, %arg1 : i32, i32
  }
  func.func @transform_3(%arg0: i32, %arg1: i32, %arg2: i32) -> (i32, i32) {
    %c0_i32 = arith.constant 0 : i32
    %c0_i32_0 = arith.constant 0 : i32
    return %c0_i32, %arg1 : i32, i32
  }
  func.func @transform_4(%arg0: i32, %arg1: i32, %arg2: i32) -> (i32, i32) {
    %c0_i32 = arith.constant 0 : i32
    return %arg0, %arg1 : i32, i32
  }
}

</mosaic_0001>

<bundles_post_ra>
// kernel: resnet50_forward.59
= control target key start
LH: loop header
LB: loop body
LE: loop exit
PB: predicated region body
PF: predicated region fallthrough
CT: control target
= control target key end

     0   :  { %s335_s1 = inlined_call_operand.vmem [shape: bf16[128,128], index: 1, kind: input, shape index: {}]   ;;  %s336_s0 = inlined_call_operand.vmem [shape: bf16[32,128], index: 0, kind: input, shape index: {}]   ;;  %s337_s2 = inlined_call_operand.vmem [shape: f32[1,128], index: 2, kind: input, shape index: {}]   ;;  %s338_s3 = inlined_call_operand.vmem [shape: f32[1,128], index: 3, kind: input, shape index: {}]   ;;  %s339_s4 = inlined_call_operand.vmem [shape: bf16[32,128], index: 4, kind: output, shape index: {}]  }
   0x1   :  { %v258_v0 = vld [vmem:[%s335_s1] sm:$0xff]   ;;  %v259_v1 = vld [vmem:[%s335_s1 + $0x8] sm:$0xff]   ;;  %v260_v2 = vld [vmem:[%s335_s1 + $0x10] sm:$0xff]  }
   0x2   :  { %238 = vmatprep.subr.bf16.mxu0 %v258_v0  ;;  %v261_v3 = vld [vmem:[%s335_s1 + $0x18] sm:$0xff]   ;;  %v266_v4 = vld [vmem:[%s336_s0] sm:$0xff]   ;;  %v263_v6 = vld [vmem:[%s335_s1 + $0x28] sm:$0xff]  }
   0x3   :  { %239 = vmatpush3.bf16.msra.mxu0 %v258_v0  ;;  %254 = vmatprep.mubr.bf16.mxu0 %v266_v4  ;;  %v262_v5 = vld [vmem:[%s335_s1 + $0x20] sm:$0xff]   ;;  %v264_v7 = vld [vmem:[%s335_s1 + $0x30] sm:$0xff]   ;;  %v265_v8 = vld [vmem:[%s335_s1 + $0x38] sm:$0xff]  }
   0x4   :  { %240 = vmatprep.subr.bf16.mxu0 %v259_v1  ;;  %v267_v9 = vld [vmem:[%s336_s0 + $0x8] sm:$0xff]   ;;  %v207_v10 = vld [vmem:[%s337_s2] ss:$0 sm:$0xff] }
   0x5   :  { %v208_v12 = vld [vmem:[%s338_s3] ss:$0 sm:$0xff] }
   0x7   :  { %241 = vmatpush3.bf16.msra.mxu0 %v259_v1 }
   0x8   :  { %242 = vmatprep.subr.bf16.mxu0 %v260_v2 }
   0xb   :  { %243 = vmatpush3.bf16.msra.mxu0 %v260_v2 }
   0xc   :  { %244 = vmatprep.subr.bf16.mxu0 %v261_v3 }
   0xf   :  { %245 = vmatpush3.bf16.msra.mxu0 %v261_v3 }
  0x10   :  { %246 = vmatprep.subr.bf16.mxu0 %v262_v5 }
  0x13   :  { %247 = vmatpush3.bf16.msra.mxu0 %v262_v5 }
  0x14   :  { %248 = vmatprep.subr.bf16.mxu0 %v263_v6 }
  0x17   :  { %249 = vmatpush3.bf16.msra.mxu0 %v263_v6 }
  0x18   :  { %250 = vmatprep.subr.bf16.mxu0 %v264_v7 }
  0x1b   :  { %251 = vmatpush3.bf16.msra.mxu0 %v264_v7 }
  0x1c   :  { %252 = vmatprep.subr.bf16.mxu0 %v265_v8 }
  0x1f   :  { %253 = vmatpush3.bf16.msra.mxu0 %v265_v8 }
  0x22   :  { %255 = vmatmul.mubr.bf16.vlgmr.msra.gmra.mrb[0].mxu0 %v267_v9 }
  0xf5   :  { %v256_v11 = vpop.f32.mrb[0].mxu0 }
  0xf6   :  { %v156_v13 = vmul.f32 %v256_v11, %v207_v10  ;;  %v132_v14 = vpop.f32.mrb[1].mxu0 }
  0xf7   :  { %v154_v15 = vmul.f32 %v207_v10, %v132_v14  ;;  %v257_v16 = vpop.f32.mrb[2].mxu0 }
  0xf8   :  { %v167_v17 = vadd.f32 %v208_v12, %v156_v13  ;;  %v157_v18 = vmul.f32 %v257_v16, %v207_v10  ;;  %v135_v19 = vpop.f32.mrb[3].mxu0 }
  0xf9   :  { %v165_v20 = vadd.f32 %v208_v12, %v154_v15  ;;  %v155_v21 = vmul.f32 %v207_v10, %v135_v19 }
  0xfa   :  { %v168_v22 = vadd.f32 %v208_v12, %v157_v18  ;;  %v171_v24 = vmax.f32 %v167_v17, 0.0 }
  0xfb   :  { %v166_v23 = vadd.f32 %v208_v12, %v155_v21  ;;  %v169_v26 = vmax.f32 %v165_v20, 0.0 }
  0xfc   :  { %v172_v25 = vmax.f32 %v168_v22, 0.0 }
  0xfd   :  { %v170_v27 = vmax.f32 %v166_v23, 0.0 }
  0xfe   :  { %v225_v28 = vpack.c.bf16 %v172_v25, %v171_v24 }
  0xff   :  { %v220_v29 = vpack.c.bf16 %v170_v27, %v169_v26 }
 0x100   :  { %227 = vst [vmem:[%s339_s4 + $0x8] sm:$0xff] %v225_v28  }
 0x101   :  { %221 = vst [vmem:[%s339_s4] sm:$0xff] %v220_v29  }

// kernel: resnet50_forward.56
= control target key start
LH: loop header
LB: loop body
LE: loop exit
PB: predicated region body
PF: predicated region fallthrough
CT: control target
= control target key end

     0   :  { %s905_s1 = inlined_call_operand.vmem [shape: bf16[256,128], index: 1, kind: input, shape index: {}]   ;;  %s906_s0 = inlined_call_operand.vmem [shape: bf16[128,256], index: 0, kind: input, shape index: {}]   ;;  %s907_s2 = inlined_call_operand.vmem [shape: f32[1,128], index: 2, kind: input, shape index: {}]   ;;  %s908_s3 = inlined_call_operand.vmem [shape: f32[1,128], index: 3, kind: input, shape index: {}]   ;;  %s909_s4 = inlined_call_operand.vmem [shape: bf16[128,128], index: 4, kind: output, shape index: {}]  }
   0x1   :  { %v678_v0 = vld [vmem:[%s905_s1 + $0x40] sm:$0xff]   ;;  %v680_v2 = vld [vmem:[%s905_s1 + $0x48] sm:$0xff]   ;;  %v682_v4 = vld [vmem:[%s905_s1 + $0x50] sm:$0xff]  }
   0x2   :  { %v679_v1 = vld [vmem:[%s905_s1] sm:$0xff]   ;;  %598 = vmatprep.subr.bf16.mxu0 %v678_v0  ;;  %662 = vmatprep.subr.bf16.mxu1 %v678_v0  ;;  %v681_v3 = vld [vmem:[%s905_s1 + $0x8] sm:$0xff]   ;;  %v683_v5 = vld [vmem:[%s905_s1 + $0x10] sm:$0xff]  }
   0x3   :  { %599 = vmatpush3.bf16.msra.mxu0 %v679_v1  ;;  %670 = vmatpush3.bf16.msra.mxu1 %v679_v1  ;;  %v684_v6 = vld [vmem:[%s905_s1 + $0x58] sm:$0xff]   ;;  %v686_v8 = vld [vmem:[%s905_s1 + $0x60] sm:$0xff]   ;;  %v688_v10 = vld [vmem:[%s905_s1 + $0x68] sm:$0xff]  }
   0x4   :  { %600 = vmatprep.subr.bf16.mxu0 %v680_v2  ;;  %663 = vmatprep.subr.bf16.mxu1 %v680_v2  ;;  %v685_v7 = vld [vmem:[%s905_s1 + $0x18] sm:$0xff]   ;;  %v687_v9 = vld [vmem:[%s905_s1 + $0x20] sm:$0xff]   ;;  %v689_v13 = vld [vmem:[%s905_s1 + $0x28] sm:$0xff]  }
   0x5   :  { %v696_v11 = vld [vmem:[%s906_s0 + $0x4] ss:$8 sps:$4 sm:$0xff]   ;;  %v690_v14 = vld [vmem:[%s905_s1 + $0x70] sm:$0xff]   ;;  %v692_v16 = vld [vmem:[%s905_s1 + $0x78] sm:$0xff]  }
   0x6   :  { %v699_v12 = vld [vmem:[%s906_s0 + $0x44] ss:$8 sps:$4 sm:$0xff]   ;;  %274 = vmatprep.mubr.bf16.mxu0 %v696_v11  ;;  %v691_v15 = vld [vmem:[%s905_s1 + $0x30] sm:$0xff]   ;;  %v693_v17 = vld [vmem:[%s905_s1 + $0x38] sm:$0xff]  }
   0x7   :  { %601 = vmatpush3.bf16.msra.mxu0 %v681_v3  ;;  %671 = vmatpush3.bf16.msra.mxu1 %v681_v3  ;;  %v694_v18 = vld [vmem:[%s906_s0] ss:$8 sps:$4 sm:$0xff]   ;;  %v700_v20 = vld [vmem:[%s906_s0 + $0x14] ss:$8 sps:$4 sm:$0xff]   ;;  %v704_v22 = vld [vmem:[%s906_s0 + $0x10] ss:$8 sps:$4 sm:$0xff]  }
   0x8   :  { %602 = vmatprep.subr.bf16.mxu0 %v682_v4  ;;  %664 = vmatprep.subr.bf16.mxu1 %v682_v4  ;;  %v697_v19 = vld [vmem:[%s906_s0 + $0x40] ss:$8 sps:$4 sm:$0xff]   ;;  %v702_v21 = vld [vmem:[%s906_s0 + $0x54] ss:$8 sps:$4 sm:$0xff]   ;;  %v705_v23 = vld [vmem:[%s906_s0 + $0x50] ss:$8 sps:$4 sm:$0xff]  }
   0x9   :  { %306 = vmatprep.mubr.bf16.mxu1 %v699_v12  ;;  %v706_v24 = vld [vmem:[%s906_s0 + $0x24] ss:$8 sps:$4 sm:$0xff]   ;;  %v710_v26 = vld [vmem:[%s906_s0 + $0x20] ss:$8 sps:$4 sm:$0xff]   ;;  %v712_v28 = vld [vmem:[%s906_s0 + $0x34] ss:$8 sps:$4 sm:$0xff]  }
   0xa   :  { %v708_v25 = vld [vmem:[%s906_s0 + $0x64] ss:$8 sps:$4 sm:$0xff]   ;;  %v711_v27 = vld [vmem:[%s906_s0 + $0x60] ss:$8 sps:$4 sm:$0xff]   ;;  %v714_v29 = vld [vmem:[%s906_s0 + $0x74] ss:$8 sps:$4 sm:$0xff]  }
   0xb   :  { %603 = vmatpush3.bf16.msra.mxu0 %v683_v5  ;;  %672 = vmatpush3.bf16.msra.mxu1 %v683_v5  ;;  %v716_v30 = vld [vmem:[%s906_s0 + $0x30] ss:$8 sps:$4 sm:$0xff]   ;;  %v842_v35 = vld [vmem:[%s907_s2] ss:$0 sm:$0xff] }
   0xc   :  { %604 = vmatprep.subr.bf16.mxu0 %v684_v6  ;;  %665 = vmatprep.subr.bf16.mxu1 %v684_v6  ;;  %v717_v31 = vld [vmem:[%s906_s0 + $0x70] ss:$8 sps:$4 sm:$0xff]   ;;  %v847_v41 = vld [vmem:[%s908_s3] ss:$0 sm:$0xff] }
   0xf   :  { %605 = vmatpush3.bf16.msra.mxu0 %v685_v7  ;;  %673 = vmatpush3.bf16.msra.mxu1 %v685_v7 }
  0x10   :  { %606 = vmatprep.subr.bf16.mxu0 %v686_v8  ;;  %666 = vmatprep.subr.bf16.mxu1 %v686_v8 }
  0x13   :  { %607 = vmatpush3.bf16.msra.mxu0 %v687_v9  ;;  %674 = vmatpush3.bf16.msra.mxu1 %v687_v9 }
  0x14   :  { %608 = vmatprep.subr.bf16.mxu0 %v688_v10  ;;  %667 = vmatprep.subr.bf16.mxu1 %v688_v10 }
  0x17   :  { %609 = vmatpush3.bf16.msra.mxu0 %v689_v13  ;;  %675 = vmatpush3.bf16.msra.mxu1 %v689_v13 }
  0x18   :  { %610 = vmatprep.subr.bf16.mxu0 %v690_v14  ;;  %668 = vmatprep.subr.bf16.mxu1 %v690_v14 }
  0x1b   :  { %611 = vmatpush3.bf16.msra.mxu0 %v691_v15  ;;  %676 = vmatpush3.bf16.msra.mxu1 %v691_v15 }
  0x1c   :  { %612 = vmatprep.subr.bf16.mxu0 %v692_v16  ;;  %669 = vmatprep.subr.bf16.mxu1 %v692_v16 }
  0x1f   :  { %613 = vmatpush3.bf16.msra.mxu0 %v693_v17  ;;  %677 = vmatpush3.bf16.msra.mxu1 %v693_v17 }
  0x22   :  { %275 = vmatmul.mubr.bf16.vlgmr.msra.gmra.mrb[0].mxu0 %v694_v18  ;;  %307 = vmatmul.mubr.bf16.vlgmr.msra.gmra.mrb[0].mxu1 %v697_v19 }
  0x23   :  { %282 = vmatprep.mubr.bf16.mxu0 %v700_v20  ;;  %314 = vmatprep.mubr.bf16.mxu1 %v702_v21 }
  0x2a   :  { %283 = vmatmul.mubr.bf16.gmra.mrb[4].mxu0 %v704_v22  ;;  %315 = vmatmul.mubr.bf16.gmra.mrb[4].mxu1 %v705_v23 }
  0x2b   :  { %290 = vmatprep.mubr.bf16.mxu0 %v706_v24  ;;  %322 = vmatprep.mubr.bf16.mxu1 %v708_v25 }
  0x32   :  { %291 = vmatmul.mubr.bf16.gmra.mrb[8].mxu0 %v710_v26  ;;  %323 = vmatmul.mubr.bf16.gmra.mrb[8].mxu1 %v711_v27 }
  0x33   :  { %298 = vmatprep.mubr.bf16.mxu0 %v712_v28  ;;  %330 = vmatprep.mubr.bf16.mxu1 %v714_v29 }
  0x3a   :  { %299 = vmatmul.mubr.bf16.gmra.mrb[12].mxu0 %v716_v30  ;;  %331 = vmatmul.mubr.bf16.gmra.mrb[12].mxu1 %v717_v31 }
  0xf5   :  { %v614_v32 = vpop.f32.mrb[0].mxu0  ;;  %v638_v33 = vpop.f32.mrb[0].mxu1 }
  0xf6   :  { %v615_v34 = vpop.f32.mrb[1].mxu0  ;;  %v639_v36 = vpop.f32.mrb[1].mxu1 }
  0xf7   :  { %v616_v37 = vadd.f32 %v615_v34, %v614_v32  ;;  %v640_v38 = vadd.f32 %v639_v36, %v638_v33  ;;  %v617_v39 = vpop.f32.mrb[2].mxu0  ;;  %v641_v40 = vpop.f32.mrb[2].mxu1 }
  0xf8   :  { %v618_v42 = vpop.f32.mrb[3].mxu0  ;;  %v642_v43 = vpop.f32.mrb[3].mxu1 }
  0xf9   :  { %v346_v44 = vmul.f32 %v616_v37, %v842_v35  ;;  %v354_v45 = vmul.f32 %v640_v38, %v842_v35  ;;  %v619_v46 = vadd.f32 %v618_v42, %v617_v39  ;;  %v643_v47 = vadd.f32 %v642_v43, %v641_v40 }
  0xfb   :  { %v369_v48 = vadd.f32 %v847_v41, %v346_v44  ;;  %v377_v49 = vadd.f32 %v847_v41, %v354_v45  ;;  %v347_v50 = vmul.f32 %v619_v46, %v842_v35  ;;  %v355_v51 = vmul.f32 %v643_v47, %v842_v35 }
  0xfd   :  { %v370_v52 = vadd.f32 %v847_v41, %v347_v50  ;;  %v378_v53 = vadd.f32 %v847_v41, %v355_v51  ;;  %v620_v54 = vpop.f32.mrb[4].mxu0  ;;  %v644_v55 = vpop.f32.mrb[4].mxu1  ;;  %v385_v56 = vmax.f32 %v369_v48, 0.0  ;;  %v393_v57 = vmax.f32 %v377_v49, 0.0 }
  0xfe   :  { %v621_v58 = vpop.f32.mrb[5].mxu0  ;;  %v645_v59 = vpop.f32.mrb[5].mxu1 }
  0xff   :  { %v386_v60 = vmax.f32 %v370_v52, 0.0  ;;  %v394_v61 = vmax.f32 %v378_v53, 0.0  ;;  %v622_v62 = vadd.f32 %v621_v58, %v620_v54  ;;  %v646_v63 = vadd.f32 %v645_v59, %v644_v55  ;;  %v623_v0 = vpop.f32.mrb[6].mxu0  ;;  %v647_v1 = vpop.f32.mrb[6].mxu1 }
 0x100   :  { %v624_v2 = vpop.f32.mrb[7].mxu0  ;;  %v648_v3 = vpop.f32.mrb[7].mxu1 }
 0x101   :  { %v554_v4 = vpack.c.bf16 %v386_v60, %v385_v56  ;;  %v574_v5 = vpack.c.bf16 %v394_v61, %v393_v57  ;;  %v348_v6 = vmul.f32 %v622_v62, %v842_v35  ;;  %v356_v7 = vmul.f32 %v646_v63, %v842_v35 }
 0x102   :  { %v625_v8 = vadd.f32 %v624_v2, %v623_v0  ;;  %v649_v9 = vadd.f32 %v648_v3, %v647_v1 }
 0x103   :  { %555 = vst [vmem:[%s909_s4] sm:$0xff] %v554_v4   ;;  %594 = vst [vmem:[%s909_s4 + $0x20] sm:$0xff] %v574_v5   ;;  %v371_v10 = vadd.f32 %v847_v41, %v348_v6  ;;  %v379_v11 = vadd.f32 %v847_v41, %v356_v7 }
 0x104   :  { %v349_v12 = vmul.f32 %v625_v8, %v842_v35  ;;  %v357_v13 = vmul.f32 %v649_v9, %v842_v35 }
 0x105   :  { %v626_v14 = vpop.f32.mrb[8].mxu0  ;;  %v650_v15 = vpop.f32.mrb[8].mxu1  ;;  %v387_v24 = vmax.f32 %v371_v10, 0.0  ;;  %v395_v25 = vmax.f32 %v379_v11, 0.0 }
 0x106   :  { %v372_v16 = vadd.f32 %v847_v41, %v349_v12  ;;  %v380_v17 = vadd.f32 %v847_v41, %v357_v13  ;;  %v627_v18 = vpop.f32.mrb[9].mxu0  ;;  %v651_v19 = vpop.f32.mrb[9].mxu1 }
 0x107   :  { %v628_v20 = vadd.f32 %v627_v18, %v626_v14  ;;  %v652_v21 = vadd.f32 %v651_v19, %v650_v15  ;;  %v629_v22 = vpop.f32.mrb[10].mxu0  ;;  %v653_v23 = vpop.f32.mrb[10].mxu1 }
 0x108   :  { %v388_v26 = vmax.f32 %v372_v16, 0.0  ;;  %v396_v27 = vmax.f32 %v380_v17, 0.0  ;;  %v630_v28 = vpop.f32.mrb[11].mxu0  ;;  %v654_v29 = vpop.f32.mrb[11].mxu1 }
 0x109   :  { %v350_v30 = vmul.f32 %v628_v20, %v842_v35  ;;  %v358_v31 = vmul.f32 %v652_v21, %v842_v35  ;;  %v631_v32 = vadd.f32 %v630_v28, %v629_v22  ;;  %v655_v33 = vadd.f32 %v654_v29, %v653_v23 }
 0x10a   :  { %v559_v34 = vpack.c.bf16 %v388_v26, %v387_v24  ;;  %v579_v36 = vpack.c.bf16 %v396_v27, %v395_v25 }
 0x10b   :  { %v373_v37 = vadd.f32 %v847_v41, %v350_v30  ;;  %v381_v38 = vadd.f32 %v847_v41, %v358_v31  ;;  %v351_v39 = vmul.f32 %v631_v32, %v842_v35  ;;  %v359_v40 = vmul.f32 %v655_v33, %v842_v35 }
 0x10c   :  { %591 = vst [vmem:[%s909_s4 + $0x8] sm:$0xff] %v559_v34   ;;  %595 = vst [vmem:[%s909_s4 + $0x28] sm:$0xff] %v579_v36  }
 0x10d   :  { %v374_v42 = vadd.f32 %v847_v41, %v351_v39  ;;  %v382_v43 = vadd.f32 %v847_v41, %v359_v40  ;;  %v632_v44 = vpop.f32.mrb[12].mxu0  ;;  %v656_v45 = vpop.f32.mrb[12].mxu1  ;;  %v389_v46 = vmax.f32 %v373_v37, 0.0  ;;  %v397_v47 = vmax.f32 %v381_v38, 0.0 }
 0x10e   :  { %v633_v48 = vpop.f32.mrb[13].mxu0  ;;  %v657_v49 = vpop.f32.mrb[13].mxu1 }
 0x10f   :  { %v390_v50 = vmax.f32 %v374_v42, 0.0  ;;  %v398_v51 = vmax.f32 %v382_v43, 0.0  ;;  %v634_v52 = vadd.f32 %v633_v48, %v632_v44  ;;  %v658_v53 = vadd.f32 %v657_v49, %v656_v45  ;;  %v635_v54 = vpop.f32.mrb[14].mxu0  ;;  %v659_v55 = vpop.f32.mrb[14].mxu1 }
 0x110   :  { %v636_v56 = vpop.f32.mrb[15].mxu0  ;;  %v660_v57 = vpop.f32.mrb[15].mxu1 }
 0x111   :  { %v564_v58 = vpack.c.bf16 %v390_v50, %v389_v46  ;;  %v584_v59 = vpack.c.bf16 %v398_v51, %v397_v47  ;;  %v352_v60 = vmul.f32 %v634_v52, %v842_v35  ;;  %v360_v61 = vmul.f32 %v658_v53, %v842_v35 }
 0x112   :  { %v637_v62 = vadd.f32 %v636_v56, %v635_v54  ;;  %v661_v63 = vadd.f32 %v660_v57, %v659_v55 }
 0x113   :  { %592 = vst [vmem:[%s909_s4 + $0x10] sm:$0xff] %v564_v58   ;;  %596 = vst [vmem:[%s909_s4 + $0x30] sm:$0xff] %v584_v59   ;;  %v375_v0 = vadd.f32 %v847_v41, %v352_v60  ;;  %v383_v1 = vadd.f32 %v847_v41, %v360_v61 }
 0x114   :  { %v353_v2 = vmul.f32 %v637_v62, %v842_v35  ;;  %v361_v3 = vmul.f32 %v661_v63, %v842_v35 }
 0x115   :  { %v391_v6 = vmax.f32 %v375_v0, 0.0  ;;  %v399_v7 = vmax.f32 %v383_v1, 0.0 }
 0x116   :  { %v376_v4 = vadd.f32 %v847_v41, %v353_v2  ;;  %v384_v5 = vadd.f32 %v847_v41, %v361_v3 }
 0x118   :  { %v392_v8 = vmax.f32 %v376_v4, 0.0  ;;  %v400_v9 = vmax.f32 %v384_v5, 0.0 }
 0x11a   :  { %v569_v10 = vpack.c.bf16 %v392_v8, %v391_v6  ;;  %v589_v11 = vpack.c.bf16 %v400_v9, %v399_v7 }
 0x11c   :  { %593 = vst [vmem:[%s909_s4 + $0x18] sm:$0xff] %v569_v10   ;;  %597 = vst [vmem:[%s909_s4 + $0x38] sm:$0xff] %v589_v11  }

// kernel: resnet50_forward.57
= control target key start
LH: loop header
LB: loop body
LE: loop exit
PB: predicated region body
PF: predicated region fallthrough
CT: control target
= control target key end

     0   :  { %vm45_vm0 = vcmask 519168   ;;  %s365_s0 = inlined_call_operand.vmem [shape: bf16[9,32,64], index: 0, kind: input, shape index: {}]   ;;  %s366_s1 = inlined_call_operand.vmem [shape: bf16[32,64], index: 1, kind: output, shape index: {}]  }
   0x1   :  { %v9_v0 = vld [vmem:[%s365_s0] sm:$0xf]  ;;  %v13_v1 = vld [vmem:[%s365_s0 + $0x10] sm:$0xf]  ;;  %v10_v12 = vld [vmem:[%s365_s0 + $0x4] sm:$0xf] }
   0x2   :  { %v17_v2 = vld [vmem:[%s365_s0 + $0x20] sm:$0xf]  ;;  %v21_v3 = vld [vmem:[%s365_s0 + $0x30] sm:$0xf]  ;;  %v48_v4 = vsel %vm45_vm0, %v9_v0, 4286644096 }
   0x3   :  { %v51_v5 = vsel %vm45_vm0, %v13_v1, 4286644096  ;;  %v55_v6 = vsel %vm45_vm0, %v17_v2, 4286644096  ;;  %v25_v7 = vld [vmem:[%s365_s0 + $0x40] sm:$0xf] }
   0x4   :  { %v53_v8 = vmax.bf16 %v51_v5, %v48_v4  ;;  %v29_v9 = vld [vmem:[%s365_s0 + $0x50] sm:$0xf]  ;;  %v59_v10 = vsel %vm45_vm0, %v21_v3, 4286644096  ;;  %v14_v13 = vld [vmem:[%s365_s0 + $0x14] sm:$0xf] }
   0x5   :  { %v18_v14 = vld [vmem:[%s365_s0 + $0x24] sm:$0xf]  ;;  %v63_v15 = vsel %vm45_vm0, %v25_v7, 4286644096  ;;  %v33_v16 = vld [vmem:[%s365_s0 + $0x60] sm:$0xf] }
   0x6   :  { %v57_v11 = vmax.bf16 %v55_v6, %v53_v8  ;;  %v67_v18 = vsel %vm45_vm0, %v29_v9, 4286644096  ;;  %v22_v19 = vld [vmem:[%s365_s0 + $0x34] sm:$0xf]  ;;  %v83_v20 = vsel %vm45_vm0, %v10_v12, 4286644096 }
   0x7   :  { %v86_v21 = vsel %vm45_vm0, %v14_v13, 4286644096  ;;  %v90_v22 = vsel %vm45_vm0, %v18_v14, 4286644096  ;;  %v37_v23 = vld [vmem:[%s365_s0 + $0x70] sm:$0xf] }
   0x8   :  { %v61_v17 = vmax.bf16 %v59_v10, %v57_v11  ;;  %v41_v24 = vld [vmem:[%s365_s0 + $0x80] sm:$0xf]  ;;  %v26_v26 = vld [vmem:[%s365_s0 + $0x44] sm:$0xf]  ;;  %v88_v27 = vmax.bf16 %v86_v21, %v83_v20  ;;  %v71_v28 = vsel %vm45_vm0, %v33_v16, 4286644096 }
   0x9   :  { %v30_v29 = vld [vmem:[%s365_s0 + $0x54] sm:$0xf]  ;;  %v94_v30 = vsel %vm45_vm0, %v22_v19, 4286644096  ;;  %v11_v33 = vld [vmem:[%s365_s0 + $0x8] sm:$0xf] }
   0xa   :  { %v65_v25 = vmax.bf16 %v63_v15, %v61_v17  ;;  %v92_v32 = vmax.bf16 %v90_v22, %v88_v27  ;;  %v15_v34 = vld [vmem:[%s365_s0 + $0x18] sm:$0xf]  ;;  %v19_v35 = vld [vmem:[%s365_s0 + $0x28] sm:$0xf]  ;;  %v75_v36 = vsel %vm45_vm0, %v37_v23, 4286644096 }
   0xb   :  { %v79_v37 = vsel %vm45_vm0, %v41_v24, 4286644096  ;;  %v98_v38 = vsel %vm45_vm0, %v26_v26, 4286644096  ;;  %v34_v40 = vld [vmem:[%s365_s0 + $0x64] sm:$0xf] }
   0xc   :  { %v69_v31 = vmax.bf16 %v67_v18, %v65_v25  ;;  %v96_v41 = vmax.bf16 %v94_v30, %v92_v32  ;;  %v102_v42 = vsel %vm45_vm0, %v30_v29, 4286644096  ;;  %v23_v43 = vld [vmem:[%s365_s0 + $0x38] sm:$0xf]  ;;  %v118_v44 = vsel %vm45_vm0, %v11_v33, 4286644096 }
   0xd   :  { %v121_v45 = vsel %vm45_vm0, %v15_v34, 4286644096  ;;  %v125_v46 = vsel %vm45_vm0, %v19_v35, 4286644096  ;;  %v38_v48 = vld [vmem:[%s365_s0 + $0x74] sm:$0xf] }
   0xe   :  { %v73_v39 = vmax.bf16 %v71_v28, %v69_v31  ;;  %v42_v49 = vld [vmem:[%s365_s0 + $0x84] sm:$0xf]  ;;  %v100_v50 = vmax.bf16 %v98_v38, %v96_v41  ;;  %v27_v51 = vld [vmem:[%s365_s0 + $0x48] sm:$0xf]  ;;  %v123_v52 = vmax.bf16 %v121_v45, %v118_v44  ;;  %v106_v53 = vsel %vm45_vm0, %v34_v40, 4286644096 }
   0xf   :  { %v31_v54 = vld [vmem:[%s365_s0 + $0x58] sm:$0xf]  ;;  %v129_v55 = vsel %vm45_vm0, %v23_v43, 4286644096  ;;  %v12_v59 = vld [vmem:[%s365_s0 + $0xc] sm:$0xf] }
  0x10   :  { %v77_v47 = vmax.bf16 %v75_v36, %v73_v39  ;;  %v104_v57 = vmax.bf16 %v102_v42, %v100_v50  ;;  %v127_v58 = vmax.bf16 %v125_v46, %v123_v52  ;;  %v16_v60 = vld [vmem:[%s365_s0 + $0x1c] sm:$0xf]  ;;  %v20_v61 = vld [vmem:[%s365_s0 + $0x2c] sm:$0xf]  ;;  %v110_v62 = vsel %vm45_vm0, %v38_v48, 4286644096 }
  0x11   :  { %v114_v63 = vsel %vm45_vm0, %v42_v49, 4286644096  ;;  %v133_v0 = vsel %vm45_vm0, %v27_v51, 4286644096  ;;  %v35_v2 = vld [vmem:[%s365_s0 + $0x68] sm:$0xf] }
  0x12   :  { %v81_v56 = vmax.bf16 %v79_v37, %v77_v47  ;;  %v108_v1 = vmax.bf16 %v106_v53, %v104_v57  ;;  %v131_v3 = vmax.bf16 %v129_v55, %v127_v58  ;;  %v137_v4 = vsel %vm45_vm0, %v31_v54, 4286644096  ;;  %v24_v5 = vld [vmem:[%s365_s0 + $0x3c] sm:$0xf]  ;;  %v39_v10 = vld [vmem:[%s365_s0 + $0x78] sm:$0xf] }
  0x13   :  { %v153_v6 = vsel %vm45_vm0, %v12_v59, 4286644096  ;;  %v156_v7 = vsel %vm45_vm0, %v16_v60, 4286644096  ;;  %v160_v8 = vsel %vm45_vm0, %v20_v61, 4286644096 }
  0x14   :  { %187 = vst.msk [vmem:[%s366_s1] sm:$0xf] %vm45_vm0, %v81_v56  ;;  %v112_v9 = vmax.bf16 %v110_v62, %v108_v1  ;;  %v135_v11 = vmax.bf16 %v133_v0, %v131_v3  ;;  %v28_v12 = vld [vmem:[%s365_s0 + $0x4c] sm:$0xf]  ;;  %v158_v13 = vmax.bf16 %v156_v7, %v153_v6  ;;  %v141_v14 = vsel %vm45_vm0, %v35_v2, 4286644096 }
  0x15   :  { %v164_v15 = vsel %vm45_vm0, %v24_v5, 4286644096  ;;  %v43_v17 = vld [vmem:[%s365_s0 + $0x88] sm:$0xf]  ;;  %v32_v19 = vld [vmem:[%s365_s0 + $0x5c] sm:$0xf] }
  0x16   :  { %v116_v16 = vmax.bf16 %v114_v63, %v112_v9  ;;  %v139_v18 = vmax.bf16 %v137_v4, %v135_v11  ;;  %v162_v20 = vmax.bf16 %v160_v8, %v158_v13  ;;  %v145_v21 = vsel %vm45_vm0, %v39_v10, 4286644096  ;;  %v36_v24 = vld [vmem:[%s365_s0 + $0x6c] sm:$0xf]  ;;  %v40_v29 = vld [vmem:[%s365_s0 + $0x7c] sm:$0xf] }
  0x17   :  { %v168_v22 = vsel %vm45_vm0, %v28_v12, 4286644096  ;;  %v149_v26 = vsel %vm45_vm0, %v43_v17, 4286644096  ;;  %v172_v27 = vsel %vm45_vm0, %v32_v19, 4286644096 }
  0x18   :  { %188 = vst.msk [vmem:[%s366_s1 + $0x4] sm:$0xf] %vm45_vm0, %v116_v16  ;;  %v143_v23 = vmax.bf16 %v141_v14, %v139_v18  ;;  %v166_v25 = vmax.bf16 %v164_v15, %v162_v20  ;;  %v176_v31 = vsel %vm45_vm0, %v36_v24, 4286644096  ;;  %v44_v33 = vld [vmem:[%s365_s0 + $0x8c] sm:$0xf] }
  0x19   :  { %v180_v35 = vsel %vm45_vm0, %v40_v29, 4286644096  ;;  %v184_v37 = vsel %vm45_vm0, %v44_v33, 4286644096 }
  0x1a   :  { %v147_v28 = vmax.bf16 %v145_v21, %v143_v23  ;;  %v170_v30 = vmax.bf16 %v168_v22, %v166_v25 }
  0x1c   :  { %v151_v32 = vmax.bf16 %v149_v26, %v147_v28  ;;  %v174_v34 = vmax.bf16 %v172_v27, %v170_v30 }
  0x1e   :  { %189 = vst.msk [vmem:[%s366_s1 + $0x8] sm:$0xf] %vm45_vm0, %v151_v32  ;;  %v178_v36 = vmax.bf16 %v176_v31, %v174_v34 }
  0x20   :  { %v182_v38 = vmax.bf16 %v180_v35, %v178_v36 }
  0x22   :  { %v186_v39 = vmax.bf16 %v184_v37, %v182_v38 }
  0x24   :  { %190 = vst.msk [vmem:[%s366_s1 + $0xc] sm:$0xf] %vm45_vm0, %v186_v39 }

// kernel: resnet50_forward.61
= control target key start
LH: loop header
LB: loop body
LE: loop exit
PB: predicated region body
PF: predicated region fallthrough
CT: control target
= control target key end

     0   :  { %v355_v1 = vmov 0   ;;  %v188_v19 = vlaneseq  ;;  %s470_s1 = inlined_call_operand.vmem [shape: bf16[128,256], index: 1, kind: input, shape index: {}]   ;;  %s471_s0 = inlined_call_operand.vmem [shape: bf16[32,128], index: 0, kind: input, shape index: {}]   ;;  %s472_s2 = inlined_call_operand.vmem [shape: f32[1,256], index: 2, kind: input, shape index: {}]   ;;  %s473_s3 = inlined_call_operand.vmem [shape: f32[1,256], index: 3, kind: input, shape index: {}]   ;;  %s474_s4 = inlined_call_operand.vmem [shape: bf16[32,256], index: 4, kind: input, shape index: {}]   ;;  %s475_s5 = inlined_call_operand.vmem [shape: bf16[32,256], index: 5, kind: output, shape index: {}]  }
   0x1   :  { %v329_v0 = vld [vmem:[%s470_s1 + $0x4] ss:$8 sps:$4 sm:$0xff]   ;;  %165 = vmatprep.mubr.bf16.mxu0 %v355_v1  ;;  %175 = vmatprep.mubr.bf16.mxu1 %v355_v1  ;;  %v331_v2 = vld [vmem:[%s470_s1] ss:$8 sps:$4 sm:$0xff]   ;;  %v332_v3 = vld [vmem:[%s470_s1 + $0x14] ss:$8 sps:$4 sm:$0xff]  }
   0x2   :  { %133 = vmatprep.subr.bf16.mxu0 %v329_v0  ;;  %312 = vmatprep.subr.bf16.mxu1 %v329_v0  ;;  %v334_v4 = vld [vmem:[%s470_s1 + $0x10] ss:$8 sps:$4 sm:$0xff]   ;;  %v335_v5 = vld [vmem:[%s470_s1 + $0x24] ss:$8 sps:$4 sm:$0xff]   ;;  %v337_v6 = vld [vmem:[%s470_s1 + $0x20] ss:$8 sps:$4 sm:$0xff]  }
   0x3   :  { %134 = vmatpush1.bf16.msra.mxu0 %v331_v2  ;;  %320 = vmatpush1.bf16.msra.mxu1 %v331_v2  ;;  %v338_v7 = vld [vmem:[%s470_s1 + $0x34] ss:$8 sps:$4 sm:$0xff]   ;;  %v340_v8 = vld [vmem:[%s470_s1 + $0x30] ss:$8 sps:$4 sm:$0xff]   ;;  %v341_v9 = vld [vmem:[%s470_s1 + $0x44] ss:$8 sps:$4 sm:$0xff]  }
   0x4   :  { %135 = vmatprep.subr.bf16.mxu0 %v332_v3  ;;  %313 = vmatprep.subr.bf16.mxu1 %v332_v3  ;;  %v343_v10 = vld [vmem:[%s470_s1 + $0x40] ss:$8 sps:$4 sm:$0xff]   ;;  %v344_v11 = vld [vmem:[%s470_s1 + $0x54] ss:$8 sps:$4 sm:$0xff]   ;;  %v346_v12 = vld [vmem:[%s470_s1 + $0x50] ss:$8 sps:$4 sm:$0xff]  }
   0x5   :  { %v347_v13 = vld [vmem:[%s470_s1 + $0x64] ss:$8 sps:$4 sm:$0xff]   ;;  %v349_v14 = vld [vmem:[%s470_s1 + $0x60] ss:$8 sps:$4 sm:$0xff]   ;;  %v350_v15 = vld [vmem:[%s470_s1 + $0x74] ss:$8 sps:$4 sm:$0xff]  }
   0x6   :  { %v352_v16 = vld [vmem:[%s470_s1 + $0x70] ss:$8 sps:$4 sm:$0xff]   ;;  %v353_v17 = vld [vmem:[%s471_s0] sm:$0xff]   ;;  %v354_v18 = vld [vmem:[%s471_s0 + $0x8] sm:$0xff]   ;;  %v189_v20 = vshrl.u32 %v188_v19, 7 }
   0x7   :  { %136 = vmatpush1.bf16.msra.mxu0 %v334_v4  ;;  %321 = vmatpush1.bf16.msra.mxu1 %v334_v4  ;;  %v186_v22 = vld [vmem:[%s472_s2] sm:$0x3]  ;;  %v228_v27 = vld [vmem:[%s474_s4 + $0x10] sm:$0xff]  ;;  %v227_v29 = vld [vmem:[%s474_s4 + $0x8] sm:$0xff] }
   0x8   :  { %137 = vmatprep.subr.bf16.mxu0 %v335_v5  ;;  %314 = vmatprep.subr.bf16.mxu1 %v335_v5  ;;  %v190_v21 = vsub.s32 0, %v189_v20  ;;  %v194_v23 = vsub.s32 1, %v189_v20  ;;  %v206_v24 = vld [vmem:[%s473_s3] sm:$0x3]  ;;  %v229_v30 = vld [vmem:[%s474_s4 + $0x18] sm:$0xff]  ;;  %v234_v36 = vunpack.c.l.bf16 %v228_v27  ;;  %v235_v38 = vunpack.c.h.bf16 %v228_v27 }
   0x9   :  { %v226_v26 = vld [vmem:[%s474_s4] sm:$0xff]  ;;  %v232_v43 = vunpack.c.l.bf16 %v227_v29  ;;  %v236_v44 = vunpack.c.l.bf16 %v229_v30  ;;  %v233_v49 = vunpack.c.h.bf16 %v227_v29  ;;  %v237_v50 = vunpack.c.h.bf16 %v229_v30 }
   0xa   :  { %v191_v25 = vrot.slane %v186_v22, %v190_v21  ;;  %v195_v28 = vrot.slane %v186_v22, %v194_v23  ;;  %v211_v31 = vrot.slane %v206_v24, %v190_v21  ;;  %v215_v32 = vrot.slane %v206_v24, %v194_v23 }
   0xb   :  { %138 = vmatpush1.bf16.msra.mxu0 %v337_v6  ;;  %322 = vmatpush1.bf16.msra.mxu1 %v337_v6  ;;  %v230_v34 = vunpack.c.l.bf16 %v226_v26  ;;  %v231_v37 = vunpack.c.h.bf16 %v226_v26 }
   0xc   :  { %139 = vmatprep.subr.bf16.mxu0 %v338_v7  ;;  %315 = vmatprep.subr.bf16.mxu1 %v338_v7 }
   0xf   :  { %140 = vmatpush1.bf16.msra.mxu0 %v340_v8  ;;  %323 = vmatpush1.bf16.msra.mxu1 %v340_v8 }
  0x10   :  { %141 = vmatprep.subr.bf16.mxu0 %v341_v9  ;;  %316 = vmatprep.subr.bf16.mxu1 %v341_v9 }
  0x13   :  { %142 = vmatpush1.bf16.msra.mxu0 %v343_v10  ;;  %324 = vmatpush1.bf16.msra.mxu1 %v343_v10 }
  0x14   :  { %143 = vmatprep.subr.bf16.mxu0 %v344_v11  ;;  %317 = vmatprep.subr.bf16.mxu1 %v344_v11 }
  0x17   :  { %144 = vmatpush1.bf16.msra.mxu0 %v346_v12  ;;  %325 = vmatpush1.bf16.msra.mxu1 %v346_v12 }
  0x18   :  { %145 = vmatprep.subr.bf16.mxu0 %v347_v13  ;;  %318 = vmatprep.subr.bf16.mxu1 %v347_v13 }
  0x1b   :  { %146 = vmatpush1.bf16.msra.mxu0 %v349_v14  ;;  %326 = vmatpush1.bf16.msra.mxu1 %v349_v14 }
  0x1c   :  { %147 = vmatprep.subr.bf16.mxu0 %v350_v15  ;;  %319 = vmatprep.subr.bf16.mxu1 %v350_v15 }
  0x1f   :  { %148 = vmatpush1.bf16.msra.mxu0 %v352_v16  ;;  %327 = vmatpush1.bf16.msra.mxu1 %v352_v16 }
  0x22   :  { %166 = vmatmul.mubr.bf16.vlgmr.msra.gmra.mrb[0].mxu0 %v353_v17  ;;  %176 = vmatmul.mubr.bf16.vlgmr.msra.gmra.mrb[0].mxu1 %v354_v18 }
  0xf5   :  { %v167_v33 = vpop.f32.mrb[0].mxu0  ;;  %v177_v35 = vpop.f32.mrb[0].mxu1 }
  0xf6   :  { %v198_v39 = vmul.f32 %v191_v25, %v167_v33  ;;  %v202_v40 = vmul.f32 %v191_v25, %v177_v35  ;;  %v169_v41 = vpop.f32.mrb[1].mxu0  ;;  %v179_v42 = vpop.f32.mrb[1].mxu1 }
  0xf7   :  { %v199_v45 = vmul.f32 %v195_v28, %v169_v41  ;;  %v203_v46 = vmul.f32 %v195_v28, %v179_v42  ;;  %v171_v47 = vpop.f32.mrb[2].mxu0  ;;  %v181_v48 = vpop.f32.mrb[2].mxu1 }
  0xf8   :  { %v218_v51 = vadd.f32 %v211_v31, %v198_v39  ;;  %v222_v52 = vadd.f32 %v211_v31, %v202_v40  ;;  %v200_v53 = vmul.f32 %v191_v25, %v171_v47  ;;  %v204_v54 = vmul.f32 %v191_v25, %v181_v48  ;;  %v173_v55 = vpop.f32.mrb[3].mxu0  ;;  %v183_v56 = vpop.f32.mrb[3].mxu1 }
  0xf9   :  { %v219_v57 = vadd.f32 %v215_v32, %v199_v45  ;;  %v223_v58 = vadd.f32 %v215_v32, %v203_v46  ;;  %v201_v59 = vmul.f32 %v195_v28, %v173_v55  ;;  %v205_v60 = vmul.f32 %v195_v28, %v183_v56 }
  0xfa   :  { %v238_v61 = vadd.f32 %v230_v34, %v218_v51  ;;  %v242_v62 = vadd.f32 %v234_v36, %v222_v52  ;;  %v220_v63 = vadd.f32 %v211_v31, %v200_v53  ;;  %v224_v0 = vadd.f32 %v211_v31, %v204_v54 }
  0xfb   :  { %v239_v1 = vadd.f32 %v231_v37, %v219_v57  ;;  %v243_v2 = vadd.f32 %v235_v38, %v223_v58  ;;  %v221_v3 = vadd.f32 %v215_v32, %v201_v59  ;;  %v225_v4 = vadd.f32 %v215_v32, %v205_v60 }
  0xfc   :  { %v246_v5 = vmax.f32 %v238_v61, 0.0  ;;  %v250_v6 = vmax.f32 %v242_v62, 0.0  ;;  %v240_v7 = vadd.f32 %v232_v43, %v220_v63  ;;  %v244_v8 = vadd.f32 %v236_v44, %v224_v0 }
  0xfd   :  { %v247_v9 = vmax.f32 %v239_v1, 0.0  ;;  %v251_v10 = vmax.f32 %v243_v2, 0.0  ;;  %v241_v11 = vadd.f32 %v233_v49, %v221_v3  ;;  %v245_v12 = vadd.f32 %v237_v50, %v225_v4 }
  0xfe   :  { %v248_v13 = vmax.f32 %v240_v7, 0.0  ;;  %v252_v14 = vmax.f32 %v244_v8, 0.0 }
  0xff   :  { %v308_v15 = vpack.c.bf16 %v247_v9, %v246_v5  ;;  %v310_v16 = vpack.c.bf16 %v251_v10, %v250_v6  ;;  %v249_v17 = vmax.f32 %v241_v11, 0.0  ;;  %v253_v18 = vmax.f32 %v245_v12, 0.0 }
 0x101   :  { %278 = vst [vmem:[%s475_s5] sm:$0xff] %v308_v15  ;;  %280 = vst [vmem:[%s475_s5 + $0x10] sm:$0xff] %v310_v16  ;;  %v309_v19 = vpack.c.bf16 %v249_v17, %v248_v13  ;;  %v311_v20 = vpack.c.bf16 %v253_v18, %v252_v14 }
 0x103   :  { %279 = vst [vmem:[%s475_s5 + $0x8] sm:$0xff] %v309_v19  ;;  %281 = vst [vmem:[%s475_s5 + $0x18] sm:$0xff] %v311_v20 }

// kernel: resnet50_forward.58
= control target key start
LH: loop header
LB: loop body
LE: loop exit
PB: predicated region body
PF: predicated region fallthrough
CT: control target
= control target key end

     0   :  { %v324_v1 = vmov 0   ;;  %v185_v19 = vlaneseq  ;;  %s422_s1 = inlined_call_operand.vmem [shape: bf16[128,256], index: 1, kind: input, shape index: {}]   ;;  %s423_s0 = inlined_call_operand.vmem [shape: bf16[32,128], index: 0, kind: input, shape index: {}]   ;;  %s424_s2 = inlined_call_operand.vmem [shape: f32[1,256], index: 2, kind: input, shape index: {}]   ;;  %s425_s3 = inlined_call_operand.vmem [shape: f32[1,256], index: 3, kind: input, shape index: {}]   ;;  %s426_s4 = inlined_call_operand.vmem [shape: bf16[32,256], index: 4, kind: output, shape index: {}]  }
   0x1   :  { %v298_v0 = vld [vmem:[%s422_s1 + $0x4] ss:$8 sps:$4 sm:$0xff]   ;;  %162 = vmatprep.mubr.bf16.mxu0 %v324_v1  ;;  %172 = vmatprep.mubr.bf16.mxu1 %v324_v1  ;;  %v300_v2 = vld [vmem:[%s422_s1] ss:$8 sps:$4 sm:$0xff]   ;;  %v301_v3 = vld [vmem:[%s422_s1 + $0x14] ss:$8 sps:$4 sm:$0xff]  }
   0x2   :  { %130 = vmatprep.subr.bf16.mxu0 %v298_v0  ;;  %281 = vmatprep.subr.bf16.mxu1 %v298_v0  ;;  %v303_v4 = vld [vmem:[%s422_s1 + $0x10] ss:$8 sps:$4 sm:$0xff]   ;;  %v304_v5 = vld [vmem:[%s422_s1 + $0x24] ss:$8 sps:$4 sm:$0xff]   ;;  %v306_v6 = vld [vmem:[%s422_s1 + $0x20] ss:$8 sps:$4 sm:$0xff]  }
   0x3   :  { %131 = vmatpush1.bf16.msra.mxu0 %v300_v2  ;;  %289 = vmatpush1.bf16.msra.mxu1 %v300_v2  ;;  %v307_v7 = vld [vmem:[%s422_s1 + $0x34] ss:$8 sps:$4 sm:$0xff]   ;;  %v309_v8 = vld [vmem:[%s422_s1 + $0x30] ss:$8 sps:$4 sm:$0xff]   ;;  %v310_v9 = vld [vmem:[%s422_s1 + $0x44] ss:$8 sps:$4 sm:$0xff]  }
   0x4   :  { %132 = vmatprep.subr.bf16.mxu0 %v301_v3  ;;  %282 = vmatprep.subr.bf16.mxu1 %v301_v3  ;;  %v312_v10 = vld [vmem:[%s422_s1 + $0x40] ss:$8 sps:$4 sm:$0xff]   ;;  %v313_v11 = vld [vmem:[%s422_s1 + $0x54] ss:$8 sps:$4 sm:$0xff]   ;;  %v315_v12 = vld [vmem:[%s422_s1 + $0x50] ss:$8 sps:$4 sm:$0xff]  }
   0x5   :  { %v316_v13 = vld [vmem:[%s422_s1 + $0x64] ss:$8 sps:$4 sm:$0xff]   ;;  %v318_v14 = vld [vmem:[%s422_s1 + $0x60] ss:$8 sps:$4 sm:$0xff]   ;;  %v319_v15 = vld [vmem:[%s422_s1 + $0x74] ss:$8 sps:$4 sm:$0xff]  }
   0x6   :  { %v321_v16 = vld [vmem:[%s422_s1 + $0x70] ss:$8 sps:$4 sm:$0xff]   ;;  %v322_v17 = vld [vmem:[%s423_s0] sm:$0xff]   ;;  %v323_v18 = vld [vmem:[%s423_s0 + $0x8] sm:$0xff]   ;;  %v186_v20 = vshrl.u32 %v185_v19, 7 }
   0x7   :  { %133 = vmatpush1.bf16.msra.mxu0 %v303_v4  ;;  %290 = vmatpush1.bf16.msra.mxu1 %v303_v4  ;;  %v183_v22 = vld [vmem:[%s424_s2] sm:$0x3] }
   0x8   :  { %134 = vmatprep.subr.bf16.mxu0 %v304_v5  ;;  %283 = vmatprep.subr.bf16.mxu1 %v304_v5  ;;  %v187_v21 = vsub.s32 0, %v186_v20  ;;  %v191_v23 = vsub.s32 1, %v186_v20  ;;  %v203_v24 = vld [vmem:[%s425_s3] sm:$0x3] }
   0xa   :  { %v188_v25 = vrot.slane %v183_v22, %v187_v21  ;;  %v192_v26 = vrot.slane %v183_v22, %v191_v23  ;;  %v208_v27 = vrot.slane %v203_v24, %v187_v21  ;;  %v212_v30 = vrot.slane %v203_v24, %v191_v23 }
   0xb   :  { %135 = vmatpush1.bf16.msra.mxu0 %v306_v6  ;;  %291 = vmatpush1.bf16.msra.mxu1 %v306_v6 }
   0xc   :  { %136 = vmatprep.subr.bf16.mxu0 %v307_v7  ;;  %284 = vmatprep.subr.bf16.mxu1 %v307_v7 }
   0xf   :  { %137 = vmatpush1.bf16.msra.mxu0 %v309_v8  ;;  %292 = vmatpush1.bf16.msra.mxu1 %v309_v8 }
  0x10   :  { %138 = vmatprep.subr.bf16.mxu0 %v310_v9  ;;  %285 = vmatprep.subr.bf16.mxu1 %v310_v9 }
  0x13   :  { %139 = vmatpush1.bf16.msra.mxu0 %v312_v10  ;;  %293 = vmatpush1.bf16.msra.mxu1 %v312_v10 }
  0x14   :  { %140 = vmatprep.subr.bf16.mxu0 %v313_v11  ;;  %286 = vmatprep.subr.bf16.mxu1 %v313_v11 }
  0x17   :  { %141 = vmatpush1.bf16.msra.mxu0 %v315_v12  ;;  %294 = vmatpush1.bf16.msra.mxu1 %v315_v12 }
  0x18   :  { %142 = vmatprep.subr.bf16.mxu0 %v316_v13  ;;  %287 = vmatprep.subr.bf16.mxu1 %v316_v13 }
  0x1b   :  { %143 = vmatpush1.bf16.msra.mxu0 %v318_v14  ;;  %295 = vmatpush1.bf16.msra.mxu1 %v318_v14 }
  0x1c   :  { %144 = vmatprep.subr.bf16.mxu0 %v319_v15  ;;  %288 = vmatprep.subr.bf16.mxu1 %v319_v15 }
  0x1f   :  { %145 = vmatpush1.bf16.msra.mxu0 %v321_v16  ;;  %296 = vmatpush1.bf16.msra.mxu1 %v321_v16 }
  0x22   :  { %163 = vmatmul.mubr.bf16.vlgmr.msra.gmra.mrb[0].mxu0 %v322_v17  ;;  %173 = vmatmul.mubr.bf16.vlgmr.msra.gmra.mrb[0].mxu1 %v323_v18 }
  0xf5   :  { %v164_v28 = vpop.f32.mrb[0].mxu0  ;;  %v174_v29 = vpop.f32.mrb[0].mxu1 }
  0xf6   :  { %v195_v31 = vmul.f32 %v188_v25, %v164_v28  ;;  %v199_v32 = vmul.f32 %v188_v25, %v174_v29  ;;  %v166_v33 = vpop.f32.mrb[1].mxu0  ;;  %v176_v34 = vpop.f32.mrb[1].mxu1 }
  0xf7   :  { %v196_v35 = vmul.f32 %v192_v26, %v166_v33  ;;  %v200_v36 = vmul.f32 %v192_v26, %v176_v34  ;;  %v168_v37 = vpop.f32.mrb[2].mxu0  ;;  %v178_v38 = vpop.f32.mrb[2].mxu1 }
  0xf8   :  { %v215_v39 = vadd.f32 %v208_v27, %v195_v31  ;;  %v219_v40 = vadd.f32 %v208_v27, %v199_v32  ;;  %v197_v41 = vmul.f32 %v188_v25, %v168_v37  ;;  %v201_v42 = vmul.f32 %v188_v25, %v178_v38  ;;  %v170_v43 = vpop.f32.mrb[3].mxu0  ;;  %v180_v44 = vpop.f32.mrb[3].mxu1 }
  0xf9   :  { %v216_v45 = vadd.f32 %v212_v30, %v196_v35  ;;  %v220_v46 = vadd.f32 %v212_v30, %v200_v36  ;;  %v198_v47 = vmul.f32 %v192_v26, %v170_v43  ;;  %v202_v48 = vmul.f32 %v192_v26, %v180_v44 }
  0xfa   :  { %v217_v49 = vadd.f32 %v208_v27, %v197_v41  ;;  %v221_v50 = vadd.f32 %v208_v27, %v201_v42 }
  0xfb   :  { %v277_v51 = vpack.c.bf16 %v216_v45, %v215_v39  ;;  %v279_v52 = vpack.c.bf16 %v220_v46, %v219_v40  ;;  %v218_v53 = vadd.f32 %v212_v30, %v198_v47  ;;  %v222_v54 = vadd.f32 %v212_v30, %v202_v48 }
  0xfd   :  { %247 = vst [vmem:[%s426_s4] sm:$0xff] %v277_v51  ;;  %249 = vst [vmem:[%s426_s4 + $0x10] sm:$0xff] %v279_v52  ;;  %v278_v55 = vpack.c.bf16 %v218_v53, %v217_v49  ;;  %v280_v56 = vpack.c.bf16 %v222_v54, %v221_v50 }
  0xff   :  { %248 = vst [vmem:[%s426_s4 + $0x8] sm:$0xff] %v278_v55  ;;  %250 = vst [vmem:[%s426_s4 + $0x18] sm:$0xff] %v280_v56 }

// kernel: resnet50_forward.60
= control target key start
LH: loop header
LB: loop body
LE: loop exit
PB: predicated region body
PF: predicated region fallthrough
CT: control target
= control target key end

     0   :  { %s867_s15 = smov 0   ;;  %s869_s16 = smov 0   ;;  %s963_s0 = inlined_call_operand.vmem [shape: bf16[32,640], index: 0, kind: input, shape index: {}]   ;;  %s964_s1 = inlined_call_operand.vmem [shape: bf16[640,128], index: 1, kind: input, shape index: {}]   ;;  %s965_s2 = inlined_call_operand.vmem [shape: f32[1,128], index: 2, kind: input, shape index: {}]   ;;  %s966_s3 = inlined_call_operand.vmem [shape: f32[1,128], index: 3, kind: input, shape index: {}]   ;;  %s967_s4 = inlined_call_operand.vmem [shape: bf16[32,128], index: 4, kind: output, shape index: {}]  }
   0x1   :  { %s871_s17 = smov 0   ;;  %s873_s18 = smov 0  }
   0x2   :  { %s875_s19 = smov 0  }
   0x3 LB: > { %s26_s20 = sadd.s32 1, %s835_s18  ;;  %p49_p1 = scmp.ne.s32.totalorder %s827_s16, %s823_s15  ;;  %s839_s19 = sphi %s875_s19, %s14_s19   ;;  %s835_s18 = sphi %s873_s18, %s971_s18   ;;  %s831_s17 = sphi %s871_s17, %s970_s17   ;;  %s827_s16 = sphi %s869_s16, %s969_s16   ;;  %s823_s15 = sphi %s867_s15, %s968_s15  }
   0x4   : > { %p27_p0 = scmp.ge.s32.totalorder %s26_s20, 5  ;;  %p50_p2 = scmp.eq.s32.totalorder %s839_s19, 0 }
   0x5   : > { %s42_s22 = sadd.s32 1, %s827_s16  ;;  %p676_p5 = scmp.ge.s32.totalorder %s839_s19, 5 }
   0x6   : > { %s973_s20 = smov (%p27_p0, %s26_s20), 0  ;;  %p51_p3 = por %p50_p2, %p49_p1 }
   0x7   : > { %s38_s21 = ssub.s32 %s835_s18, %s973_s20  ;;  %195 = sbr.rel (%p676_p5) target bundleno = 21 (0x15), region = 24 }
   0x8   : > { %p40_p4 = scmp.eq.s32.totalorder %s38_s21, 0 }
   0xa   : > { %s902_s23 = scalar_select %p40_p4, %s827_s16, %s42_s22  }
   0xe   : > { %198 = sbr.rel (!%p51_p3) target bundleno = 21 (0x15), region = 28  ;;  %s200_s24 = sand.u32 (%p51_p3), 1, %s827_s16  }
   0xf   : > { %s678_s25 = sshll.u32 (%p51_p3), %s835_s18, 2  ;;  %s677_s26 = sshll.u32 (%p51_p3), %s200_s24, 4 }
  0x10   : > { %s207_s29 = scalar_lea.vmem (%p51_p3), %s963_s0, %s678_s25  ;;  %s202_s30 = scalar_lea.vmem (%p51_p3), [#allocation3], %s677_s26 }
  0x11   : > { %v223_v0 = vld [vmem:[%s207_s29] sm:$0xf] (%p51_p3)  ;;  %v225_v1 = vld [vmem:[%s207_s29 + $0x14] sm:$0xf] (%p51_p3)  ;;  %v227_v2 = vld [vmem:[%s207_s29 + $0x28] sm:$0xf] (%p51_p3) }
  0x12   : > { %224 = vst [vmem:[%s202_s30] sm:$0xf] (%p51_p3), %v223_v0  ;;  %226 = vst [vmem:[%s202_s30 + $0x4] sm:$0xf] (%p51_p3), %v225_v1  ;;  %v229_v3 = vld [vmem:[%s207_s29 + $0x3c] sm:$0xf] (%p51_p3) }
  0x13   : > { %228 = vst [vmem:[%s202_s30 + $0x8] sm:$0xf] (%p51_p3), %v227_v2  ;;  %230 = vst [vmem:[%s202_s30 + $0xc] sm:$0xf] (%p51_p3), %v229_v3 }
  0x15 PF: > { %p679_p6 = scmp.ge.s32.totalorder %s839_s19, 1  ;;  %p272_p7 = scmp.lt.s32.totalorder %s839_s19, 6 }
  0x17   : > { %p273_p8 = pnand %p679_p6, %p272_p7 }
  0x18   : > { %s279_s5 = sand.u32 (!%p273_p8), 1, %s823_s15   ;;  %s681_s6 = sshll.u32 (!%p273_p8), %s831_s17, 4 }
  0x19   : > { %276 = sbr.rel (%p273_p8) target bundleno = 306 (0x132), region = 73  ;;  %s914_s7 = sshll.u32 (!%p273_p8), %s279_s5, 4 }
  0x1a   : > { %p323_p9 = scmp.lt.s32.totalorder (!%p273_p8), %s681_s6, 79  ;;  %s281_s12 = scalar_lea.vmem (!%p273_p8), [#allocation3], %s914_s7 }
  0x1b   : > { %p683_p10 = scmp.ne.s32.totalorder (!%p273_p8), %s831_s17, 0 }
  0x20   : > { %s975_s6 = smov (!%p323_p9, %s681_s6), 79  ;;  %350 = sbr.rel (%p683_p10) target bundleno = 39 (0x27), region = 81 }
  0x21   : > { %s682_s8 = sshll.u32 %s975_s6, 2  ;;  %v841_v4 = vmov (!%p683_p10), 0.0  }
  0x22   : > { %s919_s11 = scalar_lea.vmem %s964_s1, %s682_s8  ;;  %351 = vst [vmem:[#allocation2] sm:$0xff] (!%p683_p10), %v841_v4  ;;  %352 = vst [vmem:[#allocation2 + $0x8] sm:$0xff] (!%p683_p10), %v841_v4 }
  0x23   : > { %353 = vst [vmem:[#allocation2 + $0x10] sm:$0xff] (!%p683_p10), %v841_v4  ;;  %354 = vst [vmem:[#allocation2 + $0x18] sm:$0xff] (!%p683_p10), %v841_v4 }
  0x27 PF: > { %v791_v5 = vld [vmem:[%s919_s11] sm:$0xff]   ;;  %v792_v6 = vld [vmem:[%s919_s11 + $0x8] sm:$0xff]   ;;  %v793_v7 = vld [vmem:[%s919_s11 + $0x10] sm:$0xff]   ;;  %p694_p11 = scmp.ne.s32.totalorder %s831_s17, 4 }
  0x28   : > { %730 = vmatprep.subr.bf16.mxu0 %v791_v5  ;;  %v794_v8 = vld [vmem:[%s919_s11 + $0x18] sm:$0xff]   ;;  %v799_v9 = vld [vmem:[%s281_s12] sm:$0xff]   ;;  %v796_v11 = vld [vmem:[%s919_s11 + $0x28] sm:$0xff]  }
  0x29   : > { %731 = vmatpush3.bf16.msra.mxu0 %v791_v5  ;;  %746 = vmatprep.mubr.bf16.mxu0 %v799_v9  ;;  %v795_v10 = vld [vmem:[%s919_s11 + $0x20] sm:$0xff]   ;;  %v797_v12 = vld [vmem:[%s919_s11 + $0x30] sm:$0xff]   ;;  %v798_v13 = vld [vmem:[%s919_s11 + $0x38] sm:$0xff]  }
  0x2a   : > { %732 = vmatprep.subr.bf16.mxu0 %v792_v6  ;;  %v800_v14 = vld [vmem:[%s281_s12 + $0x8] sm:$0xff]   ;;  %v357_v15 = vld [vmem:[#allocation2 + $0x10] sm:$0xff]  ;;  %v355_v16 = vld [vmem:[#allocation2] sm:$0xff] }
  0x2b   : > { %v358_v18 = vld [vmem:[#allocation2 + $0x18] sm:$0xff]  ;;  %v356_v21 = vld [vmem:[#allocation2 + $0x8] sm:$0xff]  ;;  %v695_v29 = vld [vmem:[%s965_s2] ss:$0 sm:$0xff] (!%p694_p11) }
  0x2c   : > { %v696_v32 = vld [vmem:[%s966_s3] ss:$0 sm:$0xff] (!%p694_p11) }
  0x2d   : > { %733 = vmatpush3.bf16.msra.mxu0 %v792_v6 }
  0x2e   : > { %734 = vmatprep.subr.bf16.mxu0 %v793_v7 }
  0x31   : > { %735 = vmatpush3.bf16.msra.mxu0 %v793_v7 }
  0x32   : > { %736 = vmatprep.subr.bf16.mxu0 %v794_v8 }
  0x35   : > { %737 = vmatpush3.bf16.msra.mxu0 %v794_v8 }
  0x36   : > { %738 = vmatprep.subr.bf16.mxu0 %v795_v10 }
  0x39   : > { %739 = vmatpush3.bf16.msra.mxu0 %v795_v10 }
  0x3a   : > { %740 = vmatprep.subr.bf16.mxu0 %v796_v11 }
  0x3d   : > { %741 = vmatpush3.bf16.msra.mxu0 %v796_v11 }
  0x3e   : > { %742 = vmatprep.subr.bf16.mxu0 %v797_v12 }
  0x41   : > { %743 = vmatpush3.bf16.msra.mxu0 %v797_v12 }
  0x42   : > { %744 = vmatprep.subr.bf16.mxu0 %v798_v13 }
  0x45   : > { %745 = vmatpush3.bf16.msra.mxu0 %v798_v13 }
  0x48   : > { %747 = vmatmul.mubr.bf16.vlgmr.msra.gmra.mrb[0].mxu0 %v800_v14 }
 0x11b   : > { %v748_v17 = vpop.f32.mrb[0].mxu0  ;;  %499 = sbr.rel (%p694_p11) target bundleno = 306 (0x132), region = 85 }
 0x11c   : > { %v490_v19 = vadd.f32 %v748_v17, %v357_v15  ;;  %v473_v20 = vpop.f32.mrb[1].mxu0 }
 0x11d   : > { %v488_v22 = vadd.f32 %v473_v20, %v355_v16  ;;  %v749_v23 = vpop.f32.mrb[2].mxu0 }
 0x11e   : > { %494 = vst [vmem:[#allocation2 + $0x10] sm:$0xff] %v490_v19  ;;  %v491_v24 = vadd.f32 %v749_v23, %v358_v18  ;;  %v476_v25 = vpop.f32.mrb[3].mxu0 }
 0x11f   : > { %492 = vst [vmem:[#allocation2] sm:$0xff] %v488_v22  ;;  %v489_v26 = vadd.f32 %v476_v25, %v356_v21 }
 0x120   : > { %495 = vst [vmem:[#allocation2 + $0x18] sm:$0xff] %v491_v24 }
 0x121   : > { %493 = vst [vmem:[#allocation2 + $0x8] sm:$0xff] %v489_v26 }
 0x125   : > { %v502_v33 = vld [vmem:[#allocation2 + $0x10] sm:$0xff] }
 0x126   : > { %v500_v27 = vld [vmem:[#allocation2] sm:$0xff]  ;;  %v513_v35 = vmul.f32 %v695_v29, %v502_v33 }
 0x127   : > { %v511_v30 = vmul.f32 %v695_v29, %v500_v27  ;;  %v503_v34 = vld [vmem:[#allocation2 + $0x18] sm:$0xff] }
 0x128   : > { %v501_v28 = vld [vmem:[#allocation2 + $0x8] sm:$0xff]  ;;  %v514_v36 = vmul.f32 %v695_v29, %v503_v34  ;;  %v524_v39 = vadd.f32 %v696_v32, %v513_v35 }
 0x129   : > { %v512_v31 = vmul.f32 %v695_v29, %v501_v28  ;;  %v522_v37 = vadd.f32 %v696_v32, %v511_v30 }
 0x12a   : > { %v525_v40 = vadd.f32 %v696_v32, %v514_v36  ;;  %v528_v43 = vmax.f32 %v524_v39, 0.0 }
 0x12b   : > { %v523_v38 = vadd.f32 %v696_v32, %v512_v31  ;;  %v526_v41 = vmax.f32 %v522_v37, 0.0 }
 0x12c   : > { %v529_v44 = vmax.f32 %v525_v40, 0.0 }
 0x12d   : > { %v527_v42 = vmax.f32 %v523_v38, 0.0 }
 0x12e   : > { %v717_v46 = vpack.c.bf16 %v529_v44, %v528_v43 }
 0x12f   : > { %v712_v45 = vpack.c.bf16 %v527_v42, %v526_v41 }
 0x130   : > { %719 = vst [vmem:[%s967_s4 + $0x8] sm:$0xff] %v717_v46  }
 0x131   : > { %713 = vst [vmem:[%s967_s4] sm:$0xff] %v712_v45  }
 0x132 PF: > { %s14_s19 = sadd.s32 1, %s839_s19   ;;  %s968_s15 = smov %s827_s16 }
 0x133   : > { %p11_p12 = scmp.ge.s32.totalorder %s14_s19, 7   ;;  %s969_s16 = smov %s902_s23 }
 0x134   : > { %s970_s17 = smov %s835_s18  ;;  %s971_s18 = smov %s973_s20 }
 0x135   :  { %13 = sbr.rel (!%p11_p12) target bundleno = 3 (0x3), region = 129 }

// kernel: resnet50_forward.62
= control target key start
LH: loop header
LB: loop body
LE: loop exit
PB: predicated region body
PF: predicated region fallthrough
CT: control target
= control target key end

     0   :  { %s473_s1 = inlined_call_operand.vmem [shape: bf16[256,128], index: 1, kind: input, shape index: {}]   ;;  %s474_s0 = inlined_call_operand.vmem [shape: bf16[32,256], index: 0, kind: input, shape index: {}]   ;;  %s475_s2 = inlined_call_operand.vmem [shape: f32[1,128], index: 2, kind: input, shape index: {}]   ;;  %s476_s3 = inlined_call_operand.vmem [shape: f32[1,128], index: 3, kind: input, shape index: {}]   ;;  %s477_s4 = inlined_call_operand.vmem [shape: bf16[32,128], index: 4, kind: output, shape index: {}]  }
   0x1   :  { %v354_v0 = vld [vmem:[%s473_s1 + $0x40] sm:$0xff]   ;;  %v356_v2 = vld [vmem:[%s473_s1 + $0x48] sm:$0xff]   ;;  %v358_v4 = vld [vmem:[%s473_s1 + $0x50] sm:$0xff]  }
   0x2   :  { %v355_v1 = vld [vmem:[%s473_s1] sm:$0xff]   ;;  %310 = vmatprep.subr.bf16.mxu0 %v354_v0  ;;  %338 = vmatprep.subr.bf16.mxu1 %v354_v0  ;;  %v357_v3 = vld [vmem:[%s473_s1 + $0x8] sm:$0xff]   ;;  %v359_v5 = vld [vmem:[%s473_s1 + $0x10] sm:$0xff]  }
   0x3   :  { %311 = vmatpush3.bf16.msra.mxu0 %v355_v1  ;;  %346 = vmatpush3.bf16.msra.mxu1 %v355_v1  ;;  %v360_v6 = vld [vmem:[%s473_s1 + $0x58] sm:$0xff]   ;;  %v362_v8 = vld [vmem:[%s473_s1 + $0x60] sm:$0xff]   ;;  %v364_v10 = vld [vmem:[%s473_s1 + $0x68] sm:$0xff]  }
   0x4   :  { %312 = vmatprep.subr.bf16.mxu0 %v356_v2  ;;  %339 = vmatprep.subr.bf16.mxu1 %v356_v2  ;;  %v361_v7 = vld [vmem:[%s473_s1 + $0x18] sm:$0xff]   ;;  %v363_v9 = vld [vmem:[%s473_s1 + $0x20] sm:$0xff]   ;;  %v365_v13 = vld [vmem:[%s473_s1 + $0x28] sm:$0xff]  }
   0x5   :  { %v372_v11 = vld [vmem:[%s474_s0 + $0x4] ss:$8 sps:$4 sm:$0xff]   ;;  %v375_v12 = vld [vmem:[%s474_s0 + $0x14] ss:$8 sps:$4 sm:$0xff]   ;;  %v370_v18 = vld [vmem:[%s474_s0] ss:$8 sps:$4 sm:$0xff]  }
   0x6   :  { %v366_v14 = vld [vmem:[%s473_s1 + $0x70] sm:$0xff]   ;;  %202 = vmatprep.mubr.bf16.mxu0 %v372_v11  ;;  %210 = vmatprep.mubr.bf16.mxu1 %v375_v12  ;;  %v368_v16 = vld [vmem:[%s473_s1 + $0x78] sm:$0xff]   ;;  %v289_v23 = vld [vmem:[%s475_s2] ss:$0 sm:$0xff] }
   0x7   :  { %313 = vmatpush3.bf16.msra.mxu0 %v357_v3  ;;  %347 = vmatpush3.bf16.msra.mxu1 %v357_v3  ;;  %v367_v15 = vld [vmem:[%s473_s1 + $0x30] sm:$0xff]   ;;  %v369_v17 = vld [vmem:[%s473_s1 + $0x38] sm:$0xff]   ;;  %v290_v29 = vld [vmem:[%s476_s3] ss:$0 sm:$0xff] }
   0x8   :  { %314 = vmatprep.subr.bf16.mxu0 %v358_v4  ;;  %340 = vmatprep.subr.bf16.mxu1 %v358_v4  ;;  %v373_v19 = vld [vmem:[%s474_s0 + $0x10] ss:$8 sps:$4 sm:$0xff]  }
   0xb   :  { %315 = vmatpush3.bf16.msra.mxu0 %v359_v5  ;;  %348 = vmatpush3.bf16.msra.mxu1 %v359_v5 }
   0xc   :  { %316 = vmatprep.subr.bf16.mxu0 %v360_v6  ;;  %341 = vmatprep.subr.bf16.mxu1 %v360_v6 }
   0xf   :  { %317 = vmatpush3.bf16.msra.mxu0 %v361_v7  ;;  %349 = vmatpush3.bf16.msra.mxu1 %v361_v7 }
  0x10   :  { %318 = vmatprep.subr.bf16.mxu0 %v362_v8  ;;  %342 = vmatprep.subr.bf16.mxu1 %v362_v8 }
  0x13   :  { %319 = vmatpush3.bf16.msra.mxu0 %v363_v9  ;;  %350 = vmatpush3.bf16.msra.mxu1 %v363_v9 }
  0x14   :  { %320 = vmatprep.subr.bf16.mxu0 %v364_v10  ;;  %343 = vmatprep.subr.bf16.mxu1 %v364_v10 }
  0x17   :  { %321 = vmatpush3.bf16.msra.mxu0 %v365_v13  ;;  %351 = vmatpush3.bf16.msra.mxu1 %v365_v13 }
  0x18   :  { %322 = vmatprep.subr.bf16.mxu0 %v366_v14  ;;  %344 = vmatprep.subr.bf16.mxu1 %v366_v14 }
  0x1b   :  { %323 = vmatpush3.bf16.msra.mxu0 %v367_v15  ;;  %352 = vmatpush3.bf16.msra.mxu1 %v367_v15 }
  0x1c   :  { %324 = vmatprep.subr.bf16.mxu0 %v368_v16  ;;  %345 = vmatprep.subr.bf16.mxu1 %v368_v16 }
  0x1f   :  { %325 = vmatpush3.bf16.msra.mxu0 %v369_v17  ;;  %353 = vmatpush3.bf16.msra.mxu1 %v369_v17 }
  0x22   :  { %203 = vmatmul.mubr.bf16.vlgmr.msra.gmra.mrb[0].mxu0 %v370_v18  ;;  %211 = vmatmul.mubr.bf16.vlgmr.msra.gmra.mrb[0].mxu1 %v373_v19 }
  0xf5   :  { %v326_v20 = vpop.f32.mrb[0].mxu0  ;;  %v332_v21 = vpop.f32.mrb[0].mxu1 }
  0xf6   :  { %v327_v22 = vpop.f32.mrb[1].mxu0  ;;  %v333_v24 = vpop.f32.mrb[1].mxu1 }
  0xf7   :  { %v328_v25 = vadd.f32 %v327_v22, %v326_v20  ;;  %v334_v26 = vadd.f32 %v333_v24, %v332_v21  ;;  %v329_v27 = vpop.f32.mrb[2].mxu0  ;;  %v335_v28 = vpop.f32.mrb[2].mxu1 }
  0xf8   :  { %v330_v30 = vpop.f32.mrb[3].mxu0  ;;  %v336_v31 = vpop.f32.mrb[3].mxu1 }
  0xf9   :  { %v226_v32 = vmul.f32 %v328_v25, %v289_v23  ;;  %v228_v33 = vmul.f32 %v334_v26, %v289_v23  ;;  %v331_v34 = vadd.f32 %v330_v30, %v329_v27  ;;  %v337_v35 = vadd.f32 %v336_v31, %v335_v28 }
  0xfb   :  { %v237_v36 = vadd.f32 %v290_v29, %v226_v32  ;;  %v239_v37 = vadd.f32 %v290_v29, %v228_v33  ;;  %v227_v38 = vmul.f32 %v331_v34, %v289_v23  ;;  %v229_v39 = vmul.f32 %v337_v35, %v289_v23 }
  0xfd   :  { %v238_v40 = vadd.f32 %v290_v29, %v227_v38  ;;  %v240_v41 = vadd.f32 %v290_v29, %v229_v39  ;;  %v241_v42 = vmax.f32 %v237_v36, 0.0  ;;  %v243_v43 = vmax.f32 %v239_v37, 0.0 }
  0xff   :  { %v242_v44 = vmax.f32 %v238_v40, 0.0  ;;  %v244_v45 = vmax.f32 %v240_v41, 0.0 }
 0x101   :  { %v302_v46 = vpack.c.bf16 %v242_v44, %v241_v42  ;;  %v307_v47 = vpack.c.bf16 %v244_v45, %v243_v43 }
 0x103   :  { %303 = vst [vmem:[%s477_s4] sm:$0xff] %v302_v46   ;;  %309 = vst [vmem:[%s477_s4 + $0x8] sm:$0xff] %v307_v47  }

// kernel: resnet50_forward.70
= control target key start
LH: loop header
LB: loop body
LE: loop exit
PB: predicated region body
PF: predicated region fallthrough
CT: control target
= control target key end

     0   :  { %s934_s15 = smov 0   ;;  %s936_s16 = smov 0   ;;  %s1012_s0 = inlined_call_operand.vmem [shape: bf16[8,1152], index: 0, kind: input, shape index: {}]   ;;  %s1013_s1 = inlined_call_operand.vmem [shape: bf16[1152,128], index: 1, kind: input, shape index: {}]   ;;  %s1014_s2 = inlined_call_operand.vmem [shape: f32[1,128], index: 2, kind: input, shape index: {}]   ;;  %s1015_s3 = inlined_call_operand.vmem [shape: f32[1,128], index: 3, kind: input, shape index: {}]   ;;  %s1016_s4 = inlined_call_operand.vmem [shape: bf16[8,128], index: 4, kind: output, shape index: {}]  }
   0x1   :  { %s938_s17 = smov 0  }
   0x2 LB: > { %s26_s18 = sadd.s32 1, %s900_s16  ;;  %p740_p0 = scmp.ge.s32.totalorder %s904_s17, 1  ;;  %s904_s17 = sphi %s938_s17, %s14_s17   ;;  %s900_s16 = sphi %s936_s16, %s1018_s16   ;;  %s896_s15 = sphi %s934_s15, %s1017_s15  }
   0x3   : > { %p27_p1 = scmp.ge.s32.totalorder %s26_s18, 3  ;;  %p222_p2 = scmp.lt.s32.totalorder %s904_s17, 4 }
   0x5   : > { %s1020_s18 = smov (%p27_p1, %s26_s18), 0  ;;  %p223_p3 = pnand %p740_p0, %p222_p2 }
   0x6   : > { %s268_s19 = smul.u32 (!%p223_p3), 3, %s896_s15  ;;  %p743_p6 = scmp.ne.s32.totalorder (!%p223_p3), %s896_s15, 0 }
   0x7   : > { %226 = sbr.rel (%p223_p3) target bundleno = 293 (0x125), region = 36 }
   0x8   : > { %s278_s20 = smul.u32 (!%p223_p3), 48, %s896_s15  ;;  %p271_p4 = scmp.lt.s32.totalorder (!%p223_p3), %s268_s19, 8 }
   0xa   : > { %p279_p5 = scmp.lt.s32.totalorder (!%p223_p3), %s278_s20, 143 }
   0xe   : > { %s1022_s19 = smov (!%p271_p4, %s268_s19), 8  ;;  %s1024_s20 = smov (!%p279_p5, %s278_s20), 143 }
   0xf   : > { %s741_s21 = sshll.u32 %s1022_s19, 2  ;;  %s742_s25 = sshll.u32 %s1024_s20, 2  ;;  %v906_v0 = vmov (!%p743_p6), 0.0  }
  0x10   : > { %s959_s24 = scalar_lea.vmem %s1012_s0, %s741_s21  ;;  %s964_s28 = scalar_lea.vmem %s1013_s1, %s742_s25  ;;  %305 = vst [vmem:[#allocation2] sm:$0xff] (!%p743_p6), %v906_v0 }
  0x11   : > { %304 = sbr.rel (%p743_p6) target bundleno = 24 (0x18), region = 40 }
  0x18 PF: > { %v855_v1 = vld [vmem:[%s964_s28 + $0x40] sm:$0xff]   ;;  %v907_v2 = vmov 0.0   ;;  %vm908_vm0 = vmmov 0   ;;  %v858_v5 = vld [vmem:[%s964_s28 + $0x48] sm:$0xff]   ;;  %v861_v8 = vld [vmem:[%s964_s28 + $0x50] sm:$0xff]   ;;  %p771_p7 = scmp.ne.s32.totalorder %s896_s15, 2 }
  0x19   : > { %808 = vmatprep.subr.bf16.mxu1 %v907_v2  ;;  %v856_v3 = vld [vmem:[%s964_s28] sm:$0xff]   ;;  %777 = vmatprep.subr.bf16.mxu0 %v855_v1  ;;  %v859_v6 = vld [vmem:[%s964_s28 + $0x8] sm:$0xff]   ;;  %v862_v9 = vld [vmem:[%s964_s28 + $0x10] sm:$0xff]  }
  0x1a   : > { %v857_v4 = vld [vmem:[%s964_s28 + $0x80] sm:$0xff]   ;;  %824 = vmatprep.mubr.msk.bf16.mxu1 %vm908_vm0, %v907_v2  ;;  %778 = vmatpush3.bf16.msra.mxu0 %v856_v3  ;;  %v860_v7 = vld [vmem:[%s964_s28 + $0x88] sm:$0xff]   ;;  %v863_v10 = vld [vmem:[%s964_s28 + $0x90] sm:$0xff]  }
  0x1b   : > { %809 = vmatpush3.bf16.msra.mxu1 %v857_v4  ;;  %779 = vmatprep.subr.bf16.mxu0 %v858_v5  ;;  %v864_v11 = vld [vmem:[%s964_s28 + $0x58] sm:$0xff]   ;;  %v867_v14 = vld [vmem:[%s964_s28 + $0x60] sm:$0xff]   ;;  %v870_v17 = vld [vmem:[%s964_s28 + $0x68] sm:$0xff]  }
  0x1c   : > { %810 = vmatprep.subr.bf16.mxu1 %v907_v2  ;;  %v865_v12 = vld [vmem:[%s964_s28 + $0x18] sm:$0xff]   ;;  %v868_v15 = vld [vmem:[%s964_s28 + $0x20] sm:$0xff]   ;;  %v871_v18 = vld [vmem:[%s964_s28 + $0x28] sm:$0xff]  }
  0x1d   : > { %v866_v13 = vld [vmem:[%s964_s28 + $0x98] sm:$0xff]   ;;  %v869_v16 = vld [vmem:[%s964_s28 + $0xa0] sm:$0xff]   ;;  %v872_v19 = vld [vmem:[%s964_s28 + $0xa8] sm:$0xff]  }
  0x1e   : > { %780 = vmatpush3.bf16.msra.mxu0 %v859_v6  ;;  %v873_v20 = vld [vmem:[%s964_s28 + $0x70] sm:$0xff]   ;;  %v876_v23 = vld [vmem:[%s964_s28 + $0x78] sm:$0xff]   ;;  %v307_v24 = vld [vmem:[%s959_s24] sm:$0xff] }
  0x1f   : > { %811 = vmatpush3.bf16.msra.mxu1 %v860_v7  ;;  %781 = vmatprep.subr.bf16.mxu0 %v861_v8  ;;  %v874_v21 = vld [vmem:[%s964_s28 + $0x30] sm:$0xff]   ;;  %v745_v25 = vcombine.high %v307_v24, %v307_v24  ;;  %v877_v26 = vld [vmem:[%s964_s28 + $0x38] sm:$0xff]   ;;  %v744_v28 = vcombine.low %v307_v24, %v307_v24  ;;  %v881_v29 = vld [vmem:[%s959_s24 + $0x8] ss:$0 sps:$4 sm:$0xff]  }
  0x20   : > { %812 = vmatprep.subr.bf16.mxu1 %v907_v2  ;;  %v875_v22 = vld [vmem:[%s964_s28 + $0xb0] sm:$0xff]   ;;  %v878_v27 = vld [vmem:[%s964_s28 + $0xb8] sm:$0xff]   ;;  %v306_v36 = vld [vmem:[#allocation2] sm:$0xff] }
  0x21   : > { %544 = vmatprep.mubr.bf16.mxu0 %v745_v25  ;;  %v772_v43 = vld [vmem:[%s1014_s2] ss:$0 sm:$0xff] (!%p771_p7) }
  0x22   : > { %782 = vmatpush3.bf16.msra.mxu0 %v862_v9  ;;  %v773_v44 = vld [vmem:[%s1015_s3] ss:$0 sm:$0xff] (!%p771_p7) }
  0x23   : > { %813 = vmatpush3.bf16.msra.mxu1 %v863_v10  ;;  %783 = vmatprep.subr.bf16.mxu0 %v864_v11 }
  0x24   : > { %814 = vmatprep.subr.bf16.mxu1 %v907_v2 }
  0x26   : > { %784 = vmatpush3.bf16.msra.mxu0 %v865_v12 }
  0x27   : > { %815 = vmatpush3.bf16.msra.mxu1 %v866_v13  ;;  %785 = vmatprep.subr.bf16.mxu0 %v867_v14 }
  0x28   : > { %816 = vmatprep.subr.bf16.mxu1 %v907_v2 }
  0x2a   : > { %786 = vmatpush3.bf16.msra.mxu0 %v868_v15 }
  0x2b   : > { %817 = vmatpush3.bf16.msra.mxu1 %v869_v16  ;;  %787 = vmatprep.subr.bf16.mxu0 %v870_v17 }
  0x2c   : > { %818 = vmatprep.subr.bf16.mxu1 %v907_v2 }
  0x2e   : > { %788 = vmatpush3.bf16.msra.mxu0 %v871_v18 }
  0x2f   : > { %819 = vmatpush3.bf16.msra.mxu1 %v872_v19  ;;  %789 = vmatprep.subr.bf16.mxu0 %v873_v20 }
  0x30   : > { %820 = vmatprep.subr.bf16.mxu1 %v907_v2 }
  0x32   : > { %790 = vmatpush3.bf16.msra.mxu0 %v874_v21 }
  0x33   : > { %821 = vmatpush3.bf16.msra.mxu1 %v875_v22  ;;  %791 = vmatprep.subr.bf16.mxu0 %v876_v23 }
  0x34   : > { %822 = vmatprep.subr.bf16.mxu1 %v907_v2 }
  0x36   : > { %792 = vmatpush3.bf16.msra.mxu0 %v877_v26 }
  0x37   : > { %823 = vmatpush3.bf16.msra.mxu1 %v878_v27 }
  0x39   : > { %545 = vmatmul.mubr.bf16.vlgmr.msra.gmra.mrb[0].mxu0 %v744_v28 }
  0x3a   : > { %825 = vmatmul.mubr.bf16.vlgmr.msra.gmra.mrb[0].mxu1 %v881_v29 }
 0x10c   : > { %v793_v30 = vpop.f32.mrb[0].mxu0 }
 0x10d   : > { %v586_v31 = vpop.f32.mrb[0].mxu1  ;;  %v794_v32 = vpop.f32.mrb[1].mxu0 }
 0x10e   : > { %v795_v33 = vadd.f32 %v794_v32, %v793_v30  ;;  %v826_v34 = vpop.f32.mrb[1].mxu1  ;;  %v796_v35 = vpop.f32.mrb[2].mxu0  ;;  %597 = sbr.rel (%p771_p7) target bundleno = 293 (0x125), region = 44 }
 0x10f   : > { %v589_v37 = vpop.f32.mrb[2].mxu1  ;;  %v797_v38 = vpop.f32.mrb[3].mxu0 }
 0x110   : > { %v587_v39 = vadd.f32 %v795_v33, %v586_v31  ;;  %v827_v40 = vpop.f32.mrb[3].mxu1 }
 0x112   : > { %v592_v41 = vadd.f32 %v587_v39, %v306_v36 }
 0x114   : > { %593 = vst [vmem:[#allocation2] sm:$0xff] %v592_v41 }
 0x11b   : > { %v598_v42 = vld [vmem:[#allocation2] sm:$0xff] }
 0x11c   : > { %v606_v45 = vmul.f32 %v772_v43, %v598_v42 }
 0x11e   : > { %v614_v46 = vadd.f32 %v773_v44, %v606_v45 }
 0x120   : > { %v615_v47 = vmax.f32 %v614_v46, 0.0 }
 0x122   : > { %v616_v48 = vpack.c.bf16 %v615_v47, %v615_v47 }
 0x124   : > { %617 = vst [vmem:[%s1016_s4] sm:$0xf] %v616_v48 }
 0x125 PF: > { %s14_s17 = sadd.s32 1, %s904_s17   ;;  %s1017_s15 = smov %s900_s16 }
 0x126   : > { %p11_p8 = scmp.ge.s32.totalorder %s14_s17, 5   ;;  %s1018_s16 = smov %s1020_s18 }
 0x128   :  { %13 = sbr.rel (!%p11_p8) target bundleno = 2 (0x2), region = 83 }

// kernel: resnet50_forward.68
= control target key start
LH: loop header
LB: loop body
LE: loop exit
PB: predicated region body
PF: predicated region fallthrough
CT: control target
= control target key end

     0   :  { %s1045_s15 = smov 0   ;;  %s1047_s16 = smov 0   ;;  %s1227_s0 = inlined_call_operand.vmem [shape: bf16[8,256], index: 0, kind: input, shape index: {}]   ;;  %s1228_s1 = inlined_call_operand.vmem [shape: bf16[256,512], index: 1, kind: input, shape index: {}]   ;;  %s1229_s2 = inlined_call_operand.vmem [shape: f32[1,512], index: 2, kind: input, shape index: {}]   ;;  %s1230_s3 = inlined_call_operand.vmem [shape: f32[1,512], index: 3, kind: input, shape index: {}]   ;;  %s1231_s4 = inlined_call_operand.vmem [shape: bf16[8,512], index: 4, kind: output, shape index: {}]  }
   0x1   :  { %s1049_s17 = smov 0   ;;  %s1051_s18 = smov 0  }
   0x2   :  { %s1053_s19 = smov 0  }
   0x3 LB: > { %s23_s20 = sadd.s32 1, %s1014_s18  ;;  %p66_p1 = scmp.ne.s32.totalorder %s1006_s16, %s1002_s15  ;;  %s1018_s19 = sphi %s1053_s19, %s14_s19   ;;  %s1014_s18 = sphi %s1051_s18, %s1235_s18   ;;  %s1010_s17 = sphi %s1049_s17, %s1234_s17   ;;  %s1006_s16 = sphi %s1047_s16, %s1233_s16   ;;  %s1002_s15 = sphi %s1045_s15, %s1232_s15  }
   0x4   : > { %p24_p0 = scmp.ge.s32.totalorder %s23_s20, 2  ;;  %p67_p2 = scmp.eq.s32.totalorder %s1018_s19, 0 }
   0x5   : > { %s59_s22 = sadd.s32 1, %s1006_s16  ;;  %p841_p5 = scmp.ge.s32.totalorder %s1018_s19, 2 }
   0x6   : > { %s1237_s20 = smov (%p24_p0, %s23_s20), 0  ;;  %p68_p3 = por %p67_p2, %p66_p1 }
   0x7   : > { %s56_s21 = ssub.s32 %s1014_s18, %s1237_s20  ;;  %180 = sbr.rel (%p841_p5) target bundleno = 34 (0x22), region = 20 }
   0x8   : > { %p57_p4 = scmp.eq.s32.totalorder %s56_s21, 0 }
   0xa   : > { %s1080_s23 = scalar_select %p57_p4, %s1006_s16, %s59_s22  }
   0xe   : > { %183 = sbr.rel (!%p68_p3) target bundleno = 34 (0x22), region = 24  ;;  %s185_s24 = sand.u32 (%p68_p3), 1, %s1006_s16  }
   0xf   : > { %s888_s25 = sshll.u32 (%p68_p3), %s1014_s18, 3  ;;  %s842_s26 = sshll.u32 (%p68_p3), %s185_s24, 8 }
  0x10   : > { %s1088_s29 = scalar_lea.vmem (%p68_p3), %s1228_s1, %s888_s25  ;;  %s1093_s30 = scalar_lea.vmem (%p68_p3), [#allocation2], %s842_s26 }
  0x11   : > { %v280_v0 = vld [vmem:[%s1088_s29] sm:$0xff] (%p68_p3)  ;;  %v282_v1 = vld [vmem:[%s1088_s29 + $0x10] sm:$0xff] (%p68_p3) }
  0x12   : > { %v284_v2 = vld [vmem:[%s1088_s29 + $0x20] sm:$0xff] (%p68_p3)  ;;  %281 = vst [vmem:[%s1093_s30] sm:$0xff] (%p68_p3), %v280_v0  ;;  %283 = vst [vmem:[%s1093_s30 + $0x8] sm:$0xff] (%p68_p3), %v282_v1  ;;  %v286_v3 = vld [vmem:[%s1088_s29 + $0x30] sm:$0xff] (%p68_p3) }
  0x13   : > { %285 = vst [vmem:[%s1093_s30 + $0x10] sm:$0xff] (%p68_p3), %v284_v2  ;;  %v288_v4 = vld [vmem:[%s1088_s29 + $0x40] sm:$0xff] (%p68_p3)  ;;  %v290_v5 = vld [vmem:[%s1088_s29 + $0x50] sm:$0xff] (%p68_p3)  ;;  %287 = vst [vmem:[%s1093_s30 + $0x18] sm:$0xff] (%p68_p3), %v286_v3 }
  0x14   : > { %289 = vst [vmem:[%s1093_s30 + $0x20] sm:$0xff] (%p68_p3), %v288_v4  ;;  %291 = vst [vmem:[%s1093_s30 + $0x28] sm:$0xff] (%p68_p3), %v290_v5  ;;  %v292_v6 = vld [vmem:[%s1088_s29 + $0x60] sm:$0xff] (%p68_p3)  ;;  %v294_v7 = vld [vmem:[%s1088_s29 + $0x70] sm:$0xff] (%p68_p3) }
  0x15   : > { %v296_v8 = vld [vmem:[%s1088_s29 + $0x80] sm:$0xff]  ;;  %293 = vst [vmem:[%s1093_s30 + $0x30] sm:$0xff] %v292_v6  ;;  %295 = vst [vmem:[%s1093_s30 + $0x38] sm:$0xff] %v294_v7  ;;  %v298_v9 = vld [vmem:[%s1088_s29 + $0x90] sm:$0xff] }
  0x16   : > { %297 = vst [vmem:[%s1093_s30 + $0x40] sm:$0xff] %v296_v8  ;;  %v300_v10 = vld [vmem:[%s1088_s29 + $0xa0] sm:$0xff]  ;;  %v302_v11 = vld [vmem:[%s1088_s29 + $0xb0] sm:$0xff]  ;;  %299 = vst [vmem:[%s1093_s30 + $0x48] sm:$0xff] %v298_v9 }
  0x17   : > { %301 = vst [vmem:[%s1093_s30 + $0x50] sm:$0xff] %v300_v10  ;;  %303 = vst [vmem:[%s1093_s30 + $0x58] sm:$0xff] %v302_v11  ;;  %v304_v12 = vld [vmem:[%s1088_s29 + $0xc0] sm:$0xff]  ;;  %v306_v13 = vld [vmem:[%s1088_s29 + $0xd0] sm:$0xff] }
  0x18   : > { %v308_v14 = vld [vmem:[%s1088_s29 + $0xe0] sm:$0xff]  ;;  %305 = vst [vmem:[%s1093_s30 + $0x60] sm:$0xff] %v304_v12  ;;  %307 = vst [vmem:[%s1093_s30 + $0x68] sm:$0xff] %v306_v13  ;;  %v310_v15 = vld [vmem:[%s1088_s29 + $0xf0] sm:$0xff] }
  0x19   : > { %309 = vst [vmem:[%s1093_s30 + $0x70] sm:$0xff] %v308_v14  ;;  %v312_v16 = vld [vmem:[%s1088_s29 + $0x100] sm:$0xff]  ;;  %v314_v17 = vld [vmem:[%s1088_s29 + $0x110] sm:$0xff]  ;;  %311 = vst [vmem:[%s1093_s30 + $0x78] sm:$0xff] %v310_v15 }
  0x1a   : > { %313 = vst [vmem:[%s1093_s30 + $0x80] sm:$0xff] %v312_v16  ;;  %315 = vst [vmem:[%s1093_s30 + $0x88] sm:$0xff] %v314_v17  ;;  %v316_v18 = vld [vmem:[%s1088_s29 + $0x120] sm:$0xff]  ;;  %v318_v19 = vld [vmem:[%s1088_s29 + $0x130] sm:$0xff] }
  0x1b   : > { %v320_v20 = vld [vmem:[%s1088_s29 + $0x140] sm:$0xff]  ;;  %317 = vst [vmem:[%s1093_s30 + $0x90] sm:$0xff] %v316_v18  ;;  %319 = vst [vmem:[%s1093_s30 + $0x98] sm:$0xff] %v318_v19  ;;  %v322_v21 = vld [vmem:[%s1088_s29 + $0x150] sm:$0xff] }
  0x1c   : > { %321 = vst [vmem:[%s1093_s30 + $0xa0] sm:$0xff] %v320_v20  ;;  %v324_v22 = vld [vmem:[%s1088_s29 + $0x160] sm:$0xff]  ;;  %v326_v23 = vld [vmem:[%s1088_s29 + $0x170] sm:$0xff]  ;;  %323 = vst [vmem:[%s1093_s30 + $0xa8] sm:$0xff] %v322_v21 }
  0x1d   : > { %325 = vst [vmem:[%s1093_s30 + $0xb0] sm:$0xff] %v324_v22  ;;  %327 = vst [vmem:[%s1093_s30 + $0xb8] sm:$0xff] %v326_v23  ;;  %v328_v24 = vld [vmem:[%s1088_s29 + $0x180] sm:$0xff]  ;;  %v330_v25 = vld [vmem:[%s1088_s29 + $0x190] sm:$0xff] }
  0x1e   : > { %v332_v26 = vld [vmem:[%s1088_s29 + $0x1a0] sm:$0xff]  ;;  %329 = vst [vmem:[%s1093_s30 + $0xc0] sm:$0xff] %v328_v24  ;;  %331 = vst [vmem:[%s1093_s30 + $0xc8] sm:$0xff] %v330_v25  ;;  %v334_v27 = vld [vmem:[%s1088_s29 + $0x1b0] sm:$0xff] }
  0x1f   : > { %333 = vst [vmem:[%s1093_s30 + $0xd0] sm:$0xff] %v332_v26  ;;  %v336_v28 = vld [vmem:[%s1088_s29 + $0x1c0] sm:$0xff]  ;;  %v338_v29 = vld [vmem:[%s1088_s29 + $0x1d0] sm:$0xff]  ;;  %335 = vst [vmem:[%s1093_s30 + $0xd8] sm:$0xff] %v334_v27 }
  0x20   : > { %337 = vst [vmem:[%s1093_s30 + $0xe0] sm:$0xff] %v336_v28  ;;  %339 = vst [vmem:[%s1093_s30 + $0xe8] sm:$0xff] %v338_v29  ;;  %v340_v30 = vld [vmem:[%s1088_s29 + $0x1e0] sm:$0xff]  ;;  %v342_v31 = vld [vmem:[%s1088_s29 + $0x1f0] sm:$0xff] }
  0x21   : > { %341 = vst [vmem:[%s1093_s30 + $0xf0] sm:$0xff] %v340_v30  ;;  %343 = vst [vmem:[%s1093_s30 + $0xf8] sm:$0xff] %v342_v31 }
  0x22 PF: > { %p845_p6 = scmp.ge.s32.totalorder %s1018_s19, 1  ;;  %p364_p7 = scmp.lt.s32.totalorder %s1018_s19, 3 }
  0x24   : > { %p365_p8 = pnand %p845_p6, %p364_p7 }
  0x25   : > { %s371_s5 = sand.u32 (!%p365_p8), 1, %s1002_s15   ;;  %v1162_v32 = vld [vmem:[%s1227_s0] sm:$0xff] (!%p365_p8)  ;;  %s847_s10 = sshll.u32 (!%p365_p8), %s1010_s17, 1  ;;  %v682_v3 = vlaneseq (!%p365_p8) }
  0x26   : > { %368 = sbr.rel (%p365_p8) target bundleno = 325 (0x145), region = 70  ;;  %s846_s8 = sshll.u32 (!%p365_p8), %s371_s5, 8  ;;  %v852_v33 = vcombine.high (!%p365_p8), %v1162_v32, %v1162_v32  ;;  %v851_v2 = vcombine.low (!%p365_p8), %v1162_v32, %v1162_v32 }
  0x27   : > { %s1166_s9 = scalar_lea.vmem (!%p365_p8), [#allocation2], %s846_s8  ;;  %p420_p9 = scmp.lt.s32.totalorder (!%p365_p8), %s847_s10, 3  ;;  %v683_v4 = vshrl.u32 (!%p365_p8), %v682_v3, 7 }
  0x28   : > { %v930_v34 = vld [vmem:[%s1166_s9 + $0x4] ss:$8 sps:$4 sm:$0xff] (!%p365_p8)   ;;  %671 = vmatprep.mubr.bf16.mxu0 (!%p365_p8), %v852_v33  ;;  %v932_v35 = vld [vmem:[%s1166_s9] ss:$8 sps:$4 sm:$0xff] (!%p365_p8)   ;;  %v933_v36 = vld [vmem:[%s1166_s9 + $0x14] ss:$8 sps:$4 sm:$0xff] (!%p365_p8)  }
  0x29   : > { %639 = vmatprep.subr.bf16.mxu0 (!%p365_p8), %v930_v34  ;;  %v935_v37 = vld [vmem:[%s1166_s9 + $0x10] ss:$8 sps:$4 sm:$0xff] (!%p365_p8)   ;;  %v936_v38 = vld [vmem:[%s1166_s9 + $0x24] ss:$8 sps:$4 sm:$0xff] (!%p365_p8)   ;;  %v938_v39 = vld [vmem:[%s1166_s9 + $0x20] ss:$8 sps:$4 sm:$0xff] (!%p365_p8)  }
  0x2a   : > { %640 = vmatpush1.bf16.msra.mxu0 (!%p365_p8), %v932_v35  ;;  %v939_v40 = vld [vmem:[%s1166_s9 + $0x34] ss:$8 sps:$4 sm:$0xff] (!%p365_p8)   ;;  %v941_v41 = vld [vmem:[%s1166_s9 + $0x30] ss:$8 sps:$4 sm:$0xff] (!%p365_p8)   ;;  %v942_v42 = vld [vmem:[%s1166_s9 + $0x44] ss:$8 sps:$4 sm:$0xff] (!%p365_p8)  }
  0x2b   : > { %641 = vmatprep.subr.bf16.mxu0 (!%p365_p8), %v933_v36  ;;  %v944_v43 = vld [vmem:[%s1166_s9 + $0x40] ss:$8 sps:$4 sm:$0xff] (!%p365_p8)   ;;  %v945_v44 = vld [vmem:[%s1166_s9 + $0x54] ss:$8 sps:$4 sm:$0xff] (!%p365_p8)   ;;  %v947_v45 = vld [vmem:[%s1166_s9 + $0x50] ss:$8 sps:$4 sm:$0xff] (!%p365_p8)  }
  0x2c   : > { %v948_v46 = vld [vmem:[%s1166_s9 + $0x64] ss:$8 sps:$4 sm:$0xff] (!%p365_p8)   ;;  %v950_v47 = vld [vmem:[%s1166_s9 + $0x60] ss:$8 sps:$4 sm:$0xff] (!%p365_p8)   ;;  %v951_v48 = vld [vmem:[%s1166_s9 + $0x74] ss:$8 sps:$4 sm:$0xff] (!%p365_p8)  }
  0x2d   : > { %v953_v49 = vld [vmem:[%s1166_s9 + $0x70] ss:$8 sps:$4 sm:$0xff]   ;;  %v954_v50 = vld [vmem:[%s1166_s9 + $0x84] ss:$8 sps:$4 sm:$0xff]   ;;  %v956_v51 = vld [vmem:[%s1166_s9 + $0x80] ss:$8 sps:$4 sm:$0xff]  }
  0x2e   : > { %642 = vmatpush1.bf16.msra.mxu0 %v935_v37  ;;  %v957_v52 = vld [vmem:[%s1166_s9 + $0x94] ss:$8 sps:$4 sm:$0xff]   ;;  %v959_v53 = vld [vmem:[%s1166_s9 + $0x90] ss:$8 sps:$4 sm:$0xff]   ;;  %v960_v54 = vld [vmem:[%s1166_s9 + $0xa4] ss:$8 sps:$4 sm:$0xff]  }
  0x2f   : > { %643 = vmatprep.subr.bf16.mxu0 %v936_v38  ;;  %v962_v55 = vld [vmem:[%s1166_s9 + $0xa0] ss:$8 sps:$4 sm:$0xff]   ;;  %v963_v56 = vld [vmem:[%s1166_s9 + $0xb4] ss:$8 sps:$4 sm:$0xff]   ;;  %v965_v57 = vld [vmem:[%s1166_s9 + $0xb0] ss:$8 sps:$4 sm:$0xff]  }
  0x30   : > { %v966_v58 = vld [vmem:[%s1166_s9 + $0xc4] ss:$8 sps:$4 sm:$0xff]   ;;  %v968_v59 = vld [vmem:[%s1166_s9 + $0xc0] ss:$8 sps:$4 sm:$0xff]   ;;  %v969_v60 = vld [vmem:[%s1166_s9 + $0xd4] ss:$8 sps:$4 sm:$0xff]  }
  0x31   : > { %v971_v61 = vld [vmem:[%s1166_s9 + $0xd0] ss:$8 sps:$4 sm:$0xff]   ;;  %v972_v62 = vld [vmem:[%s1166_s9 + $0xe4] ss:$8 sps:$4 sm:$0xff]   ;;  %v974_v63 = vld [vmem:[%s1166_s9 + $0xe0] ss:$8 sps:$4 sm:$0xff]  }
  0x32   : > { %644 = vmatpush1.bf16.msra.mxu0 %v938_v39  ;;  %v975_v0 = vld [vmem:[%s1166_s9 + $0xf4] ss:$8 sps:$4 sm:$0xff]   ;;  %v977_v1 = vld [vmem:[%s1166_s9 + $0xf0] ss:$8 sps:$4 sm:$0xff]   ;;  %s1239_s10 = smov (!%p420_p9, %s847_s10), 3  ;;  %v684_v5 = vsub.s32 0, %v683_v4 }
  0x33   : > { %645 = vmatprep.subr.bf16.mxu0 %v939_v40  ;;  %s422_s13 = scalar_lea.vmem %s1229_s2, %s1239_s10  ;;  %s427_s21 = scalar_lea.vmem %s1230_s3, %s1239_s10  ;;  %v688_v7 = vsub.s32 1, %v683_v4 }
  0x34   : > { %v680_v6 = vld [vmem:[%s422_s13] sm:$0x3]  ;;  %s850_s17 = sshll.u32 %s1239_s10, 2 }
  0x35   : > { %v694_v8 = vld [vmem:[%s427_s21] sm:$0x3]  ;;  %v685_v9 = vrot.slane %v680_v6, %v684_v5  ;;  %v689_v10 = vrot.slane %v680_v6, %v688_v7  ;;  %s437_s25 = scalar_lea.vmem %s1231_s4, %s850_s17 }
  0x36   : > { %646 = vmatpush1.bf16.msra.mxu0 %v941_v41  ;;  %v699_v11 = vrot.slane %v694_v8, %v684_v5  ;;  %v703_v13 = vrot.slane %v694_v8, %v688_v7 }
  0x37   : > { %647 = vmatprep.subr.bf16.mxu0 %v942_v42 }
  0x3a   : > { %648 = vmatpush1.bf16.msra.mxu0 %v944_v43 }
  0x3b   : > { %649 = vmatprep.subr.bf16.mxu0 %v945_v44 }
  0x3e   : > { %650 = vmatpush1.bf16.msra.mxu0 %v947_v45 }
  0x3f   : > { %651 = vmatprep.subr.bf16.mxu0 %v948_v46 }
  0x42   : > { %652 = vmatpush1.bf16.msra.mxu0 %v950_v47 }
  0x43   : > { %653 = vmatprep.subr.bf16.mxu0 %v951_v48 }
  0x46   : > { %654 = vmatpush1.bf16.msra.mxu0 %v953_v49 }
  0x47   : > { %655 = vmatprep.subr.bf16.mxu0 %v954_v50 }
  0x4a   : > { %656 = vmatpush1.bf16.msra.mxu0 %v956_v51 }
  0x4b   : > { %657 = vmatprep.subr.bf16.mxu0 %v957_v52 }
  0x4e   : > { %658 = vmatpush1.bf16.msra.mxu0 %v959_v53 }
  0x4f   : > { %659 = vmatprep.subr.bf16.mxu0 %v960_v54 }
  0x52   : > { %660 = vmatpush1.bf16.msra.mxu0 %v962_v55 }
  0x53   : > { %661 = vmatprep.subr.bf16.mxu0 %v963_v56 }
  0x56   : > { %662 = vmatpush1.bf16.msra.mxu0 %v965_v57 }
  0x57   : > { %663 = vmatprep.subr.bf16.mxu0 %v966_v58 }
  0x5a   : > { %664 = vmatpush1.bf16.msra.mxu0 %v968_v59 }
  0x5b   : > { %665 = vmatprep.subr.bf16.mxu0 %v969_v60 }
  0x5e   : > { %666 = vmatpush1.bf16.msra.mxu0 %v971_v61 }
  0x5f   : > { %667 = vmatprep.subr.bf16.mxu0 %v972_v62 }
  0x62   : > { %668 = vmatpush1.bf16.msra.mxu0 %v974_v63 }
  0x63   : > { %669 = vmatprep.subr.bf16.mxu0 %v975_v0 }
  0x66   : > { %670 = vmatpush1.bf16.msra.mxu0 %v977_v1 }
  0x69   : > { %672 = vmatmul.mubr.bf16.vlgmr.msra.gmra.mrb[0].mxu0 %v851_v2 }
 0x13c   : > { %v673_v12 = vpop.f32.mrb[0].mxu0 }
 0x13d   : > { %v692_v14 = vmul.f32 %v685_v9, %v673_v12  ;;  %v675_v15 = vpop.f32.mrb[1].mxu0 }
 0x13e   : > { %v693_v16 = vmul.f32 %v689_v10, %v675_v15  ;;  %v677_v17 = vpop.f32.mrb[2].mxu0 }
 0x13f   : > { %v706_v18 = vadd.f32 %v699_v11, %v692_v14  ;;  %v678_v19 = vpop.f32.mrb[3].mxu0 }
 0x140   : > { %v707_v20 = vadd.f32 %v703_v13, %v693_v16 }
 0x142   : > { %v889_v21 = vpack.c.bf16 %v707_v20, %v706_v18 }
 0x144   : > { %716 = vst [vmem:[%s437_s25] sm:$0xff] %v889_v21 }
 0x145 PF: > { %s14_s19 = sadd.s32 1, %s1018_s19   ;;  %s1232_s15 = smov %s1006_s16 }
 0x146   : > { %p11_p10 = scmp.ge.s32.totalorder %s14_s19, 4   ;;  %s1233_s16 = smov %s1080_s23 }
 0x147   : > { %s1234_s17 = smov %s1014_s18  ;;  %s1235_s18 = smov %s1237_s20 }
 0x148   :  { %13 = sbr.rel (!%p11_p10) target bundleno = 3 (0x3), region = 118 }

// kernel: resnet50_forward.71
= control target key start
LH: loop header
LB: loop body
LE: loop exit
PB: predicated region body
PF: predicated region fallthrough
CT: control target
= control target key end

     0   :  { %s929_s18 = smov 0   ;;  %s931_s19 = smov 0   ;;  %s1029_s0 = inlined_call_operand.vmem [shape: bf16[8,128], index: 0, kind: input, shape index: {}]   ;;  %s1030_s1 = inlined_call_operand.vmem [shape: bf16[128,512], index: 1, kind: input, shape index: {}]   ;;  %s1031_s2 = inlined_call_operand.vmem [shape: f32[1,512], index: 2, kind: input, shape index: {}]   ;;  %s1032_s3 = inlined_call_operand.vmem [shape: f32[1,512], index: 3, kind: input, shape index: {}]   ;;  %s1033_s4 = inlined_call_operand.vmem [shape: bf16[8,512], index: 4, kind: input, shape index: {}]   ;;  %s1034_s5 = inlined_call_operand.vmem [shape: bf16[8,512], index: 5, kind: output, shape index: {}]  }
   0x1   :  { %s933_s20 = smov 0   ;;  %s935_s21 = smov 0  }
   0x2   :  { %s937_s22 = smov 0  }
   0x3 LB: > { %s24_s23 = sadd.s32 1, %s892_s21  ;;  %p67_p1 = scmp.ne.s32.totalorder %s884_s19, %s880_s18  ;;  %s896_s22 = sphi %s937_s22, %s15_s22   ;;  %s892_s21 = sphi %s935_s21, %s1038_s21   ;;  %s888_s20 = sphi %s933_s20, %s1037_s20   ;;  %s884_s19 = sphi %s931_s19, %s1036_s19   ;;  %s880_s18 = sphi %s929_s18, %s1035_s18  }
   0x4   : > { %p25_p0 = scmp.ge.s32.totalorder %s24_s23, 2  ;;  %p68_p2 = scmp.eq.s32.totalorder %s896_s22, 0 }
   0x5   : > { %s60_s25 = sadd.s32 1, %s884_s19  ;;  %p760_p5 = scmp.ge.s32.totalorder %s896_s22, 2 }
   0x6   : > { %s1040_s23 = smov (%p25_p0, %s24_s23), 0  ;;  %p69_p3 = por %p68_p2, %p67_p1 }
   0x7   : > { %s57_s24 = ssub.s32 %s892_s21, %s1040_s23  ;;  %208 = sbr.rel (%p760_p5) target bundleno = 26 (0x1a), region = 20 }
   0x8   : > { %p58_p4 = scmp.eq.s32.totalorder %s57_s24, 0 }
   0xa   : > { %s964_s26 = scalar_select %p58_p4, %s884_s19, %s60_s25  }
   0xe   : > { %211 = sbr.rel (!%p69_p3) target bundleno = 26 (0x1a), region = 24  ;;  %s213_s27 = sand.u32 (%p69_p3), 1, %s884_s19  }
   0xf   : > { %s791_s28 = sshll.u32 (%p69_p3), %s892_s21, 3  ;;  %s761_s29 = sshll.u32 (%p69_p3), %s213_s27, 7 }
  0x10   : > { %s972_s7 = scalar_lea.vmem (%p69_p3), %s1030_s1, %s791_s28  ;;  %s215_s8 = scalar_lea.vmem (%p69_p3), [#allocation2], %s761_s29 }
  0x11   : > { %v276_v0 = vld [vmem:[%s972_s7] sm:$0xff] (%p69_p3)  ;;  %v278_v1 = vld [vmem:[%s972_s7 + $0x10] sm:$0xff] (%p69_p3) }
  0x12   : > { %v280_v2 = vld [vmem:[%s972_s7 + $0x20] sm:$0xff] (%p69_p3)  ;;  %277 = vst [vmem:[%s215_s8] sm:$0xff] (%p69_p3), %v276_v0  ;;  %279 = vst [vmem:[%s215_s8 + $0x8] sm:$0xff] (%p69_p3), %v278_v1  ;;  %v282_v3 = vld [vmem:[%s972_s7 + $0x30] sm:$0xff] (%p69_p3) }
  0x13   : > { %281 = vst [vmem:[%s215_s8 + $0x10] sm:$0xff] (%p69_p3), %v280_v2  ;;  %v284_v4 = vld [vmem:[%s972_s7 + $0x40] sm:$0xff] (%p69_p3)  ;;  %v286_v5 = vld [vmem:[%s972_s7 + $0x50] sm:$0xff] (%p69_p3)  ;;  %283 = vst [vmem:[%s215_s8 + $0x18] sm:$0xff] (%p69_p3), %v282_v3 }
  0x14   : > { %285 = vst [vmem:[%s215_s8 + $0x20] sm:$0xff] (%p69_p3), %v284_v4  ;;  %287 = vst [vmem:[%s215_s8 + $0x28] sm:$0xff] (%p69_p3), %v286_v5  ;;  %v288_v6 = vld [vmem:[%s972_s7 + $0x60] sm:$0xff] (%p69_p3)  ;;  %v290_v7 = vld [vmem:[%s972_s7 + $0x70] sm:$0xff] (%p69_p3) }
  0x15   : > { %v292_v8 = vld [vmem:[%s972_s7 + $0x80] sm:$0xff]  ;;  %289 = vst [vmem:[%s215_s8 + $0x30] sm:$0xff] %v288_v6  ;;  %291 = vst [vmem:[%s215_s8 + $0x38] sm:$0xff] %v290_v7  ;;  %v294_v9 = vld [vmem:[%s972_s7 + $0x90] sm:$0xff] }
  0x16   : > { %293 = vst [vmem:[%s215_s8 + $0x40] sm:$0xff] %v292_v8  ;;  %v296_v10 = vld [vmem:[%s972_s7 + $0xa0] sm:$0xff]  ;;  %v298_v11 = vld [vmem:[%s972_s7 + $0xb0] sm:$0xff]  ;;  %295 = vst [vmem:[%s215_s8 + $0x48] sm:$0xff] %v294_v9 }
  0x17   : > { %297 = vst [vmem:[%s215_s8 + $0x50] sm:$0xff] %v296_v10  ;;  %299 = vst [vmem:[%s215_s8 + $0x58] sm:$0xff] %v298_v11  ;;  %v300_v12 = vld [vmem:[%s972_s7 + $0xc0] sm:$0xff]  ;;  %v302_v13 = vld [vmem:[%s972_s7 + $0xd0] sm:$0xff] }
  0x18   : > { %v304_v14 = vld [vmem:[%s972_s7 + $0xe0] sm:$0xff]  ;;  %301 = vst [vmem:[%s215_s8 + $0x60] sm:$0xff] %v300_v12  ;;  %303 = vst [vmem:[%s215_s8 + $0x68] sm:$0xff] %v302_v13  ;;  %v306_v15 = vld [vmem:[%s972_s7 + $0xf0] sm:$0xff] }
  0x19   : > { %305 = vst [vmem:[%s215_s8 + $0x70] sm:$0xff] %v304_v14  ;;  %307 = vst [vmem:[%s215_s8 + $0x78] sm:$0xff] %v306_v15 }
  0x1a PF: > { %p764_p6 = scmp.ge.s32.totalorder %s896_s22, 1  ;;  %p341_p7 = scmp.lt.s32.totalorder %s896_s22, 3 }
  0x1c   : > { %p342_p8 = pnand %p764_p6, %p341_p7 }
  0x1d   : > { %s348_s9 = sand.u32 (!%p342_p8), 1, %s880_s18   ;;  %v898_v16 = vmov (!%p342_p8), 0   ;;  %v436_v33 = vld [vmem:[%s1029_s0] sm:$0xf] (!%p342_p8)  ;;  %s766_s14 = sshll.u32 (!%p342_p8), %s888_s20, 1  ;;  %v576_v34 = vlaneseq (!%p342_p8) }
  0x1e   : > { %345 = sbr.rel (%p342_p8) target bundleno = 289 (0x121), region = 74  ;;  %s765_s10 = sshll.u32 (!%p342_p8), %s348_s9, 7  ;;  %565 = vmatprep.mubr.bf16.mxu0 (!%p342_p8), %v898_v16 }
  0x1f   : > { %s350_s11 = scalar_lea.vmem (!%p342_p8), [#allocation2], %s765_s10  ;;  %p406_p9 = scmp.lt.s32.totalorder (!%p342_p8), %s766_s14, 3  ;;  %v577_v35 = vshrl.u32 (!%p342_p8), %v576_v34, 7 }
  0x20   : > { %v834_v17 = vld [vmem:[%s350_s11 + $0x4] ss:$8 sps:$4 sm:$0xff] (!%p342_p8)   ;;  %v836_v18 = vld [vmem:[%s350_s11] ss:$8 sps:$4 sm:$0xff] (!%p342_p8)   ;;  %v837_v19 = vld [vmem:[%s350_s11 + $0x14] ss:$8 sps:$4 sm:$0xff] (!%p342_p8)  }
  0x21   : > { %533 = vmatprep.subr.bf16.mxu0 (!%p342_p8), %v834_v17  ;;  %v839_v20 = vld [vmem:[%s350_s11 + $0x10] ss:$8 sps:$4 sm:$0xff] (!%p342_p8)   ;;  %v840_v21 = vld [vmem:[%s350_s11 + $0x24] ss:$8 sps:$4 sm:$0xff] (!%p342_p8)   ;;  %v842_v22 = vld [vmem:[%s350_s11 + $0x20] ss:$8 sps:$4 sm:$0xff] (!%p342_p8)  }
  0x22   : > { %534 = vmatpush1.bf16.msra.mxu0 (!%p342_p8), %v836_v18  ;;  %v843_v23 = vld [vmem:[%s350_s11 + $0x34] ss:$8 sps:$4 sm:$0xff] (!%p342_p8)   ;;  %v845_v24 = vld [vmem:[%s350_s11 + $0x30] ss:$8 sps:$4 sm:$0xff] (!%p342_p8)   ;;  %v846_v25 = vld [vmem:[%s350_s11 + $0x44] ss:$8 sps:$4 sm:$0xff] (!%p342_p8)  }
  0x23   : > { %535 = vmatprep.subr.bf16.mxu0 (!%p342_p8), %v837_v19  ;;  %v848_v26 = vld [vmem:[%s350_s11 + $0x40] ss:$8 sps:$4 sm:$0xff] (!%p342_p8)   ;;  %v849_v27 = vld [vmem:[%s350_s11 + $0x54] ss:$8 sps:$4 sm:$0xff] (!%p342_p8)   ;;  %v851_v28 = vld [vmem:[%s350_s11 + $0x50] ss:$8 sps:$4 sm:$0xff] (!%p342_p8)  }
  0x24   : > { %v852_v29 = vld [vmem:[%s350_s11 + $0x64] ss:$8 sps:$4 sm:$0xff] (!%p342_p8)   ;;  %v854_v30 = vld [vmem:[%s350_s11 + $0x60] ss:$8 sps:$4 sm:$0xff] (!%p342_p8)   ;;  %v855_v31 = vld [vmem:[%s350_s11 + $0x74] ss:$8 sps:$4 sm:$0xff] (!%p342_p8)  }
  0x25   : > { %v857_v32 = vld [vmem:[%s350_s11 + $0x70] ss:$8 sps:$4 sm:$0xff]   ;;  %s1042_s14 = smov (!%p406_p9, %s766_s14), 3  ;;  %v578_v36 = vsub.s32 0, %v577_v35  ;;  %v582_v38 = vsub.s32 1, %v577_v35 }
  0x26   : > { %536 = vmatpush1.bf16.msra.mxu0 %v839_v20  ;;  %s408_s17 = scalar_lea.vmem %s1031_s2, %s1042_s14  ;;  %s769_s18 = sshll.u32 %s1042_s14, 2 }
  0x27   : > { %537 = vmatprep.subr.bf16.mxu0 %v840_v21  ;;  %s413_s27 = scalar_lea.vmem %s1032_s3, %s1042_s14  ;;  %v574_v37 = vld [vmem:[%s408_s17] sm:$0x3]  ;;  %s423_s29 = scalar_lea.vmem %s1033_s4, %s769_s18 }
  0x28   : > { %v588_v39 = vld [vmem:[%s413_s27] sm:$0x3]  ;;  %v579_v40 = vrot.slane %v574_v37, %v578_v36  ;;  %v583_v42 = vrot.slane %v574_v37, %v582_v38  ;;  %s433_s7 = scalar_lea.vmem %s1034_s5, %s769_s18 }
  0x29   : > { %v602_v41 = vld [vmem:[%s423_s29] sm:$0xff]  ;;  %v593_v43 = vrot.slane %v588_v39, %v578_v36  ;;  %v597_v45 = vrot.slane %v588_v39, %v582_v38 }
  0x2a   : > { %538 = vmatpush1.bf16.msra.mxu0 %v842_v22  ;;  %v603_v47 = vunpack.c.l.bf16 %v602_v41  ;;  %v604_v50 = vunpack.c.h.bf16 %v602_v41 }
  0x2b   : > { %539 = vmatprep.subr.bf16.mxu0 %v843_v23 }
  0x2e   : > { %540 = vmatpush1.bf16.msra.mxu0 %v845_v24 }
  0x2f   : > { %541 = vmatprep.subr.bf16.mxu0 %v846_v25 }
  0x32   : > { %542 = vmatpush1.bf16.msra.mxu0 %v848_v26 }
  0x33   : > { %543 = vmatprep.subr.bf16.mxu0 %v849_v27 }
  0x36   : > { %544 = vmatpush1.bf16.msra.mxu0 %v851_v28 }
  0x37   : > { %545 = vmatprep.subr.bf16.mxu0 %v852_v29 }
  0x3a   : > { %546 = vmatpush1.bf16.msra.mxu0 %v854_v30 }
  0x3b   : > { %547 = vmatprep.subr.bf16.mxu0 %v855_v31 }
  0x3e   : > { %548 = vmatpush1.bf16.msra.mxu0 %v857_v32 }
  0x41   : > { %566 = vmatmul.mubr.bf16.vlgmr.msra.gmra.mrb[0].mxu0 %v436_v33 }
 0x114   : > { %v567_v44 = vpop.f32.mrb[0].mxu0 }
 0x115   : > { %v586_v46 = vmul.f32 %v579_v40, %v567_v44  ;;  %v569_v48 = vpop.f32.mrb[1].mxu0 }
 0x116   : > { %v587_v49 = vmul.f32 %v583_v42, %v569_v48  ;;  %v571_v51 = vpop.f32.mrb[2].mxu0 }
 0x117   : > { %v600_v52 = vadd.f32 %v593_v43, %v586_v46  ;;  %v572_v53 = vpop.f32.mrb[3].mxu0 }
 0x118   : > { %v601_v54 = vadd.f32 %v597_v45, %v587_v49 }
 0x119   : > { %v605_v55 = vadd.f32 %v603_v47, %v600_v52 }
 0x11a   : > { %v606_v56 = vadd.f32 %v604_v50, %v601_v54 }
 0x11b   : > { %v607_v57 = vmax.f32 %v605_v55, 0.0 }
 0x11c   : > { %v608_v58 = vmax.f32 %v606_v56, 0.0 }
 0x11e   : > { %v792_v59 = vpack.c.bf16 %v608_v58, %v607_v57 }
 0x120   : > { %617 = vst [vmem:[%s433_s7] sm:$0xff] %v792_v59 }
 0x121 PF: > { %s15_s22 = sadd.s32 1, %s896_s22   ;;  %s1035_s18 = smov %s884_s19 }
 0x122   : > { %p12_p10 = scmp.ge.s32.totalorder %s15_s22, 4   ;;  %s1036_s19 = smov %s964_s26 }
 0x123   : > { %s1037_s20 = smov %s892_s21  ;;  %s1038_s21 = smov %s1040_s23 }
 0x124   :  { %14 = sbr.rel (!%p12_p10) target bundleno = 3 (0x3), region = 125 }

// kernel: resnet50_forward.72
= control target key start
LH: loop header
LB: loop body
LE: loop exit
PB: predicated region body
PF: predicated region fallthrough
CT: control target
= control target key end

     0   :  { %s647_s1 = inlined_call_operand.vmem [shape: bf16[512,128], index: 1, kind: input, shape index: {}]   ;;  %s648_s0 = inlined_call_operand.vmem [shape: bf16[8,512], index: 0, kind: input, shape index: {}]   ;;  %s649_s2 = inlined_call_operand.vmem [shape: f32[1,128], index: 2, kind: input, shape index: {}]   ;;  %s650_s3 = inlined_call_operand.vmem [shape: f32[1,128], index: 3, kind: input, shape index: {}]   ;;  %s651_s4 = inlined_call_operand.vmem [shape: bf16[8,128], index: 4, kind: output, shape index: {}]  }
   0x1   :  { %v475_v0 = vld [vmem:[%s647_s1 + $0x40] sm:$0xff]   ;;  %v479_v4 = vld [vmem:[%s647_s1 + $0x48] sm:$0xff]   ;;  %v483_v8 = vld [vmem:[%s647_s1 + $0x50] sm:$0xff]  }
   0x2   :  { %v476_v1 = vld [vmem:[%s647_s1 + $0xc0] sm:$0xff]   ;;  %431 = vmatprep.subr.bf16.mxu0 %v475_v0  ;;  %v480_v5 = vld [vmem:[%s647_s1 + $0xc8] sm:$0xff]   ;;  %v484_v9 = vld [vmem:[%s647_s1 + $0xd0] sm:$0xff]  }
   0x3   :  { %v477_v2 = vld [vmem:[%s647_s1] sm:$0xff]   ;;  %453 = vmatprep.subr.bf16.mxu1 %v476_v1  ;;  %v481_v6 = vld [vmem:[%s647_s1 + $0x8] sm:$0xff]   ;;  %v485_v10 = vld [vmem:[%s647_s1 + $0x10] sm:$0xff]  }
   0x4   :  { %v478_v3 = vld [vmem:[%s647_s1 + $0x80] sm:$0xff]   ;;  %432 = vmatpush3.bf16.msra.mxu0 %v477_v2  ;;  %v482_v7 = vld [vmem:[%s647_s1 + $0x88] sm:$0xff]   ;;  %v486_v11 = vld [vmem:[%s647_s1 + $0x90] sm:$0xff]  }
   0x5   :  { %454 = vmatpush3.bf16.msra.mxu1 %v478_v3  ;;  %433 = vmatprep.subr.bf16.mxu0 %v479_v4  ;;  %v487_v12 = vld [vmem:[%s647_s1 + $0x58] sm:$0xff]   ;;  %v491_v16 = vld [vmem:[%s647_s1 + $0x60] sm:$0xff]   ;;  %v495_v20 = vld [vmem:[%s647_s1 + $0x68] sm:$0xff]  }
   0x6   :  { %455 = vmatprep.subr.bf16.mxu1 %v480_v5  ;;  %v488_v13 = vld [vmem:[%s647_s1 + $0xd8] sm:$0xff]   ;;  %v492_v17 = vld [vmem:[%s647_s1 + $0xe0] sm:$0xff]   ;;  %v496_v21 = vld [vmem:[%s647_s1 + $0xe8] sm:$0xff]  }
   0x7   :  { %v489_v14 = vld [vmem:[%s647_s1 + $0x18] sm:$0xff]   ;;  %v493_v18 = vld [vmem:[%s647_s1 + $0x20] sm:$0xff]   ;;  %v497_v22 = vld [vmem:[%s647_s1 + $0x28] sm:$0xff]  }
   0x8   :  { %434 = vmatpush3.bf16.msra.mxu0 %v481_v6  ;;  %v490_v15 = vld [vmem:[%s647_s1 + $0x98] sm:$0xff]   ;;  %v494_v19 = vld [vmem:[%s647_s1 + $0xa0] sm:$0xff]   ;;  %v498_v23 = vld [vmem:[%s647_s1 + $0xa8] sm:$0xff]  }
   0x9   :  { %456 = vmatpush3.bf16.msra.mxu1 %v482_v7  ;;  %435 = vmatprep.subr.bf16.mxu0 %v483_v8  ;;  %v499_v24 = vld [vmem:[%s647_s1 + $0x70] sm:$0xff]   ;;  %v503_v28 = vld [vmem:[%s647_s1 + $0x78] sm:$0xff]   ;;  %v18_v32 = vld [vmem:[%s648_s0] sm:$0xff] }
   0xa   :  { %457 = vmatprep.subr.bf16.mxu1 %v484_v9  ;;  %v500_v25 = vld [vmem:[%s647_s1 + $0xf0] sm:$0xff]   ;;  %v504_v29 = vld [vmem:[%s647_s1 + $0xf8] sm:$0xff]   ;;  %v19_v33 = vld [vmem:[%s648_s0 + $0x8] sm:$0xff]  ;;  %v393_v34 = vcombine.low %v18_v32, %v18_v32  ;;  %v394_v35 = vcombine.high %v18_v32, %v18_v32 }
   0xb   :  { %v501_v26 = vld [vmem:[%s647_s1 + $0x30] sm:$0xff]   ;;  %v505_v30 = vld [vmem:[%s647_s1 + $0x38] sm:$0xff]   ;;  %v395_v36 = vcombine.low %v19_v33, %v19_v33  ;;  %v396_v37 = vcombine.high %v19_v33, %v19_v33  ;;  %v429_v46 = vld [vmem:[%s649_s2] ss:$0 sm:$0xff] }
   0xc   :  { %436 = vmatpush3.bf16.msra.mxu0 %v485_v10  ;;  %v502_v27 = vld [vmem:[%s647_s1 + $0xb0] sm:$0xff]   ;;  %v506_v31 = vld [vmem:[%s647_s1 + $0xb8] sm:$0xff]   ;;  %322 = vmatprep.mubr.bf16.mxu0 %v394_v35  ;;  %v430_v50 = vld [vmem:[%s650_s3] ss:$0 sm:$0xff] }
   0xd   :  { %458 = vmatpush3.bf16.msra.mxu1 %v486_v11  ;;  %437 = vmatprep.subr.bf16.mxu0 %v487_v12 }
   0xe   :  { %459 = vmatprep.subr.bf16.mxu1 %v488_v13  ;;  %362 = vmatprep.mubr.bf16.mxu1 %v396_v37 }
  0x10   :  { %438 = vmatpush3.bf16.msra.mxu0 %v489_v14 }
  0x11   :  { %460 = vmatpush3.bf16.msra.mxu1 %v490_v15  ;;  %439 = vmatprep.subr.bf16.mxu0 %v491_v16 }
  0x12   :  { %461 = vmatprep.subr.bf16.mxu1 %v492_v17 }
  0x14   :  { %440 = vmatpush3.bf16.msra.mxu0 %v493_v18 }
  0x15   :  { %462 = vmatpush3.bf16.msra.mxu1 %v494_v19  ;;  %441 = vmatprep.subr.bf16.mxu0 %v495_v20 }
  0x16   :  { %463 = vmatprep.subr.bf16.mxu1 %v496_v21 }
  0x18   :  { %442 = vmatpush3.bf16.msra.mxu0 %v497_v22 }
  0x19   :  { %464 = vmatpush3.bf16.msra.mxu1 %v498_v23  ;;  %443 = vmatprep.subr.bf16.mxu0 %v499_v24 }
  0x1a   :  { %465 = vmatprep.subr.bf16.mxu1 %v500_v25 }
  0x1c   :  { %444 = vmatpush3.bf16.msra.mxu0 %v501_v26 }
  0x1d   :  { %466 = vmatpush3.bf16.msra.mxu1 %v502_v27  ;;  %445 = vmatprep.subr.bf16.mxu0 %v503_v28 }
  0x1e   :  { %467 = vmatprep.subr.bf16.mxu1 %v504_v29 }
  0x20   :  { %446 = vmatpush3.bf16.msra.mxu0 %v505_v30 }
  0x21   :  { %468 = vmatpush3.bf16.msra.mxu1 %v506_v31 }
  0x23   :  { %323 = vmatmul.mubr.bf16.vlgmr.msra.gmra.mrb[0].mxu0 %v393_v34 }
  0x24   :  { %363 = vmatmul.mubr.bf16.vlgmr.msra.gmra.mrb[0].mxu1 %v395_v36 }
  0xf6   :  { %v447_v38 = vpop.f32.mrb[0].mxu0 }
  0xf7   :  { %v469_v39 = vpop.f32.mrb[0].mxu1  ;;  %v448_v40 = vpop.f32.mrb[1].mxu0 }
  0xf8   :  { %v470_v41 = vpop.f32.mrb[1].mxu1  ;;  %v449_v42 = vadd.f32 %v448_v40, %v447_v38  ;;  %v450_v44 = vpop.f32.mrb[2].mxu0 }
  0xf9   :  { %v471_v43 = vadd.f32 %v470_v41, %v469_v39  ;;  %v472_v45 = vpop.f32.mrb[2].mxu1  ;;  %v451_v47 = vpop.f32.mrb[3].mxu0 }
  0xfa   :  { %v473_v48 = vpop.f32.mrb[3].mxu1 }
  0xfb   :  { %v365_v49 = vadd.f32 %v471_v43, %v449_v42 }
  0xfd   :  { %v377_v51 = vmul.f32 %v429_v46, %v365_v49 }
  0xff   :  { %v385_v52 = vadd.f32 %v430_v50, %v377_v51 }
 0x101   :  { %v386_v53 = vmax.f32 %v385_v52, 0.0 }
 0x103   :  { %v387_v54 = vpack.c.bf16 %v386_v53, %v386_v53 }
 0x105   :  { %388 = vst [vmem:[%s651_s4] sm:$0xf] %v387_v54 }

// kernel: resnet50_forward.82
= control target key start
LH: loop header
LB: loop body
LE: loop exit
PB: predicated region body
PF: predicated region fallthrough
CT: control target
= control target key end

     0   :  { %s946_s1 = inlined_call_operand.vmem [shape: bf16[512,256], index: 1, kind: input, shape index: {}]   ;;  %s947_s0 = inlined_call_operand.vmem [shape: bf16[8,512], index: 0, kind: input, shape index: {}]   ;;  %s948_s2 = inlined_call_operand.vmem [shape: f32[1,256], index: 2, kind: input, shape index: {}]   ;;  %s949_s3 = inlined_call_operand.vmem [shape: f32[1,256], index: 3, kind: input, shape index: {}]   ;;  %s950_s4 = inlined_call_operand.vmem [shape: bf16[8,256], index: 4, kind: output, shape index: {}]  }
   0x1   :  { %v614_v0 = vld [vmem:[%s946_s1 + $0x4] ss:$8 sps:$4 sm:$0xff]   ;;  %v618_v2 = vld [vmem:[%s946_s1] ss:$8 sps:$4 sm:$0xff]   ;;  %v620_v4 = vld [vmem:[%s946_s1 + $0x14] ss:$8 sps:$4 sm:$0xff]  }
   0x2   :  { %v616_v1 = vld [vmem:[%s946_s1 + $0x104] ss:$8 sps:$4 sm:$0xff]   ;;  %417 = vmatprep.subr.bf16.mxu1 %v614_v0  ;;  %v619_v3 = vld [vmem:[%s946_s1 + $0x100] ss:$8 sps:$4 sm:$0xff]   ;;  %v622_v5 = vld [vmem:[%s946_s1 + $0x114] ss:$8 sps:$4 sm:$0xff]  }
   0x3   :  { %458 = vmatprep.subr.bf16.mxu0 %v616_v1  ;;  %418 = vmatpush1.bf16.msra.mxu1 %v618_v2  ;;  %v624_v6 = vld [vmem:[%s946_s1 + $0x10] ss:$8 sps:$4 sm:$0xff]   ;;  %v626_v8 = vld [vmem:[%s946_s1 + $0x24] ss:$8 sps:$4 sm:$0xff]   ;;  %v630_v10 = vld [vmem:[%s946_s1 + $0x20] ss:$8 sps:$4 sm:$0xff]  }
   0x4   :  { %459 = vmatpush1.bf16.msra.mxu0 %v619_v3  ;;  %419 = vmatprep.subr.bf16.mxu1 %v620_v4  ;;  %v625_v7 = vld [vmem:[%s946_s1 + $0x110] ss:$8 sps:$4 sm:$0xff]   ;;  %v628_v9 = vld [vmem:[%s946_s1 + $0x124] ss:$8 sps:$4 sm:$0xff]   ;;  %v631_v11 = vld [vmem:[%s946_s1 + $0x120] ss:$8 sps:$4 sm:$0xff]  }
   0x5   :  { %460 = vmatprep.subr.bf16.mxu0 %v622_v5  ;;  %v632_v12 = vld [vmem:[%s946_s1 + $0x34] ss:$8 sps:$4 sm:$0xff]   ;;  %v636_v14 = vld [vmem:[%s946_s1 + $0x30] ss:$8 sps:$4 sm:$0xff]   ;;  %v638_v16 = vld [vmem:[%s946_s1 + $0x44] ss:$8 sps:$4 sm:$0xff]  }
   0x6   :  { %v634_v13 = vld [vmem:[%s946_s1 + $0x134] ss:$8 sps:$4 sm:$0xff]   ;;  %v637_v15 = vld [vmem:[%s946_s1 + $0x130] ss:$8 sps:$4 sm:$0xff]   ;;  %v640_v17 = vld [vmem:[%s946_s1 + $0x144] ss:$8 sps:$4 sm:$0xff]  }
   0x7   :  { %420 = vmatpush1.bf16.msra.mxu1 %v624_v6  ;;  %v642_v18 = vld [vmem:[%s946_s1 + $0x40] ss:$8 sps:$4 sm:$0xff]   ;;  %v644_v20 = vld [vmem:[%s946_s1 + $0x54] ss:$8 sps:$4 sm:$0xff]   ;;  %v648_v22 = vld [vmem:[%s946_s1 + $0x50] ss:$8 sps:$4 sm:$0xff]   ;;  %v501_v6 = vlaneseq }
   0x8   :  { %461 = vmatpush1.bf16.msra.mxu0 %v625_v7  ;;  %421 = vmatprep.subr.bf16.mxu1 %v626_v8  ;;  %v643_v19 = vld [vmem:[%s946_s1 + $0x140] ss:$8 sps:$4 sm:$0xff]   ;;  %v646_v21 = vld [vmem:[%s946_s1 + $0x154] ss:$8 sps:$4 sm:$0xff]   ;;  %v649_v23 = vld [vmem:[%s946_s1 + $0x150] ss:$8 sps:$4 sm:$0xff]  }
   0x9   :  { %462 = vmatprep.subr.bf16.mxu0 %v628_v9  ;;  %v650_v24 = vld [vmem:[%s946_s1 + $0x64] ss:$8 sps:$4 sm:$0xff]   ;;  %v654_v26 = vld [vmem:[%s946_s1 + $0x60] ss:$8 sps:$4 sm:$0xff]   ;;  %v656_v28 = vld [vmem:[%s946_s1 + $0x74] ss:$8 sps:$4 sm:$0xff]  }
   0xa   :  { %v652_v25 = vld [vmem:[%s946_s1 + $0x164] ss:$8 sps:$4 sm:$0xff]   ;;  %v655_v27 = vld [vmem:[%s946_s1 + $0x160] ss:$8 sps:$4 sm:$0xff]   ;;  %v658_v29 = vld [vmem:[%s946_s1 + $0x174] ss:$8 sps:$4 sm:$0xff]  }
   0xb   :  { %422 = vmatpush1.bf16.msra.mxu1 %v630_v10  ;;  %v660_v30 = vld [vmem:[%s946_s1 + $0x70] ss:$8 sps:$4 sm:$0xff]   ;;  %v662_v32 = vld [vmem:[%s946_s1 + $0x84] ss:$8 sps:$4 sm:$0xff]   ;;  %v666_v34 = vld [vmem:[%s946_s1 + $0x80] ss:$8 sps:$4 sm:$0xff]  }
   0xc   :  { %463 = vmatpush1.bf16.msra.mxu0 %v631_v11  ;;  %423 = vmatprep.subr.bf16.mxu1 %v632_v12  ;;  %v661_v31 = vld [vmem:[%s946_s1 + $0x170] ss:$8 sps:$4 sm:$0xff]   ;;  %v664_v33 = vld [vmem:[%s946_s1 + $0x184] ss:$8 sps:$4 sm:$0xff]   ;;  %v667_v35 = vld [vmem:[%s946_s1 + $0x180] ss:$8 sps:$4 sm:$0xff]  }
   0xd   :  { %464 = vmatprep.subr.bf16.mxu0 %v634_v13  ;;  %v668_v36 = vld [vmem:[%s946_s1 + $0x94] ss:$8 sps:$4 sm:$0xff]   ;;  %v672_v38 = vld [vmem:[%s946_s1 + $0x90] ss:$8 sps:$4 sm:$0xff]   ;;  %v674_v40 = vld [vmem:[%s946_s1 + $0xa4] ss:$8 sps:$4 sm:$0xff]  }
   0xe   :  { %v670_v37 = vld [vmem:[%s946_s1 + $0x194] ss:$8 sps:$4 sm:$0xff]   ;;  %v673_v39 = vld [vmem:[%s946_s1 + $0x190] ss:$8 sps:$4 sm:$0xff]   ;;  %v676_v41 = vld [vmem:[%s946_s1 + $0x1a4] ss:$8 sps:$4 sm:$0xff]  }
   0xf   :  { %424 = vmatpush1.bf16.msra.mxu1 %v636_v14  ;;  %v678_v42 = vld [vmem:[%s946_s1 + $0xa0] ss:$8 sps:$4 sm:$0xff]   ;;  %v680_v44 = vld [vmem:[%s946_s1 + $0xb4] ss:$8 sps:$4 sm:$0xff]   ;;  %v684_v49 = vld [vmem:[%s946_s1 + $0xb0] ss:$8 sps:$4 sm:$0xff]  }
  0x10   :  { %465 = vmatpush1.bf16.msra.mxu0 %v637_v15  ;;  %425 = vmatprep.subr.bf16.mxu1 %v638_v16  ;;  %v679_v43 = vld [vmem:[%s946_s1 + $0x1a0] ss:$8 sps:$4 sm:$0xff]   ;;  %v682_v45 = vld [vmem:[%s946_s1 + $0x1b4] ss:$8 sps:$4 sm:$0xff]   ;;  %v685_v50 = vld [vmem:[%s946_s1 + $0x1b0] ss:$8 sps:$4 sm:$0xff]  }
  0x11   :  { %466 = vmatprep.subr.bf16.mxu0 %v640_v17  ;;  %v17_v46 = vld [vmem:[%s947_s0] sm:$0xff]  ;;  %v18_v48 = vld [vmem:[%s947_s0 + $0x8] sm:$0xff]  ;;  %v692_v56 = vld [vmem:[%s946_s1 + $0xd4] ss:$8 sps:$4 sm:$0xff]   ;;  %v502_v7 = vshrl.u32 %v501_v6, 7 }
  0x12   :  { %v543_v47 = vcombine.high %v17_v46, %v17_v46  ;;  %v545_v51 = vcombine.high %v18_v48, %v18_v48  ;;  %v686_v52 = vld [vmem:[%s946_s1 + $0xc4] ss:$8 sps:$4 sm:$0xff]   ;;  %v690_v54 = vld [vmem:[%s946_s1 + $0xc0] ss:$8 sps:$4 sm:$0xff]   ;;  %v694_v57 = vld [vmem:[%s946_s1 + $0x1d4] ss:$8 sps:$4 sm:$0xff]   ;;  %v542_v4 = vcombine.low %v17_v46, %v17_v46  ;;  %v544_v5 = vcombine.low %v18_v48, %v18_v48 }
  0x13   :  { %426 = vmatpush1.bf16.msra.mxu1 %v642_v18  ;;  %v688_v53 = vld [vmem:[%s946_s1 + $0x1c4] ss:$8 sps:$4 sm:$0xff]   ;;  %v691_v55 = vld [vmem:[%s946_s1 + $0x1c0] ss:$8 sps:$4 sm:$0xff]   ;;  %v696_v58 = vld [vmem:[%s946_s1 + $0xd0] ss:$8 sps:$4 sm:$0xff]  }
  0x14   :  { %467 = vmatpush1.bf16.msra.mxu0 %v643_v19  ;;  %427 = vmatprep.subr.bf16.mxu1 %v644_v20  ;;  %v697_v59 = vld [vmem:[%s946_s1 + $0x1d0] ss:$8 sps:$4 sm:$0xff]   ;;  %v698_v60 = vld [vmem:[%s946_s1 + $0xe4] ss:$8 sps:$4 sm:$0xff]   ;;  %v702_v62 = vld [vmem:[%s946_s1 + $0xe0] ss:$8 sps:$4 sm:$0xff]  }
  0x15   :  { %468 = vmatprep.subr.bf16.mxu0 %v646_v21  ;;  %449 = vmatprep.mubr.bf16.mxu1 %v543_v47  ;;  %v700_v61 = vld [vmem:[%s946_s1 + $0x1e4] ss:$8 sps:$4 sm:$0xff]   ;;  %v703_v63 = vld [vmem:[%s946_s1 + $0x1e0] ss:$8 sps:$4 sm:$0xff]   ;;  %v704_v0 = vld [vmem:[%s946_s1 + $0xf4] ss:$8 sps:$4 sm:$0xff]  }
  0x16   :  { %490 = vmatprep.mubr.bf16.mxu0 %v545_v51  ;;  %v706_v1 = vld [vmem:[%s946_s1 + $0x1f4] ss:$8 sps:$4 sm:$0xff]   ;;  %v708_v2 = vld [vmem:[%s946_s1 + $0xf0] ss:$8 sps:$4 sm:$0xff]   ;;  %v503_v8 = vsub.s32 0, %v502_v7  ;;  %v507_v10 = vsub.s32 1, %v502_v7 }
  0x17   :  { %428 = vmatpush1.bf16.msra.mxu1 %v648_v22  ;;  %v709_v3 = vld [vmem:[%s946_s1 + $0x1f0] ss:$8 sps:$4 sm:$0xff]   ;;  %v499_v9 = vld [vmem:[%s948_s2] sm:$0x3] }
  0x18   :  { %469 = vmatpush1.bf16.msra.mxu0 %v649_v23  ;;  %429 = vmatprep.subr.bf16.mxu1 %v650_v24  ;;  %v513_v11 = vld [vmem:[%s949_s3] sm:$0x3]  ;;  %v504_v12 = vrot.slane %v499_v9, %v503_v8  ;;  %v508_v15 = vrot.slane %v499_v9, %v507_v10 }
  0x19   :  { %470 = vmatprep.subr.bf16.mxu0 %v652_v25  ;;  %v518_v17 = vrot.slane %v513_v11, %v503_v8  ;;  %v522_v21 = vrot.slane %v513_v11, %v507_v10 }
  0x1b   :  { %430 = vmatpush1.bf16.msra.mxu1 %v654_v26 }
  0x1c   :  { %471 = vmatpush1.bf16.msra.mxu0 %v655_v27  ;;  %431 = vmatprep.subr.bf16.mxu1 %v656_v28 }
  0x1d   :  { %472 = vmatprep.subr.bf16.mxu0 %v658_v29 }
  0x1f   :  { %432 = vmatpush1.bf16.msra.mxu1 %v660_v30 }
  0x20   :  { %473 = vmatpush1.bf16.msra.mxu0 %v661_v31  ;;  %433 = vmatprep.subr.bf16.mxu1 %v662_v32 }
  0x21   :  { %474 = vmatprep.subr.bf16.mxu0 %v664_v33 }
  0x23   :  { %434 = vmatpush1.bf16.msra.mxu1 %v666_v34 }
  0x24   :  { %475 = vmatpush1.bf16.msra.mxu0 %v667_v35  ;;  %435 = vmatprep.subr.bf16.mxu1 %v668_v36 }
  0x25   :  { %476 = vmatprep.subr.bf16.mxu0 %v670_v37 }
  0x27   :  { %436 = vmatpush1.bf16.msra.mxu1 %v672_v38 }
  0x28   :  { %477 = vmatpush1.bf16.msra.mxu0 %v673_v39  ;;  %437 = vmatprep.subr.bf16.mxu1 %v674_v40 }
  0x29   :  { %478 = vmatprep.subr.bf16.mxu0 %v676_v41 }
  0x2b   :  { %438 = vmatpush1.bf16.msra.mxu1 %v678_v42 }
  0x2c   :  { %479 = vmatpush1.bf16.msra.mxu0 %v679_v43  ;;  %439 = vmatprep.subr.bf16.mxu1 %v680_v44 }
  0x2d   :  { %480 = vmatprep.subr.bf16.mxu0 %v682_v45 }
  0x2f   :  { %440 = vmatpush1.bf16.msra.mxu1 %v684_v49 }
  0x30   :  { %481 = vmatpush1.bf16.msra.mxu0 %v685_v50  ;;  %441 = vmatprep.subr.bf16.mxu1 %v686_v52 }
  0x31   :  { %482 = vmatprep.subr.bf16.mxu0 %v688_v53 }
  0x33   :  { %442 = vmatpush1.bf16.msra.mxu1 %v690_v54 }
  0x34   :  { %483 = vmatpush1.bf16.msra.mxu0 %v691_v55  ;;  %443 = vmatprep.subr.bf16.mxu1 %v692_v56 }
  0x35   :  { %484 = vmatprep.subr.bf16.mxu0 %v694_v57 }
  0x37   :  { %444 = vmatpush1.bf16.msra.mxu1 %v696_v58 }
  0x38   :  { %485 = vmatpush1.bf16.msra.mxu0 %v697_v59  ;;  %445 = vmatprep.subr.bf16.mxu1 %v698_v60 }
  0x39   :  { %486 = vmatprep.subr.bf16.mxu0 %v700_v61 }
  0x3b   :  { %446 = vmatpush1.bf16.msra.mxu1 %v702_v62 }
  0x3c   :  { %487 = vmatpush1.bf16.msra.mxu0 %v703_v63  ;;  %447 = vmatprep.subr.bf16.mxu1 %v704_v0 }
  0x3d   :  { %488 = vmatprep.subr.bf16.mxu0 %v706_v1 }
  0x3f   :  { %448 = vmatpush1.bf16.msra.mxu1 %v708_v2 }
  0x40   :  { %489 = vmatpush1.bf16.msra.mxu0 %v709_v3 }
  0x42   :  { %450 = vmatmul.mubr.bf16.vlgmr.msra.gmra.mrb[0].mxu1 %v542_v4 }
  0x43   :  { %491 = vmatmul.mubr.bf16.vlgmr.msra.gmra.mrb[0].mxu0 %v544_v5 }
 0x115   :  { %v451_v13 = vpop.f32.mrb[0].mxu1 }
 0x116   :  { %v492_v14 = vpop.f32.mrb[0].mxu0  ;;  %v453_v18 = vpop.f32.mrb[1].mxu1 }
 0x117   :  { %v493_v16 = vadd.f32 %v492_v14, %v451_v13  ;;  %v494_v19 = vpop.f32.mrb[1].mxu0  ;;  %v455_v22 = vpop.f32.mrb[2].mxu1 }
 0x118   :  { %v495_v20 = vadd.f32 %v494_v19, %v453_v18  ;;  %v496_v23 = vpop.f32.mrb[2].mxu0  ;;  %v456_v25 = vpop.f32.mrb[3].mxu1 }
 0x119   :  { %v511_v24 = vmul.f32 %v504_v12, %v493_v16  ;;  %v497_v26 = vpop.f32.mrb[3].mxu0 }
 0x11a   :  { %v512_v27 = vmul.f32 %v508_v15, %v495_v20 }
 0x11b   :  { %v525_v28 = vadd.f32 %v518_v17, %v511_v24 }
 0x11c   :  { %v526_v29 = vadd.f32 %v522_v21, %v512_v27 }
 0x11d   :  { %v527_v30 = vmax.f32 %v525_v28, 0.0 }
 0x11e   :  { %v528_v31 = vmax.f32 %v526_v29, 0.0 }
 0x120   :  { %v611_v32 = vpack.c.bf16 %v528_v31, %v527_v30 }
 0x122   :  { %537 = vst [vmem:[%s950_s4] sm:$0xff] %v611_v32 }

// kernel: resnet50_forward.83
= control target key start
LH: loop header
LB: loop body
LE: loop exit
PB: predicated region body
PF: predicated region fallthrough
CT: control target
= control target key end

     0   :  { %s1114_s15 = smov 0   ;;  %s1116_s16 = smov 0   ;;  %s1216_s0 = inlined_call_operand.vmem [shape: bf16[8,2304], index: 0, kind: input, shape index: {}]   ;;  %s1217_s1 = inlined_call_operand.vmem [shape: bf16[2304,256], index: 1, kind: input, shape index: {}]   ;;  %s1218_s2 = inlined_call_operand.vmem [shape: f32[1,256], index: 2, kind: input, shape index: {}]   ;;  %s1219_s3 = inlined_call_operand.vmem [shape: f32[1,256], index: 3, kind: input, shape index: {}]   ;;  %s1220_s4 = inlined_call_operand.vmem [shape: bf16[8,256], index: 4, kind: output, shape index: {}]  }
   0x1   :  { %s1118_s17 = smov 0  }
   0x2 LB: > { %s26_s18 = sadd.s32 1, %s1081_s16  ;;  %p898_p0 = scmp.ge.s32.totalorder %s1085_s17, 1  ;;  %s1085_s17 = sphi %s1118_s17, %s14_s17   ;;  %s1081_s16 = sphi %s1116_s16, %s1222_s16   ;;  %s1077_s15 = sphi %s1114_s15, %s1221_s15  }
   0x3   : > { %p27_p1 = scmp.ge.s32.totalorder %s26_s18, 6  ;;  %p229_p2 = scmp.lt.s32.totalorder %s1085_s17, 7 }
   0x5   : > { %s1224_s18 = smov (%p27_p1, %s26_s18), 0  ;;  %p230_p3 = pnand %p898_p0, %p229_p2 }
   0x6   : > { %s281_s19 = smul.u32 (!%p230_p3), 3, %s1077_s15  ;;  %p902_p6 = scmp.ne.s32.totalorder (!%p230_p3), %s1077_s15, 0 }
   0x7   : > { %233 = sbr.rel (%p230_p3) target bundleno = 323 (0x143), region = 36 }
   0x8   : > { %s291_s20 = smul.u32 (!%p230_p3), 48, %s1077_s15  ;;  %p284_p4 = scmp.lt.s32.totalorder (!%p230_p3), %s281_s19, 17 }
   0xa   : > { %p293_p5 = scmp.lt.s32.totalorder (!%p230_p3), %s291_s20, 287 }
   0xe   : > { %s1226_s19 = smov (!%p284_p4, %s281_s19), 17  ;;  %s1228_s20 = smov (!%p293_p5, %s291_s20), 287 }
   0xf   : > { %s899_s21 = sshll.u32 %s1226_s19, 2  ;;  %s960_s25 = sshll.u32 %s1228_s20, 3  ;;  %v1087_v0 = vmov (!%p902_p6), 0.0  }
  0x10   : > { %s1139_s24 = scalar_lea.vmem %s1216_s0, %s899_s21  ;;  %s1144_s28 = scalar_lea.vmem %s1217_s1, %s960_s25  ;;  %328 = vst [vmem:[#allocation2] sm:$0xff] (!%p902_p6), %v1087_v0  ;;  %329 = vst [vmem:[#allocation2 + $0x8] sm:$0xff] (!%p902_p6), %v1087_v0 }
  0x11   : > { %327 = sbr.rel (%p902_p6) target bundleno = 24 (0x18), region = 40 }
  0x18 PF: > { %v988_v1 = vld [vmem:[%s1144_s28 + $0x4] ss:$8 sps:$4 sm:$0xff]   ;;  %v990_v2 = vld [vmem:[%s1144_s28] ss:$8 sps:$4 sm:$0xff]   ;;  %v1088_v3 = vmov 0   ;;  %p954_p7 = scmp.ne.s32.totalorder %s1077_s15, 5 }
  0x19   : > { %706 = vmatprep.mubr.bf16.mxu1 %v1088_v3  ;;  %633 = vmatprep.subr.bf16.mxu0 %v988_v1  ;;  %v991_v4 = vld [vmem:[%s1144_s28 + $0x14] ss:$8 sps:$4 sm:$0xff]   ;;  %v993_v5 = vld [vmem:[%s1144_s28 + $0x10] ss:$8 sps:$4 sm:$0xff]   ;;  %v994_v6 = vld [vmem:[%s1144_s28 + $0x24] ss:$8 sps:$4 sm:$0xff]  }
  0x1a   : > { %634 = vmatpush1.bf16.msra.mxu0 %v990_v2  ;;  %v996_v7 = vld [vmem:[%s1144_s28 + $0x20] ss:$8 sps:$4 sm:$0xff]   ;;  %v997_v8 = vld [vmem:[%s1144_s28 + $0x34] ss:$8 sps:$4 sm:$0xff]   ;;  %v999_v9 = vld [vmem:[%s1144_s28 + $0x30] ss:$8 sps:$4 sm:$0xff]  }
  0x1b   : > { %635 = vmatprep.subr.bf16.mxu0 %v991_v4  ;;  %v1012_v10 = vld [vmem:[%s1144_s28 + $0x104] ss:$8 sps:$4 sm:$0xff]   ;;  %v1014_v11 = vld [vmem:[%s1144_s28 + $0x100] ss:$8 sps:$4 sm:$0xff]   ;;  %v1018_v13 = vld [vmem:[%s1144_s28 + $0x114] ss:$8 sps:$4 sm:$0xff]   ;;  %v727_v4 = vlaneseq (!%p954_p7) }
  0x1c   : > { %v1000_v12 = vld [vmem:[%s1144_s28 + $0x44] ss:$8 sps:$4 sm:$0xff]   ;;  %674 = vmatprep.subr.bf16.mxu1 %v1012_v10  ;;  %v1020_v14 = vld [vmem:[%s1144_s28 + $0x110] ss:$8 sps:$4 sm:$0xff]   ;;  %v1002_v15 = vld [vmem:[%s1144_s28 + $0x40] ss:$8 sps:$4 sm:$0xff]  }
  0x1d   : > { %675 = vmatpush1.bf16.msra.mxu1 %v1014_v11  ;;  %v1003_v16 = vld [vmem:[%s1144_s28 + $0x54] ss:$8 sps:$4 sm:$0xff]   ;;  %v1024_v17 = vld [vmem:[%s1144_s28 + $0x124] ss:$8 sps:$4 sm:$0xff]   ;;  %v1026_v18 = vld [vmem:[%s1144_s28 + $0x120] ss:$8 sps:$4 sm:$0xff]  }
  0x1e   : > { %636 = vmatpush1.bf16.msra.mxu0 %v993_v5  ;;  %676 = vmatprep.subr.bf16.mxu1 %v1018_v13  ;;  %v1005_v19 = vld [vmem:[%s1144_s28 + $0x50] ss:$8 sps:$4 sm:$0xff]   ;;  %v1030_v20 = vld [vmem:[%s1144_s28 + $0x134] ss:$8 sps:$4 sm:$0xff]   ;;  %v1006_v21 = vld [vmem:[%s1144_s28 + $0x64] ss:$8 sps:$4 sm:$0xff]  }
  0x1f   : > { %637 = vmatprep.subr.bf16.mxu0 %v994_v6  ;;  %v1032_v22 = vld [vmem:[%s1144_s28 + $0x130] ss:$8 sps:$4 sm:$0xff]   ;;  %v1008_v23 = vld [vmem:[%s1144_s28 + $0x60] ss:$8 sps:$4 sm:$0xff]   ;;  %v1036_v24 = vld [vmem:[%s1144_s28 + $0x144] ss:$8 sps:$4 sm:$0xff]  }
  0x20   : > { %v1009_v25 = vld [vmem:[%s1144_s28 + $0x74] ss:$8 sps:$4 sm:$0xff]   ;;  %v1038_v26 = vld [vmem:[%s1144_s28 + $0x140] ss:$8 sps:$4 sm:$0xff]   ;;  %v1011_v27 = vld [vmem:[%s1144_s28 + $0x70] ss:$8 sps:$4 sm:$0xff]  }
  0x21   : > { %677 = vmatpush1.bf16.msra.mxu1 %v1020_v14  ;;  %v1042_v28 = vld [vmem:[%s1144_s28 + $0x154] ss:$8 sps:$4 sm:$0xff]   ;;  %v1015_v29 = vld [vmem:[%s1144_s28 + $0x84] ss:$8 sps:$4 sm:$0xff]   ;;  %v1044_v30 = vld [vmem:[%s1144_s28 + $0x150] ss:$8 sps:$4 sm:$0xff]  }
  0x22   : > { %638 = vmatpush1.bf16.msra.mxu0 %v996_v7  ;;  %678 = vmatprep.subr.bf16.mxu1 %v1024_v17  ;;  %v1017_v31 = vld [vmem:[%s1144_s28 + $0x80] ss:$8 sps:$4 sm:$0xff]   ;;  %v1048_v32 = vld [vmem:[%s1144_s28 + $0x164] ss:$8 sps:$4 sm:$0xff]   ;;  %v1021_v33 = vld [vmem:[%s1144_s28 + $0x94] ss:$8 sps:$4 sm:$0xff]  }
  0x23   : > { %639 = vmatprep.subr.bf16.mxu0 %v997_v8  ;;  %v332_v34 = vld [vmem:[%s1139_s24] sm:$0xff]  ;;  %v1023_v37 = vld [vmem:[%s1144_s28 + $0x90] ss:$8 sps:$4 sm:$0xff]   ;;  %v1054_v38 = vld [vmem:[%s1144_s28 + $0x174] ss:$8 sps:$4 sm:$0xff]   ;;  %v728_v5 = vshrl.u32 (!%p954_p7), %v727_v4, 7 }
  0x24   : > { %v904_v35 = vcombine.high %v332_v34, %v332_v34  ;;  %v1050_v36 = vld [vmem:[%s1144_s28 + $0x160] ss:$8 sps:$4 sm:$0xff]   ;;  %v1027_v39 = vld [vmem:[%s1144_s28 + $0xa4] ss:$8 sps:$4 sm:$0xff]   ;;  %v1056_v40 = vld [vmem:[%s1144_s28 + $0x170] ss:$8 sps:$4 sm:$0xff]   ;;  %v903_v53 = vcombine.low %v332_v34, %v332_v34 }
  0x25   : > { %679 = vmatpush1.bf16.msra.mxu1 %v1026_v18  ;;  %v1029_v41 = vld [vmem:[%s1144_s28 + $0xa0] ss:$8 sps:$4 sm:$0xff]   ;;  %v1033_v42 = vld [vmem:[%s1144_s28 + $0xb4] ss:$8 sps:$4 sm:$0xff]   ;;  %v1035_v44 = vld [vmem:[%s1144_s28 + $0xb0] ss:$8 sps:$4 sm:$0xff]  }
  0x26   : > { %640 = vmatpush1.bf16.msra.mxu0 %v999_v9  ;;  %680 = vmatprep.subr.bf16.mxu1 %v1030_v20  ;;  %v1060_v43 = vld [vmem:[%s1139_s24 + $0x8] ss:$0 sps:$4 sm:$0xff]   ;;  %v1039_v45 = vld [vmem:[%s1144_s28 + $0xc4] ss:$8 sps:$4 sm:$0xff]   ;;  %v1045_v47 = vld [vmem:[%s1144_s28 + $0xd4] ss:$8 sps:$4 sm:$0xff]  }
  0x27   : > { %641 = vmatprep.subr.bf16.mxu0 %v1000_v12  ;;  %665 = vmatprep.mubr.bf16.mxu0 %v904_v35  ;;  %v1041_v46 = vld [vmem:[%s1144_s28 + $0xc0] ss:$8 sps:$4 sm:$0xff]   ;;  %v1047_v48 = vld [vmem:[%s1144_s28 + $0xd0] ss:$8 sps:$4 sm:$0xff]   ;;  %v1051_v49 = vld [vmem:[%s1144_s28 + $0xe4] ss:$8 sps:$4 sm:$0xff]  }
  0x28   : > { %v1053_v50 = vld [vmem:[%s1144_s28 + $0xe0] ss:$8 sps:$4 sm:$0xff]   ;;  %v1057_v51 = vld [vmem:[%s1144_s28 + $0xf4] ss:$8 sps:$4 sm:$0xff]   ;;  %v1059_v52 = vld [vmem:[%s1144_s28 + $0xf0] ss:$8 sps:$4 sm:$0xff]  }
  0x29   : > { %681 = vmatpush1.bf16.msra.mxu1 %v1032_v22  ;;  %v330_v58 = vld [vmem:[#allocation2] sm:$0xff]  ;;  %v331_v61 = vld [vmem:[#allocation2 + $0x8] sm:$0xff]  ;;  %v729_v8 = vsub.s32 (!%p954_p7), 0, %v728_v5  ;;  %v733_v9 = vsub.s32 (!%p954_p7), 1, %v728_v5 }
  0x2a   : > { %642 = vmatpush1.bf16.msra.mxu0 %v1002_v15  ;;  %682 = vmatprep.subr.bf16.mxu1 %v1036_v24  ;;  %v725_v6 = vld [vmem:[%s1218_s2] sm:$0x3] (!%p954_p7) }
  0x2b   : > { %643 = vmatprep.subr.bf16.mxu0 %v1003_v16  ;;  %v739_v7 = vld [vmem:[%s1219_s3] sm:$0x3] (!%p954_p7)  ;;  %v730_v12 = vrot.slane (!%p954_p7), %v725_v6, %v729_v8  ;;  %v734_v13 = vrot.slane (!%p954_p7), %v725_v6, %v733_v9 }
  0x2c   : > { %v744_v14 = vrot.slane (!%p954_p7), %v739_v7, %v729_v8  ;;  %v748_v15 = vrot.slane (!%p954_p7), %v739_v7, %v733_v9 }
  0x2d   : > { %683 = vmatpush1.bf16.msra.mxu1 %v1038_v26 }
  0x2e   : > { %644 = vmatpush1.bf16.msra.mxu0 %v1005_v19  ;;  %684 = vmatprep.subr.bf16.mxu1 %v1042_v28 }
  0x2f   : > { %645 = vmatprep.subr.bf16.mxu0 %v1006_v21 }
  0x31   : > { %685 = vmatpush1.bf16.msra.mxu1 %v1044_v30 }
  0x32   : > { %646 = vmatpush1.bf16.msra.mxu0 %v1008_v23  ;;  %686 = vmatprep.subr.bf16.mxu1 %v1048_v32 }
  0x33   : > { %647 = vmatprep.subr.bf16.mxu0 %v1009_v25 }
  0x35   : > { %687 = vmatpush1.bf16.msra.mxu1 %v1050_v36 }
  0x36   : > { %648 = vmatpush1.bf16.msra.mxu0 %v1011_v27  ;;  %688 = vmatprep.subr.bf16.mxu1 %v1054_v38 }
  0x37   : > { %649 = vmatprep.subr.bf16.mxu0 %v1015_v29 }
  0x39   : > { %689 = vmatpush1.bf16.msra.mxu1 %v1056_v40 }
  0x3a   : > { %650 = vmatpush1.bf16.msra.mxu0 %v1017_v31 }
  0x3b   : > { %651 = vmatprep.subr.bf16.mxu0 %v1021_v33 }
  0x3c   : > { %707 = vmatmul.mubr.bf16.vlgmr.msra.gmra.mrb[0].mxu1 %v1060_v43 }
  0x3e   : > { %652 = vmatpush1.bf16.msra.mxu0 %v1023_v37 }
  0x3f   : > { %653 = vmatprep.subr.bf16.mxu0 %v1027_v39 }
  0x42   : > { %654 = vmatpush1.bf16.msra.mxu0 %v1029_v41 }
  0x43   : > { %655 = vmatprep.subr.bf16.mxu0 %v1033_v42 }
  0x46   : > { %656 = vmatpush1.bf16.msra.mxu0 %v1035_v44 }
  0x47   : > { %657 = vmatprep.subr.bf16.mxu0 %v1039_v45 }
  0x4a   : > { %658 = vmatpush1.bf16.msra.mxu0 %v1041_v46 }
  0x4b   : > { %659 = vmatprep.subr.bf16.mxu0 %v1045_v47 }
  0x4e   : > { %660 = vmatpush1.bf16.msra.mxu0 %v1047_v48 }
  0x4f   : > { %661 = vmatprep.subr.bf16.mxu0 %v1051_v49 }
  0x52   : > { %662 = vmatpush1.bf16.msra.mxu0 %v1053_v50 }
  0x53   : > { %663 = vmatprep.subr.bf16.mxu0 %v1057_v51 }
  0x56   : > { %664 = vmatpush1.bf16.msra.mxu0 %v1059_v52 }
  0x59   : > { %666 = vmatmul.mubr.bf16.vlgmr.msra.gmra.mrb[0].mxu0 %v903_v53 }
 0x10f   : > { %v708_v54 = vpop.f32.mrb[0].mxu1 }
 0x110   : > { %v710_v55 = vpop.f32.mrb[1].mxu1 }
 0x111   : > { %v712_v56 = vpop.f32.mrb[2].mxu1 }
 0x112   : > { %v713_v57 = vpop.f32.mrb[3].mxu1 }
 0x12c   : > { %v667_v59 = vpop.f32.mrb[0].mxu0  ;;  %722 = sbr.rel (%p954_p7) target bundleno = 323 (0x143), region = 44 }
 0x12d   : > { %v709_v60 = vadd.f32 %v708_v54, %v667_v59  ;;  %v669_v62 = vpop.f32.mrb[1].mxu0 }
 0x12e   : > { %v711_v63 = vadd.f32 %v710_v55, %v669_v62  ;;  %v671_v0 = vpop.f32.mrb[2].mxu0 }
 0x12f   : > { %v715_v1 = vadd.f32 %v709_v60, %v330_v58  ;;  %v672_v2 = vpop.f32.mrb[3].mxu0 }
 0x130   : > { %v716_v3 = vadd.f32 %v711_v63, %v331_v61 }
 0x131   : > { %717 = vst [vmem:[#allocation2] sm:$0xff] %v715_v1 }
 0x132   : > { %718 = vst [vmem:[#allocation2 + $0x8] sm:$0xff] %v716_v3 }
 0x138   : > { %v723_v10 = vld [vmem:[#allocation2] sm:$0xff] }
 0x139   : > { %v724_v11 = vld [vmem:[#allocation2 + $0x8] sm:$0xff]  ;;  %v737_v16 = vmul.f32 %v730_v12, %v723_v10 }
 0x13a   : > { %v738_v17 = vmul.f32 %v734_v13, %v724_v11 }
 0x13b   : > { %v751_v18 = vadd.f32 %v744_v14, %v737_v16 }
 0x13c   : > { %v752_v19 = vadd.f32 %v748_v15, %v738_v17 }
 0x13d   : > { %v753_v20 = vmax.f32 %v751_v18, 0.0 }
 0x13e   : > { %v754_v21 = vmax.f32 %v752_v19, 0.0 }
 0x140   : > { %v961_v22 = vpack.c.bf16 %v754_v21, %v753_v20 }
 0x142   : > { %763 = vst [vmem:[%s1220_s4] sm:$0xff] %v961_v22 }
 0x143 PF: > { %s14_s17 = sadd.s32 1, %s1085_s17   ;;  %s1221_s15 = smov %s1081_s16 }
 0x144   : > { %p11_p8 = scmp.ge.s32.totalorder %s14_s17, 8   ;;  %s1222_s16 = smov %s1224_s18 }
 0x146   :  { %13 = sbr.rel (!%p11_p8) target bundleno = 2 (0x2), region = 83 }

// kernel: resnet50_forward.81
= control target key start
LH: loop header
LB: loop body
LE: loop exit
PB: predicated region body
PF: predicated region fallthrough
CT: control target
= control target key end

     0   :  { %s1500_s15 = smov 0   ;;  %s1502_s16 = smov 0   ;;  %s1787_s0 = inlined_call_operand.vmem [shape: bf16[8,512], index: 0, kind: input, shape index: {}]   ;;  %s1788_s1 = inlined_call_operand.vmem [shape: bf16[512,1024], index: 1, kind: input, shape index: {}]   ;;  %s1789_s2 = inlined_call_operand.vmem [shape: f32[1,1024], index: 2, kind: input, shape index: {}]   ;;  %s1790_s3 = inlined_call_operand.vmem [shape: f32[1,1024], index: 3, kind: input, shape index: {}]   ;;  %s1791_s4 = inlined_call_operand.vmem [shape: bf16[8,1024], index: 4, kind: output, shape index: {}]  }
   0x1   :  { %s1504_s17 = smov 0   ;;  %s1506_s18 = smov 0  }
   0x2   :  { %s1508_s19 = smov 0  }
   0x3 LB: > { %s23_s20 = sadd.s32 1, %s1469_s18  ;;  %p66_p1 = scmp.ne.s32.totalorder %s1461_s16, %s1457_s15  ;;  %s1473_s19 = sphi %s1508_s19, %s14_s19   ;;  %s1469_s18 = sphi %s1506_s18, %s1795_s18   ;;  %s1465_s17 = sphi %s1504_s17, %s1794_s17   ;;  %s1461_s16 = sphi %s1502_s16, %s1793_s16   ;;  %s1457_s15 = sphi %s1500_s15, %s1792_s15  }
   0x4   : > { %p24_p0 = scmp.ge.s32.totalorder %s23_s20, 4  ;;  %p67_p2 = scmp.eq.s32.totalorder %s1473_s19, 0 }
   0x5   : > { %s59_s22 = sadd.s32 1, %s1461_s16  ;;  %p1210_p5 = scmp.ge.s32.totalorder %s1473_s19, 4 }
   0x6   : > { %s1797_s20 = smov (%p24_p0, %s23_s20), 0  ;;  %p68_p3 = por %p67_p2, %p66_p1 }
   0x7   : > { %s56_s21 = ssub.s32 %s1469_s18, %s1797_s20  ;;  %180 = sbr.rel (%p1210_p5) target bundleno = 82 (0x52), region = 20 }
   0x8   : > { %p57_p4 = scmp.eq.s32.totalorder %s56_s21, 0 }
   0xa   : > { %s1535_s23 = scalar_select %p57_p4, %s1461_s16, %s59_s22  }
   0xe   : > { %183 = sbr.rel (!%p68_p3) target bundleno = 82 (0x52), region = 24  ;;  %s185_s24 = sand.u32 (%p68_p3), 1, %s1461_s16  }
   0xf   : > { %s1291_s25 = sshll.u32 (%p68_p3), %s1469_s18, 3  ;;  %s1211_s26 = sshll.u32 (%p68_p3), %s185_s24, 9 }
  0x10   : > { %s1543_s29 = scalar_lea.vmem (%p68_p3), %s1788_s1, %s1291_s25  ;;  %s1548_s30 = scalar_lea.vmem (%p68_p3), [#allocation2], %s1211_s26 }
  0x11   : > { %v344_v0 = vld [vmem:[%s1543_s29] sm:$0xff] (%p68_p3) }
  0x12   : > { %v346_v1 = vld [vmem:[%s1543_s29 + $0x20] sm:$0xff] (%p68_p3)  ;;  %345 = vst [vmem:[%s1548_s30] sm:$0xff] (%p68_p3), %v344_v0 }
  0x13   : > { %v348_v2 = vld [vmem:[%s1543_s29 + $0x40] sm:$0xff] (%p68_p3)  ;;  %347 = vst [vmem:[%s1548_s30 + $0x8] sm:$0xff] (%p68_p3), %v346_v1 }
  0x14   : > { %349 = vst [vmem:[%s1548_s30 + $0x10] sm:$0xff] (%p68_p3), %v348_v2  ;;  %v350_v3 = vld [vmem:[%s1543_s29 + $0x60] sm:$0xff] (%p68_p3) }
  0x15   : > { %v352_v4 = vld [vmem:[%s1543_s29 + $0x80] sm:$0xff]  ;;  %351 = vst [vmem:[%s1548_s30 + $0x18] sm:$0xff] %v350_v3 }
  0x16   : > { %v354_v5 = vld [vmem:[%s1543_s29 + $0xa0] sm:$0xff]  ;;  %353 = vst [vmem:[%s1548_s30 + $0x20] sm:$0xff] %v352_v4 }
  0x17   : > { %355 = vst [vmem:[%s1548_s30 + $0x28] sm:$0xff] %v354_v5  ;;  %v356_v6 = vld [vmem:[%s1543_s29 + $0xc0] sm:$0xff] }
  0x18   : > { %v358_v7 = vld [vmem:[%s1543_s29 + $0xe0] sm:$0xff]  ;;  %357 = vst [vmem:[%s1548_s30 + $0x30] sm:$0xff] %v356_v6 }
  0x19   : > { %v360_v8 = vld [vmem:[%s1543_s29 + $0x100] sm:$0xff]  ;;  %359 = vst [vmem:[%s1548_s30 + $0x38] sm:$0xff] %v358_v7 }
  0x1a   : > { %361 = vst [vmem:[%s1548_s30 + $0x40] sm:$0xff] %v360_v8  ;;  %v362_v9 = vld [vmem:[%s1543_s29 + $0x120] sm:$0xff] }
  0x1b   : > { %v364_v10 = vld [vmem:[%s1543_s29 + $0x140] sm:$0xff]  ;;  %363 = vst [vmem:[%s1548_s30 + $0x48] sm:$0xff] %v362_v9 }
  0x1c   : > { %v366_v11 = vld [vmem:[%s1543_s29 + $0x160] sm:$0xff]  ;;  %365 = vst [vmem:[%s1548_s30 + $0x50] sm:$0xff] %v364_v10 }
  0x1d   : > { %367 = vst [vmem:[%s1548_s30 + $0x58] sm:$0xff] %v366_v11  ;;  %v368_v12 = vld [vmem:[%s1543_s29 + $0x180] sm:$0xff] }
  0x1e   : > { %v370_v13 = vld [vmem:[%s1543_s29 + $0x1a0] sm:$0xff]  ;;  %369 = vst [vmem:[%s1548_s30 + $0x60] sm:$0xff] %v368_v12 }
  0x1f   : > { %v372_v14 = vld [vmem:[%s1543_s29 + $0x1c0] sm:$0xff]  ;;  %371 = vst [vmem:[%s1548_s30 + $0x68] sm:$0xff] %v370_v13 }
  0x20   : > { %373 = vst [vmem:[%s1548_s30 + $0x70] sm:$0xff] %v372_v14  ;;  %v374_v15 = vld [vmem:[%s1543_s29 + $0x1e0] sm:$0xff] }
  0x21   : > { %v376_v16 = vld [vmem:[%s1543_s29 + $0x200] sm:$0xff]  ;;  %375 = vst [vmem:[%s1548_s30 + $0x78] sm:$0xff] %v374_v15 }
  0x22   : > { %v378_v17 = vld [vmem:[%s1543_s29 + $0x220] sm:$0xff]  ;;  %377 = vst [vmem:[%s1548_s30 + $0x80] sm:$0xff] %v376_v16 }
  0x23   : > { %379 = vst [vmem:[%s1548_s30 + $0x88] sm:$0xff] %v378_v17  ;;  %v380_v18 = vld [vmem:[%s1543_s29 + $0x240] sm:$0xff] }
  0x24   : > { %v382_v19 = vld [vmem:[%s1543_s29 + $0x260] sm:$0xff]  ;;  %381 = vst [vmem:[%s1548_s30 + $0x90] sm:$0xff] %v380_v18 }
  0x25   : > { %v384_v20 = vld [vmem:[%s1543_s29 + $0x280] sm:$0xff]  ;;  %383 = vst [vmem:[%s1548_s30 + $0x98] sm:$0xff] %v382_v19 }
  0x26   : > { %385 = vst [vmem:[%s1548_s30 + $0xa0] sm:$0xff] %v384_v20  ;;  %v386_v21 = vld [vmem:[%s1543_s29 + $0x2a0] sm:$0xff] }
  0x27   : > { %v388_v22 = vld [vmem:[%s1543_s29 + $0x2c0] sm:$0xff]  ;;  %387 = vst [vmem:[%s1548_s30 + $0xa8] sm:$0xff] %v386_v21 }
  0x28   : > { %v390_v23 = vld [vmem:[%s1543_s29 + $0x2e0] sm:$0xff]  ;;  %389 = vst [vmem:[%s1548_s30 + $0xb0] sm:$0xff] %v388_v22 }
  0x29   : > { %391 = vst [vmem:[%s1548_s30 + $0xb8] sm:$0xff] %v390_v23  ;;  %v392_v24 = vld [vmem:[%s1543_s29 + $0x300] sm:$0xff] }
  0x2a   : > { %v394_v25 = vld [vmem:[%s1543_s29 + $0x320] sm:$0xff]  ;;  %393 = vst [vmem:[%s1548_s30 + $0xc0] sm:$0xff] %v392_v24 }
  0x2b   : > { %v396_v26 = vld [vmem:[%s1543_s29 + $0x340] sm:$0xff]  ;;  %395 = vst [vmem:[%s1548_s30 + $0xc8] sm:$0xff] %v394_v25 }
  0x2c   : > { %397 = vst [vmem:[%s1548_s30 + $0xd0] sm:$0xff] %v396_v26  ;;  %v398_v27 = vld [vmem:[%s1543_s29 + $0x360] sm:$0xff] }
  0x2d   : > { %v400_v28 = vld [vmem:[%s1543_s29 + $0x380] sm:$0xff]  ;;  %399 = vst [vmem:[%s1548_s30 + $0xd8] sm:$0xff] %v398_v27 }
  0x2e   : > { %v402_v29 = vld [vmem:[%s1543_s29 + $0x3a0] sm:$0xff]  ;;  %401 = vst [vmem:[%s1548_s30 + $0xe0] sm:$0xff] %v400_v28 }
  0x2f   : > { %403 = vst [vmem:[%s1548_s30 + $0xe8] sm:$0xff] %v402_v29  ;;  %v404_v30 = vld [vmem:[%s1543_s29 + $0x3c0] sm:$0xff] }
  0x30   : > { %v406_v31 = vld [vmem:[%s1543_s29 + $0x3e0] sm:$0xff]  ;;  %405 = vst [vmem:[%s1548_s30 + $0xf0] sm:$0xff] %v404_v30 }
  0x31   : > { %v408_v32 = vld [vmem:[%s1543_s29 + $0x400] sm:$0xff]  ;;  %407 = vst [vmem:[%s1548_s30 + $0xf8] sm:$0xff] %v406_v31 }
  0x32   : > { %409 = vst [vmem:[%s1548_s30 + $0x100] sm:$0xff] %v408_v32  ;;  %v410_v33 = vld [vmem:[%s1543_s29 + $0x420] sm:$0xff] }
  0x33   : > { %v412_v34 = vld [vmem:[%s1543_s29 + $0x440] sm:$0xff]  ;;  %411 = vst [vmem:[%s1548_s30 + $0x108] sm:$0xff] %v410_v33 }
  0x34   : > { %v414_v35 = vld [vmem:[%s1543_s29 + $0x460] sm:$0xff]  ;;  %413 = vst [vmem:[%s1548_s30 + $0x110] sm:$0xff] %v412_v34 }
  0x35   : > { %415 = vst [vmem:[%s1548_s30 + $0x118] sm:$0xff] %v414_v35  ;;  %v416_v36 = vld [vmem:[%s1543_s29 + $0x480] sm:$0xff] }
  0x36   : > { %v418_v37 = vld [vmem:[%s1543_s29 + $0x4a0] sm:$0xff]  ;;  %417 = vst [vmem:[%s1548_s30 + $0x120] sm:$0xff] %v416_v36 }
  0x37   : > { %v420_v38 = vld [vmem:[%s1543_s29 + $0x4c0] sm:$0xff]  ;;  %419 = vst [vmem:[%s1548_s30 + $0x128] sm:$0xff] %v418_v37 }
  0x38   : > { %421 = vst [vmem:[%s1548_s30 + $0x130] sm:$0xff] %v420_v38  ;;  %v422_v39 = vld [vmem:[%s1543_s29 + $0x4e0] sm:$0xff] }
  0x39   : > { %v424_v40 = vld [vmem:[%s1543_s29 + $0x500] sm:$0xff]  ;;  %423 = vst [vmem:[%s1548_s30 + $0x138] sm:$0xff] %v422_v39 }
  0x3a   : > { %v426_v41 = vld [vmem:[%s1543_s29 + $0x520] sm:$0xff]  ;;  %425 = vst [vmem:[%s1548_s30 + $0x140] sm:$0xff] %v424_v40 }
  0x3b   : > { %427 = vst [vmem:[%s1548_s30 + $0x148] sm:$0xff] %v426_v41  ;;  %v428_v42 = vld [vmem:[%s1543_s29 + $0x540] sm:$0xff] }
  0x3c   : > { %v430_v43 = vld [vmem:[%s1543_s29 + $0x560] sm:$0xff]  ;;  %429 = vst [vmem:[%s1548_s30 + $0x150] sm:$0xff] %v428_v42 }
  0x3d   : > { %v432_v44 = vld [vmem:[%s1543_s29 + $0x580] sm:$0xff]  ;;  %431 = vst [vmem:[%s1548_s30 + $0x158] sm:$0xff] %v430_v43 }
  0x3e   : > { %433 = vst [vmem:[%s1548_s30 + $0x160] sm:$0xff] %v432_v44  ;;  %v434_v45 = vld [vmem:[%s1543_s29 + $0x5a0] sm:$0xff] }
  0x3f   : > { %v436_v46 = vld [vmem:[%s1543_s29 + $0x5c0] sm:$0xff]  ;;  %435 = vst [vmem:[%s1548_s30 + $0x168] sm:$0xff] %v434_v45 }
  0x40   : > { %v438_v47 = vld [vmem:[%s1543_s29 + $0x5e0] sm:$0xff]  ;;  %437 = vst [vmem:[%s1548_s30 + $0x170] sm:$0xff] %v436_v46 }
  0x41   : > { %439 = vst [vmem:[%s1548_s30 + $0x178] sm:$0xff] %v438_v47  ;;  %v440_v48 = vld [vmem:[%s1543_s29 + $0x600] sm:$0xff] }
  0x42   : > { %v442_v49 = vld [vmem:[%s1543_s29 + $0x620] sm:$0xff]  ;;  %441 = vst [vmem:[%s1548_s30 + $0x180] sm:$0xff] %v440_v48 }
  0x43   : > { %v444_v50 = vld [vmem:[%s1543_s29 + $0x640] sm:$0xff]  ;;  %443 = vst [vmem:[%s1548_s30 + $0x188] sm:$0xff] %v442_v49 }
  0x44   : > { %445 = vst [vmem:[%s1548_s30 + $0x190] sm:$0xff] %v444_v50  ;;  %v446_v51 = vld [vmem:[%s1543_s29 + $0x660] sm:$0xff] }
  0x45   : > { %v448_v52 = vld [vmem:[%s1543_s29 + $0x680] sm:$0xff]  ;;  %447 = vst [vmem:[%s1548_s30 + $0x198] sm:$0xff] %v446_v51 }
  0x46   : > { %v450_v53 = vld [vmem:[%s1543_s29 + $0x6a0] sm:$0xff]  ;;  %449 = vst [vmem:[%s1548_s30 + $0x1a0] sm:$0xff] %v448_v52 }
  0x47   : > { %451 = vst [vmem:[%s1548_s30 + $0x1a8] sm:$0xff] %v450_v53  ;;  %v452_v54 = vld [vmem:[%s1543_s29 + $0x6c0] sm:$0xff] }
  0x48   : > { %v454_v55 = vld [vmem:[%s1543_s29 + $0x6e0] sm:$0xff]  ;;  %453 = vst [vmem:[%s1548_s30 + $0x1b0] sm:$0xff] %v452_v54 }
  0x49   : > { %v456_v56 = vld [vmem:[%s1543_s29 + $0x700] sm:$0xff]  ;;  %455 = vst [vmem:[%s1548_s30 + $0x1b8] sm:$0xff] %v454_v55 }
  0x4a   : > { %457 = vst [vmem:[%s1548_s30 + $0x1c0] sm:$0xff] %v456_v56  ;;  %v458_v57 = vld [vmem:[%s1543_s29 + $0x720] sm:$0xff] }
  0x4b   : > { %v460_v58 = vld [vmem:[%s1543_s29 + $0x740] sm:$0xff]  ;;  %459 = vst [vmem:[%s1548_s30 + $0x1c8] sm:$0xff] %v458_v57 }
  0x4c   : > { %v462_v59 = vld [vmem:[%s1543_s29 + $0x760] sm:$0xff]  ;;  %461 = vst [vmem:[%s1548_s30 + $0x1d0] sm:$0xff] %v460_v58 }
  0x4d   : > { %463 = vst [vmem:[%s1548_s30 + $0x1d8] sm:$0xff] %v462_v59  ;;  %v464_v60 = vld [vmem:[%s1543_s29 + $0x780] sm:$0xff] }
  0x4e   : > { %v466_v61 = vld [vmem:[%s1543_s29 + $0x7a0] sm:$0xff]  ;;  %465 = vst [vmem:[%s1548_s30 + $0x1e0] sm:$0xff] %v464_v60 }
  0x4f   : > { %v468_v62 = vld [vmem:[%s1543_s29 + $0x7c0] sm:$0xff]  ;;  %467 = vst [vmem:[%s1548_s30 + $0x1e8] sm:$0xff] %v466_v61 }
  0x50   : > { %469 = vst [vmem:[%s1548_s30 + $0x1f0] sm:$0xff] %v468_v62  ;;  %v470_v63 = vld [vmem:[%s1543_s29 + $0x7e0] sm:$0xff] }
  0x51   : > { %471 = vst [vmem:[%s1548_s30 + $0x1f8] sm:$0xff] %v470_v63 }
  0x52 PF: > { %p1214_p6 = scmp.ge.s32.totalorder %s1473_s19, 1  ;;  %p492_p7 = scmp.lt.s32.totalorder %s1473_s19, 5 }
  0x54   : > { %p493_p8 = pnand %p1214_p6, %p492_p7 }
  0x55   : > { %s499_s5 = sand.u32 (!%p493_p8), 1, %s1457_s15   ;;  %v1681_v0 = vld [vmem:[%s1787_s0] sm:$0xff] (!%p493_p8)  ;;  %v1686_v1 = vld [vmem:[%s1787_s0 + $0x8] sm:$0xff] (!%p493_p8)  ;;  %s1216_s12 = sshll.u32 (!%p493_p8), %s1465_s17, 1 }
  0x56   : > { %496 = sbr.rel (%p493_p8) target bundleno = 376 (0x178), region = 70  ;;  %s1215_s10 = sshll.u32 (!%p493_p8), %s499_s5, 9  ;;  %v1221_v2 = vcombine.high (!%p493_p8), %v1681_v0, %v1681_v0  ;;  %v1223_v3 = vcombine.high (!%p493_p8), %v1686_v1, %v1686_v1 }
  0x57   : > { %s1692_s11 = scalar_lea.vmem (!%p493_p8), [#allocation2], %s1215_s10  ;;  %p548_p9 = scmp.lt.s32.totalorder (!%p493_p8), %s1216_s12, 7 }
  0x58   : > { %v1335_v4 = vld [vmem:[%s1692_s11 + $0x4] ss:$8 sps:$4 sm:$0xff] (!%p493_p8)   ;;  %999 = vmatprep.mubr.bf16.mxu1 (!%p493_p8), %v1221_v2  ;;  %1040 = vmatprep.mubr.bf16.mxu0 (!%p493_p8), %v1223_v3  ;;  %v1339_v6 = vld [vmem:[%s1692_s11] ss:$8 sps:$4 sm:$0xff] (!%p493_p8)   ;;  %v1341_v8 = vld [vmem:[%s1692_s11 + $0x14] ss:$8 sps:$4 sm:$0xff] (!%p493_p8)  }
  0x59   : > { %v1337_v5 = vld [vmem:[%s1692_s11 + $0x104] ss:$8 sps:$4 sm:$0xff] (!%p493_p8)   ;;  %967 = vmatprep.subr.bf16.mxu1 (!%p493_p8), %v1335_v4  ;;  %v1340_v7 = vld [vmem:[%s1692_s11 + $0x100] ss:$8 sps:$4 sm:$0xff] (!%p493_p8)   ;;  %v1343_v9 = vld [vmem:[%s1692_s11 + $0x114] ss:$8 sps:$4 sm:$0xff] (!%p493_p8)  }
  0x5a   : > { %1008 = vmatprep.subr.bf16.mxu0 (!%p493_p8), %v1337_v5  ;;  %968 = vmatpush1.bf16.msra.mxu1 (!%p493_p8), %v1339_v6  ;;  %v1345_v10 = vld [vmem:[%s1692_s11 + $0x10] ss:$8 sps:$4 sm:$0xff] (!%p493_p8)   ;;  %v1347_v12 = vld [vmem:[%s1692_s11 + $0x24] ss:$8 sps:$4 sm:$0xff] (!%p493_p8)   ;;  %v1351_v14 = vld [vmem:[%s1692_s11 + $0x20] ss:$8 sps:$4 sm:$0xff] (!%p493_p8)   ;;  %v1220_v6 = vcombine.low (!%p493_p8), %v1681_v0, %v1681_v0 }
  0x5b   : > { %1009 = vmatpush1.bf16.msra.mxu0 (!%p493_p8), %v1340_v7  ;;  %969 = vmatprep.subr.bf16.mxu1 (!%p493_p8), %v1341_v8  ;;  %v1346_v11 = vld [vmem:[%s1692_s11 + $0x110] ss:$8 sps:$4 sm:$0xff] (!%p493_p8)   ;;  %v1349_v13 = vld [vmem:[%s1692_s11 + $0x124] ss:$8 sps:$4 sm:$0xff] (!%p493_p8)   ;;  %v1352_v15 = vld [vmem:[%s1692_s11 + $0x120] ss:$8 sps:$4 sm:$0xff] (!%p493_p8)   ;;  %v1222_v7 = vcombine.low (!%p493_p8), %v1686_v1, %v1686_v1  ;;  %v1051_v8 = vlaneseq (!%p493_p8) }
  0x5c   : > { %1010 = vmatprep.subr.bf16.mxu0 (!%p493_p8), %v1343_v9  ;;  %v1353_v16 = vld [vmem:[%s1692_s11 + $0x34] ss:$8 sps:$4 sm:$0xff] (!%p493_p8)   ;;  %v1357_v18 = vld [vmem:[%s1692_s11 + $0x30] ss:$8 sps:$4 sm:$0xff] (!%p493_p8)   ;;  %v1359_v20 = vld [vmem:[%s1692_s11 + $0x44] ss:$8 sps:$4 sm:$0xff] (!%p493_p8)  }
  0x5d   : > { %v1355_v17 = vld [vmem:[%s1692_s11 + $0x134] ss:$8 sps:$4 sm:$0xff]   ;;  %v1358_v19 = vld [vmem:[%s1692_s11 + $0x130] ss:$8 sps:$4 sm:$0xff]   ;;  %v1361_v21 = vld [vmem:[%s1692_s11 + $0x144] ss:$8 sps:$4 sm:$0xff]  }
  0x5e   : > { %970 = vmatpush1.bf16.msra.mxu1 %v1345_v10  ;;  %v1363_v22 = vld [vmem:[%s1692_s11 + $0x40] ss:$8 sps:$4 sm:$0xff]   ;;  %v1365_v24 = vld [vmem:[%s1692_s11 + $0x54] ss:$8 sps:$4 sm:$0xff]   ;;  %v1369_v26 = vld [vmem:[%s1692_s11 + $0x50] ss:$8 sps:$4 sm:$0xff]  }
  0x5f   : > { %1011 = vmatpush1.bf16.msra.mxu0 %v1346_v11  ;;  %971 = vmatprep.subr.bf16.mxu1 %v1347_v12  ;;  %v1364_v23 = vld [vmem:[%s1692_s11 + $0x140] ss:$8 sps:$4 sm:$0xff]   ;;  %v1367_v25 = vld [vmem:[%s1692_s11 + $0x154] ss:$8 sps:$4 sm:$0xff]   ;;  %v1370_v27 = vld [vmem:[%s1692_s11 + $0x150] ss:$8 sps:$4 sm:$0xff]  }
  0x60   : > { %1012 = vmatprep.subr.bf16.mxu0 %v1349_v13  ;;  %v1371_v28 = vld [vmem:[%s1692_s11 + $0x64] ss:$8 sps:$4 sm:$0xff]   ;;  %v1375_v30 = vld [vmem:[%s1692_s11 + $0x60] ss:$8 sps:$4 sm:$0xff]   ;;  %v1377_v32 = vld [vmem:[%s1692_s11 + $0x74] ss:$8 sps:$4 sm:$0xff]  }
  0x61   : > { %v1373_v29 = vld [vmem:[%s1692_s11 + $0x164] ss:$8 sps:$4 sm:$0xff]   ;;  %v1376_v31 = vld [vmem:[%s1692_s11 + $0x160] ss:$8 sps:$4 sm:$0xff]   ;;  %v1379_v33 = vld [vmem:[%s1692_s11 + $0x174] ss:$8 sps:$4 sm:$0xff]  }
  0x62   : > { %972 = vmatpush1.bf16.msra.mxu1 %v1351_v14  ;;  %v1381_v34 = vld [vmem:[%s1692_s11 + $0x70] ss:$8 sps:$4 sm:$0xff]   ;;  %v1383_v36 = vld [vmem:[%s1692_s11 + $0x84] ss:$8 sps:$4 sm:$0xff]   ;;  %v1387_v38 = vld [vmem:[%s1692_s11 + $0x80] ss:$8 sps:$4 sm:$0xff]  }
  0x63   : > { %1013 = vmatpush1.bf16.msra.mxu0 %v1352_v15  ;;  %973 = vmatprep.subr.bf16.mxu1 %v1353_v16  ;;  %v1382_v35 = vld [vmem:[%s1692_s11 + $0x170] ss:$8 sps:$4 sm:$0xff]   ;;  %v1385_v37 = vld [vmem:[%s1692_s11 + $0x184] ss:$8 sps:$4 sm:$0xff]   ;;  %v1388_v39 = vld [vmem:[%s1692_s11 + $0x180] ss:$8 sps:$4 sm:$0xff]  }
  0x64   : > { %1014 = vmatprep.subr.bf16.mxu0 %v1355_v17  ;;  %v1389_v40 = vld [vmem:[%s1692_s11 + $0x94] ss:$8 sps:$4 sm:$0xff]   ;;  %v1393_v42 = vld [vmem:[%s1692_s11 + $0x90] ss:$8 sps:$4 sm:$0xff]   ;;  %v1395_v44 = vld [vmem:[%s1692_s11 + $0xa4] ss:$8 sps:$4 sm:$0xff]  }
  0x65   : > { %v1391_v41 = vld [vmem:[%s1692_s11 + $0x194] ss:$8 sps:$4 sm:$0xff]   ;;  %v1394_v43 = vld [vmem:[%s1692_s11 + $0x190] ss:$8 sps:$4 sm:$0xff]   ;;  %v1397_v45 = vld [vmem:[%s1692_s11 + $0x1a4] ss:$8 sps:$4 sm:$0xff]  }
  0x66   : > { %974 = vmatpush1.bf16.msra.mxu1 %v1357_v18  ;;  %v1399_v46 = vld [vmem:[%s1692_s11 + $0xa0] ss:$8 sps:$4 sm:$0xff]   ;;  %v1401_v48 = vld [vmem:[%s1692_s11 + $0xb4] ss:$8 sps:$4 sm:$0xff]   ;;  %v1405_v50 = vld [vmem:[%s1692_s11 + $0xb0] ss:$8 sps:$4 sm:$0xff]  }
  0x67   : > { %1015 = vmatpush1.bf16.msra.mxu0 %v1358_v19  ;;  %975 = vmatprep.subr.bf16.mxu1 %v1359_v20  ;;  %v1400_v47 = vld [vmem:[%s1692_s11 + $0x1a0] ss:$8 sps:$4 sm:$0xff]   ;;  %v1403_v49 = vld [vmem:[%s1692_s11 + $0x1b4] ss:$8 sps:$4 sm:$0xff]   ;;  %v1406_v51 = vld [vmem:[%s1692_s11 + $0x1b0] ss:$8 sps:$4 sm:$0xff]  }
  0x68   : > { %1016 = vmatprep.subr.bf16.mxu0 %v1361_v21  ;;  %v1407_v52 = vld [vmem:[%s1692_s11 + $0xc4] ss:$8 sps:$4 sm:$0xff]   ;;  %v1411_v54 = vld [vmem:[%s1692_s11 + $0xc0] ss:$8 sps:$4 sm:$0xff]   ;;  %v1413_v56 = vld [vmem:[%s1692_s11 + $0xd4] ss:$8 sps:$4 sm:$0xff]  }
  0x69   : > { %v1409_v53 = vld [vmem:[%s1692_s11 + $0x1c4] ss:$8 sps:$4 sm:$0xff]   ;;  %v1412_v55 = vld [vmem:[%s1692_s11 + $0x1c0] ss:$8 sps:$4 sm:$0xff]   ;;  %v1415_v57 = vld [vmem:[%s1692_s11 + $0x1d4] ss:$8 sps:$4 sm:$0xff]  }
  0x6a   : > { %976 = vmatpush1.bf16.msra.mxu1 %v1363_v22  ;;  %v1417_v58 = vld [vmem:[%s1692_s11 + $0xd0] ss:$8 sps:$4 sm:$0xff]   ;;  %v1419_v60 = vld [vmem:[%s1692_s11 + $0xe4] ss:$8 sps:$4 sm:$0xff]   ;;  %v1423_v62 = vld [vmem:[%s1692_s11 + $0xe0] ss:$8 sps:$4 sm:$0xff]  }
  0x6b   : > { %1017 = vmatpush1.bf16.msra.mxu0 %v1364_v23  ;;  %977 = vmatprep.subr.bf16.mxu1 %v1365_v24  ;;  %v1418_v59 = vld [vmem:[%s1692_s11 + $0x1d0] ss:$8 sps:$4 sm:$0xff]   ;;  %v1421_v61 = vld [vmem:[%s1692_s11 + $0x1e4] ss:$8 sps:$4 sm:$0xff]   ;;  %v1424_v63 = vld [vmem:[%s1692_s11 + $0x1e0] ss:$8 sps:$4 sm:$0xff]  }
  0x6c   : > { %1018 = vmatprep.subr.bf16.mxu0 %v1367_v25  ;;  %v1425_v2 = vld [vmem:[%s1692_s11 + $0xf4] ss:$8 sps:$4 sm:$0xff]   ;;  %v1429_v4 = vld [vmem:[%s1692_s11 + $0xf0] ss:$8 sps:$4 sm:$0xff]   ;;  %s1799_s12 = smov (!%p548_p9, %s1216_s12), 7  ;;  %v1052_v9 = vshrl.u32 %v1051_v8, 7 }
  0x6d   : > { %v1427_v3 = vld [vmem:[%s1692_s11 + $0x1f4] ss:$8 sps:$4 sm:$0xff]   ;;  %v1430_v5 = vld [vmem:[%s1692_s11 + $0x1f0] ss:$8 sps:$4 sm:$0xff]   ;;  %s550_s15 = scalar_lea.vmem %s1789_s2, %s1799_s12  ;;  %s555_s24 = scalar_lea.vmem %s1790_s3, %s1799_s12 }
  0x6e   : > { %978 = vmatpush1.bf16.msra.mxu1 %v1369_v26  ;;  %v1053_v0 = vsub.s32 0, %v1052_v9  ;;  %v1049_v10 = vld [vmem:[%s550_s15] sm:$0x3]  ;;  %v1057_v1 = vsub.s32 1, %v1052_v9  ;;  %s1219_s17 = sshll.u32 %s1799_s12, 2 }
  0x6f   : > { %1019 = vmatpush1.bf16.msra.mxu0 %v1370_v27  ;;  %979 = vmatprep.subr.bf16.mxu1 %v1371_v28  ;;  %v1063_v11 = vld [vmem:[%s555_s24] sm:$0x3]  ;;  %s565_s27 = scalar_lea.vmem %s1791_s4, %s1219_s17 }
  0x70   : > { %1020 = vmatprep.subr.bf16.mxu0 %v1373_v29  ;;  %v1054_v12 = vrot.slane %v1049_v10, %v1053_v0  ;;  %v1058_v15 = vrot.slane %v1049_v10, %v1057_v1  ;;  %v1068_v17 = vrot.slane %v1063_v11, %v1053_v0  ;;  %v1072_v21 = vrot.slane %v1063_v11, %v1057_v1 }
  0x72   : > { %980 = vmatpush1.bf16.msra.mxu1 %v1375_v30 }
  0x73   : > { %1021 = vmatpush1.bf16.msra.mxu0 %v1376_v31  ;;  %981 = vmatprep.subr.bf16.mxu1 %v1377_v32 }
  0x74   : > { %1022 = vmatprep.subr.bf16.mxu0 %v1379_v33 }
  0x76   : > { %982 = vmatpush1.bf16.msra.mxu1 %v1381_v34 }
  0x77   : > { %1023 = vmatpush1.bf16.msra.mxu0 %v1382_v35  ;;  %983 = vmatprep.subr.bf16.mxu1 %v1383_v36 }
  0x78   : > { %1024 = vmatprep.subr.bf16.mxu0 %v1385_v37 }
  0x7a   : > { %984 = vmatpush1.bf16.msra.mxu1 %v1387_v38 }
  0x7b   : > { %1025 = vmatpush1.bf16.msra.mxu0 %v1388_v39  ;;  %985 = vmatprep.subr.bf16.mxu1 %v1389_v40 }
  0x7c   : > { %1026 = vmatprep.subr.bf16.mxu0 %v1391_v41 }
  0x7e   : > { %986 = vmatpush1.bf16.msra.mxu1 %v1393_v42 }
  0x7f   : > { %1027 = vmatpush1.bf16.msra.mxu0 %v1394_v43  ;;  %987 = vmatprep.subr.bf16.mxu1 %v1395_v44 }
  0x80   : > { %1028 = vmatprep.subr.bf16.mxu0 %v1397_v45 }
  0x82   : > { %988 = vmatpush1.bf16.msra.mxu1 %v1399_v46 }
  0x83   : > { %1029 = vmatpush1.bf16.msra.mxu0 %v1400_v47  ;;  %989 = vmatprep.subr.bf16.mxu1 %v1401_v48 }
  0x84   : > { %1030 = vmatprep.subr.bf16.mxu0 %v1403_v49 }
  0x86   : > { %990 = vmatpush1.bf16.msra.mxu1 %v1405_v50 }
  0x87   : > { %1031 = vmatpush1.bf16.msra.mxu0 %v1406_v51  ;;  %991 = vmatprep.subr.bf16.mxu1 %v1407_v52 }
  0x88   : > { %1032 = vmatprep.subr.bf16.mxu0 %v1409_v53 }
  0x8a   : > { %992 = vmatpush1.bf16.msra.mxu1 %v1411_v54 }
  0x8b   : > { %1033 = vmatpush1.bf16.msra.mxu0 %v1412_v55  ;;  %993 = vmatprep.subr.bf16.mxu1 %v1413_v56 }
  0x8c   : > { %1034 = vmatprep.subr.bf16.mxu0 %v1415_v57 }
  0x8e   : > { %994 = vmatpush1.bf16.msra.mxu1 %v1417_v58 }
  0x8f   : > { %1035 = vmatpush1.bf16.msra.mxu0 %v1418_v59  ;;  %995 = vmatprep.subr.bf16.mxu1 %v1419_v60 }
  0x90   : > { %1036 = vmatprep.subr.bf16.mxu0 %v1421_v61 }
  0x92   : > { %996 = vmatpush1.bf16.msra.mxu1 %v1423_v62 }
  0x93   : > { %1037 = vmatpush1.bf16.msra.mxu0 %v1424_v63  ;;  %997 = vmatprep.subr.bf16.mxu1 %v1425_v2 }
  0x94   : > { %1038 = vmatprep.subr.bf16.mxu0 %v1427_v3 }
  0x96   : > { %998 = vmatpush1.bf16.msra.mxu1 %v1429_v4 }
  0x97   : > { %1039 = vmatpush1.bf16.msra.mxu0 %v1430_v5 }
  0x99   : > { %1000 = vmatmul.mubr.bf16.vlgmr.msra.gmra.mrb[0].mxu1 %v1220_v6 }
  0x9a   : > { %1041 = vmatmul.mubr.bf16.vlgmr.msra.gmra.mrb[0].mxu0 %v1222_v7 }
 0x16c   : > { %v1001_v13 = vpop.f32.mrb[0].mxu1 }
 0x16d   : > { %v1042_v14 = vpop.f32.mrb[0].mxu0  ;;  %v1003_v18 = vpop.f32.mrb[1].mxu1 }
 0x16e   : > { %v1043_v16 = vadd.f32 %v1042_v14, %v1001_v13  ;;  %v1044_v19 = vpop.f32.mrb[1].mxu0  ;;  %v1005_v22 = vpop.f32.mrb[2].mxu1 }
 0x16f   : > { %v1045_v20 = vadd.f32 %v1044_v19, %v1003_v18  ;;  %v1046_v23 = vpop.f32.mrb[2].mxu0  ;;  %v1006_v25 = vpop.f32.mrb[3].mxu1 }
 0x170   : > { %v1061_v24 = vmul.f32 %v1054_v12, %v1043_v16  ;;  %v1047_v26 = vpop.f32.mrb[3].mxu0 }
 0x171   : > { %v1062_v27 = vmul.f32 %v1058_v15, %v1045_v20 }
 0x172   : > { %v1075_v28 = vadd.f32 %v1068_v17, %v1061_v24 }
 0x173   : > { %v1076_v29 = vadd.f32 %v1072_v21, %v1062_v27 }
 0x175   : > { %v1292_v30 = vpack.c.bf16 %v1076_v29, %v1075_v28 }
 0x177   : > { %1085 = vst [vmem:[%s565_s27] sm:$0xff] %v1292_v30 }
 0x178 PF: > { %s14_s19 = sadd.s32 1, %s1473_s19   ;;  %s1792_s15 = smov %s1461_s16 }
 0x179   : > { %p11_p10 = scmp.ge.s32.totalorder %s14_s19, 6   ;;  %s1793_s16 = smov %s1535_s23 }
 0x17a   : > { %s1794_s17 = smov %s1469_s18  ;;  %s1795_s18 = smov %s1797_s20 }
 0x17b   :  { %13 = sbr.rel (!%p11_p10) target bundleno = 3 (0x3), region = 118 }

// kernel: resnet50_forward.84
= control target key start
LH: loop header
LB: loop body
LE: loop exit
PB: predicated region body
PF: predicated region fallthrough
CT: control target
= control target key end

     0   :  { %s1140_s18 = smov 0   ;;  %s1142_s19 = smov 0   ;;  %s1330_s0 = inlined_call_operand.vmem [shape: bf16[8,256], index: 0, kind: input, shape index: {}]   ;;  %s1331_s1 = inlined_call_operand.vmem [shape: bf16[256,1024], index: 1, kind: input, shape index: {}]   ;;  %s1332_s2 = inlined_call_operand.vmem [shape: f32[1,1024], index: 2, kind: input, shape index: {}]   ;;  %s1333_s3 = inlined_call_operand.vmem [shape: f32[1,1024], index: 3, kind: input, shape index: {}]   ;;  %s1334_s4 = inlined_call_operand.vmem [shape: bf16[8,1024], index: 4, kind: input, shape index: {}]   ;;  %s1335_s5 = inlined_call_operand.vmem [shape: bf16[8,1024], index: 5, kind: output, shape index: {}]  }
   0x1   :  { %s1144_s20 = smov 0   ;;  %s1146_s21 = smov 0  }
   0x2   :  { %s1148_s22 = smov 0  }
   0x3 LB: > { %s24_s23 = sadd.s32 1, %s1104_s21  ;;  %p67_p1 = scmp.ne.s32.totalorder %s1096_s19, %s1092_s18  ;;  %s1108_s22 = sphi %s1148_s22, %s15_s22   ;;  %s1104_s21 = sphi %s1146_s21, %s1339_s21   ;;  %s1100_s20 = sphi %s1144_s20, %s1338_s20   ;;  %s1096_s19 = sphi %s1142_s19, %s1337_s19   ;;  %s1092_s18 = sphi %s1140_s18, %s1336_s18  }
   0x4   : > { %p25_p0 = scmp.ge.s32.totalorder %s24_s23, 4  ;;  %p68_p2 = scmp.eq.s32.totalorder %s1108_s22, 0 }
   0x5   : > { %s60_s25 = sadd.s32 1, %s1096_s19  ;;  %p929_p5 = scmp.ge.s32.totalorder %s1108_s22, 4 }
   0x6   : > { %s1341_s23 = smov (%p25_p0, %s24_s23), 0  ;;  %p69_p3 = por %p68_p2, %p67_p1 }
   0x7   : > { %s57_s24 = ssub.s32 %s1104_s21, %s1341_s23  ;;  %209 = sbr.rel (%p929_p5) target bundleno = 50 (0x32), region = 20 }
   0x8   : > { %p58_p4 = scmp.eq.s32.totalorder %s57_s24, 0 }
   0xa   : > { %s1175_s26 = scalar_select %p58_p4, %s1096_s19, %s60_s25  }
   0xe   : > { %212 = sbr.rel (!%p69_p3) target bundleno = 50 (0x32), region = 24  ;;  %s214_s27 = sand.u32 (%p69_p3), 1, %s1096_s19  }
   0xf   : > { %s978_s28 = sshll.u32 (%p69_p3), %s1104_s21, 3  ;;  %s930_s29 = sshll.u32 (%p69_p3), %s214_s27, 8 }
  0x10   : > { %s1183_s7 = scalar_lea.vmem (%p69_p3), %s1331_s1, %s978_s28  ;;  %s1188_s8 = scalar_lea.vmem (%p69_p3), [#allocation2], %s930_s29 }
  0x11   : > { %v309_v0 = vld [vmem:[%s1183_s7] sm:$0xff] (%p69_p3) }
  0x12   : > { %v311_v1 = vld [vmem:[%s1183_s7 + $0x20] sm:$0xff] (%p69_p3)  ;;  %310 = vst [vmem:[%s1188_s8] sm:$0xff] (%p69_p3), %v309_v0 }
  0x13   : > { %v313_v2 = vld [vmem:[%s1183_s7 + $0x40] sm:$0xff] (%p69_p3)  ;;  %312 = vst [vmem:[%s1188_s8 + $0x8] sm:$0xff] (%p69_p3), %v311_v1 }
  0x14   : > { %314 = vst [vmem:[%s1188_s8 + $0x10] sm:$0xff] (%p69_p3), %v313_v2  ;;  %v315_v3 = vld [vmem:[%s1183_s7 + $0x60] sm:$0xff] (%p69_p3) }
  0x15   : > { %v317_v4 = vld [vmem:[%s1183_s7 + $0x80] sm:$0xff]  ;;  %316 = vst [vmem:[%s1188_s8 + $0x18] sm:$0xff] %v315_v3 }
  0x16   : > { %v319_v5 = vld [vmem:[%s1183_s7 + $0xa0] sm:$0xff]  ;;  %318 = vst [vmem:[%s1188_s8 + $0x20] sm:$0xff] %v317_v4 }
  0x17   : > { %320 = vst [vmem:[%s1188_s8 + $0x28] sm:$0xff] %v319_v5  ;;  %v321_v6 = vld [vmem:[%s1183_s7 + $0xc0] sm:$0xff] }
  0x18   : > { %v323_v7 = vld [vmem:[%s1183_s7 + $0xe0] sm:$0xff]  ;;  %322 = vst [vmem:[%s1188_s8 + $0x30] sm:$0xff] %v321_v6 }
  0x19   : > { %v325_v8 = vld [vmem:[%s1183_s7 + $0x100] sm:$0xff]  ;;  %324 = vst [vmem:[%s1188_s8 + $0x38] sm:$0xff] %v323_v7 }
  0x1a   : > { %326 = vst [vmem:[%s1188_s8 + $0x40] sm:$0xff] %v325_v8  ;;  %v327_v9 = vld [vmem:[%s1183_s7 + $0x120] sm:$0xff] }
  0x1b   : > { %v329_v10 = vld [vmem:[%s1183_s7 + $0x140] sm:$0xff]  ;;  %328 = vst [vmem:[%s1188_s8 + $0x48] sm:$0xff] %v327_v9 }
  0x1c   : > { %v331_v11 = vld [vmem:[%s1183_s7 + $0x160] sm:$0xff]  ;;  %330 = vst [vmem:[%s1188_s8 + $0x50] sm:$0xff] %v329_v10 }
  0x1d   : > { %332 = vst [vmem:[%s1188_s8 + $0x58] sm:$0xff] %v331_v11  ;;  %v333_v12 = vld [vmem:[%s1183_s7 + $0x180] sm:$0xff] }
  0x1e   : > { %v335_v13 = vld [vmem:[%s1183_s7 + $0x1a0] sm:$0xff]  ;;  %334 = vst [vmem:[%s1188_s8 + $0x60] sm:$0xff] %v333_v12 }
  0x1f   : > { %v337_v14 = vld [vmem:[%s1183_s7 + $0x1c0] sm:$0xff]  ;;  %336 = vst [vmem:[%s1188_s8 + $0x68] sm:$0xff] %v335_v13 }
  0x20   : > { %338 = vst [vmem:[%s1188_s8 + $0x70] sm:$0xff] %v337_v14  ;;  %v339_v15 = vld [vmem:[%s1183_s7 + $0x1e0] sm:$0xff] }
  0x21   : > { %v341_v16 = vld [vmem:[%s1183_s7 + $0x200] sm:$0xff]  ;;  %340 = vst [vmem:[%s1188_s8 + $0x78] sm:$0xff] %v339_v15 }
  0x22   : > { %v343_v17 = vld [vmem:[%s1183_s7 + $0x220] sm:$0xff]  ;;  %342 = vst [vmem:[%s1188_s8 + $0x80] sm:$0xff] %v341_v16 }
  0x23   : > { %344 = vst [vmem:[%s1188_s8 + $0x88] sm:$0xff] %v343_v17  ;;  %v345_v18 = vld [vmem:[%s1183_s7 + $0x240] sm:$0xff] }
  0x24   : > { %v347_v19 = vld [vmem:[%s1183_s7 + $0x260] sm:$0xff]  ;;  %346 = vst [vmem:[%s1188_s8 + $0x90] sm:$0xff] %v345_v18 }
  0x25   : > { %v349_v20 = vld [vmem:[%s1183_s7 + $0x280] sm:$0xff]  ;;  %348 = vst [vmem:[%s1188_s8 + $0x98] sm:$0xff] %v347_v19 }
  0x26   : > { %350 = vst [vmem:[%s1188_s8 + $0xa0] sm:$0xff] %v349_v20  ;;  %v351_v21 = vld [vmem:[%s1183_s7 + $0x2a0] sm:$0xff] }
  0x27   : > { %v353_v22 = vld [vmem:[%s1183_s7 + $0x2c0] sm:$0xff]  ;;  %352 = vst [vmem:[%s1188_s8 + $0xa8] sm:$0xff] %v351_v21 }
  0x28   : > { %v355_v23 = vld [vmem:[%s1183_s7 + $0x2e0] sm:$0xff]  ;;  %354 = vst [vmem:[%s1188_s8 + $0xb0] sm:$0xff] %v353_v22 }
  0x29   : > { %356 = vst [vmem:[%s1188_s8 + $0xb8] sm:$0xff] %v355_v23  ;;  %v357_v24 = vld [vmem:[%s1183_s7 + $0x300] sm:$0xff] }
  0x2a   : > { %v359_v25 = vld [vmem:[%s1183_s7 + $0x320] sm:$0xff]  ;;  %358 = vst [vmem:[%s1188_s8 + $0xc0] sm:$0xff] %v357_v24 }
  0x2b   : > { %v361_v26 = vld [vmem:[%s1183_s7 + $0x340] sm:$0xff]  ;;  %360 = vst [vmem:[%s1188_s8 + $0xc8] sm:$0xff] %v359_v25 }
  0x2c   : > { %362 = vst [vmem:[%s1188_s8 + $0xd0] sm:$0xff] %v361_v26  ;;  %v363_v27 = vld [vmem:[%s1183_s7 + $0x360] sm:$0xff] }
  0x2d   : > { %v365_v28 = vld [vmem:[%s1183_s7 + $0x380] sm:$0xff]  ;;  %364 = vst [vmem:[%s1188_s8 + $0xd8] sm:$0xff] %v363_v27 }
  0x2e   : > { %v367_v29 = vld [vmem:[%s1183_s7 + $0x3a0] sm:$0xff]  ;;  %366 = vst [vmem:[%s1188_s8 + $0xe0] sm:$0xff] %v365_v28 }
  0x2f   : > { %368 = vst [vmem:[%s1188_s8 + $0xe8] sm:$0xff] %v367_v29  ;;  %v369_v30 = vld [vmem:[%s1183_s7 + $0x3c0] sm:$0xff] }
  0x30   : > { %v371_v31 = vld [vmem:[%s1183_s7 + $0x3e0] sm:$0xff]  ;;  %370 = vst [vmem:[%s1188_s8 + $0xf0] sm:$0xff] %v369_v30 }
  0x31   : > { %372 = vst [vmem:[%s1188_s8 + $0xf8] sm:$0xff] %v371_v31 }
  0x32 PF: > { %p933_p6 = scmp.ge.s32.totalorder %s1108_s22, 1  ;;  %p406_p7 = scmp.lt.s32.totalorder %s1108_s22, 5 }
  0x34   : > { %p407_p8 = pnand %p933_p6, %p406_p7 }
  0x35   : > { %s413_s9 = sand.u32 (!%p407_p8), 1, %s1092_s18   ;;  %v1257_v32 = vld [vmem:[%s1330_s0] sm:$0xff] (!%p407_p8)  ;;  %s935_s14 = sshll.u32 (!%p407_p8), %s1100_s20, 1  ;;  %v745_v3 = vlaneseq (!%p407_p8) }
  0x36   : > { %410 = sbr.rel (%p407_p8) target bundleno = 345 (0x159), region = 74  ;;  %s934_s12 = sshll.u32 (!%p407_p8), %s413_s9, 8  ;;  %v942_v33 = vcombine.high (!%p407_p8), %v1257_v32, %v1257_v32  ;;  %v941_v2 = vcombine.low (!%p407_p8), %v1257_v32, %v1257_v32 }
  0x37   : > { %s1261_s13 = scalar_lea.vmem (!%p407_p8), [#allocation2], %s934_s12  ;;  %p473_p9 = scmp.lt.s32.totalorder (!%p407_p8), %s935_s14, 7  ;;  %v746_v4 = vshrl.u32 (!%p407_p8), %v745_v3, 7 }
  0x38   : > { %v1020_v34 = vld [vmem:[%s1261_s13 + $0x4] ss:$8 sps:$4 sm:$0xff] (!%p407_p8)   ;;  %734 = vmatprep.mubr.bf16.mxu0 (!%p407_p8), %v942_v33  ;;  %v1022_v35 = vld [vmem:[%s1261_s13] ss:$8 sps:$4 sm:$0xff] (!%p407_p8)   ;;  %v1023_v36 = vld [vmem:[%s1261_s13 + $0x14] ss:$8 sps:$4 sm:$0xff] (!%p407_p8)  }
  0x39   : > { %702 = vmatprep.subr.bf16.mxu0 (!%p407_p8), %v1020_v34  ;;  %v1025_v37 = vld [vmem:[%s1261_s13 + $0x10] ss:$8 sps:$4 sm:$0xff] (!%p407_p8)   ;;  %v1026_v38 = vld [vmem:[%s1261_s13 + $0x24] ss:$8 sps:$4 sm:$0xff] (!%p407_p8)   ;;  %v1028_v39 = vld [vmem:[%s1261_s13 + $0x20] ss:$8 sps:$4 sm:$0xff] (!%p407_p8)  }
  0x3a   : > { %703 = vmatpush1.bf16.msra.mxu0 (!%p407_p8), %v1022_v35  ;;  %v1029_v40 = vld [vmem:[%s1261_s13 + $0x34] ss:$8 sps:$4 sm:$0xff] (!%p407_p8)   ;;  %v1031_v41 = vld [vmem:[%s1261_s13 + $0x30] ss:$8 sps:$4 sm:$0xff] (!%p407_p8)   ;;  %v1032_v42 = vld [vmem:[%s1261_s13 + $0x44] ss:$8 sps:$4 sm:$0xff] (!%p407_p8)  }
  0x3b   : > { %704 = vmatprep.subr.bf16.mxu0 (!%p407_p8), %v1023_v36  ;;  %v1034_v43 = vld [vmem:[%s1261_s13 + $0x40] ss:$8 sps:$4 sm:$0xff] (!%p407_p8)   ;;  %v1035_v44 = vld [vmem:[%s1261_s13 + $0x54] ss:$8 sps:$4 sm:$0xff] (!%p407_p8)   ;;  %v1037_v45 = vld [vmem:[%s1261_s13 + $0x50] ss:$8 sps:$4 sm:$0xff] (!%p407_p8)  }
  0x3c   : > { %v1038_v46 = vld [vmem:[%s1261_s13 + $0x64] ss:$8 sps:$4 sm:$0xff] (!%p407_p8)   ;;  %v1040_v47 = vld [vmem:[%s1261_s13 + $0x60] ss:$8 sps:$4 sm:$0xff] (!%p407_p8)   ;;  %v1041_v48 = vld [vmem:[%s1261_s13 + $0x74] ss:$8 sps:$4 sm:$0xff] (!%p407_p8)  }
  0x3d   : > { %v1043_v49 = vld [vmem:[%s1261_s13 + $0x70] ss:$8 sps:$4 sm:$0xff]   ;;  %v1044_v50 = vld [vmem:[%s1261_s13 + $0x84] ss:$8 sps:$4 sm:$0xff]   ;;  %v1046_v51 = vld [vmem:[%s1261_s13 + $0x80] ss:$8 sps:$4 sm:$0xff]  }
  0x3e   : > { %705 = vmatpush1.bf16.msra.mxu0 %v1025_v37  ;;  %v1047_v52 = vld [vmem:[%s1261_s13 + $0x94] ss:$8 sps:$4 sm:$0xff]   ;;  %v1049_v53 = vld [vmem:[%s1261_s13 + $0x90] ss:$8 sps:$4 sm:$0xff]   ;;  %v1050_v54 = vld [vmem:[%s1261_s13 + $0xa4] ss:$8 sps:$4 sm:$0xff]  }
  0x3f   : > { %706 = vmatprep.subr.bf16.mxu0 %v1026_v38  ;;  %v1052_v55 = vld [vmem:[%s1261_s13 + $0xa0] ss:$8 sps:$4 sm:$0xff]   ;;  %v1053_v56 = vld [vmem:[%s1261_s13 + $0xb4] ss:$8 sps:$4 sm:$0xff]   ;;  %v1055_v57 = vld [vmem:[%s1261_s13 + $0xb0] ss:$8 sps:$4 sm:$0xff]  }
  0x40   : > { %v1056_v58 = vld [vmem:[%s1261_s13 + $0xc4] ss:$8 sps:$4 sm:$0xff]   ;;  %v1058_v59 = vld [vmem:[%s1261_s13 + $0xc0] ss:$8 sps:$4 sm:$0xff]   ;;  %v1059_v60 = vld [vmem:[%s1261_s13 + $0xd4] ss:$8 sps:$4 sm:$0xff]  }
  0x41   : > { %v1061_v61 = vld [vmem:[%s1261_s13 + $0xd0] ss:$8 sps:$4 sm:$0xff]   ;;  %v1062_v62 = vld [vmem:[%s1261_s13 + $0xe4] ss:$8 sps:$4 sm:$0xff]   ;;  %v1064_v63 = vld [vmem:[%s1261_s13 + $0xe0] ss:$8 sps:$4 sm:$0xff]  }
  0x42   : > { %707 = vmatpush1.bf16.msra.mxu0 %v1028_v39  ;;  %v1065_v0 = vld [vmem:[%s1261_s13 + $0xf4] ss:$8 sps:$4 sm:$0xff]   ;;  %v1067_v1 = vld [vmem:[%s1261_s13 + $0xf0] ss:$8 sps:$4 sm:$0xff]   ;;  %s1343_s14 = smov (!%p473_p9, %s935_s14), 7  ;;  %v747_v5 = vsub.s32 0, %v746_v4 }
  0x43   : > { %708 = vmatprep.subr.bf16.mxu0 %v1029_v40  ;;  %s475_s17 = scalar_lea.vmem %s1332_s2, %s1343_s14  ;;  %s938_s18 = sshll.u32 %s1343_s14, 2  ;;  %v751_v7 = vsub.s32 1, %v746_v4 }
  0x44   : > { %s480_s27 = scalar_lea.vmem %s1333_s3, %s1343_s14  ;;  %v743_v6 = vld [vmem:[%s475_s17] sm:$0x3]  ;;  %s490_s29 = scalar_lea.vmem %s1334_s4, %s938_s18 }
  0x45   : > { %v757_v8 = vld [vmem:[%s480_s27] sm:$0x3]  ;;  %v748_v9 = vrot.slane %v743_v6, %v747_v5  ;;  %v752_v11 = vrot.slane %v743_v6, %v751_v7  ;;  %s500_s7 = scalar_lea.vmem %s1335_s5, %s938_s18 }
  0x46   : > { %709 = vmatpush1.bf16.msra.mxu0 %v1031_v41  ;;  %v771_v10 = vld [vmem:[%s490_s29] sm:$0xff]  ;;  %v762_v12 = vrot.slane %v757_v8, %v747_v5  ;;  %v766_v14 = vrot.slane %v757_v8, %v751_v7 }
  0x47   : > { %710 = vmatprep.subr.bf16.mxu0 %v1032_v42  ;;  %v772_v16 = vunpack.c.l.bf16 %v771_v10  ;;  %v773_v19 = vunpack.c.h.bf16 %v771_v10 }
  0x4a   : > { %711 = vmatpush1.bf16.msra.mxu0 %v1034_v43 }
  0x4b   : > { %712 = vmatprep.subr.bf16.mxu0 %v1035_v44 }
  0x4e   : > { %713 = vmatpush1.bf16.msra.mxu0 %v1037_v45 }
  0x4f   : > { %714 = vmatprep.subr.bf16.mxu0 %v1038_v46 }
  0x52   : > { %715 = vmatpush1.bf16.msra.mxu0 %v1040_v47 }
  0x53   : > { %716 = vmatprep.subr.bf16.mxu0 %v1041_v48 }
  0x56   : > { %717 = vmatpush1.bf16.msra.mxu0 %v1043_v49 }
  0x57   : > { %718 = vmatprep.subr.bf16.mxu0 %v1044_v50 }
  0x5a   : > { %719 = vmatpush1.bf16.msra.mxu0 %v1046_v51 }
  0x5b   : > { %720 = vmatprep.subr.bf16.mxu0 %v1047_v52 }
  0x5e   : > { %721 = vmatpush1.bf16.msra.mxu0 %v1049_v53 }
  0x5f   : > { %722 = vmatprep.subr.bf16.mxu0 %v1050_v54 }
  0x62   : > { %723 = vmatpush1.bf16.msra.mxu0 %v1052_v55 }
  0x63   : > { %724 = vmatprep.subr.bf16.mxu0 %v1053_v56 }
  0x66   : > { %725 = vmatpush1.bf16.msra.mxu0 %v1055_v57 }
  0x67   : > { %726 = vmatprep.subr.bf16.mxu0 %v1056_v58 }
  0x6a   : > { %727 = vmatpush1.bf16.msra.mxu0 %v1058_v59 }
  0x6b   : > { %728 = vmatprep.subr.bf16.mxu0 %v1059_v60 }
  0x6e   : > { %729 = vmatpush1.bf16.msra.mxu0 %v1061_v61 }
  0x6f   : > { %730 = vmatprep.subr.bf16.mxu0 %v1062_v62 }
  0x72   : > { %731 = vmatpush1.bf16.msra.mxu0 %v1064_v63 }
  0x73   : > { %732 = vmatprep.subr.bf16.mxu0 %v1065_v0 }
  0x76   : > { %733 = vmatpush1.bf16.msra.mxu0 %v1067_v1 }
  0x79   : > { %735 = vmatmul.mubr.bf16.vlgmr.msra.gmra.mrb[0].mxu0 %v941_v2 }
 0x14c   : > { %v736_v13 = vpop.f32.mrb[0].mxu0 }
 0x14d   : > { %v755_v15 = vmul.f32 %v748_v9, %v736_v13  ;;  %v738_v17 = vpop.f32.mrb[1].mxu0 }
 0x14e   : > { %v756_v18 = vmul.f32 %v752_v11, %v738_v17  ;;  %v740_v20 = vpop.f32.mrb[2].mxu0 }
 0x14f   : > { %v769_v21 = vadd.f32 %v762_v12, %v755_v15  ;;  %v741_v22 = vpop.f32.mrb[3].mxu0 }
 0x150   : > { %v770_v23 = vadd.f32 %v766_v14, %v756_v18 }
 0x151   : > { %v774_v24 = vadd.f32 %v772_v16, %v769_v21 }
 0x152   : > { %v775_v25 = vadd.f32 %v773_v19, %v770_v23 }
 0x153   : > { %v776_v26 = vmax.f32 %v774_v24, 0.0 }
 0x154   : > { %v777_v27 = vmax.f32 %v775_v25, 0.0 }
 0x156   : > { %v979_v28 = vpack.c.bf16 %v777_v27, %v776_v26 }
 0x158   : > { %786 = vst [vmem:[%s500_s7] sm:$0xff] %v979_v28 }
 0x159 PF: > { %s15_s22 = sadd.s32 1, %s1108_s22   ;;  %s1336_s18 = smov %s1096_s19 }
 0x15a   : > { %p12_p10 = scmp.ge.s32.totalorder %s15_s22, 6   ;;  %s1337_s19 = smov %s1175_s26 }
 0x15b   : > { %s1338_s20 = smov %s1104_s21  ;;  %s1339_s21 = smov %s1341_s23 }
 0x15c   :  { %14 = sbr.rel (!%p12_p10) target bundleno = 3 (0x3), region = 125 }

// kernel: resnet50_forward.85
= control target key start
LH: loop header
LB: loop body
LE: loop exit
PB: predicated region body
PF: predicated region fallthrough
CT: control target
= control target key end

     0   :  { %s1254_s15 = smov 0   ;;  %s1256_s16 = smov 0   ;;  %s1372_s0 = inlined_call_operand.vmem [shape: bf16[8,1024], index: 0, kind: input, shape index: {}]   ;;  %s1373_s1 = inlined_call_operand.vmem [shape: bf16[1024,256], index: 1, kind: input, shape index: {}]   ;;  %s1374_s2 = inlined_call_operand.vmem [shape: f32[1,256], index: 2, kind: input, shape index: {}]   ;;  %s1375_s3 = inlined_call_operand.vmem [shape: f32[1,256], index: 3, kind: input, shape index: {}]   ;;  %s1376_s4 = inlined_call_operand.vmem [shape: bf16[8,256], index: 4, kind: output, shape index: {}]  }
   0x1   :  { %s1258_s17 = smov 0  }
   0x2 LB: > { %s26_s18 = sadd.s32 1, %s1222_s16  ;;  %p996_p0 = scmp.ge.s32.totalorder %s1226_s17, 1  ;;  %s1226_s17 = sphi %s1258_s17, %s14_s17   ;;  %s1222_s16 = sphi %s1256_s16, %s1378_s16   ;;  %s1218_s15 = sphi %s1254_s15, %s1377_s15  }
   0x3   : > { %p27_p1 = scmp.ge.s32.totalorder %s26_s18, 2  ;;  %p229_p2 = scmp.lt.s32.totalorder %s1226_s17, 3 }
   0x5   : > { %s1380_s18 = smov (%p27_p1, %s26_s18), 0  ;;  %p230_p3 = pnand %p996_p0, %p229_p2 }
   0x6   : > { %s997_s19 = sshll.u32 (!%p230_p3), %s1218_s15, 2  ;;  %s999_s20 = sshll.u32 (!%p230_p3), %s1218_s15, 6 }
   0x7   : > { %233 = sbr.rel (%p230_p3) target bundleno = 324 (0x144), region = 36  ;;  %p284_p4 = scmp.lt.s32.totalorder (!%p230_p3), %s997_s19, 7 }
   0x8   : > { %p293_p5 = scmp.lt.s32.totalorder (!%p230_p3), %s999_s20, 127  ;;  %p1002_p6 = scmp.ne.s32.totalorder (!%p230_p3), %s1218_s15, 0 }
   0xe   : > { %s1382_s19 = smov (!%p284_p4, %s997_s19), 7  ;;  %s1384_s20 = smov (!%p293_p5, %s999_s20), 127 }
   0xf   : > { %s998_s21 = sshll.u32 %s1382_s19, 2  ;;  %s1077_s25 = sshll.u32 %s1384_s20, 3  ;;  %v1228_v0 = vmov (!%p1002_p6), 0.0  }
  0x10   : > { %s1279_s24 = scalar_lea.vmem %s1372_s0, %s998_s21  ;;  %s1284_s28 = scalar_lea.vmem %s1373_s1, %s1077_s25  ;;  %327 = vst [vmem:[#allocation2] sm:$0xff] (!%p1002_p6), %v1228_v0  ;;  %328 = vst [vmem:[#allocation2 + $0x8] sm:$0xff] (!%p1002_p6), %v1228_v0 }
  0x11   : > { %326 = sbr.rel (%p1002_p6) target bundleno = 24 (0x18), region = 40 }
  0x18 PF: > { %v1104_v1 = vld [vmem:[%s1284_s28 + $0x4] ss:$8 sps:$4 sm:$0xff]   ;;  %v1108_v3 = vld [vmem:[%s1284_s28] ss:$8 sps:$4 sm:$0xff]   ;;  %v1110_v5 = vld [vmem:[%s1284_s28 + $0x14] ss:$8 sps:$4 sm:$0xff]  }
  0x19   : > { %v1106_v2 = vld [vmem:[%s1284_s28 + $0x104] ss:$8 sps:$4 sm:$0xff]   ;;  %731 = vmatprep.subr.bf16.mxu0 %v1104_v1  ;;  %v1109_v4 = vld [vmem:[%s1284_s28 + $0x100] ss:$8 sps:$4 sm:$0xff]   ;;  %v1112_v6 = vld [vmem:[%s1284_s28 + $0x114] ss:$8 sps:$4 sm:$0xff]  }
  0x1a   : > { %772 = vmatprep.subr.bf16.mxu1 %v1106_v2  ;;  %732 = vmatpush1.bf16.msra.mxu0 %v1108_v3  ;;  %v1114_v7 = vld [vmem:[%s1284_s28 + $0x10] ss:$8 sps:$4 sm:$0xff]   ;;  %v1116_v9 = vld [vmem:[%s1284_s28 + $0x24] ss:$8 sps:$4 sm:$0xff]   ;;  %v1120_v11 = vld [vmem:[%s1284_s28 + $0x20] ss:$8 sps:$4 sm:$0xff]  }
  0x1b   : > { %773 = vmatpush1.bf16.msra.mxu1 %v1109_v4  ;;  %733 = vmatprep.subr.bf16.mxu0 %v1110_v5  ;;  %v1115_v8 = vld [vmem:[%s1284_s28 + $0x110] ss:$8 sps:$4 sm:$0xff]   ;;  %v1118_v10 = vld [vmem:[%s1284_s28 + $0x124] ss:$8 sps:$4 sm:$0xff]   ;;  %v1121_v12 = vld [vmem:[%s1284_s28 + $0x120] ss:$8 sps:$4 sm:$0xff]  }
  0x1c   : > { %774 = vmatprep.subr.bf16.mxu1 %v1112_v6  ;;  %v1122_v13 = vld [vmem:[%s1284_s28 + $0x34] ss:$8 sps:$4 sm:$0xff]   ;;  %v1126_v15 = vld [vmem:[%s1284_s28 + $0x30] ss:$8 sps:$4 sm:$0xff]   ;;  %v1128_v17 = vld [vmem:[%s1284_s28 + $0x44] ss:$8 sps:$4 sm:$0xff]  }
  0x1d   : > { %v1124_v14 = vld [vmem:[%s1284_s28 + $0x134] ss:$8 sps:$4 sm:$0xff]   ;;  %v1127_v16 = vld [vmem:[%s1284_s28 + $0x130] ss:$8 sps:$4 sm:$0xff]   ;;  %v1130_v18 = vld [vmem:[%s1284_s28 + $0x144] ss:$8 sps:$4 sm:$0xff]  }
  0x1e   : > { %734 = vmatpush1.bf16.msra.mxu0 %v1114_v7  ;;  %v1132_v19 = vld [vmem:[%s1284_s28 + $0x40] ss:$8 sps:$4 sm:$0xff]   ;;  %v1134_v21 = vld [vmem:[%s1284_s28 + $0x54] ss:$8 sps:$4 sm:$0xff]   ;;  %v1138_v23 = vld [vmem:[%s1284_s28 + $0x50] ss:$8 sps:$4 sm:$0xff]  }
  0x1f   : > { %775 = vmatpush1.bf16.msra.mxu1 %v1115_v8  ;;  %735 = vmatprep.subr.bf16.mxu0 %v1116_v9  ;;  %v1133_v20 = vld [vmem:[%s1284_s28 + $0x140] ss:$8 sps:$4 sm:$0xff]   ;;  %v1136_v22 = vld [vmem:[%s1284_s28 + $0x154] ss:$8 sps:$4 sm:$0xff]   ;;  %v1139_v24 = vld [vmem:[%s1284_s28 + $0x150] ss:$8 sps:$4 sm:$0xff]  }
  0x20   : > { %776 = vmatprep.subr.bf16.mxu1 %v1118_v10  ;;  %v1140_v25 = vld [vmem:[%s1284_s28 + $0x64] ss:$8 sps:$4 sm:$0xff]   ;;  %v1144_v27 = vld [vmem:[%s1284_s28 + $0x60] ss:$8 sps:$4 sm:$0xff]   ;;  %v1146_v29 = vld [vmem:[%s1284_s28 + $0x74] ss:$8 sps:$4 sm:$0xff]  }
  0x21   : > { %v1142_v26 = vld [vmem:[%s1284_s28 + $0x164] ss:$8 sps:$4 sm:$0xff]   ;;  %v1145_v28 = vld [vmem:[%s1284_s28 + $0x160] ss:$8 sps:$4 sm:$0xff]   ;;  %v1148_v30 = vld [vmem:[%s1284_s28 + $0x174] ss:$8 sps:$4 sm:$0xff]  }
  0x22   : > { %736 = vmatpush1.bf16.msra.mxu0 %v1120_v11  ;;  %v1150_v31 = vld [vmem:[%s1284_s28 + $0x70] ss:$8 sps:$4 sm:$0xff]   ;;  %v1152_v33 = vld [vmem:[%s1284_s28 + $0x84] ss:$8 sps:$4 sm:$0xff]   ;;  %v1156_v35 = vld [vmem:[%s1284_s28 + $0x80] ss:$8 sps:$4 sm:$0xff]  }
  0x23   : > { %777 = vmatpush1.bf16.msra.mxu1 %v1121_v12  ;;  %737 = vmatprep.subr.bf16.mxu0 %v1122_v13  ;;  %v1151_v32 = vld [vmem:[%s1284_s28 + $0x170] ss:$8 sps:$4 sm:$0xff]   ;;  %v1154_v34 = vld [vmem:[%s1284_s28 + $0x184] ss:$8 sps:$4 sm:$0xff]   ;;  %v1157_v36 = vld [vmem:[%s1284_s28 + $0x180] ss:$8 sps:$4 sm:$0xff]  }
  0x24   : > { %778 = vmatprep.subr.bf16.mxu1 %v1124_v14  ;;  %v1158_v37 = vld [vmem:[%s1284_s28 + $0x94] ss:$8 sps:$4 sm:$0xff]   ;;  %v1162_v39 = vld [vmem:[%s1284_s28 + $0x90] ss:$8 sps:$4 sm:$0xff]   ;;  %v1164_v41 = vld [vmem:[%s1284_s28 + $0xa4] ss:$8 sps:$4 sm:$0xff]  }
  0x25   : > { %v1160_v38 = vld [vmem:[%s1284_s28 + $0x194] ss:$8 sps:$4 sm:$0xff]   ;;  %v1163_v40 = vld [vmem:[%s1284_s28 + $0x190] ss:$8 sps:$4 sm:$0xff]   ;;  %v1166_v42 = vld [vmem:[%s1284_s28 + $0x1a4] ss:$8 sps:$4 sm:$0xff]  }
  0x26   : > { %738 = vmatpush1.bf16.msra.mxu0 %v1126_v15  ;;  %v1168_v43 = vld [vmem:[%s1284_s28 + $0xa0] ss:$8 sps:$4 sm:$0xff]   ;;  %v1170_v45 = vld [vmem:[%s1284_s28 + $0xb4] ss:$8 sps:$4 sm:$0xff]   ;;  %v1174_v50 = vld [vmem:[%s1284_s28 + $0xb0] ss:$8 sps:$4 sm:$0xff]  }
  0x27   : > { %779 = vmatpush1.bf16.msra.mxu1 %v1127_v16  ;;  %739 = vmatprep.subr.bf16.mxu0 %v1128_v17  ;;  %v1169_v44 = vld [vmem:[%s1284_s28 + $0x1a0] ss:$8 sps:$4 sm:$0xff]   ;;  %v1172_v46 = vld [vmem:[%s1284_s28 + $0x1b4] ss:$8 sps:$4 sm:$0xff]   ;;  %v1175_v51 = vld [vmem:[%s1284_s28 + $0x1b0] ss:$8 sps:$4 sm:$0xff]  }
  0x28   : > { %780 = vmatprep.subr.bf16.mxu1 %v1130_v18  ;;  %v331_v47 = vld [vmem:[%s1279_s24] sm:$0xff]  ;;  %v332_v49 = vld [vmem:[%s1279_s24 + $0x8] sm:$0xff]  ;;  %v1182_v57 = vld [vmem:[%s1284_s28 + $0xd4] ss:$8 sps:$4 sm:$0xff]   ;;  %p1071_p7 = scmp.ne.s32.totalorder %s1218_s15, 1 }
  0x29   : > { %v1004_v48 = vcombine.high %v331_v47, %v331_v47  ;;  %v1006_v52 = vcombine.high %v332_v49, %v332_v49  ;;  %v1176_v53 = vld [vmem:[%s1284_s28 + $0xc4] ss:$8 sps:$4 sm:$0xff]   ;;  %v1180_v55 = vld [vmem:[%s1284_s28 + $0xc0] ss:$8 sps:$4 sm:$0xff]   ;;  %v1184_v58 = vld [vmem:[%s1284_s28 + $0x1d4] ss:$8 sps:$4 sm:$0xff]   ;;  %v1003_v5 = vcombine.low %v331_v47, %v331_v47  ;;  %v1005_v6 = vcombine.low %v332_v49, %v332_v49 }
  0x2a   : > { %740 = vmatpush1.bf16.msra.mxu0 %v1132_v19  ;;  %v1178_v54 = vld [vmem:[%s1284_s28 + $0x1c4] ss:$8 sps:$4 sm:$0xff]   ;;  %v1181_v56 = vld [vmem:[%s1284_s28 + $0x1c0] ss:$8 sps:$4 sm:$0xff]   ;;  %v1186_v59 = vld [vmem:[%s1284_s28 + $0xd0] ss:$8 sps:$4 sm:$0xff]  }
  0x2b   : > { %781 = vmatpush1.bf16.msra.mxu1 %v1133_v20  ;;  %741 = vmatprep.subr.bf16.mxu0 %v1134_v21  ;;  %v1187_v60 = vld [vmem:[%s1284_s28 + $0x1d0] ss:$8 sps:$4 sm:$0xff]   ;;  %v1188_v61 = vld [vmem:[%s1284_s28 + $0xe4] ss:$8 sps:$4 sm:$0xff]   ;;  %v1192_v63 = vld [vmem:[%s1284_s28 + $0xe0] ss:$8 sps:$4 sm:$0xff]   ;;  %v825_v21 = vlaneseq (!%p1071_p7) }
  0x2c   : > { %782 = vmatprep.subr.bf16.mxu1 %v1136_v22  ;;  %763 = vmatprep.mubr.bf16.mxu0 %v1004_v48  ;;  %v1190_v62 = vld [vmem:[%s1284_s28 + $0x1e4] ss:$8 sps:$4 sm:$0xff]   ;;  %v1193_v0 = vld [vmem:[%s1284_s28 + $0x1e0] ss:$8 sps:$4 sm:$0xff]   ;;  %v1194_v1 = vld [vmem:[%s1284_s28 + $0xf4] ss:$8 sps:$4 sm:$0xff]  }
  0x2d   : > { %804 = vmatprep.mubr.bf16.mxu1 %v1006_v52  ;;  %v1196_v2 = vld [vmem:[%s1284_s28 + $0x1f4] ss:$8 sps:$4 sm:$0xff]   ;;  %v1198_v3 = vld [vmem:[%s1284_s28 + $0xf0] ss:$8 sps:$4 sm:$0xff]   ;;  %v329_v8 = vld [vmem:[#allocation2] sm:$0xff]  ;;  %v826_v22 = vshrl.u32 (!%p1071_p7), %v825_v21, 7 }
  0x2e   : > { %742 = vmatpush1.bf16.msra.mxu0 %v1138_v23  ;;  %v1199_v4 = vld [vmem:[%s1284_s28 + $0x1f0] ss:$8 sps:$4 sm:$0xff]   ;;  %v330_v12 = vld [vmem:[#allocation2 + $0x8] sm:$0xff]  ;;  %v823_v23 = vld [vmem:[%s1374_s2] sm:$0x3] (!%p1071_p7) }
  0x2f   : > { %783 = vmatpush1.bf16.msra.mxu1 %v1139_v24  ;;  %743 = vmatprep.subr.bf16.mxu0 %v1140_v25  ;;  %v837_v24 = vld [vmem:[%s1375_s3] sm:$0x3] (!%p1071_p7)  ;;  %v827_v25 = vsub.s32 (!%p1071_p7), 0, %v826_v22 }
  0x30   : > { %784 = vmatprep.subr.bf16.mxu1 %v1142_v26  ;;  %v831_v26 = vsub.s32 (!%p1071_p7), 1, %v826_v22 }
  0x32   : > { %744 = vmatpush1.bf16.msra.mxu0 %v1144_v27 }
  0x33   : > { %785 = vmatpush1.bf16.msra.mxu1 %v1145_v28  ;;  %745 = vmatprep.subr.bf16.mxu0 %v1146_v29  ;;  %v828_v29 = vrot.slane (!%p1071_p7), %v823_v23, %v827_v25 }
  0x34   : > { %786 = vmatprep.subr.bf16.mxu1 %v1148_v30  ;;  %v832_v30 = vrot.slane (!%p1071_p7), %v823_v23, %v831_v26 }
  0x36   : > { %746 = vmatpush1.bf16.msra.mxu0 %v1150_v31  ;;  %v842_v31 = vrot.slane (!%p1071_p7), %v837_v24, %v827_v25 }
  0x37   : > { %787 = vmatpush1.bf16.msra.mxu1 %v1151_v32  ;;  %747 = vmatprep.subr.bf16.mxu0 %v1152_v33  ;;  %v846_v32 = vrot.slane (!%p1071_p7), %v837_v24, %v831_v26 }
  0x38   : > { %788 = vmatprep.subr.bf16.mxu1 %v1154_v34 }
  0x3a   : > { %748 = vmatpush1.bf16.msra.mxu0 %v1156_v35 }
  0x3b   : > { %789 = vmatpush1.bf16.msra.mxu1 %v1157_v36  ;;  %749 = vmatprep.subr.bf16.mxu0 %v1158_v37 }
  0x3c   : > { %790 = vmatprep.subr.bf16.mxu1 %v1160_v38 }
  0x3e   : > { %750 = vmatpush1.bf16.msra.mxu0 %v1162_v39 }
  0x3f   : > { %791 = vmatpush1.bf16.msra.mxu1 %v1163_v40  ;;  %751 = vmatprep.subr.bf16.mxu0 %v1164_v41 }
  0x40   : > { %792 = vmatprep.subr.bf16.mxu1 %v1166_v42 }
  0x42   : > { %752 = vmatpush1.bf16.msra.mxu0 %v1168_v43 }
  0x43   : > { %793 = vmatpush1.bf16.msra.mxu1 %v1169_v44  ;;  %753 = vmatprep.subr.bf16.mxu0 %v1170_v45 }
  0x44   : > { %794 = vmatprep.subr.bf16.mxu1 %v1172_v46 }
  0x46   : > { %754 = vmatpush1.bf16.msra.mxu0 %v1174_v50 }
  0x47   : > { %795 = vmatpush1.bf16.msra.mxu1 %v1175_v51  ;;  %755 = vmatprep.subr.bf16.mxu0 %v1176_v53 }
  0x48   : > { %796 = vmatprep.subr.bf16.mxu1 %v1178_v54 }
  0x4a   : > { %756 = vmatpush1.bf16.msra.mxu0 %v1180_v55 }
  0x4b   : > { %797 = vmatpush1.bf16.msra.mxu1 %v1181_v56  ;;  %757 = vmatprep.subr.bf16.mxu0 %v1182_v57 }
  0x4c   : > { %798 = vmatprep.subr.bf16.mxu1 %v1184_v58 }
  0x4e   : > { %758 = vmatpush1.bf16.msra.mxu0 %v1186_v59 }
  0x4f   : > { %799 = vmatpush1.bf16.msra.mxu1 %v1187_v60  ;;  %759 = vmatprep.subr.bf16.mxu0 %v1188_v61 }
  0x50   : > { %800 = vmatprep.subr.bf16.mxu1 %v1190_v62 }
  0x52   : > { %760 = vmatpush1.bf16.msra.mxu0 %v1192_v63 }
  0x53   : > { %801 = vmatpush1.bf16.msra.mxu1 %v1193_v0  ;;  %761 = vmatprep.subr.bf16.mxu0 %v1194_v1 }
  0x54   : > { %802 = vmatprep.subr.bf16.mxu1 %v1196_v2 }
  0x56   : > { %762 = vmatpush1.bf16.msra.mxu0 %v1198_v3 }
  0x57   : > { %803 = vmatpush1.bf16.msra.mxu1 %v1199_v4 }
  0x59   : > { %764 = vmatmul.mubr.bf16.vlgmr.msra.gmra.mrb[0].mxu0 %v1003_v5 }
  0x5a   : > { %805 = vmatmul.mubr.bf16.vlgmr.msra.gmra.mrb[0].mxu1 %v1005_v6 }
 0x12c   : > { %v765_v7 = vpop.f32.mrb[0].mxu0 }
 0x12d   : > { %v806_v9 = vpop.f32.mrb[0].mxu1  ;;  %v767_v11 = vpop.f32.mrb[1].mxu0  ;;  %820 = sbr.rel (%p1071_p7) target bundleno = 324 (0x144), region = 44 }
 0x12e   : > { %v807_v10 = vadd.f32 %v806_v9, %v765_v7  ;;  %v808_v13 = vpop.f32.mrb[1].mxu1  ;;  %v769_v15 = vpop.f32.mrb[2].mxu0 }
 0x12f   : > { %v809_v14 = vadd.f32 %v808_v13, %v767_v11  ;;  %v810_v16 = vpop.f32.mrb[2].mxu1  ;;  %v770_v18 = vpop.f32.mrb[3].mxu0 }
 0x130   : > { %v813_v17 = vadd.f32 %v807_v10, %v329_v8  ;;  %v811_v19 = vpop.f32.mrb[3].mxu1 }
 0x131   : > { %v814_v20 = vadd.f32 %v809_v14, %v330_v12 }
 0x132   : > { %815 = vst [vmem:[#allocation2] sm:$0xff] %v813_v17 }
 0x133   : > { %816 = vst [vmem:[#allocation2 + $0x8] sm:$0xff] %v814_v20 }
 0x139   : > { %v821_v27 = vld [vmem:[#allocation2] sm:$0xff] }
 0x13a   : > { %v822_v28 = vld [vmem:[#allocation2 + $0x8] sm:$0xff]  ;;  %v835_v33 = vmul.f32 %v828_v29, %v821_v27 }
 0x13b   : > { %v836_v34 = vmul.f32 %v832_v30, %v822_v28 }
 0x13c   : > { %v849_v35 = vadd.f32 %v842_v31, %v835_v33 }
 0x13d   : > { %v850_v36 = vadd.f32 %v846_v32, %v836_v34 }
 0x13e   : > { %v851_v37 = vmax.f32 %v849_v35, 0.0 }
 0x13f   : > { %v852_v38 = vmax.f32 %v850_v36, 0.0 }
 0x141   : > { %v1078_v39 = vpack.c.bf16 %v852_v38, %v851_v37 }
 0x143   : > { %861 = vst [vmem:[%s1376_s4] sm:$0xff] %v1078_v39 }
 0x144 PF: > { %s14_s17 = sadd.s32 1, %s1226_s17   ;;  %s1377_s15 = smov %s1222_s16 }
 0x145   : > { %p11_p8 = scmp.ge.s32.totalorder %s14_s17, 4   ;;  %s1378_s16 = smov %s1380_s18 }
 0x147   :  { %13 = sbr.rel (!%p11_p8) target bundleno = 2 (0x2), region = 83 }

// kernel: resnet50_forward.101
= control target key start
LH: loop header
LB: loop body
LE: loop exit
PB: predicated region body
PF: predicated region fallthrough
CT: control target
= control target key end

     0   :  { %s1598_s15 = smov 0   ;;  %s1600_s16 = smov 0   ;;  %s1918_s0 = inlined_call_operand.vmem [shape: bf16[8,1024], index: 0, kind: input, shape index: {}]   ;;  %s1919_s1 = inlined_call_operand.vmem [shape: bf16[1024,512], index: 1, kind: input, shape index: {}]   ;;  %s1920_s2 = inlined_call_operand.vmem [shape: f32[1,512], index: 2, kind: input, shape index: {}]   ;;  %s1921_s3 = inlined_call_operand.vmem [shape: f32[1,512], index: 3, kind: input, shape index: {}]   ;;  %s1922_s4 = inlined_call_operand.vmem [shape: bf16[8,512], index: 4, kind: output, shape index: {}]  }
   0x1   :  { %s1602_s17 = smov 0   ;;  %s1604_s18 = smov 0  }
   0x2   :  { %s1606_s19 = smov 0   ;;  %s1608_s20 = smov 0  }
   0x3   :  { %s1610_s21 = smov 0  }
   0x4 LB: > { %s26_s22 = sadd.s32 1, %s1562_s19  ;;  %s29_s23 = sadd.s32 1, %s1566_s20  ;;  %s1570_s21 = sphi %s1610_s21, %s14_s21   ;;  %s1566_s20 = sphi %s1608_s20, %s1928_s20   ;;  %s1562_s19 = sphi %s1606_s19, %s1927_s19   ;;  %s1558_s18 = sphi %s1604_s18, %s1926_s18   ;;  %s1554_s17 = sphi %s1602_s17, %s1925_s17   ;;  %s1550_s16 = sphi %s1600_s16, %s1924_s16   ;;  %s1546_s15 = sphi %s1598_s15, %s1923_s15  }
   0x5   : > { %p27_p0 = scmp.ge.s32.totalorder %s26_s22, 2  ;;  %p77_p1 = scmp.ne.s32.totalorder %s1550_s16, %s1546_s15 }
   0x6   : > { %p78_p2 = scmp.eq.s32.totalorder %s1570_s21, 0  ;;  %s70_s27 = sadd.s32 1, %s1550_s16 }
   0x7   : > { %s1930_s22 = smov (%p27_p0, %s26_s22), 0  ;;  %s1932_s23 = smov (!%p27_p0, %s29_s23), %s1566_s20 }
   0x8   : > { %p79_p3 = por %p78_p2, %p77_p1  ;;  %p31_p4 = scmp.ge.s32.totalorder %s1932_s23, 2 }
   0x9   : > { %s65_s24 = ssub.s32 %s1562_s19, %s1930_s22  ;;  %p1270_p6 = scmp.ge.s32.totalorder %s1570_s21, 4 }
   0xa   : > { %s1934_s23 = smov (%p31_p4, %s1932_s23), 0 }
   0xb   : > { %s66_s25 = ssub.s32 %s1566_s20, %s1934_s23  ;;  %183 = sbr.rel (%p1270_p6) target bundleno = 57 (0x39), region = 16 }
   0xc   : > { %s67_s26 = sor.u32 %s66_s25, %s65_s24 }
   0xd   : > { %p68_p5 = scmp.eq.s32.totalorder %s67_s26, 0 }
   0xf   : > { %s1649_s28 = scalar_select %p68_p5, %s1550_s16, %s70_s27  }
  0x12   : > { %199 = sbr.rel (!%p79_p3) target bundleno = 57 (0x39), region = 24  ;;  %s201_s29 = sand.u32 (%p79_p3), 1, %s1550_s16  }
  0x13   : > { %s1273_s30 = sshll.u32 (%p79_p3), %s1566_s20, 1  ;;  %s1271_s5 = sshll.u32 (%p79_p3), %s201_s29, 9 }
  0x14   : > { %s1357_s6 = sshll.u32 (%p79_p3), %s1562_s19, 8  ;;  %s1663_s12 = scalar_lea.vmem (%p79_p3), [#allocation3], %s1271_s5 }
  0x15   : > { %s207_s7 = sadd.s32 (%p79_p3), %s1357_s6, %s1273_s30 }
  0x16   : > { %s1275_s8 = sshll.u32 (%p79_p3), %s207_s7, 2 }
  0x17   : > { %s1658_s11 = scalar_lea.vmem (%p79_p3), %s1919_s1, %s1275_s8 }
  0x18   : > { %v363_v0 = vld [vmem:[%s1658_s11] sm:$0xff] (%p79_p3)  ;;  %v365_v1 = vld [vmem:[%s1658_s11 + $0x10] sm:$0xff] (%p79_p3) }
  0x19   : > { %v367_v2 = vld [vmem:[%s1658_s11 + $0x20] sm:$0xff]  ;;  %364 = vst [vmem:[%s1663_s12] sm:$0xff] %v363_v0  ;;  %366 = vst [vmem:[%s1663_s12 + $0x8] sm:$0xff] %v365_v1  ;;  %v369_v3 = vld [vmem:[%s1658_s11 + $0x30] sm:$0xff] }
  0x1a   : > { %368 = vst [vmem:[%s1663_s12 + $0x10] sm:$0xff] %v367_v2  ;;  %v371_v4 = vld [vmem:[%s1658_s11 + $0x40] sm:$0xff]  ;;  %v373_v5 = vld [vmem:[%s1658_s11 + $0x50] sm:$0xff]  ;;  %370 = vst [vmem:[%s1663_s12 + $0x18] sm:$0xff] %v369_v3 }
  0x1b   : > { %372 = vst [vmem:[%s1663_s12 + $0x20] sm:$0xff] %v371_v4  ;;  %374 = vst [vmem:[%s1663_s12 + $0x28] sm:$0xff] %v373_v5  ;;  %v375_v6 = vld [vmem:[%s1658_s11 + $0x60] sm:$0xff]  ;;  %v377_v7 = vld [vmem:[%s1658_s11 + $0x70] sm:$0xff] }
  0x1c   : > { %v379_v8 = vld [vmem:[%s1658_s11 + $0x80] sm:$0xff]  ;;  %376 = vst [vmem:[%s1663_s12 + $0x30] sm:$0xff] %v375_v6  ;;  %378 = vst [vmem:[%s1663_s12 + $0x38] sm:$0xff] %v377_v7  ;;  %v381_v9 = vld [vmem:[%s1658_s11 + $0x90] sm:$0xff] }
  0x1d   : > { %380 = vst [vmem:[%s1663_s12 + $0x40] sm:$0xff] %v379_v8  ;;  %v383_v10 = vld [vmem:[%s1658_s11 + $0xa0] sm:$0xff]  ;;  %v385_v11 = vld [vmem:[%s1658_s11 + $0xb0] sm:$0xff]  ;;  %382 = vst [vmem:[%s1663_s12 + $0x48] sm:$0xff] %v381_v9 }
  0x1e   : > { %384 = vst [vmem:[%s1663_s12 + $0x50] sm:$0xff] %v383_v10  ;;  %386 = vst [vmem:[%s1663_s12 + $0x58] sm:$0xff] %v385_v11  ;;  %v387_v12 = vld [vmem:[%s1658_s11 + $0xc0] sm:$0xff]  ;;  %v389_v13 = vld [vmem:[%s1658_s11 + $0xd0] sm:$0xff] }
  0x1f   : > { %v391_v14 = vld [vmem:[%s1658_s11 + $0xe0] sm:$0xff]  ;;  %388 = vst [vmem:[%s1663_s12 + $0x60] sm:$0xff] %v387_v12  ;;  %390 = vst [vmem:[%s1663_s12 + $0x68] sm:$0xff] %v389_v13  ;;  %v393_v15 = vld [vmem:[%s1658_s11 + $0xf0] sm:$0xff] }
  0x20   : > { %392 = vst [vmem:[%s1663_s12 + $0x70] sm:$0xff] %v391_v14  ;;  %v395_v16 = vld [vmem:[%s1658_s11 + $0x100] sm:$0xff]  ;;  %v397_v17 = vld [vmem:[%s1658_s11 + $0x110] sm:$0xff]  ;;  %394 = vst [vmem:[%s1663_s12 + $0x78] sm:$0xff] %v393_v15 }
  0x21   : > { %396 = vst [vmem:[%s1663_s12 + $0x80] sm:$0xff] %v395_v16  ;;  %398 = vst [vmem:[%s1663_s12 + $0x88] sm:$0xff] %v397_v17  ;;  %v399_v18 = vld [vmem:[%s1658_s11 + $0x120] sm:$0xff]  ;;  %v401_v19 = vld [vmem:[%s1658_s11 + $0x130] sm:$0xff] }
  0x22   : > { %v403_v20 = vld [vmem:[%s1658_s11 + $0x140] sm:$0xff]  ;;  %400 = vst [vmem:[%s1663_s12 + $0x90] sm:$0xff] %v399_v18  ;;  %402 = vst [vmem:[%s1663_s12 + $0x98] sm:$0xff] %v401_v19  ;;  %v405_v21 = vld [vmem:[%s1658_s11 + $0x150] sm:$0xff] }
  0x23   : > { %404 = vst [vmem:[%s1663_s12 + $0xa0] sm:$0xff] %v403_v20  ;;  %v407_v22 = vld [vmem:[%s1658_s11 + $0x160] sm:$0xff]  ;;  %v409_v23 = vld [vmem:[%s1658_s11 + $0x170] sm:$0xff]  ;;  %406 = vst [vmem:[%s1663_s12 + $0xa8] sm:$0xff] %v405_v21 }
  0x24   : > { %408 = vst [vmem:[%s1663_s12 + $0xb0] sm:$0xff] %v407_v22  ;;  %410 = vst [vmem:[%s1663_s12 + $0xb8] sm:$0xff] %v409_v23  ;;  %v411_v24 = vld [vmem:[%s1658_s11 + $0x180] sm:$0xff]  ;;  %v413_v25 = vld [vmem:[%s1658_s11 + $0x190] sm:$0xff] }
  0x25   : > { %v415_v26 = vld [vmem:[%s1658_s11 + $0x1a0] sm:$0xff]  ;;  %412 = vst [vmem:[%s1663_s12 + $0xc0] sm:$0xff] %v411_v24  ;;  %414 = vst [vmem:[%s1663_s12 + $0xc8] sm:$0xff] %v413_v25  ;;  %v417_v27 = vld [vmem:[%s1658_s11 + $0x1b0] sm:$0xff] }
  0x26   : > { %416 = vst [vmem:[%s1663_s12 + $0xd0] sm:$0xff] %v415_v26  ;;  %v419_v28 = vld [vmem:[%s1658_s11 + $0x1c0] sm:$0xff]  ;;  %v421_v29 = vld [vmem:[%s1658_s11 + $0x1d0] sm:$0xff]  ;;  %418 = vst [vmem:[%s1663_s12 + $0xd8] sm:$0xff] %v417_v27 }
  0x27   : > { %420 = vst [vmem:[%s1663_s12 + $0xe0] sm:$0xff] %v419_v28  ;;  %422 = vst [vmem:[%s1663_s12 + $0xe8] sm:$0xff] %v421_v29  ;;  %v423_v30 = vld [vmem:[%s1658_s11 + $0x1e0] sm:$0xff]  ;;  %v425_v31 = vld [vmem:[%s1658_s11 + $0x1f0] sm:$0xff] }
  0x28   : > { %v427_v32 = vld [vmem:[%s1658_s11 + $0x200] sm:$0xff]  ;;  %424 = vst [vmem:[%s1663_s12 + $0xf0] sm:$0xff] %v423_v30  ;;  %426 = vst [vmem:[%s1663_s12 + $0xf8] sm:$0xff] %v425_v31  ;;  %v429_v33 = vld [vmem:[%s1658_s11 + $0x210] sm:$0xff] }
  0x29   : > { %428 = vst [vmem:[%s1663_s12 + $0x100] sm:$0xff] %v427_v32  ;;  %v431_v34 = vld [vmem:[%s1658_s11 + $0x220] sm:$0xff]  ;;  %v433_v35 = vld [vmem:[%s1658_s11 + $0x230] sm:$0xff]  ;;  %430 = vst [vmem:[%s1663_s12 + $0x108] sm:$0xff] %v429_v33 }
  0x2a   : > { %432 = vst [vmem:[%s1663_s12 + $0x110] sm:$0xff] %v431_v34  ;;  %434 = vst [vmem:[%s1663_s12 + $0x118] sm:$0xff] %v433_v35  ;;  %v435_v36 = vld [vmem:[%s1658_s11 + $0x240] sm:$0xff]  ;;  %v437_v37 = vld [vmem:[%s1658_s11 + $0x250] sm:$0xff] }
  0x2b   : > { %v439_v38 = vld [vmem:[%s1658_s11 + $0x260] sm:$0xff]  ;;  %436 = vst [vmem:[%s1663_s12 + $0x120] sm:$0xff] %v435_v36  ;;  %438 = vst [vmem:[%s1663_s12 + $0x128] sm:$0xff] %v437_v37  ;;  %v441_v39 = vld [vmem:[%s1658_s11 + $0x270] sm:$0xff] }
  0x2c   : > { %440 = vst [vmem:[%s1663_s12 + $0x130] sm:$0xff] %v439_v38  ;;  %v443_v40 = vld [vmem:[%s1658_s11 + $0x280] sm:$0xff]  ;;  %v445_v41 = vld [vmem:[%s1658_s11 + $0x290] sm:$0xff]  ;;  %442 = vst [vmem:[%s1663_s12 + $0x138] sm:$0xff] %v441_v39 }
  0x2d   : > { %444 = vst [vmem:[%s1663_s12 + $0x140] sm:$0xff] %v443_v40  ;;  %446 = vst [vmem:[%s1663_s12 + $0x148] sm:$0xff] %v445_v41  ;;  %v447_v42 = vld [vmem:[%s1658_s11 + $0x2a0] sm:$0xff]  ;;  %v449_v43 = vld [vmem:[%s1658_s11 + $0x2b0] sm:$0xff] }
  0x2e   : > { %v451_v44 = vld [vmem:[%s1658_s11 + $0x2c0] sm:$0xff]  ;;  %448 = vst [vmem:[%s1663_s12 + $0x150] sm:$0xff] %v447_v42  ;;  %450 = vst [vmem:[%s1663_s12 + $0x158] sm:$0xff] %v449_v43  ;;  %v453_v45 = vld [vmem:[%s1658_s11 + $0x2d0] sm:$0xff] }
  0x2f   : > { %452 = vst [vmem:[%s1663_s12 + $0x160] sm:$0xff] %v451_v44  ;;  %v455_v46 = vld [vmem:[%s1658_s11 + $0x2e0] sm:$0xff]  ;;  %v457_v47 = vld [vmem:[%s1658_s11 + $0x2f0] sm:$0xff]  ;;  %454 = vst [vmem:[%s1663_s12 + $0x168] sm:$0xff] %v453_v45 }
  0x30   : > { %456 = vst [vmem:[%s1663_s12 + $0x170] sm:$0xff] %v455_v46  ;;  %458 = vst [vmem:[%s1663_s12 + $0x178] sm:$0xff] %v457_v47  ;;  %v459_v48 = vld [vmem:[%s1658_s11 + $0x300] sm:$0xff]  ;;  %v461_v49 = vld [vmem:[%s1658_s11 + $0x310] sm:$0xff] }
  0x31   : > { %v463_v50 = vld [vmem:[%s1658_s11 + $0x320] sm:$0xff]  ;;  %460 = vst [vmem:[%s1663_s12 + $0x180] sm:$0xff] %v459_v48  ;;  %462 = vst [vmem:[%s1663_s12 + $0x188] sm:$0xff] %v461_v49  ;;  %v465_v51 = vld [vmem:[%s1658_s11 + $0x330] sm:$0xff] }
  0x32   : > { %464 = vst [vmem:[%s1663_s12 + $0x190] sm:$0xff] %v463_v50  ;;  %v467_v52 = vld [vmem:[%s1658_s11 + $0x340] sm:$0xff]  ;;  %v469_v53 = vld [vmem:[%s1658_s11 + $0x350] sm:$0xff]  ;;  %466 = vst [vmem:[%s1663_s12 + $0x198] sm:$0xff] %v465_v51 }
  0x33   : > { %468 = vst [vmem:[%s1663_s12 + $0x1a0] sm:$0xff] %v467_v52  ;;  %470 = vst [vmem:[%s1663_s12 + $0x1a8] sm:$0xff] %v469_v53  ;;  %v471_v54 = vld [vmem:[%s1658_s11 + $0x360] sm:$0xff]  ;;  %v473_v55 = vld [vmem:[%s1658_s11 + $0x370] sm:$0xff] }
  0x34   : > { %v475_v56 = vld [vmem:[%s1658_s11 + $0x380] sm:$0xff]  ;;  %472 = vst [vmem:[%s1663_s12 + $0x1b0] sm:$0xff] %v471_v54  ;;  %474 = vst [vmem:[%s1663_s12 + $0x1b8] sm:$0xff] %v473_v55  ;;  %v477_v57 = vld [vmem:[%s1658_s11 + $0x390] sm:$0xff] }
  0x35   : > { %476 = vst [vmem:[%s1663_s12 + $0x1c0] sm:$0xff] %v475_v56  ;;  %v479_v58 = vld [vmem:[%s1658_s11 + $0x3a0] sm:$0xff]  ;;  %v481_v59 = vld [vmem:[%s1658_s11 + $0x3b0] sm:$0xff]  ;;  %478 = vst [vmem:[%s1663_s12 + $0x1c8] sm:$0xff] %v477_v57 }
  0x36   : > { %480 = vst [vmem:[%s1663_s12 + $0x1d0] sm:$0xff] %v479_v58  ;;  %482 = vst [vmem:[%s1663_s12 + $0x1d8] sm:$0xff] %v481_v59  ;;  %v483_v60 = vld [vmem:[%s1658_s11 + $0x3c0] sm:$0xff]  ;;  %v485_v61 = vld [vmem:[%s1658_s11 + $0x3d0] sm:$0xff] }
  0x37   : > { %v487_v62 = vld [vmem:[%s1658_s11 + $0x3e0] sm:$0xff]  ;;  %484 = vst [vmem:[%s1663_s12 + $0x1e0] sm:$0xff] %v483_v60  ;;  %486 = vst [vmem:[%s1663_s12 + $0x1e8] sm:$0xff] %v485_v61  ;;  %v489_v63 = vld [vmem:[%s1658_s11 + $0x3f0] sm:$0xff] }
  0x38   : > { %488 = vst [vmem:[%s1663_s12 + $0x1f0] sm:$0xff] %v487_v62  ;;  %490 = vst [vmem:[%s1663_s12 + $0x1f8] sm:$0xff] %v489_v63 }
  0x39 PF: > { %p1276_p7 = scmp.ge.s32.totalorder %s1570_s21, 1  ;;  %p511_p8 = scmp.lt.s32.totalorder %s1570_s21, 5 }
  0x3b   : > { %p512_p9 = pnand %p1276_p7, %p511_p8 }
  0x3c   : > { %s518_s13 = sand.u32 (!%p512_p9), 1, %s1546_s15   ;;  %s1278_s14 = sshll.u32 (!%p512_p9), %s1554_s17, 2 }
  0x3d   : > { %515 = sbr.rel (%p512_p9) target bundleno = 378 (0x17a), region = 70  ;;  %s1277_s24 = sshll.u32 (!%p512_p9), %s518_s13, 9 }
  0x3e   : > { %p567_p10 = scmp.lt.s32.totalorder (!%p512_p9), %s1278_s14, 7  ;;  %s1280_s25 = sshll.u32 (!%p512_p9), %s1558_s18, 1 }
  0x3f   : > { %p577_p11 = scmp.lt.s32.totalorder (!%p512_p9), %s1280_s25, 3  ;;  %s1816_s13 = scalar_lea.vmem (!%p512_p9), [#allocation3], %s1277_s24 }
  0x40   : > { %p1284_p12 = scmp.ne.s32.totalorder (!%p512_p9), %s1554_s17, 0 }
  0x44   : > { %s1936_s14 = smov (!%p567_p10, %s1278_s14), 7  ;;  %s1938_s25 = smov (!%p577_p11, %s1280_s25), 3 }
  0x45   : > { %s1279_s26 = sshll.u32 %s1936_s14, 2  ;;  %s579_s15 = scalar_lea.vmem %s1920_s2, %s1938_s25  ;;  %v1572_v0 = vmov (!%p1284_p12), 0.0  }
  0x46   : > { %s1798_s30 = scalar_lea.vmem %s1918_s0, %s1279_s26  ;;  %s584_s18 = scalar_lea.vmem %s1921_s3, %s1938_s25  ;;  %600 = vst [vmem:[#allocation2] sm:$0xff] (!%p1284_p12), %v1572_v0  ;;  %601 = vst [vmem:[#allocation2 + $0x8] sm:$0xff] (!%p1284_p12), %v1572_v0 }
  0x47   : > { %s1283_s9 = sshll.u32 %s1938_s25, 2  ;;  %599 = sbr.rel (%p1284_p12) target bundleno = 78 (0x4e), region = 78 }
  0x48   : > { %s1814_s12 = scalar_lea.vmem %s1922_s4, %s1283_s9 }
  0x4e PF: > { %v1416_v1 = vld [vmem:[%s1816_s13 + $0x4] ss:$8 sps:$4 sm:$0xff]   ;;  %v1420_v3 = vld [vmem:[%s1816_s13] ss:$8 sps:$4 sm:$0xff]   ;;  %v1422_v5 = vld [vmem:[%s1816_s13 + $0x14] ss:$8 sps:$4 sm:$0xff]  }
  0x4f   : > { %v1418_v2 = vld [vmem:[%s1816_s13 + $0x104] ss:$8 sps:$4 sm:$0xff]   ;;  %1004 = vmatprep.subr.bf16.mxu0 %v1416_v1  ;;  %v1421_v4 = vld [vmem:[%s1816_s13 + $0x100] ss:$8 sps:$4 sm:$0xff]   ;;  %v1424_v6 = vld [vmem:[%s1816_s13 + $0x114] ss:$8 sps:$4 sm:$0xff]  }
  0x50   : > { %1045 = vmatprep.subr.bf16.mxu1 %v1418_v2  ;;  %1005 = vmatpush1.bf16.msra.mxu0 %v1420_v3  ;;  %v1426_v7 = vld [vmem:[%s1816_s13 + $0x10] ss:$8 sps:$4 sm:$0xff]   ;;  %v1428_v9 = vld [vmem:[%s1816_s13 + $0x24] ss:$8 sps:$4 sm:$0xff]   ;;  %v1432_v11 = vld [vmem:[%s1816_s13 + $0x20] ss:$8 sps:$4 sm:$0xff]  }
  0x51   : > { %1046 = vmatpush1.bf16.msra.mxu1 %v1421_v4  ;;  %1006 = vmatprep.subr.bf16.mxu0 %v1422_v5  ;;  %v1427_v8 = vld [vmem:[%s1816_s13 + $0x110] ss:$8 sps:$4 sm:$0xff]   ;;  %v1430_v10 = vld [vmem:[%s1816_s13 + $0x124] ss:$8 sps:$4 sm:$0xff]   ;;  %v1433_v12 = vld [vmem:[%s1816_s13 + $0x120] ss:$8 sps:$4 sm:$0xff]  }
  0x52   : > { %1047 = vmatprep.subr.bf16.mxu1 %v1424_v6  ;;  %v1434_v13 = vld [vmem:[%s1816_s13 + $0x34] ss:$8 sps:$4 sm:$0xff]   ;;  %v1438_v15 = vld [vmem:[%s1816_s13 + $0x30] ss:$8 sps:$4 sm:$0xff]   ;;  %v1440_v17 = vld [vmem:[%s1816_s13 + $0x44] ss:$8 sps:$4 sm:$0xff]  }
  0x53   : > { %v1436_v14 = vld [vmem:[%s1816_s13 + $0x134] ss:$8 sps:$4 sm:$0xff]   ;;  %v1439_v16 = vld [vmem:[%s1816_s13 + $0x130] ss:$8 sps:$4 sm:$0xff]   ;;  %v1442_v18 = vld [vmem:[%s1816_s13 + $0x144] ss:$8 sps:$4 sm:$0xff]  }
  0x54   : > { %1007 = vmatpush1.bf16.msra.mxu0 %v1426_v7  ;;  %v1444_v19 = vld [vmem:[%s1816_s13 + $0x40] ss:$8 sps:$4 sm:$0xff]   ;;  %v1446_v21 = vld [vmem:[%s1816_s13 + $0x54] ss:$8 sps:$4 sm:$0xff]   ;;  %v1450_v23 = vld [vmem:[%s1816_s13 + $0x50] ss:$8 sps:$4 sm:$0xff]  }
  0x55   : > { %1048 = vmatpush1.bf16.msra.mxu1 %v1427_v8  ;;  %1008 = vmatprep.subr.bf16.mxu0 %v1428_v9  ;;  %v1445_v20 = vld [vmem:[%s1816_s13 + $0x140] ss:$8 sps:$4 sm:$0xff]   ;;  %v1448_v22 = vld [vmem:[%s1816_s13 + $0x154] ss:$8 sps:$4 sm:$0xff]   ;;  %v1451_v24 = vld [vmem:[%s1816_s13 + $0x150] ss:$8 sps:$4 sm:$0xff]  }
  0x56   : > { %1049 = vmatprep.subr.bf16.mxu1 %v1430_v10  ;;  %v1452_v25 = vld [vmem:[%s1816_s13 + $0x64] ss:$8 sps:$4 sm:$0xff]   ;;  %v1456_v27 = vld [vmem:[%s1816_s13 + $0x60] ss:$8 sps:$4 sm:$0xff]   ;;  %v1458_v29 = vld [vmem:[%s1816_s13 + $0x74] ss:$8 sps:$4 sm:$0xff]  }
  0x57   : > { %v1454_v26 = vld [vmem:[%s1816_s13 + $0x164] ss:$8 sps:$4 sm:$0xff]   ;;  %v1457_v28 = vld [vmem:[%s1816_s13 + $0x160] ss:$8 sps:$4 sm:$0xff]   ;;  %v1460_v30 = vld [vmem:[%s1816_s13 + $0x174] ss:$8 sps:$4 sm:$0xff]  }
  0x58   : > { %1009 = vmatpush1.bf16.msra.mxu0 %v1432_v11  ;;  %v1462_v31 = vld [vmem:[%s1816_s13 + $0x70] ss:$8 sps:$4 sm:$0xff]   ;;  %v1464_v33 = vld [vmem:[%s1816_s13 + $0x84] ss:$8 sps:$4 sm:$0xff]   ;;  %v1468_v35 = vld [vmem:[%s1816_s13 + $0x80] ss:$8 sps:$4 sm:$0xff]  }
  0x59   : > { %1050 = vmatpush1.bf16.msra.mxu1 %v1433_v12  ;;  %1010 = vmatprep.subr.bf16.mxu0 %v1434_v13  ;;  %v1463_v32 = vld [vmem:[%s1816_s13 + $0x170] ss:$8 sps:$4 sm:$0xff]   ;;  %v1466_v34 = vld [vmem:[%s1816_s13 + $0x184] ss:$8 sps:$4 sm:$0xff]   ;;  %v1469_v36 = vld [vmem:[%s1816_s13 + $0x180] ss:$8 sps:$4 sm:$0xff]  }
  0x5a   : > { %1051 = vmatprep.subr.bf16.mxu1 %v1436_v14  ;;  %v1470_v37 = vld [vmem:[%s1816_s13 + $0x94] ss:$8 sps:$4 sm:$0xff]   ;;  %v1474_v39 = vld [vmem:[%s1816_s13 + $0x90] ss:$8 sps:$4 sm:$0xff]   ;;  %v1476_v41 = vld [vmem:[%s1816_s13 + $0xa4] ss:$8 sps:$4 sm:$0xff]  }
  0x5b   : > { %v1472_v38 = vld [vmem:[%s1816_s13 + $0x194] ss:$8 sps:$4 sm:$0xff]   ;;  %v1475_v40 = vld [vmem:[%s1816_s13 + $0x190] ss:$8 sps:$4 sm:$0xff]   ;;  %v1478_v42 = vld [vmem:[%s1816_s13 + $0x1a4] ss:$8 sps:$4 sm:$0xff]  }
  0x5c   : > { %1011 = vmatpush1.bf16.msra.mxu0 %v1438_v15  ;;  %v1480_v43 = vld [vmem:[%s1816_s13 + $0xa0] ss:$8 sps:$4 sm:$0xff]   ;;  %v1482_v45 = vld [vmem:[%s1816_s13 + $0xb4] ss:$8 sps:$4 sm:$0xff]   ;;  %v1486_v50 = vld [vmem:[%s1816_s13 + $0xb0] ss:$8 sps:$4 sm:$0xff]  }
  0x5d   : > { %1052 = vmatpush1.bf16.msra.mxu1 %v1439_v16  ;;  %1012 = vmatprep.subr.bf16.mxu0 %v1440_v17  ;;  %v1481_v44 = vld [vmem:[%s1816_s13 + $0x1a0] ss:$8 sps:$4 sm:$0xff]   ;;  %v1484_v46 = vld [vmem:[%s1816_s13 + $0x1b4] ss:$8 sps:$4 sm:$0xff]   ;;  %v1487_v51 = vld [vmem:[%s1816_s13 + $0x1b0] ss:$8 sps:$4 sm:$0xff]  }
  0x5e   : > { %1053 = vmatprep.subr.bf16.mxu1 %v1442_v18  ;;  %v604_v47 = vld [vmem:[%s1798_s30] sm:$0xff]  ;;  %v605_v49 = vld [vmem:[%s1798_s30 + $0x8] sm:$0xff]  ;;  %v1488_v53 = vld [vmem:[%s1816_s13 + $0xc4] ss:$8 sps:$4 sm:$0xff]   ;;  %p1353_p13 = scmp.ne.s32.totalorder %s1554_s17, 1 }
  0x5f   : > { %v1286_v48 = vcombine.high %v604_v47, %v604_v47  ;;  %v1288_v52 = vcombine.high %v605_v49, %v605_v49  ;;  %v1490_v54 = vld [vmem:[%s1816_s13 + $0x1c4] ss:$8 sps:$4 sm:$0xff]   ;;  %v1492_v55 = vld [vmem:[%s1816_s13 + $0xc0] ss:$8 sps:$4 sm:$0xff]   ;;  %v1494_v57 = vld [vmem:[%s1816_s13 + $0xd4] ss:$8 sps:$4 sm:$0xff]   ;;  %v1285_v5 = vcombine.low %v604_v47, %v604_v47  ;;  %v1287_v6 = vcombine.low %v605_v49, %v605_v49 }
  0x60   : > { %1013 = vmatpush1.bf16.msra.mxu0 %v1444_v19  ;;  %v1493_v56 = vld [vmem:[%s1816_s13 + $0x1c0] ss:$8 sps:$4 sm:$0xff]   ;;  %v1496_v58 = vld [vmem:[%s1816_s13 + $0x1d4] ss:$8 sps:$4 sm:$0xff]   ;;  %v1498_v59 = vld [vmem:[%s1816_s13 + $0xd0] ss:$8 sps:$4 sm:$0xff]  }
  0x61   : > { %1054 = vmatpush1.bf16.msra.mxu1 %v1445_v20  ;;  %1014 = vmatprep.subr.bf16.mxu0 %v1446_v21  ;;  %v1499_v60 = vld [vmem:[%s1816_s13 + $0x1d0] ss:$8 sps:$4 sm:$0xff]   ;;  %v1500_v61 = vld [vmem:[%s1816_s13 + $0xe4] ss:$8 sps:$4 sm:$0xff]   ;;  %v1504_v63 = vld [vmem:[%s1816_s13 + $0xe0] ss:$8 sps:$4 sm:$0xff]   ;;  %v1098_v21 = vlaneseq (!%p1353_p13) }
  0x62   : > { %1055 = vmatprep.subr.bf16.mxu1 %v1448_v22  ;;  %1036 = vmatprep.mubr.bf16.mxu0 %v1286_v48  ;;  %v1502_v62 = vld [vmem:[%s1816_s13 + $0x1e4] ss:$8 sps:$4 sm:$0xff]   ;;  %v1505_v0 = vld [vmem:[%s1816_s13 + $0x1e0] ss:$8 sps:$4 sm:$0xff]   ;;  %v1506_v1 = vld [vmem:[%s1816_s13 + $0xf4] ss:$8 sps:$4 sm:$0xff]  }
  0x63   : > { %1077 = vmatprep.mubr.bf16.mxu1 %v1288_v52  ;;  %v1508_v2 = vld [vmem:[%s1816_s13 + $0x1f4] ss:$8 sps:$4 sm:$0xff]   ;;  %v1510_v3 = vld [vmem:[%s1816_s13 + $0xf0] ss:$8 sps:$4 sm:$0xff]   ;;  %v1099_v22 = vshrl.u32 (!%p1353_p13), %v1098_v21, 7 }
  0x64   : > { %1015 = vmatpush1.bf16.msra.mxu0 %v1450_v23  ;;  %v1511_v4 = vld [vmem:[%s1816_s13 + $0x1f0] ss:$8 sps:$4 sm:$0xff]  }
  0x65   : > { %1056 = vmatpush1.bf16.msra.mxu1 %v1451_v24  ;;  %1016 = vmatprep.subr.bf16.mxu0 %v1452_v25  ;;  %v602_v8 = vld [vmem:[#allocation2] sm:$0xff]  ;;  %v603_v12 = vld [vmem:[#allocation2 + $0x8] sm:$0xff]  ;;  %v1100_v25 = vsub.s32 (!%p1353_p13), 0, %v1099_v22 }
  0x66   : > { %1057 = vmatprep.subr.bf16.mxu1 %v1454_v26  ;;  %v1096_v23 = vld [vmem:[%s579_s15] sm:$0x3] (!%p1353_p13)  ;;  %v1104_v26 = vsub.s32 (!%p1353_p13), 1, %v1099_v22 }
  0x67   : > { %v1110_v24 = vld [vmem:[%s584_s18] sm:$0x3] (!%p1353_p13) }
  0x68   : > { %1017 = vmatpush1.bf16.msra.mxu0 %v1456_v27 }
  0x69   : > { %1058 = vmatpush1.bf16.msra.mxu1 %v1457_v28  ;;  %1018 = vmatprep.subr.bf16.mxu0 %v1458_v29  ;;  %v1101_v29 = vrot.slane (!%p1353_p13), %v1096_v23, %v1100_v25 }
  0x6a   : > { %1059 = vmatprep.subr.bf16.mxu1 %v1460_v30  ;;  %v1105_v30 = vrot.slane (!%p1353_p13), %v1096_v23, %v1104_v26 }
  0x6c   : > { %1019 = vmatpush1.bf16.msra.mxu0 %v1462_v31  ;;  %v1115_v31 = vrot.slane (!%p1353_p13), %v1110_v24, %v1100_v25 }
  0x6d   : > { %1060 = vmatpush1.bf16.msra.mxu1 %v1463_v32  ;;  %1020 = vmatprep.subr.bf16.mxu0 %v1464_v33  ;;  %v1119_v32 = vrot.slane (!%p1353_p13), %v1110_v24, %v1104_v26 }
  0x6e   : > { %1061 = vmatprep.subr.bf16.mxu1 %v1466_v34 }
  0x70   : > { %1021 = vmatpush1.bf16.msra.mxu0 %v1468_v35 }
  0x71   : > { %1062 = vmatpush1.bf16.msra.mxu1 %v1469_v36  ;;  %1022 = vmatprep.subr.bf16.mxu0 %v1470_v37 }
  0x72   : > { %1063 = vmatprep.subr.bf16.mxu1 %v1472_v38 }
  0x74   : > { %1023 = vmatpush1.bf16.msra.mxu0 %v1474_v39 }
  0x75   : > { %1064 = vmatpush1.bf16.msra.mxu1 %v1475_v40  ;;  %1024 = vmatprep.subr.bf16.mxu0 %v1476_v41 }
  0x76   : > { %1065 = vmatprep.subr.bf16.mxu1 %v1478_v42 }
  0x78   : > { %1025 = vmatpush1.bf16.msra.mxu0 %v1480_v43 }
  0x79   : > { %1066 = vmatpush1.bf16.msra.mxu1 %v1481_v44  ;;  %1026 = vmatprep.subr.bf16.mxu0 %v1482_v45 }
  0x7a   : > { %1067 = vmatprep.subr.bf16.mxu1 %v1484_v46 }
  0x7c   : > { %1027 = vmatpush1.bf16.msra.mxu0 %v1486_v50 }
  0x7d   : > { %1068 = vmatpush1.bf16.msra.mxu1 %v1487_v51  ;;  %1028 = vmatprep.subr.bf16.mxu0 %v1488_v53 }
  0x7e   : > { %1069 = vmatprep.subr.bf16.mxu1 %v1490_v54 }
  0x80   : > { %1029 = vmatpush1.bf16.msra.mxu0 %v1492_v55 }
  0x81   : > { %1070 = vmatpush1.bf16.msra.mxu1 %v1493_v56  ;;  %1030 = vmatprep.subr.bf16.mxu0 %v1494_v57 }
  0x82   : > { %1071 = vmatprep.subr.bf16.mxu1 %v1496_v58 }
  0x84   : > { %1031 = vmatpush1.bf16.msra.mxu0 %v1498_v59 }
  0x85   : > { %1072 = vmatpush1.bf16.msra.mxu1 %v1499_v60  ;;  %1032 = vmatprep.subr.bf16.mxu0 %v1500_v61 }
  0x86   : > { %1073 = vmatprep.subr.bf16.mxu1 %v1502_v62 }
  0x88   : > { %1033 = vmatpush1.bf16.msra.mxu0 %v1504_v63 }
  0x89   : > { %1074 = vmatpush1.bf16.msra.mxu1 %v1505_v0  ;;  %1034 = vmatprep.subr.bf16.mxu0 %v1506_v1 }
  0x8a   : > { %1075 = vmatprep.subr.bf16.mxu1 %v1508_v2 }
  0x8c   : > { %1035 = vmatpush1.bf16.msra.mxu0 %v1510_v3 }
  0x8d   : > { %1076 = vmatpush1.bf16.msra.mxu1 %v1511_v4 }
  0x8f   : > { %1037 = vmatmul.mubr.bf16.vlgmr.msra.gmra.mrb[0].mxu0 %v1285_v5 }
  0x90   : > { %1078 = vmatmul.mubr.bf16.vlgmr.msra.gmra.mrb[0].mxu1 %v1287_v6 }
 0x162   : > { %v1038_v7 = vpop.f32.mrb[0].mxu0 }
 0x163   : > { %v1079_v9 = vpop.f32.mrb[0].mxu1  ;;  %v1040_v11 = vpop.f32.mrb[1].mxu0  ;;  %1093 = sbr.rel (%p1353_p13) target bundleno = 378 (0x17a), region = 82 }
 0x164   : > { %v1080_v10 = vadd.f32 %v1079_v9, %v1038_v7  ;;  %v1081_v13 = vpop.f32.mrb[1].mxu1  ;;  %v1042_v15 = vpop.f32.mrb[2].mxu0 }
 0x165   : > { %v1082_v14 = vadd.f32 %v1081_v13, %v1040_v11  ;;  %v1083_v16 = vpop.f32.mrb[2].mxu1  ;;  %v1043_v18 = vpop.f32.mrb[3].mxu0 }
 0x166   : > { %v1086_v17 = vadd.f32 %v1080_v10, %v602_v8  ;;  %v1084_v19 = vpop.f32.mrb[3].mxu1 }
 0x167   : > { %v1087_v20 = vadd.f32 %v1082_v14, %v603_v12 }
 0x168   : > { %1088 = vst [vmem:[#allocation2] sm:$0xff] %v1086_v17 }
 0x169   : > { %1089 = vst [vmem:[#allocation2 + $0x8] sm:$0xff] %v1087_v20 }
 0x16f   : > { %v1094_v27 = vld [vmem:[#allocation2] sm:$0xff] }
 0x170   : > { %v1095_v28 = vld [vmem:[#allocation2 + $0x8] sm:$0xff]  ;;  %v1108_v33 = vmul.f32 %v1101_v29, %v1094_v27 }
 0x171   : > { %v1109_v34 = vmul.f32 %v1105_v30, %v1095_v28 }
 0x172   : > { %v1122_v35 = vadd.f32 %v1115_v31, %v1108_v33 }
 0x173   : > { %v1123_v36 = vadd.f32 %v1119_v32, %v1109_v34 }
 0x174   : > { %v1124_v37 = vmax.f32 %v1122_v35, 0.0 }
 0x175   : > { %v1125_v38 = vmax.f32 %v1123_v36, 0.0 }
 0x177   : > { %v1358_v39 = vpack.c.bf16 %v1125_v38, %v1124_v37 }
 0x179   : > { %1134 = vst [vmem:[%s1814_s12] sm:$0xff] %v1358_v39 }
 0x17a PF: > { %s14_s21 = sadd.s32 1, %s1570_s21   ;;  %s1923_s15 = smov %s1550_s16 }
 0x17b   : > { %p11_p0 = scmp.ge.s32.totalorder %s14_s21, 6   ;;  %s1924_s16 = smov %s1649_s28 }
 0x17c   : > { %s1925_s17 = smov %s1562_s19  ;;  %s1926_s18 = smov %s1566_s20 }
 0x17d   : > { %s1927_s19 = smov %s1930_s22  ;;  %s1928_s20 = smov %s1934_s23 }
 0x17e   :  { %13 = sbr.rel (!%p11_p0) target bundleno = 4 (0x4), region = 126 }

// kernel: resnet50_forward.102
= control target key start
LH: loop header
LB: loop body
LE: loop exit
PB: predicated region body
PF: predicated region fallthrough
CT: control target
= control target key end

     0   :  { %s1598_s15 = smov 0   ;;  %s1600_s16 = smov 0   ;;  %s1918_s0 = inlined_call_operand.vmem [shape: bf16[8,4608], index: 0, kind: input, shape index: {}]   ;;  %s1919_s1 = inlined_call_operand.vmem [shape: bf16[4608,512], index: 1, kind: input, shape index: {}]   ;;  %s1920_s2 = inlined_call_operand.vmem [shape: f32[1,512], index: 2, kind: input, shape index: {}]   ;;  %s1921_s3 = inlined_call_operand.vmem [shape: f32[1,512], index: 3, kind: input, shape index: {}]   ;;  %s1922_s4 = inlined_call_operand.vmem [shape: bf16[8,512], index: 4, kind: output, shape index: {}]  }
   0x1   :  { %s1602_s17 = smov 0   ;;  %s1604_s18 = smov 0  }
   0x2   :  { %s1606_s19 = smov 0   ;;  %s1608_s20 = smov 0  }
   0x3   :  { %s1610_s21 = smov 0  }
   0x4 LB: > { %s26_s22 = sadd.s32 1, %s1562_s19  ;;  %s29_s23 = sadd.s32 1, %s1566_s20  ;;  %s1570_s21 = sphi %s1610_s21, %s14_s21   ;;  %s1566_s20 = sphi %s1608_s20, %s1928_s20   ;;  %s1562_s19 = sphi %s1606_s19, %s1927_s19   ;;  %s1558_s18 = sphi %s1604_s18, %s1926_s18   ;;  %s1554_s17 = sphi %s1602_s17, %s1925_s17   ;;  %s1550_s16 = sphi %s1600_s16, %s1924_s16   ;;  %s1546_s15 = sphi %s1598_s15, %s1923_s15  }
   0x5   : > { %p27_p0 = scmp.ge.s32.totalorder %s26_s22, 9  ;;  %p77_p1 = scmp.ne.s32.totalorder %s1550_s16, %s1546_s15 }
   0x6   : > { %p78_p2 = scmp.eq.s32.totalorder %s1570_s21, 0  ;;  %s70_s27 = sadd.s32 1, %s1550_s16 }
   0x7   : > { %s1930_s22 = smov (%p27_p0, %s26_s22), 0  ;;  %s1932_s23 = smov (!%p27_p0, %s29_s23), %s1566_s20 }
   0x8   : > { %p79_p3 = por %p78_p2, %p77_p1  ;;  %p31_p4 = scmp.ge.s32.totalorder %s1932_s23, 2 }
   0x9   : > { %s65_s24 = ssub.s32 %s1562_s19, %s1930_s22  ;;  %p1270_p6 = scmp.ge.s32.totalorder %s1570_s21, 18 }
   0xa   : > { %s1934_s23 = smov (%p31_p4, %s1932_s23), 0 }
   0xb   : > { %s66_s25 = ssub.s32 %s1566_s20, %s1934_s23  ;;  %183 = sbr.rel (%p1270_p6) target bundleno = 57 (0x39), region = 16 }
   0xc   : > { %s67_s26 = sor.u32 %s66_s25, %s65_s24 }
   0xd   : > { %p68_p5 = scmp.eq.s32.totalorder %s67_s26, 0 }
   0xf   : > { %s1649_s28 = scalar_select %p68_p5, %s1550_s16, %s70_s27  }
  0x12   : > { %199 = sbr.rel (!%p79_p3) target bundleno = 57 (0x39), region = 24  ;;  %s201_s29 = sand.u32 (%p79_p3), 1, %s1550_s16  }
  0x13   : > { %s1273_s30 = sshll.u32 (%p79_p3), %s1566_s20, 1  ;;  %s1271_s5 = sshll.u32 (%p79_p3), %s201_s29, 9 }
  0x14   : > { %s1357_s6 = sshll.u32 (%p79_p3), %s1562_s19, 8  ;;  %s1663_s12 = scalar_lea.vmem (%p79_p3), [#allocation3], %s1271_s5 }
  0x15   : > { %s207_s7 = sadd.s32 (%p79_p3), %s1357_s6, %s1273_s30 }
  0x16   : > { %s1275_s8 = sshll.u32 (%p79_p3), %s207_s7, 2 }
  0x17   : > { %s1658_s11 = scalar_lea.vmem (%p79_p3), %s1919_s1, %s1275_s8 }
  0x18   : > { %v363_v0 = vld [vmem:[%s1658_s11] sm:$0xff] (%p79_p3)  ;;  %v365_v1 = vld [vmem:[%s1658_s11 + $0x10] sm:$0xff] (%p79_p3) }
  0x19   : > { %v367_v2 = vld [vmem:[%s1658_s11 + $0x20] sm:$0xff]  ;;  %364 = vst [vmem:[%s1663_s12] sm:$0xff] %v363_v0  ;;  %366 = vst [vmem:[%s1663_s12 + $0x8] sm:$0xff] %v365_v1  ;;  %v369_v3 = vld [vmem:[%s1658_s11 + $0x30] sm:$0xff] }
  0x1a   : > { %368 = vst [vmem:[%s1663_s12 + $0x10] sm:$0xff] %v367_v2  ;;  %v371_v4 = vld [vmem:[%s1658_s11 + $0x40] sm:$0xff]  ;;  %v373_v5 = vld [vmem:[%s1658_s11 + $0x50] sm:$0xff]  ;;  %370 = vst [vmem:[%s1663_s12 + $0x18] sm:$0xff] %v369_v3 }
  0x1b   : > { %372 = vst [vmem:[%s1663_s12 + $0x20] sm:$0xff] %v371_v4  ;;  %374 = vst [vmem:[%s1663_s12 + $0x28] sm:$0xff] %v373_v5  ;;  %v375_v6 = vld [vmem:[%s1658_s11 + $0x60] sm:$0xff]  ;;  %v377_v7 = vld [vmem:[%s1658_s11 + $0x70] sm:$0xff] }
  0x1c   : > { %v379_v8 = vld [vmem:[%s1658_s11 + $0x80] sm:$0xff]  ;;  %376 = vst [vmem:[%s1663_s12 + $0x30] sm:$0xff] %v375_v6  ;;  %378 = vst [vmem:[%s1663_s12 + $0x38] sm:$0xff] %v377_v7  ;;  %v381_v9 = vld [vmem:[%s1658_s11 + $0x90] sm:$0xff] }
  0x1d   : > { %380 = vst [vmem:[%s1663_s12 + $0x40] sm:$0xff] %v379_v8  ;;  %v383_v10 = vld [vmem:[%s1658_s11 + $0xa0] sm:$0xff]  ;;  %v385_v11 = vld [vmem:[%s1658_s11 + $0xb0] sm:$0xff]  ;;  %382 = vst [vmem:[%s1663_s12 + $0x48] sm:$0xff] %v381_v9 }
  0x1e   : > { %384 = vst [vmem:[%s1663_s12 + $0x50] sm:$0xff] %v383_v10  ;;  %386 = vst [vmem:[%s1663_s12 + $0x58] sm:$0xff] %v385_v11  ;;  %v387_v12 = vld [vmem:[%s1658_s11 + $0xc0] sm:$0xff]  ;;  %v389_v13 = vld [vmem:[%s1658_s11 + $0xd0] sm:$0xff] }
  0x1f   : > { %v391_v14 = vld [vmem:[%s1658_s11 + $0xe0] sm:$0xff]  ;;  %388 = vst [vmem:[%s1663_s12 + $0x60] sm:$0xff] %v387_v12  ;;  %390 = vst [vmem:[%s1663_s12 + $0x68] sm:$0xff] %v389_v13  ;;  %v393_v15 = vld [vmem:[%s1658_s11 + $0xf0] sm:$0xff] }
  0x20   : > { %392 = vst [vmem:[%s1663_s12 + $0x70] sm:$0xff] %v391_v14  ;;  %v395_v16 = vld [vmem:[%s1658_s11 + $0x100] sm:$0xff]  ;;  %v397_v17 = vld [vmem:[%s1658_s11 + $0x110] sm:$0xff]  ;;  %394 = vst [vmem:[%s1663_s12 + $0x78] sm:$0xff] %v393_v15 }
  0x21   : > { %396 = vst [vmem:[%s1663_s12 + $0x80] sm:$0xff] %v395_v16  ;;  %398 = vst [vmem:[%s1663_s12 + $0x88] sm:$0xff] %v397_v17  ;;  %v399_v18 = vld [vmem:[%s1658_s11 + $0x120] sm:$0xff]  ;;  %v401_v19 = vld [vmem:[%s1658_s11 + $0x130] sm:$0xff] }
  0x22   : > { %v403_v20 = vld [vmem:[%s1658_s11 + $0x140] sm:$0xff]  ;;  %400 = vst [vmem:[%s1663_s12 + $0x90] sm:$0xff] %v399_v18  ;;  %402 = vst [vmem:[%s1663_s12 + $0x98] sm:$0xff] %v401_v19  ;;  %v405_v21 = vld [vmem:[%s1658_s11 + $0x150] sm:$0xff] }
  0x23   : > { %404 = vst [vmem:[%s1663_s12 + $0xa0] sm:$0xff] %v403_v20  ;;  %v407_v22 = vld [vmem:[%s1658_s11 + $0x160] sm:$0xff]  ;;  %v409_v23 = vld [vmem:[%s1658_s11 + $0x170] sm:$0xff]  ;;  %406 = vst [vmem:[%s1663_s12 + $0xa8] sm:$0xff] %v405_v21 }
  0x24   : > { %408 = vst [vmem:[%s1663_s12 + $0xb0] sm:$0xff] %v407_v22  ;;  %410 = vst [vmem:[%s1663_s12 + $0xb8] sm:$0xff] %v409_v23  ;;  %v411_v24 = vld [vmem:[%s1658_s11 + $0x180] sm:$0xff]  ;;  %v413_v25 = vld [vmem:[%s1658_s11 + $0x190] sm:$0xff] }
  0x25   : > { %v415_v26 = vld [vmem:[%s1658_s11 + $0x1a0] sm:$0xff]  ;;  %412 = vst [vmem:[%s1663_s12 + $0xc0] sm:$0xff] %v411_v24  ;;  %414 = vst [vmem:[%s1663_s12 + $0xc8] sm:$0xff] %v413_v25  ;;  %v417_v27 = vld [vmem:[%s1658_s11 + $0x1b0] sm:$0xff] }
  0x26   : > { %416 = vst [vmem:[%s1663_s12 + $0xd0] sm:$0xff] %v415_v26  ;;  %v419_v28 = vld [vmem:[%s1658_s11 + $0x1c0] sm:$0xff]  ;;  %v421_v29 = vld [vmem:[%s1658_s11 + $0x1d0] sm:$0xff]  ;;  %418 = vst [vmem:[%s1663_s12 + $0xd8] sm:$0xff] %v417_v27 }
  0x27   : > { %420 = vst [vmem:[%s1663_s12 + $0xe0] sm:$0xff] %v419_v28  ;;  %422 = vst [vmem:[%s1663_s12 + $0xe8] sm:$0xff] %v421_v29  ;;  %v423_v30 = vld [vmem:[%s1658_s11 + $0x1e0] sm:$0xff]  ;;  %v425_v31 = vld [vmem:[%s1658_s11 + $0x1f0] sm:$0xff] }
  0x28   : > { %v427_v32 = vld [vmem:[%s1658_s11 + $0x200] sm:$0xff]  ;;  %424 = vst [vmem:[%s1663_s12 + $0xf0] sm:$0xff] %v423_v30  ;;  %426 = vst [vmem:[%s1663_s12 + $0xf8] sm:$0xff] %v425_v31  ;;  %v429_v33 = vld [vmem:[%s1658_s11 + $0x210] sm:$0xff] }
  0x29   : > { %428 = vst [vmem:[%s1663_s12 + $0x100] sm:$0xff] %v427_v32  ;;  %v431_v34 = vld [vmem:[%s1658_s11 + $0x220] sm:$0xff]  ;;  %v433_v35 = vld [vmem:[%s1658_s11 + $0x230] sm:$0xff]  ;;  %430 = vst [vmem:[%s1663_s12 + $0x108] sm:$0xff] %v429_v33 }
  0x2a   : > { %432 = vst [vmem:[%s1663_s12 + $0x110] sm:$0xff] %v431_v34  ;;  %434 = vst [vmem:[%s1663_s12 + $0x118] sm:$0xff] %v433_v35  ;;  %v435_v36 = vld [vmem:[%s1658_s11 + $0x240] sm:$0xff]  ;;  %v437_v37 = vld [vmem:[%s1658_s11 + $0x250] sm:$0xff] }
  0x2b   : > { %v439_v38 = vld [vmem:[%s1658_s11 + $0x260] sm:$0xff]  ;;  %436 = vst [vmem:[%s1663_s12 + $0x120] sm:$0xff] %v435_v36  ;;  %438 = vst [vmem:[%s1663_s12 + $0x128] sm:$0xff] %v437_v37  ;;  %v441_v39 = vld [vmem:[%s1658_s11 + $0x270] sm:$0xff] }
  0x2c   : > { %440 = vst [vmem:[%s1663_s12 + $0x130] sm:$0xff] %v439_v38  ;;  %v443_v40 = vld [vmem:[%s1658_s11 + $0x280] sm:$0xff]  ;;  %v445_v41 = vld [vmem:[%s1658_s11 + $0x290] sm:$0xff]  ;;  %442 = vst [vmem:[%s1663_s12 + $0x138] sm:$0xff] %v441_v39 }
  0x2d   : > { %444 = vst [vmem:[%s1663_s12 + $0x140] sm:$0xff] %v443_v40  ;;  %446 = vst [vmem:[%s1663_s12 + $0x148] sm:$0xff] %v445_v41  ;;  %v447_v42 = vld [vmem:[%s1658_s11 + $0x2a0] sm:$0xff]  ;;  %v449_v43 = vld [vmem:[%s1658_s11 + $0x2b0] sm:$0xff] }
  0x2e   : > { %v451_v44 = vld [vmem:[%s1658_s11 + $0x2c0] sm:$0xff]  ;;  %448 = vst [vmem:[%s1663_s12 + $0x150] sm:$0xff] %v447_v42  ;;  %450 = vst [vmem:[%s1663_s12 + $0x158] sm:$0xff] %v449_v43  ;;  %v453_v45 = vld [vmem:[%s1658_s11 + $0x2d0] sm:$0xff] }
  0x2f   : > { %452 = vst [vmem:[%s1663_s12 + $0x160] sm:$0xff] %v451_v44  ;;  %v455_v46 = vld [vmem:[%s1658_s11 + $0x2e0] sm:$0xff]  ;;  %v457_v47 = vld [vmem:[%s1658_s11 + $0x2f0] sm:$0xff]  ;;  %454 = vst [vmem:[%s1663_s12 + $0x168] sm:$0xff] %v453_v45 }
  0x30   : > { %456 = vst [vmem:[%s1663_s12 + $0x170] sm:$0xff] %v455_v46  ;;  %458 = vst [vmem:[%s1663_s12 + $0x178] sm:$0xff] %v457_v47  ;;  %v459_v48 = vld [vmem:[%s1658_s11 + $0x300] sm:$0xff]  ;;  %v461_v49 = vld [vmem:[%s1658_s11 + $0x310] sm:$0xff] }
  0x31   : > { %v463_v50 = vld [vmem:[%s1658_s11 + $0x320] sm:$0xff]  ;;  %460 = vst [vmem:[%s1663_s12 + $0x180] sm:$0xff] %v459_v48  ;;  %462 = vst [vmem:[%s1663_s12 + $0x188] sm:$0xff] %v461_v49  ;;  %v465_v51 = vld [vmem:[%s1658_s11 + $0x330] sm:$0xff] }
  0x32   : > { %464 = vst [vmem:[%s1663_s12 + $0x190] sm:$0xff] %v463_v50  ;;  %v467_v52 = vld [vmem:[%s1658_s11 + $0x340] sm:$0xff]  ;;  %v469_v53 = vld [vmem:[%s1658_s11 + $0x350] sm:$0xff]  ;;  %466 = vst [vmem:[%s1663_s12 + $0x198] sm:$0xff] %v465_v51 }
  0x33   : > { %468 = vst [vmem:[%s1663_s12 + $0x1a0] sm:$0xff] %v467_v52  ;;  %470 = vst [vmem:[%s1663_s12 + $0x1a8] sm:$0xff] %v469_v53  ;;  %v471_v54 = vld [vmem:[%s1658_s11 + $0x360] sm:$0xff]  ;;  %v473_v55 = vld [vmem:[%s1658_s11 + $0x370] sm:$0xff] }
  0x34   : > { %v475_v56 = vld [vmem:[%s1658_s11 + $0x380] sm:$0xff]  ;;  %472 = vst [vmem:[%s1663_s12 + $0x1b0] sm:$0xff] %v471_v54  ;;  %474 = vst [vmem:[%s1663_s12 + $0x1b8] sm:$0xff] %v473_v55  ;;  %v477_v57 = vld [vmem:[%s1658_s11 + $0x390] sm:$0xff] }
  0x35   : > { %476 = vst [vmem:[%s1663_s12 + $0x1c0] sm:$0xff] %v475_v56  ;;  %v479_v58 = vld [vmem:[%s1658_s11 + $0x3a0] sm:$0xff]  ;;  %v481_v59 = vld [vmem:[%s1658_s11 + $0x3b0] sm:$0xff]  ;;  %478 = vst [vmem:[%s1663_s12 + $0x1c8] sm:$0xff] %v477_v57 }
  0x36   : > { %480 = vst [vmem:[%s1663_s12 + $0x1d0] sm:$0xff] %v479_v58  ;;  %482 = vst [vmem:[%s1663_s12 + $0x1d8] sm:$0xff] %v481_v59  ;;  %v483_v60 = vld [vmem:[%s1658_s11 + $0x3c0] sm:$0xff]  ;;  %v485_v61 = vld [vmem:[%s1658_s11 + $0x3d0] sm:$0xff] }
  0x37   : > { %v487_v62 = vld [vmem:[%s1658_s11 + $0x3e0] sm:$0xff]  ;;  %484 = vst [vmem:[%s1663_s12 + $0x1e0] sm:$0xff] %v483_v60  ;;  %486 = vst [vmem:[%s1663_s12 + $0x1e8] sm:$0xff] %v485_v61  ;;  %v489_v63 = vld [vmem:[%s1658_s11 + $0x3f0] sm:$0xff] }
  0x38   : > { %488 = vst [vmem:[%s1663_s12 + $0x1f0] sm:$0xff] %v487_v62  ;;  %490 = vst [vmem:[%s1663_s12 + $0x1f8] sm:$0xff] %v489_v63 }
  0x39 PF: > { %p1276_p7 = scmp.ge.s32.totalorder %s1570_s21, 1  ;;  %p511_p8 = scmp.lt.s32.totalorder %s1570_s21, 19 }
  0x3b   : > { %p512_p9 = pnand %p1276_p7, %p511_p8 }
  0x3c   : > { %s518_s13 = sand.u32 (!%p512_p9), 1, %s1546_s15   ;;  %s1278_s14 = sshll.u32 (!%p512_p9), %s1554_s17, 2 }
  0x3d   : > { %515 = sbr.rel (%p512_p9) target bundleno = 378 (0x17a), region = 70  ;;  %s1277_s24 = sshll.u32 (!%p512_p9), %s518_s13, 9 }
  0x3e   : > { %p567_p10 = scmp.lt.s32.totalorder (!%p512_p9), %s1278_s14, 35  ;;  %s1280_s25 = sshll.u32 (!%p512_p9), %s1558_s18, 1 }
  0x3f   : > { %p577_p11 = scmp.lt.s32.totalorder (!%p512_p9), %s1280_s25, 3  ;;  %s1816_s13 = scalar_lea.vmem (!%p512_p9), [#allocation3], %s1277_s24 }
  0x40   : > { %p1284_p12 = scmp.ne.s32.totalorder (!%p512_p9), %s1554_s17, 0 }
  0x44   : > { %s1936_s14 = smov (!%p567_p10, %s1278_s14), 35  ;;  %s1938_s25 = smov (!%p577_p11, %s1280_s25), 3 }
  0x45   : > { %s1279_s26 = sshll.u32 %s1936_s14, 2  ;;  %s579_s15 = scalar_lea.vmem %s1920_s2, %s1938_s25  ;;  %v1572_v0 = vmov (!%p1284_p12), 0.0  }
  0x46   : > { %s1798_s30 = scalar_lea.vmem %s1918_s0, %s1279_s26  ;;  %s584_s18 = scalar_lea.vmem %s1921_s3, %s1938_s25  ;;  %600 = vst [vmem:[#allocation2] sm:$0xff] (!%p1284_p12), %v1572_v0  ;;  %601 = vst [vmem:[#allocation2 + $0x8] sm:$0xff] (!%p1284_p12), %v1572_v0 }
  0x47   : > { %s1283_s9 = sshll.u32 %s1938_s25, 2  ;;  %599 = sbr.rel (%p1284_p12) target bundleno = 78 (0x4e), region = 78 }
  0x48   : > { %s1814_s12 = scalar_lea.vmem %s1922_s4, %s1283_s9 }
  0x4e PF: > { %v1416_v1 = vld [vmem:[%s1816_s13 + $0x4] ss:$8 sps:$4 sm:$0xff]   ;;  %v1420_v3 = vld [vmem:[%s1816_s13] ss:$8 sps:$4 sm:$0xff]   ;;  %v1422_v5 = vld [vmem:[%s1816_s13 + $0x14] ss:$8 sps:$4 sm:$0xff]  }
  0x4f   : > { %v1418_v2 = vld [vmem:[%s1816_s13 + $0x104] ss:$8 sps:$4 sm:$0xff]   ;;  %1004 = vmatprep.subr.bf16.mxu0 %v1416_v1  ;;  %v1421_v4 = vld [vmem:[%s1816_s13 + $0x100] ss:$8 sps:$4 sm:$0xff]   ;;  %v1424_v6 = vld [vmem:[%s1816_s13 + $0x114] ss:$8 sps:$4 sm:$0xff]  }
  0x50   : > { %1045 = vmatprep.subr.bf16.mxu1 %v1418_v2  ;;  %1005 = vmatpush1.bf16.msra.mxu0 %v1420_v3  ;;  %v1426_v7 = vld [vmem:[%s1816_s13 + $0x10] ss:$8 sps:$4 sm:$0xff]   ;;  %v1428_v9 = vld [vmem:[%s1816_s13 + $0x24] ss:$8 sps:$4 sm:$0xff]   ;;  %v1432_v11 = vld [vmem:[%s1816_s13 + $0x20] ss:$8 sps:$4 sm:$0xff]  }
  0x51   : > { %1046 = vmatpush1.bf16.msra.mxu1 %v1421_v4  ;;  %1006 = vmatprep.subr.bf16.mxu0 %v1422_v5  ;;  %v1427_v8 = vld [vmem:[%s1816_s13 + $0x110] ss:$8 sps:$4 sm:$0xff]   ;;  %v1430_v10 = vld [vmem:[%s1816_s13 + $0x124] ss:$8 sps:$4 sm:$0xff]   ;;  %v1433_v12 = vld [vmem:[%s1816_s13 + $0x120] ss:$8 sps:$4 sm:$0xff]  }
  0x52   : > { %1047 = vmatprep.subr.bf16.mxu1 %v1424_v6  ;;  %v1434_v13 = vld [vmem:[%s1816_s13 + $0x34] ss:$8 sps:$4 sm:$0xff]   ;;  %v1438_v15 = vld [vmem:[%s1816_s13 + $0x30] ss:$8 sps:$4 sm:$0xff]   ;;  %v1440_v17 = vld [vmem:[%s1816_s13 + $0x44] ss:$8 sps:$4 sm:$0xff]  }
  0x53   : > { %v1436_v14 = vld [vmem:[%s1816_s13 + $0x134] ss:$8 sps:$4 sm:$0xff]   ;;  %v1439_v16 = vld [vmem:[%s1816_s13 + $0x130] ss:$8 sps:$4 sm:$0xff]   ;;  %v1442_v18 = vld [vmem:[%s1816_s13 + $0x144] ss:$8 sps:$4 sm:$0xff]  }
  0x54   : > { %1007 = vmatpush1.bf16.msra.mxu0 %v1426_v7  ;;  %v1444_v19 = vld [vmem:[%s1816_s13 + $0x40] ss:$8 sps:$4 sm:$0xff]   ;;  %v1446_v21 = vld [vmem:[%s1816_s13 + $0x54] ss:$8 sps:$4 sm:$0xff]   ;;  %v1450_v23 = vld [vmem:[%s1816_s13 + $0x50] ss:$8 sps:$4 sm:$0xff]  }
  0x55   : > { %1048 = vmatpush1.bf16.msra.mxu1 %v1427_v8  ;;  %1008 = vmatprep.subr.bf16.mxu0 %v1428_v9  ;;  %v1445_v20 = vld [vmem:[%s1816_s13 + $0x140] ss:$8 sps:$4 sm:$0xff]   ;;  %v1448_v22 = vld [vmem:[%s1816_s13 + $0x154] ss:$8 sps:$4 sm:$0xff]   ;;  %v1451_v24 = vld [vmem:[%s1816_s13 + $0x150] ss:$8 sps:$4 sm:$0xff]  }
  0x56   : > { %1049 = vmatprep.subr.bf16.mxu1 %v1430_v10  ;;  %v1452_v25 = vld [vmem:[%s1816_s13 + $0x64] ss:$8 sps:$4 sm:$0xff]   ;;  %v1456_v27 = vld [vmem:[%s1816_s13 + $0x60] ss:$8 sps:$4 sm:$0xff]   ;;  %v1458_v29 = vld [vmem:[%s1816_s13 + $0x74] ss:$8 sps:$4 sm:$0xff]  }
  0x57   : > { %v1454_v26 = vld [vmem:[%s1816_s13 + $0x164] ss:$8 sps:$4 sm:$0xff]   ;;  %v1457_v28 = vld [vmem:[%s1816_s13 + $0x160] ss:$8 sps:$4 sm:$0xff]   ;;  %v1460_v30 = vld [vmem:[%s1816_s13 + $0x174] ss:$8 sps:$4 sm:$0xff]  }
  0x58   : > { %1009 = vmatpush1.bf16.msra.mxu0 %v1432_v11  ;;  %v1462_v31 = vld [vmem:[%s1816_s13 + $0x70] ss:$8 sps:$4 sm:$0xff]   ;;  %v1464_v33 = vld [vmem:[%s1816_s13 + $0x84] ss:$8 sps:$4 sm:$0xff]   ;;  %v1468_v35 = vld [vmem:[%s1816_s13 + $0x80] ss:$8 sps:$4 sm:$0xff]  }
  0x59   : > { %1050 = vmatpush1.bf16.msra.mxu1 %v1433_v12  ;;  %1010 = vmatprep.subr.bf16.mxu0 %v1434_v13  ;;  %v1463_v32 = vld [vmem:[%s1816_s13 + $0x170] ss:$8 sps:$4 sm:$0xff]   ;;  %v1466_v34 = vld [vmem:[%s1816_s13 + $0x184] ss:$8 sps:$4 sm:$0xff]   ;;  %v1469_v36 = vld [vmem:[%s1816_s13 + $0x180] ss:$8 sps:$4 sm:$0xff]  }
  0x5a   : > { %1051 = vmatprep.subr.bf16.mxu1 %v1436_v14  ;;  %v1470_v37 = vld [vmem:[%s1816_s13 + $0x94] ss:$8 sps:$4 sm:$0xff]   ;;  %v1474_v39 = vld [vmem:[%s1816_s13 + $0x90] ss:$8 sps:$4 sm:$0xff]   ;;  %v1476_v41 = vld [vmem:[%s1816_s13 + $0xa4] ss:$8 sps:$4 sm:$0xff]  }
  0x5b   : > { %v1472_v38 = vld [vmem:[%s1816_s13 + $0x194] ss:$8 sps:$4 sm:$0xff]   ;;  %v1475_v40 = vld [vmem:[%s1816_s13 + $0x190] ss:$8 sps:$4 sm:$0xff]   ;;  %v1478_v42 = vld [vmem:[%s1816_s13 + $0x1a4] ss:$8 sps:$4 sm:$0xff]  }
  0x5c   : > { %1011 = vmatpush1.bf16.msra.mxu0 %v1438_v15  ;;  %v1480_v43 = vld [vmem:[%s1816_s13 + $0xa0] ss:$8 sps:$4 sm:$0xff]   ;;  %v1482_v45 = vld [vmem:[%s1816_s13 + $0xb4] ss:$8 sps:$4 sm:$0xff]   ;;  %v1486_v50 = vld [vmem:[%s1816_s13 + $0xb0] ss:$8 sps:$4 sm:$0xff]  }
  0x5d   : > { %1052 = vmatpush1.bf16.msra.mxu1 %v1439_v16  ;;  %1012 = vmatprep.subr.bf16.mxu0 %v1440_v17  ;;  %v1481_v44 = vld [vmem:[%s1816_s13 + $0x1a0] ss:$8 sps:$4 sm:$0xff]   ;;  %v1484_v46 = vld [vmem:[%s1816_s13 + $0x1b4] ss:$8 sps:$4 sm:$0xff]   ;;  %v1487_v51 = vld [vmem:[%s1816_s13 + $0x1b0] ss:$8 sps:$4 sm:$0xff]  }
  0x5e   : > { %1053 = vmatprep.subr.bf16.mxu1 %v1442_v18  ;;  %v604_v47 = vld [vmem:[%s1798_s30] sm:$0xff]  ;;  %v605_v49 = vld [vmem:[%s1798_s30 + $0x8] sm:$0xff]  ;;  %v1488_v53 = vld [vmem:[%s1816_s13 + $0xc4] ss:$8 sps:$4 sm:$0xff]   ;;  %p1353_p13 = scmp.ne.s32.totalorder %s1554_s17, 8 }
  0x5f   : > { %v1286_v48 = vcombine.high %v604_v47, %v604_v47  ;;  %v1288_v52 = vcombine.high %v605_v49, %v605_v49  ;;  %v1490_v54 = vld [vmem:[%s1816_s13 + $0x1c4] ss:$8 sps:$4 sm:$0xff]   ;;  %v1492_v55 = vld [vmem:[%s1816_s13 + $0xc0] ss:$8 sps:$4 sm:$0xff]   ;;  %v1494_v57 = vld [vmem:[%s1816_s13 + $0xd4] ss:$8 sps:$4 sm:$0xff]   ;;  %v1285_v5 = vcombine.low %v604_v47, %v604_v47  ;;  %v1287_v6 = vcombine.low %v605_v49, %v605_v49 }
  0x60   : > { %1013 = vmatpush1.bf16.msra.mxu0 %v1444_v19  ;;  %v1493_v56 = vld [vmem:[%s1816_s13 + $0x1c0] ss:$8 sps:$4 sm:$0xff]   ;;  %v1496_v58 = vld [vmem:[%s1816_s13 + $0x1d4] ss:$8 sps:$4 sm:$0xff]   ;;  %v1498_v59 = vld [vmem:[%s1816_s13 + $0xd0] ss:$8 sps:$4 sm:$0xff]  }
  0x61   : > { %1054 = vmatpush1.bf16.msra.mxu1 %v1445_v20  ;;  %1014 = vmatprep.subr.bf16.mxu0 %v1446_v21  ;;  %v1499_v60 = vld [vmem:[%s1816_s13 + $0x1d0] ss:$8 sps:$4 sm:$0xff]   ;;  %v1500_v61 = vld [vmem:[%s1816_s13 + $0xe4] ss:$8 sps:$4 sm:$0xff]   ;;  %v1504_v63 = vld [vmem:[%s1816_s13 + $0xe0] ss:$8 sps:$4 sm:$0xff]   ;;  %v1098_v21 = vlaneseq (!%p1353_p13) }
  0x62   : > { %1055 = vmatprep.subr.bf16.mxu1 %v1448_v22  ;;  %1036 = vmatprep.mubr.bf16.mxu0 %v1286_v48  ;;  %v1502_v62 = vld [vmem:[%s1816_s13 + $0x1e4] ss:$8 sps:$4 sm:$0xff]   ;;  %v1505_v0 = vld [vmem:[%s1816_s13 + $0x1e0] ss:$8 sps:$4 sm:$0xff]   ;;  %v1506_v1 = vld [vmem:[%s1816_s13 + $0xf4] ss:$8 sps:$4 sm:$0xff]  }
  0x63   : > { %1077 = vmatprep.mubr.bf16.mxu1 %v1288_v52  ;;  %v1508_v2 = vld [vmem:[%s1816_s13 + $0x1f4] ss:$8 sps:$4 sm:$0xff]   ;;  %v1510_v3 = vld [vmem:[%s1816_s13 + $0xf0] ss:$8 sps:$4 sm:$0xff]   ;;  %v1099_v22 = vshrl.u32 (!%p1353_p13), %v1098_v21, 7 }
  0x64   : > { %1015 = vmatpush1.bf16.msra.mxu0 %v1450_v23  ;;  %v1511_v4 = vld [vmem:[%s1816_s13 + $0x1f0] ss:$8 sps:$4 sm:$0xff]  }
  0x65   : > { %1056 = vmatpush1.bf16.msra.mxu1 %v1451_v24  ;;  %1016 = vmatprep.subr.bf16.mxu0 %v1452_v25  ;;  %v602_v8 = vld [vmem:[#allocation2] sm:$0xff]  ;;  %v603_v12 = vld [vmem:[#allocation2 + $0x8] sm:$0xff]  ;;  %v1100_v25 = vsub.s32 (!%p1353_p13), 0, %v1099_v22 }
  0x66   : > { %1057 = vmatprep.subr.bf16.mxu1 %v1454_v26  ;;  %v1096_v23 = vld [vmem:[%s579_s15] sm:$0x3] (!%p1353_p13)  ;;  %v1104_v26 = vsub.s32 (!%p1353_p13), 1, %v1099_v22 }
  0x67   : > { %v1110_v24 = vld [vmem:[%s584_s18] sm:$0x3] (!%p1353_p13) }
  0x68   : > { %1017 = vmatpush1.bf16.msra.mxu0 %v1456_v27 }
  0x69   : > { %1058 = vmatpush1.bf16.msra.mxu1 %v1457_v28  ;;  %1018 = vmatprep.subr.bf16.mxu0 %v1458_v29  ;;  %v1101_v29 = vrot.slane (!%p1353_p13), %v1096_v23, %v1100_v25 }
  0x6a   : > { %1059 = vmatprep.subr.bf16.mxu1 %v1460_v30  ;;  %v1105_v30 = vrot.slane (!%p1353_p13), %v1096_v23, %v1104_v26 }
  0x6c   : > { %1019 = vmatpush1.bf16.msra.mxu0 %v1462_v31  ;;  %v1115_v31 = vrot.slane (!%p1353_p13), %v1110_v24, %v1100_v25 }
  0x6d   : > { %1060 = vmatpush1.bf16.msra.mxu1 %v1463_v32  ;;  %1020 = vmatprep.subr.bf16.mxu0 %v1464_v33  ;;  %v1119_v32 = vrot.slane (!%p1353_p13), %v1110_v24, %v1104_v26 }
  0x6e   : > { %1061 = vmatprep.subr.bf16.mxu1 %v1466_v34 }
  0x70   : > { %1021 = vmatpush1.bf16.msra.mxu0 %v1468_v35 }
  0x71   : > { %1062 = vmatpush1.bf16.msra.mxu1 %v1469_v36  ;;  %1022 = vmatprep.subr.bf16.mxu0 %v1470_v37 }
  0x72   : > { %1063 = vmatprep.subr.bf16.mxu1 %v1472_v38 }
  0x74   : > { %1023 = vmatpush1.bf16.msra.mxu0 %v1474_v39 }
  0x75   : > { %1064 = vmatpush1.bf16.msra.mxu1 %v1475_v40  ;;  %1024 = vmatprep.subr.bf16.mxu0 %v1476_v41 }
  0x76   : > { %1065 = vmatprep.subr.bf16.mxu1 %v1478_v42 }
  0x78   : > { %1025 = vmatpush1.bf16.msra.mxu0 %v1480_v43 }
  0x79   : > { %1066 = vmatpush1.bf16.msra.mxu1 %v1481_v44  ;;  %1026 = vmatprep.subr.bf16.mxu0 %v1482_v45 }
  0x7a   : > { %1067 = vmatprep.subr.bf16.mxu1 %v1484_v46 }
  0x7c   : > { %1027 = vmatpush1.bf16.msra.mxu0 %v1486_v50 }
  0x7d   : > { %1068 = vmatpush1.bf16.msra.mxu1 %v1487_v51  ;;  %1028 = vmatprep.subr.bf16.mxu0 %v1488_v53 }
  0x7e   : > { %1069 = vmatprep.subr.bf16.mxu1 %v1490_v54 }
  0x80   : > { %1029 = vmatpush1.bf16.msra.mxu0 %v1492_v55 }
  0x81   : > { %1070 = vmatpush1.bf16.msra.mxu1 %v1493_v56  ;;  %1030 = vmatprep.subr.bf16.mxu0 %v1494_v57 }
  0x82   : > { %1071 = vmatprep.subr.bf16.mxu1 %v1496_v58 }
  0x84   : > { %1031 = vmatpush1.bf16.msra.mxu0 %v1498_v59 }
  0x85   : > { %1072 = vmatpush1.bf16.msra.mxu1 %v1499_v60  ;;  %1032 = vmatprep.subr.bf16.mxu0 %v1500_v61 }
  0x86   : > { %1073 = vmatprep.subr.bf16.mxu1 %v1502_v62 }
  0x88   : > { %1033 = vmatpush1.bf16.msra.mxu0 %v1504_v63 }
  0x89   : > { %1074 = vmatpush1.bf16.msra.mxu1 %v1505_v0  ;;  %1034 = vmatprep.subr.bf16.mxu0 %v1506_v1 }
  0x8a   : > { %1075 = vmatprep.subr.bf16.mxu1 %v1508_v2 }
  0x8c   : > { %1035 = vmatpush1.bf16.msra.mxu0 %v1510_v3 }
  0x8d   : > { %1076 = vmatpush1.bf16.msra.mxu1 %v1511_v4 }
  0x8f   : > { %1037 = vmatmul.mubr.bf16.vlgmr.msra.gmra.mrb[0].mxu0 %v1285_v5 }
  0x90   : > { %1078 = vmatmul.mubr.bf16.vlgmr.msra.gmra.mrb[0].mxu1 %v1287_v6 }
 0x162   : > { %v1038_v7 = vpop.f32.mrb[0].mxu0 }
 0x163   : > { %v1079_v9 = vpop.f32.mrb[0].mxu1  ;;  %v1040_v11 = vpop.f32.mrb[1].mxu0  ;;  %1093 = sbr.rel (%p1353_p13) target bundleno = 378 (0x17a), region = 82 }
 0x164   : > { %v1080_v10 = vadd.f32 %v1079_v9, %v1038_v7  ;;  %v1081_v13 = vpop.f32.mrb[1].mxu1  ;;  %v1042_v15 = vpop.f32.mrb[2].mxu0 }
 0x165   : > { %v1082_v14 = vadd.f32 %v1081_v13, %v1040_v11  ;;  %v1083_v16 = vpop.f32.mrb[2].mxu1  ;;  %v1043_v18 = vpop.f32.mrb[3].mxu0 }
 0x166   : > { %v1086_v17 = vadd.f32 %v1080_v10, %v602_v8  ;;  %v1084_v19 = vpop.f32.mrb[3].mxu1 }
 0x167   : > { %v1087_v20 = vadd.f32 %v1082_v14, %v603_v12 }
 0x168   : > { %1088 = vst [vmem:[#allocation2] sm:$0xff] %v1086_v17 }
 0x169   : > { %1089 = vst [vmem:[#allocation2 + $0x8] sm:$0xff] %v1087_v20 }
 0x16f   : > { %v1094_v27 = vld [vmem:[#allocation2] sm:$0xff] }
 0x170   : > { %v1095_v28 = vld [vmem:[#allocation2 + $0x8] sm:$0xff]  ;;  %v1108_v33 = vmul.f32 %v1101_v29, %v1094_v27 }
 0x171   : > { %v1109_v34 = vmul.f32 %v1105_v30, %v1095_v28 }
 0x172   : > { %v1122_v35 = vadd.f32 %v1115_v31, %v1108_v33 }
 0x173   : > { %v1123_v36 = vadd.f32 %v1119_v32, %v1109_v34 }
 0x174   : > { %v1124_v37 = vmax.f32 %v1122_v35, 0.0 }
 0x175   : > { %v1125_v38 = vmax.f32 %v1123_v36, 0.0 }
 0x177   : > { %v1358_v39 = vpack.c.bf16 %v1125_v38, %v1124_v37 }
 0x179   : > { %1134 = vst [vmem:[%s1814_s12] sm:$0xff] %v1358_v39 }
 0x17a PF: > { %s14_s21 = sadd.s32 1, %s1570_s21   ;;  %s1923_s15 = smov %s1550_s16 }
 0x17b   : > { %p11_p0 = scmp.ge.s32.totalorder %s14_s21, 20   ;;  %s1924_s16 = smov %s1649_s28 }
 0x17c   : > { %s1925_s17 = smov %s1562_s19  ;;  %s1926_s18 = smov %s1566_s20 }
 0x17d   : > { %s1927_s19 = smov %s1930_s22  ;;  %s1928_s20 = smov %s1934_s23 }
 0x17e   :  { %13 = sbr.rel (!%p11_p0) target bundleno = 4 (0x4), region = 126 }

// kernel: resnet50_forward.100
= control target key start
LH: loop header
LB: loop body
LE: loop exit
PB: predicated region body
PF: predicated region fallthrough
CT: control target
= control target key end

     0   :  { %s1596_s15 = smov 0   ;;  %s1598_s16 = smov 0   ;;  %s1916_s0 = inlined_call_operand.vmem [shape: bf16[8,1024], index: 0, kind: input, shape index: {}]   ;;  %s1917_s1 = inlined_call_operand.vmem [shape: bf16[1024,2048], index: 1, kind: input, shape index: {}]   ;;  %s1918_s2 = inlined_call_operand.vmem [shape: f32[1,2048], index: 2, kind: input, shape index: {}]   ;;  %s1919_s3 = inlined_call_operand.vmem [shape: f32[1,2048], index: 3, kind: input, shape index: {}]   ;;  %s1920_s4 = inlined_call_operand.vmem [shape: bf16[8,2048], index: 4, kind: output, shape index: {}]  }
   0x1   :  { %s1600_s17 = smov 0   ;;  %s1602_s18 = smov 0  }
   0x2   :  { %s1604_s19 = smov 0   ;;  %s1606_s20 = smov 0  }
   0x3   :  { %s1608_s21 = smov 0  }
   0x4 LB: > { %s26_s22 = sadd.s32 1, %s1560_s19  ;;  %s29_s23 = sadd.s32 1, %s1564_s20  ;;  %s1568_s21 = sphi %s1608_s21, %s14_s21   ;;  %s1564_s20 = sphi %s1606_s20, %s1926_s20   ;;  %s1560_s19 = sphi %s1604_s19, %s1925_s19   ;;  %s1556_s18 = sphi %s1602_s18, %s1924_s18   ;;  %s1552_s17 = sphi %s1600_s17, %s1923_s17   ;;  %s1548_s16 = sphi %s1598_s16, %s1922_s16   ;;  %s1544_s15 = sphi %s1596_s15, %s1921_s15  }
   0x5   : > { %p27_p0 = scmp.ge.s32.totalorder %s26_s22, 2  ;;  %p77_p1 = scmp.ne.s32.totalorder %s1548_s16, %s1544_s15 }
   0x6   : > { %p78_p2 = scmp.eq.s32.totalorder %s1568_s21, 0  ;;  %s70_s27 = sadd.s32 1, %s1548_s16 }
   0x7   : > { %s1928_s22 = smov (%p27_p0, %s26_s22), 0  ;;  %s1930_s23 = smov (!%p27_p0, %s29_s23), %s1564_s20 }
   0x8   : > { %p79_p3 = por %p78_p2, %p77_p1  ;;  %p31_p4 = scmp.ge.s32.totalorder %s1930_s23, 8 }
   0x9   : > { %s65_s24 = ssub.s32 %s1560_s19, %s1928_s22  ;;  %p1268_p6 = scmp.ge.s32.totalorder %s1568_s21, 16 }
   0xa   : > { %s1932_s23 = smov (%p31_p4, %s1930_s23), 0 }
   0xb   : > { %s66_s25 = ssub.s32 %s1564_s20, %s1932_s23  ;;  %183 = sbr.rel (%p1268_p6) target bundleno = 89 (0x59), region = 16 }
   0xc   : > { %s67_s26 = sor.u32 %s66_s25, %s65_s24 }
   0xd   : > { %p68_p5 = scmp.eq.s32.totalorder %s67_s26, 0 }
   0xf   : > { %s1647_s28 = scalar_select %p68_p5, %s1548_s16, %s70_s27  }
  0x12   : > { %199 = sbr.rel (!%p79_p3) target bundleno = 89 (0x59), region = 24  ;;  %s201_s29 = sand.u32 (%p79_p3), 1, %s1548_s16  }
  0x13   : > { %s1271_s30 = sshll.u32 (%p79_p3), %s1564_s20, 1  ;;  %s1269_s5 = sshll.u32 (%p79_p3), %s201_s29, 9 }
  0x14   : > { %s1355_s6 = sshll.u32 (%p79_p3), %s1560_s19, 10  ;;  %s1661_s12 = scalar_lea.vmem (%p79_p3), [#allocation3], %s1269_s5 }
  0x15   : > { %s207_s7 = sadd.s32 (%p79_p3), %s1355_s6, %s1271_s30 }
  0x16   : > { %s1273_s8 = sshll.u32 (%p79_p3), %s207_s7, 2 }
  0x17   : > { %s1656_s11 = scalar_lea.vmem (%p79_p3), %s1917_s1, %s1273_s8 }
  0x18   : > { %v363_v0 = vld [vmem:[%s1656_s11] sm:$0xff] (%p79_p3) }
  0x19   : > { %v365_v1 = vld [vmem:[%s1656_s11 + $0x40] sm:$0xff]  ;;  %364 = vst [vmem:[%s1661_s12] sm:$0xff] %v363_v0 }
  0x1a   : > { %v367_v2 = vld [vmem:[%s1656_s11 + $0x80] sm:$0xff]  ;;  %366 = vst [vmem:[%s1661_s12 + $0x8] sm:$0xff] %v365_v1 }
  0x1b   : > { %368 = vst [vmem:[%s1661_s12 + $0x10] sm:$0xff] %v367_v2  ;;  %v369_v3 = vld [vmem:[%s1656_s11 + $0xc0] sm:$0xff] }
  0x1c   : > { %v371_v4 = vld [vmem:[%s1656_s11 + $0x100] sm:$0xff]  ;;  %370 = vst [vmem:[%s1661_s12 + $0x18] sm:$0xff] %v369_v3 }
  0x1d   : > { %v373_v5 = vld [vmem:[%s1656_s11 + $0x140] sm:$0xff]  ;;  %372 = vst [vmem:[%s1661_s12 + $0x20] sm:$0xff] %v371_v4 }
  0x1e   : > { %374 = vst [vmem:[%s1661_s12 + $0x28] sm:$0xff] %v373_v5  ;;  %v375_v6 = vld [vmem:[%s1656_s11 + $0x180] sm:$0xff] }
  0x1f   : > { %v377_v7 = vld [vmem:[%s1656_s11 + $0x1c0] sm:$0xff]  ;;  %376 = vst [vmem:[%s1661_s12 + $0x30] sm:$0xff] %v375_v6 }
  0x20   : > { %v379_v8 = vld [vmem:[%s1656_s11 + $0x200] sm:$0xff]  ;;  %378 = vst [vmem:[%s1661_s12 + $0x38] sm:$0xff] %v377_v7 }
  0x21   : > { %380 = vst [vmem:[%s1661_s12 + $0x40] sm:$0xff] %v379_v8  ;;  %v381_v9 = vld [vmem:[%s1656_s11 + $0x240] sm:$0xff] }
  0x22   : > { %v383_v10 = vld [vmem:[%s1656_s11 + $0x280] sm:$0xff]  ;;  %382 = vst [vmem:[%s1661_s12 + $0x48] sm:$0xff] %v381_v9 }
  0x23   : > { %v385_v11 = vld [vmem:[%s1656_s11 + $0x2c0] sm:$0xff]  ;;  %384 = vst [vmem:[%s1661_s12 + $0x50] sm:$0xff] %v383_v10 }
  0x24   : > { %386 = vst [vmem:[%s1661_s12 + $0x58] sm:$0xff] %v385_v11  ;;  %v387_v12 = vld [vmem:[%s1656_s11 + $0x300] sm:$0xff] }
  0x25   : > { %v389_v13 = vld [vmem:[%s1656_s11 + $0x340] sm:$0xff]  ;;  %388 = vst [vmem:[%s1661_s12 + $0x60] sm:$0xff] %v387_v12 }
  0x26   : > { %v391_v14 = vld [vmem:[%s1656_s11 + $0x380] sm:$0xff]  ;;  %390 = vst [vmem:[%s1661_s12 + $0x68] sm:$0xff] %v389_v13 }
  0x27   : > { %392 = vst [vmem:[%s1661_s12 + $0x70] sm:$0xff] %v391_v14  ;;  %v393_v15 = vld [vmem:[%s1656_s11 + $0x3c0] sm:$0xff] }
  0x28   : > { %v395_v16 = vld [vmem:[%s1656_s11 + $0x400] sm:$0xff]  ;;  %394 = vst [vmem:[%s1661_s12 + $0x78] sm:$0xff] %v393_v15 }
  0x29   : > { %v397_v17 = vld [vmem:[%s1656_s11 + $0x440] sm:$0xff]  ;;  %396 = vst [vmem:[%s1661_s12 + $0x80] sm:$0xff] %v395_v16 }
  0x2a   : > { %398 = vst [vmem:[%s1661_s12 + $0x88] sm:$0xff] %v397_v17  ;;  %v399_v18 = vld [vmem:[%s1656_s11 + $0x480] sm:$0xff] }
  0x2b   : > { %v401_v19 = vld [vmem:[%s1656_s11 + $0x4c0] sm:$0xff]  ;;  %400 = vst [vmem:[%s1661_s12 + $0x90] sm:$0xff] %v399_v18 }
  0x2c   : > { %v403_v20 = vld [vmem:[%s1656_s11 + $0x500] sm:$0xff]  ;;  %402 = vst [vmem:[%s1661_s12 + $0x98] sm:$0xff] %v401_v19 }
  0x2d   : > { %404 = vst [vmem:[%s1661_s12 + $0xa0] sm:$0xff] %v403_v20  ;;  %v405_v21 = vld [vmem:[%s1656_s11 + $0x540] sm:$0xff] }
  0x2e   : > { %v407_v22 = vld [vmem:[%s1656_s11 + $0x580] sm:$0xff]  ;;  %406 = vst [vmem:[%s1661_s12 + $0xa8] sm:$0xff] %v405_v21 }
  0x2f   : > { %v409_v23 = vld [vmem:[%s1656_s11 + $0x5c0] sm:$0xff]  ;;  %408 = vst [vmem:[%s1661_s12 + $0xb0] sm:$0xff] %v407_v22 }
  0x30   : > { %410 = vst [vmem:[%s1661_s12 + $0xb8] sm:$0xff] %v409_v23  ;;  %v411_v24 = vld [vmem:[%s1656_s11 + $0x600] sm:$0xff] }
  0x31   : > { %v413_v25 = vld [vmem:[%s1656_s11 + $0x640] sm:$0xff]  ;;  %412 = vst [vmem:[%s1661_s12 + $0xc0] sm:$0xff] %v411_v24 }
  0x32   : > { %v415_v26 = vld [vmem:[%s1656_s11 + $0x680] sm:$0xff]  ;;  %414 = vst [vmem:[%s1661_s12 + $0xc8] sm:$0xff] %v413_v25 }
  0x33   : > { %416 = vst [vmem:[%s1661_s12 + $0xd0] sm:$0xff] %v415_v26  ;;  %v417_v27 = vld [vmem:[%s1656_s11 + $0x6c0] sm:$0xff] }
  0x34   : > { %v419_v28 = vld [vmem:[%s1656_s11 + $0x700] sm:$0xff]  ;;  %418 = vst [vmem:[%s1661_s12 + $0xd8] sm:$0xff] %v417_v27 }
  0x35   : > { %v421_v29 = vld [vmem:[%s1656_s11 + $0x740] sm:$0xff]  ;;  %420 = vst [vmem:[%s1661_s12 + $0xe0] sm:$0xff] %v419_v28 }
  0x36   : > { %422 = vst [vmem:[%s1661_s12 + $0xe8] sm:$0xff] %v421_v29  ;;  %v423_v30 = vld [vmem:[%s1656_s11 + $0x780] sm:$0xff] }
  0x37   : > { %v425_v31 = vld [vmem:[%s1656_s11 + $0x7c0] sm:$0xff]  ;;  %424 = vst [vmem:[%s1661_s12 + $0xf0] sm:$0xff] %v423_v30 }
  0x38   : > { %v427_v32 = vld [vmem:[%s1656_s11 + $0x800] sm:$0xff]  ;;  %426 = vst [vmem:[%s1661_s12 + $0xf8] sm:$0xff] %v425_v31 }
  0x39   : > { %428 = vst [vmem:[%s1661_s12 + $0x100] sm:$0xff] %v427_v32  ;;  %v429_v33 = vld [vmem:[%s1656_s11 + $0x840] sm:$0xff] }
  0x3a   : > { %v431_v34 = vld [vmem:[%s1656_s11 + $0x880] sm:$0xff]  ;;  %430 = vst [vmem:[%s1661_s12 + $0x108] sm:$0xff] %v429_v33 }
  0x3b   : > { %v433_v35 = vld [vmem:[%s1656_s11 + $0x8c0] sm:$0xff]  ;;  %432 = vst [vmem:[%s1661_s12 + $0x110] sm:$0xff] %v431_v34 }
  0x3c   : > { %434 = vst [vmem:[%s1661_s12 + $0x118] sm:$0xff] %v433_v35  ;;  %v435_v36 = vld [vmem:[%s1656_s11 + $0x900] sm:$0xff] }
  0x3d   : > { %v437_v37 = vld [vmem:[%s1656_s11 + $0x940] sm:$0xff]  ;;  %436 = vst [vmem:[%s1661_s12 + $0x120] sm:$0xff] %v435_v36 }
  0x3e   : > { %v439_v38 = vld [vmem:[%s1656_s11 + $0x980] sm:$0xff]  ;;  %438 = vst [vmem:[%s1661_s12 + $0x128] sm:$0xff] %v437_v37 }
  0x3f   : > { %440 = vst [vmem:[%s1661_s12 + $0x130] sm:$0xff] %v439_v38  ;;  %v441_v39 = vld [vmem:[%s1656_s11 + $0x9c0] sm:$0xff] }
  0x40   : > { %v443_v40 = vld [vmem:[%s1656_s11 + $0xa00] sm:$0xff]  ;;  %442 = vst [vmem:[%s1661_s12 + $0x138] sm:$0xff] %v441_v39 }
  0x41   : > { %v445_v41 = vld [vmem:[%s1656_s11 + $0xa40] sm:$0xff]  ;;  %444 = vst [vmem:[%s1661_s12 + $0x140] sm:$0xff] %v443_v40 }
  0x42   : > { %446 = vst [vmem:[%s1661_s12 + $0x148] sm:$0xff] %v445_v41  ;;  %v447_v42 = vld [vmem:[%s1656_s11 + $0xa80] sm:$0xff] }
  0x43   : > { %v449_v43 = vld [vmem:[%s1656_s11 + $0xac0] sm:$0xff]  ;;  %448 = vst [vmem:[%s1661_s12 + $0x150] sm:$0xff] %v447_v42 }
  0x44   : > { %v451_v44 = vld [vmem:[%s1656_s11 + $0xb00] sm:$0xff]  ;;  %450 = vst [vmem:[%s1661_s12 + $0x158] sm:$0xff] %v449_v43 }
  0x45   : > { %452 = vst [vmem:[%s1661_s12 + $0x160] sm:$0xff] %v451_v44  ;;  %v453_v45 = vld [vmem:[%s1656_s11 + $0xb40] sm:$0xff] }
  0x46   : > { %v455_v46 = vld [vmem:[%s1656_s11 + $0xb80] sm:$0xff]  ;;  %454 = vst [vmem:[%s1661_s12 + $0x168] sm:$0xff] %v453_v45 }
  0x47   : > { %v457_v47 = vld [vmem:[%s1656_s11 + $0xbc0] sm:$0xff]  ;;  %456 = vst [vmem:[%s1661_s12 + $0x170] sm:$0xff] %v455_v46 }
  0x48   : > { %458 = vst [vmem:[%s1661_s12 + $0x178] sm:$0xff] %v457_v47  ;;  %v459_v48 = vld [vmem:[%s1656_s11 + $0xc00] sm:$0xff] }
  0x49   : > { %v461_v49 = vld [vmem:[%s1656_s11 + $0xc40] sm:$0xff]  ;;  %460 = vst [vmem:[%s1661_s12 + $0x180] sm:$0xff] %v459_v48 }
  0x4a   : > { %v463_v50 = vld [vmem:[%s1656_s11 + $0xc80] sm:$0xff]  ;;  %462 = vst [vmem:[%s1661_s12 + $0x188] sm:$0xff] %v461_v49 }
  0x4b   : > { %464 = vst [vmem:[%s1661_s12 + $0x190] sm:$0xff] %v463_v50  ;;  %v465_v51 = vld [vmem:[%s1656_s11 + $0xcc0] sm:$0xff] }
  0x4c   : > { %v467_v52 = vld [vmem:[%s1656_s11 + $0xd00] sm:$0xff]  ;;  %466 = vst [vmem:[%s1661_s12 + $0x198] sm:$0xff] %v465_v51 }
  0x4d   : > { %v469_v53 = vld [vmem:[%s1656_s11 + $0xd40] sm:$0xff]  ;;  %468 = vst [vmem:[%s1661_s12 + $0x1a0] sm:$0xff] %v467_v52 }
  0x4e   : > { %470 = vst [vmem:[%s1661_s12 + $0x1a8] sm:$0xff] %v469_v53  ;;  %v471_v54 = vld [vmem:[%s1656_s11 + $0xd80] sm:$0xff] }
  0x4f   : > { %v473_v55 = vld [vmem:[%s1656_s11 + $0xdc0] sm:$0xff]  ;;  %472 = vst [vmem:[%s1661_s12 + $0x1b0] sm:$0xff] %v471_v54 }
  0x50   : > { %v475_v56 = vld [vmem:[%s1656_s11 + $0xe00] sm:$0xff]  ;;  %474 = vst [vmem:[%s1661_s12 + $0x1b8] sm:$0xff] %v473_v55 }
  0x51   : > { %476 = vst [vmem:[%s1661_s12 + $0x1c0] sm:$0xff] %v475_v56  ;;  %v477_v57 = vld [vmem:[%s1656_s11 + $0xe40] sm:$0xff] }
  0x52   : > { %v479_v58 = vld [vmem:[%s1656_s11 + $0xe80] sm:$0xff]  ;;  %478 = vst [vmem:[%s1661_s12 + $0x1c8] sm:$0xff] %v477_v57 }
  0x53   : > { %v481_v59 = vld [vmem:[%s1656_s11 + $0xec0] sm:$0xff]  ;;  %480 = vst [vmem:[%s1661_s12 + $0x1d0] sm:$0xff] %v479_v58 }
  0x54   : > { %482 = vst [vmem:[%s1661_s12 + $0x1d8] sm:$0xff] %v481_v59  ;;  %v483_v60 = vld [vmem:[%s1656_s11 + $0xf00] sm:$0xff] }
  0x55   : > { %v485_v61 = vld [vmem:[%s1656_s11 + $0xf40] sm:$0xff]  ;;  %484 = vst [vmem:[%s1661_s12 + $0x1e0] sm:$0xff] %v483_v60 }
  0x56   : > { %v487_v62 = vld [vmem:[%s1656_s11 + $0xf80] sm:$0xff]  ;;  %486 = vst [vmem:[%s1661_s12 + $0x1e8] sm:$0xff] %v485_v61 }
  0x57   : > { %488 = vst [vmem:[%s1661_s12 + $0x1f0] sm:$0xff] %v487_v62  ;;  %v489_v63 = vld [vmem:[%s1656_s11 + $0xfc0] sm:$0xff] }
  0x58   : > { %490 = vst [vmem:[%s1661_s12 + $0x1f8] sm:$0xff] %v489_v63 }
  0x59 PF: > { %p1274_p7 = scmp.ge.s32.totalorder %s1568_s21, 1  ;;  %p511_p8 = scmp.lt.s32.totalorder %s1568_s21, 17 }
  0x5b   : > { %p512_p9 = pnand %p1274_p7, %p511_p8 }
  0x5c   : > { %s518_s13 = sand.u32 (!%p512_p9), 1, %s1544_s15   ;;  %s1276_s14 = sshll.u32 (!%p512_p9), %s1552_s17, 2 }
  0x5d   : > { %515 = sbr.rel (%p512_p9) target bundleno = 408 (0x198), region = 70  ;;  %s1275_s24 = sshll.u32 (!%p512_p9), %s518_s13, 9 }
  0x5e   : > { %p567_p10 = scmp.lt.s32.totalorder (!%p512_p9), %s1276_s14, 7  ;;  %s1278_s25 = sshll.u32 (!%p512_p9), %s1556_s18, 1 }
  0x5f   : > { %p577_p11 = scmp.lt.s32.totalorder (!%p512_p9), %s1278_s25, 15  ;;  %s1814_s13 = scalar_lea.vmem (!%p512_p9), [#allocation3], %s1275_s24 }
  0x60   : > { %p1282_p12 = scmp.ne.s32.totalorder (!%p512_p9), %s1552_s17, 0 }
  0x64   : > { %s1934_s14 = smov (!%p567_p10, %s1276_s14), 7  ;;  %s1936_s25 = smov (!%p577_p11, %s1278_s25), 15 }
  0x65   : > { %s1277_s26 = sshll.u32 %s1934_s14, 2  ;;  %s579_s15 = scalar_lea.vmem %s1918_s2, %s1936_s25  ;;  %v1570_v0 = vmov (!%p1282_p12), 0.0  }
  0x66   : > { %s1796_s30 = scalar_lea.vmem %s1916_s0, %s1277_s26  ;;  %s584_s18 = scalar_lea.vmem %s1919_s3, %s1936_s25  ;;  %600 = vst [vmem:[#allocation2] sm:$0xff] (!%p1282_p12), %v1570_v0  ;;  %601 = vst [vmem:[#allocation2 + $0x8] sm:$0xff] (!%p1282_p12), %v1570_v0 }
  0x67   : > { %s1281_s9 = sshll.u32 %s1936_s25, 2  ;;  %599 = sbr.rel (%p1282_p12) target bundleno = 110 (0x6e), region = 78 }
  0x68   : > { %s1812_s12 = scalar_lea.vmem %s1920_s4, %s1281_s9 }
  0x6e PF: > { %v1414_v1 = vld [vmem:[%s1814_s13 + $0x4] ss:$8 sps:$4 sm:$0xff]   ;;  %v1418_v3 = vld [vmem:[%s1814_s13] ss:$8 sps:$4 sm:$0xff]   ;;  %v1420_v5 = vld [vmem:[%s1814_s13 + $0x14] ss:$8 sps:$4 sm:$0xff]  }
  0x6f   : > { %v1416_v2 = vld [vmem:[%s1814_s13 + $0x104] ss:$8 sps:$4 sm:$0xff]   ;;  %1004 = vmatprep.subr.bf16.mxu0 %v1414_v1  ;;  %v1419_v4 = vld [vmem:[%s1814_s13 + $0x100] ss:$8 sps:$4 sm:$0xff]   ;;  %v1422_v6 = vld [vmem:[%s1814_s13 + $0x114] ss:$8 sps:$4 sm:$0xff]  }
  0x70   : > { %1045 = vmatprep.subr.bf16.mxu1 %v1416_v2  ;;  %1005 = vmatpush1.bf16.msra.mxu0 %v1418_v3  ;;  %v1424_v7 = vld [vmem:[%s1814_s13 + $0x10] ss:$8 sps:$4 sm:$0xff]   ;;  %v1426_v9 = vld [vmem:[%s1814_s13 + $0x24] ss:$8 sps:$4 sm:$0xff]   ;;  %v1430_v11 = vld [vmem:[%s1814_s13 + $0x20] ss:$8 sps:$4 sm:$0xff]  }
  0x71   : > { %1046 = vmatpush1.bf16.msra.mxu1 %v1419_v4  ;;  %1006 = vmatprep.subr.bf16.mxu0 %v1420_v5  ;;  %v1425_v8 = vld [vmem:[%s1814_s13 + $0x110] ss:$8 sps:$4 sm:$0xff]   ;;  %v1428_v10 = vld [vmem:[%s1814_s13 + $0x124] ss:$8 sps:$4 sm:$0xff]   ;;  %v1431_v12 = vld [vmem:[%s1814_s13 + $0x120] ss:$8 sps:$4 sm:$0xff]  }
  0x72   : > { %1047 = vmatprep.subr.bf16.mxu1 %v1422_v6  ;;  %v1432_v13 = vld [vmem:[%s1814_s13 + $0x34] ss:$8 sps:$4 sm:$0xff]   ;;  %v1436_v15 = vld [vmem:[%s1814_s13 + $0x30] ss:$8 sps:$4 sm:$0xff]   ;;  %v1438_v17 = vld [vmem:[%s1814_s13 + $0x44] ss:$8 sps:$4 sm:$0xff]  }
  0x73   : > { %v1434_v14 = vld [vmem:[%s1814_s13 + $0x134] ss:$8 sps:$4 sm:$0xff]   ;;  %v1437_v16 = vld [vmem:[%s1814_s13 + $0x130] ss:$8 sps:$4 sm:$0xff]   ;;  %v1440_v18 = vld [vmem:[%s1814_s13 + $0x144] ss:$8 sps:$4 sm:$0xff]  }
  0x74   : > { %1007 = vmatpush1.bf16.msra.mxu0 %v1424_v7  ;;  %v1442_v19 = vld [vmem:[%s1814_s13 + $0x40] ss:$8 sps:$4 sm:$0xff]   ;;  %v1444_v21 = vld [vmem:[%s1814_s13 + $0x54] ss:$8 sps:$4 sm:$0xff]   ;;  %v1448_v23 = vld [vmem:[%s1814_s13 + $0x50] ss:$8 sps:$4 sm:$0xff]  }
  0x75   : > { %1048 = vmatpush1.bf16.msra.mxu1 %v1425_v8  ;;  %1008 = vmatprep.subr.bf16.mxu0 %v1426_v9  ;;  %v1443_v20 = vld [vmem:[%s1814_s13 + $0x140] ss:$8 sps:$4 sm:$0xff]   ;;  %v1446_v22 = vld [vmem:[%s1814_s13 + $0x154] ss:$8 sps:$4 sm:$0xff]   ;;  %v1449_v24 = vld [vmem:[%s1814_s13 + $0x150] ss:$8 sps:$4 sm:$0xff]  }
  0x76   : > { %1049 = vmatprep.subr.bf16.mxu1 %v1428_v10  ;;  %v1450_v25 = vld [vmem:[%s1814_s13 + $0x64] ss:$8 sps:$4 sm:$0xff]   ;;  %v1454_v27 = vld [vmem:[%s1814_s13 + $0x60] ss:$8 sps:$4 sm:$0xff]   ;;  %v1456_v29 = vld [vmem:[%s1814_s13 + $0x74] ss:$8 sps:$4 sm:$0xff]  }
  0x77   : > { %v1452_v26 = vld [vmem:[%s1814_s13 + $0x164] ss:$8 sps:$4 sm:$0xff]   ;;  %v1455_v28 = vld [vmem:[%s1814_s13 + $0x160] ss:$8 sps:$4 sm:$0xff]   ;;  %v1458_v30 = vld [vmem:[%s1814_s13 + $0x174] ss:$8 sps:$4 sm:$0xff]  }
  0x78   : > { %1009 = vmatpush1.bf16.msra.mxu0 %v1430_v11  ;;  %v1460_v31 = vld [vmem:[%s1814_s13 + $0x70] ss:$8 sps:$4 sm:$0xff]   ;;  %v1462_v33 = vld [vmem:[%s1814_s13 + $0x84] ss:$8 sps:$4 sm:$0xff]   ;;  %v1466_v35 = vld [vmem:[%s1814_s13 + $0x80] ss:$8 sps:$4 sm:$0xff]  }
  0x79   : > { %1050 = vmatpush1.bf16.msra.mxu1 %v1431_v12  ;;  %1010 = vmatprep.subr.bf16.mxu0 %v1432_v13  ;;  %v1461_v32 = vld [vmem:[%s1814_s13 + $0x170] ss:$8 sps:$4 sm:$0xff]   ;;  %v1464_v34 = vld [vmem:[%s1814_s13 + $0x184] ss:$8 sps:$4 sm:$0xff]   ;;  %v1467_v36 = vld [vmem:[%s1814_s13 + $0x180] ss:$8 sps:$4 sm:$0xff]  }
  0x7a   : > { %1051 = vmatprep.subr.bf16.mxu1 %v1434_v14  ;;  %v1468_v37 = vld [vmem:[%s1814_s13 + $0x94] ss:$8 sps:$4 sm:$0xff]   ;;  %v1472_v39 = vld [vmem:[%s1814_s13 + $0x90] ss:$8 sps:$4 sm:$0xff]   ;;  %v1474_v41 = vld [vmem:[%s1814_s13 + $0xa4] ss:$8 sps:$4 sm:$0xff]  }
  0x7b   : > { %v1470_v38 = vld [vmem:[%s1814_s13 + $0x194] ss:$8 sps:$4 sm:$0xff]   ;;  %v1473_v40 = vld [vmem:[%s1814_s13 + $0x190] ss:$8 sps:$4 sm:$0xff]   ;;  %v1476_v42 = vld [vmem:[%s1814_s13 + $0x1a4] ss:$8 sps:$4 sm:$0xff]  }
  0x7c   : > { %1011 = vmatpush1.bf16.msra.mxu0 %v1436_v15  ;;  %v1478_v43 = vld [vmem:[%s1814_s13 + $0xa0] ss:$8 sps:$4 sm:$0xff]   ;;  %v1480_v45 = vld [vmem:[%s1814_s13 + $0xb4] ss:$8 sps:$4 sm:$0xff]   ;;  %v1484_v50 = vld [vmem:[%s1814_s13 + $0xb0] ss:$8 sps:$4 sm:$0xff]  }
  0x7d   : > { %1052 = vmatpush1.bf16.msra.mxu1 %v1437_v16  ;;  %1012 = vmatprep.subr.bf16.mxu0 %v1438_v17  ;;  %v1479_v44 = vld [vmem:[%s1814_s13 + $0x1a0] ss:$8 sps:$4 sm:$0xff]   ;;  %v1482_v46 = vld [vmem:[%s1814_s13 + $0x1b4] ss:$8 sps:$4 sm:$0xff]   ;;  %v1485_v51 = vld [vmem:[%s1814_s13 + $0x1b0] ss:$8 sps:$4 sm:$0xff]  }
  0x7e   : > { %1053 = vmatprep.subr.bf16.mxu1 %v1440_v18  ;;  %v604_v47 = vld [vmem:[%s1796_s30] sm:$0xff]  ;;  %v605_v49 = vld [vmem:[%s1796_s30 + $0x8] sm:$0xff]  ;;  %v1486_v53 = vld [vmem:[%s1814_s13 + $0xc4] ss:$8 sps:$4 sm:$0xff]   ;;  %p1351_p13 = scmp.ne.s32.totalorder %s1552_s17, 1 }
  0x7f   : > { %v1284_v48 = vcombine.high %v604_v47, %v604_v47  ;;  %v1286_v52 = vcombine.high %v605_v49, %v605_v49  ;;  %v1488_v54 = vld [vmem:[%s1814_s13 + $0x1c4] ss:$8 sps:$4 sm:$0xff]   ;;  %v1490_v55 = vld [vmem:[%s1814_s13 + $0xc0] ss:$8 sps:$4 sm:$0xff]   ;;  %v1492_v57 = vld [vmem:[%s1814_s13 + $0xd4] ss:$8 sps:$4 sm:$0xff]   ;;  %v1283_v5 = vcombine.low %v604_v47, %v604_v47  ;;  %v1285_v6 = vcombine.low %v605_v49, %v605_v49 }
  0x80   : > { %1013 = vmatpush1.bf16.msra.mxu0 %v1442_v19  ;;  %v1491_v56 = vld [vmem:[%s1814_s13 + $0x1c0] ss:$8 sps:$4 sm:$0xff]   ;;  %v1494_v58 = vld [vmem:[%s1814_s13 + $0x1d4] ss:$8 sps:$4 sm:$0xff]   ;;  %v1496_v59 = vld [vmem:[%s1814_s13 + $0xd0] ss:$8 sps:$4 sm:$0xff]  }
  0x81   : > { %1054 = vmatpush1.bf16.msra.mxu1 %v1443_v20  ;;  %1014 = vmatprep.subr.bf16.mxu0 %v1444_v21  ;;  %v1497_v60 = vld [vmem:[%s1814_s13 + $0x1d0] ss:$8 sps:$4 sm:$0xff]   ;;  %v1498_v61 = vld [vmem:[%s1814_s13 + $0xe4] ss:$8 sps:$4 sm:$0xff]   ;;  %v1502_v63 = vld [vmem:[%s1814_s13 + $0xe0] ss:$8 sps:$4 sm:$0xff]   ;;  %v1098_v21 = vlaneseq (!%p1351_p13) }
  0x82   : > { %1055 = vmatprep.subr.bf16.mxu1 %v1446_v22  ;;  %1036 = vmatprep.mubr.bf16.mxu0 %v1284_v48  ;;  %v1500_v62 = vld [vmem:[%s1814_s13 + $0x1e4] ss:$8 sps:$4 sm:$0xff]   ;;  %v1503_v0 = vld [vmem:[%s1814_s13 + $0x1e0] ss:$8 sps:$4 sm:$0xff]   ;;  %v1504_v1 = vld [vmem:[%s1814_s13 + $0xf4] ss:$8 sps:$4 sm:$0xff]  }
  0x83   : > { %1077 = vmatprep.mubr.bf16.mxu1 %v1286_v52  ;;  %v1506_v2 = vld [vmem:[%s1814_s13 + $0x1f4] ss:$8 sps:$4 sm:$0xff]   ;;  %v1508_v3 = vld [vmem:[%s1814_s13 + $0xf0] ss:$8 sps:$4 sm:$0xff]   ;;  %v1099_v22 = vshrl.u32 (!%p1351_p13), %v1098_v21, 7 }
  0x84   : > { %1015 = vmatpush1.bf16.msra.mxu0 %v1448_v23  ;;  %v1509_v4 = vld [vmem:[%s1814_s13 + $0x1f0] ss:$8 sps:$4 sm:$0xff]  }
  0x85   : > { %1056 = vmatpush1.bf16.msra.mxu1 %v1449_v24  ;;  %1016 = vmatprep.subr.bf16.mxu0 %v1450_v25  ;;  %v602_v8 = vld [vmem:[#allocation2] sm:$0xff]  ;;  %v603_v12 = vld [vmem:[#allocation2 + $0x8] sm:$0xff]  ;;  %v1100_v25 = vsub.s32 (!%p1351_p13), 0, %v1099_v22 }
  0x86   : > { %1057 = vmatprep.subr.bf16.mxu1 %v1452_v26  ;;  %v1096_v23 = vld [vmem:[%s579_s15] sm:$0x3] (!%p1351_p13)  ;;  %v1104_v26 = vsub.s32 (!%p1351_p13), 1, %v1099_v22 }
  0x87   : > { %v1110_v24 = vld [vmem:[%s584_s18] sm:$0x3] (!%p1351_p13) }
  0x88   : > { %1017 = vmatpush1.bf16.msra.mxu0 %v1454_v27 }
  0x89   : > { %1058 = vmatpush1.bf16.msra.mxu1 %v1455_v28  ;;  %1018 = vmatprep.subr.bf16.mxu0 %v1456_v29  ;;  %v1101_v29 = vrot.slane (!%p1351_p13), %v1096_v23, %v1100_v25 }
  0x8a   : > { %1059 = vmatprep.subr.bf16.mxu1 %v1458_v30  ;;  %v1105_v30 = vrot.slane (!%p1351_p13), %v1096_v23, %v1104_v26 }
  0x8c   : > { %1019 = vmatpush1.bf16.msra.mxu0 %v1460_v31  ;;  %v1115_v31 = vrot.slane (!%p1351_p13), %v1110_v24, %v1100_v25 }
  0x8d   : > { %1060 = vmatpush1.bf16.msra.mxu1 %v1461_v32  ;;  %1020 = vmatprep.subr.bf16.mxu0 %v1462_v33  ;;  %v1119_v32 = vrot.slane (!%p1351_p13), %v1110_v24, %v1104_v26 }
  0x8e   : > { %1061 = vmatprep.subr.bf16.mxu1 %v1464_v34 }
  0x90   : > { %1021 = vmatpush1.bf16.msra.mxu0 %v1466_v35 }
  0x91   : > { %1062 = vmatpush1.bf16.msra.mxu1 %v1467_v36  ;;  %1022 = vmatprep.subr.bf16.mxu0 %v1468_v37 }
  0x92   : > { %1063 = vmatprep.subr.bf16.mxu1 %v1470_v38 }
  0x94   : > { %1023 = vmatpush1.bf16.msra.mxu0 %v1472_v39 }
  0x95   : > { %1064 = vmatpush1.bf16.msra.mxu1 %v1473_v40  ;;  %1024 = vmatprep.subr.bf16.mxu0 %v1474_v41 }
  0x96   : > { %1065 = vmatprep.subr.bf16.mxu1 %v1476_v42 }
  0x98   : > { %1025 = vmatpush1.bf16.msra.mxu0 %v1478_v43 }
  0x99   : > { %1066 = vmatpush1.bf16.msra.mxu1 %v1479_v44  ;;  %1026 = vmatprep.subr.bf16.mxu0 %v1480_v45 }
  0x9a   : > { %1067 = vmatprep.subr.bf16.mxu1 %v1482_v46 }
  0x9c   : > { %1027 = vmatpush1.bf16.msra.mxu0 %v1484_v50 }
  0x9d   : > { %1068 = vmatpush1.bf16.msra.mxu1 %v1485_v51  ;;  %1028 = vmatprep.subr.bf16.mxu0 %v1486_v53 }
  0x9e   : > { %1069 = vmatprep.subr.bf16.mxu1 %v1488_v54 }
  0xa0   : > { %1029 = vmatpush1.bf16.msra.mxu0 %v1490_v55 }
  0xa1   : > { %1070 = vmatpush1.bf16.msra.mxu1 %v1491_v56  ;;  %1030 = vmatprep.subr.bf16.mxu0 %v1492_v57 }
  0xa2   : > { %1071 = vmatprep.subr.bf16.mxu1 %v1494_v58 }
  0xa4   : > { %1031 = vmatpush1.bf16.msra.mxu0 %v1496_v59 }
  0xa5   : > { %1072 = vmatpush1.bf16.msra.mxu1 %v1497_v60  ;;  %1032 = vmatprep.subr.bf16.mxu0 %v1498_v61 }
  0xa6   : > { %1073 = vmatprep.subr.bf16.mxu1 %v1500_v62 }
  0xa8   : > { %1033 = vmatpush1.bf16.msra.mxu0 %v1502_v63 }
  0xa9   : > { %1074 = vmatpush1.bf16.msra.mxu1 %v1503_v0  ;;  %1034 = vmatprep.subr.bf16.mxu0 %v1504_v1 }
  0xaa   : > { %1075 = vmatprep.subr.bf16.mxu1 %v1506_v2 }
  0xac   : > { %1035 = vmatpush1.bf16.msra.mxu0 %v1508_v3 }
  0xad   : > { %1076 = vmatpush1.bf16.msra.mxu1 %v1509_v4 }
  0xaf   : > { %1037 = vmatmul.mubr.bf16.vlgmr.msra.gmra.mrb[0].mxu0 %v1283_v5 }
  0xb0   : > { %1078 = vmatmul.mubr.bf16.vlgmr.msra.gmra.mrb[0].mxu1 %v1285_v6 }
 0x182   : > { %v1038_v7 = vpop.f32.mrb[0].mxu0 }
 0x183   : > { %v1079_v9 = vpop.f32.mrb[0].mxu1  ;;  %v1040_v11 = vpop.f32.mrb[1].mxu0  ;;  %1093 = sbr.rel (%p1351_p13) target bundleno = 408 (0x198), region = 82 }
 0x184   : > { %v1080_v10 = vadd.f32 %v1079_v9, %v1038_v7  ;;  %v1081_v13 = vpop.f32.mrb[1].mxu1  ;;  %v1042_v15 = vpop.f32.mrb[2].mxu0 }
 0x185   : > { %v1082_v14 = vadd.f32 %v1081_v13, %v1040_v11  ;;  %v1083_v16 = vpop.f32.mrb[2].mxu1  ;;  %v1043_v18 = vpop.f32.mrb[3].mxu0 }
 0x186   : > { %v1086_v17 = vadd.f32 %v1080_v10, %v602_v8  ;;  %v1084_v19 = vpop.f32.mrb[3].mxu1 }
 0x187   : > { %v1087_v20 = vadd.f32 %v1082_v14, %v603_v12 }
 0x188   : > { %1088 = vst [vmem:[#allocation2] sm:$0xff] %v1086_v17 }
 0x189   : > { %1089 = vst [vmem:[#allocation2 + $0x8] sm:$0xff] %v1087_v20 }
 0x18f   : > { %v1094_v27 = vld [vmem:[#allocation2] sm:$0xff] }
 0x190   : > { %v1095_v28 = vld [vmem:[#allocation2 + $0x8] sm:$0xff]  ;;  %v1108_v33 = vmul.f32 %v1101_v29, %v1094_v27 }
 0x191   : > { %v1109_v34 = vmul.f32 %v1105_v30, %v1095_v28 }
 0x192   : > { %v1122_v35 = vadd.f32 %v1115_v31, %v1108_v33 }
 0x193   : > { %v1123_v36 = vadd.f32 %v1119_v32, %v1109_v34 }
 0x195   : > { %v1356_v37 = vpack.c.bf16 %v1123_v36, %v1122_v35 }
 0x197   : > { %1132 = vst [vmem:[%s1812_s12] sm:$0xff] %v1356_v37 }
 0x198 PF: > { %s14_s21 = sadd.s32 1, %s1568_s21   ;;  %s1921_s15 = smov %s1548_s16 }
 0x199   : > { %p11_p0 = scmp.ge.s32.totalorder %s14_s21, 18   ;;  %s1922_s16 = smov %s1647_s28 }
 0x19a   : > { %s1923_s17 = smov %s1560_s19  ;;  %s1924_s18 = smov %s1564_s20 }
 0x19b   : > { %s1925_s19 = smov %s1928_s22  ;;  %s1926_s20 = smov %s1932_s23 }
 0x19c   :  { %13 = sbr.rel (!%p11_p0) target bundleno = 4 (0x4), region = 126 }

// kernel: resnet50_forward.103
= control target key start
LH: loop header
LB: loop body
LE: loop exit
PB: predicated region body
PF: predicated region fallthrough
CT: control target
= control target key end

     0   :  { %s1595_s18 = smov 0   ;;  %s1597_s19 = smov 0   ;;  %s1894_s0 = inlined_call_operand.vmem [shape: bf16[8,512], index: 0, kind: input, shape index: {}]   ;;  %s1895_s1 = inlined_call_operand.vmem [shape: bf16[512,2048], index: 1, kind: input, shape index: {}]   ;;  %s1896_s2 = inlined_call_operand.vmem [shape: f32[1,2048], index: 2, kind: input, shape index: {}]   ;;  %s1897_s3 = inlined_call_operand.vmem [shape: f32[1,2048], index: 3, kind: input, shape index: {}]   ;;  %s1898_s4 = inlined_call_operand.vmem [shape: bf16[8,2048], index: 4, kind: input, shape index: {}]   ;;  %s1899_s5 = inlined_call_operand.vmem [shape: bf16[8,2048], index: 5, kind: output, shape index: {}]  }
   0x1   :  { %s1599_s20 = smov 0   ;;  %s1601_s21 = smov 0  }
   0x2   :  { %s1603_s22 = smov 0  }
   0x3 LB: > { %s24_s23 = sadd.s32 1, %s1559_s21  ;;  %p67_p1 = scmp.ne.s32.totalorder %s1551_s19, %s1547_s18  ;;  %s1563_s22 = sphi %s1603_s22, %s15_s22   ;;  %s1559_s21 = sphi %s1601_s21, %s1903_s21   ;;  %s1555_s20 = sphi %s1599_s20, %s1902_s20   ;;  %s1551_s19 = sphi %s1597_s19, %s1901_s19   ;;  %s1547_s18 = sphi %s1595_s18, %s1900_s18  }
   0x4   : > { %p25_p0 = scmp.ge.s32.totalorder %s24_s23, 8  ;;  %p68_p2 = scmp.eq.s32.totalorder %s1563_s22, 0 }
   0x5   : > { %s60_s25 = sadd.s32 1, %s1551_s19  ;;  %p1298_p5 = scmp.ge.s32.totalorder %s1563_s22, 8 }
   0x6   : > { %s1905_s23 = smov (%p25_p0, %s24_s23), 0  ;;  %p69_p3 = por %p68_p2, %p67_p1 }
   0x7   : > { %s57_s24 = ssub.s32 %s1559_s21, %s1905_s23  ;;  %209 = sbr.rel (%p1298_p5) target bundleno = 82 (0x52), region = 20 }
   0x8   : > { %p58_p4 = scmp.eq.s32.totalorder %s57_s24, 0 }
   0xa   : > { %s1630_s26 = scalar_select %p58_p4, %s1551_s19, %s60_s25  }
   0xe   : > { %212 = sbr.rel (!%p69_p3) target bundleno = 82 (0x52), region = 24  ;;  %s214_s27 = sand.u32 (%p69_p3), 1, %s1551_s19  }
   0xf   : > { %s1381_s28 = sshll.u32 (%p69_p3), %s1559_s21, 3  ;;  %s1299_s29 = sshll.u32 (%p69_p3), %s214_s27, 9 }
  0x10   : > { %s1638_s7 = scalar_lea.vmem (%p69_p3), %s1895_s1, %s1381_s28  ;;  %s1643_s8 = scalar_lea.vmem (%p69_p3), [#allocation2], %s1299_s29 }
  0x11   : > { %v373_v0 = vld [vmem:[%s1638_s7] sm:$0xff] (%p69_p3) }
  0x12   : > { %v375_v1 = vld [vmem:[%s1638_s7 + $0x40] sm:$0xff] (%p69_p3)  ;;  %374 = vst [vmem:[%s1643_s8] sm:$0xff] (%p69_p3), %v373_v0 }
  0x13   : > { %v377_v2 = vld [vmem:[%s1638_s7 + $0x80] sm:$0xff] (%p69_p3)  ;;  %376 = vst [vmem:[%s1643_s8 + $0x8] sm:$0xff] (%p69_p3), %v375_v1 }
  0x14   : > { %378 = vst [vmem:[%s1643_s8 + $0x10] sm:$0xff] (%p69_p3), %v377_v2  ;;  %v379_v3 = vld [vmem:[%s1638_s7 + $0xc0] sm:$0xff] (%p69_p3) }
  0x15   : > { %v381_v4 = vld [vmem:[%s1638_s7 + $0x100] sm:$0xff]  ;;  %380 = vst [vmem:[%s1643_s8 + $0x18] sm:$0xff] %v379_v3 }
  0x16   : > { %v383_v5 = vld [vmem:[%s1638_s7 + $0x140] sm:$0xff]  ;;  %382 = vst [vmem:[%s1643_s8 + $0x20] sm:$0xff] %v381_v4 }
  0x17   : > { %384 = vst [vmem:[%s1643_s8 + $0x28] sm:$0xff] %v383_v5  ;;  %v385_v6 = vld [vmem:[%s1638_s7 + $0x180] sm:$0xff] }
  0x18   : > { %v387_v7 = vld [vmem:[%s1638_s7 + $0x1c0] sm:$0xff]  ;;  %386 = vst [vmem:[%s1643_s8 + $0x30] sm:$0xff] %v385_v6 }
  0x19   : > { %v389_v8 = vld [vmem:[%s1638_s7 + $0x200] sm:$0xff]  ;;  %388 = vst [vmem:[%s1643_s8 + $0x38] sm:$0xff] %v387_v7 }
  0x1a   : > { %390 = vst [vmem:[%s1643_s8 + $0x40] sm:$0xff] %v389_v8  ;;  %v391_v9 = vld [vmem:[%s1638_s7 + $0x240] sm:$0xff] }
  0x1b   : > { %v393_v10 = vld [vmem:[%s1638_s7 + $0x280] sm:$0xff]  ;;  %392 = vst [vmem:[%s1643_s8 + $0x48] sm:$0xff] %v391_v9 }
  0x1c   : > { %v395_v11 = vld [vmem:[%s1638_s7 + $0x2c0] sm:$0xff]  ;;  %394 = vst [vmem:[%s1643_s8 + $0x50] sm:$0xff] %v393_v10 }
  0x1d   : > { %396 = vst [vmem:[%s1643_s8 + $0x58] sm:$0xff] %v395_v11  ;;  %v397_v12 = vld [vmem:[%s1638_s7 + $0x300] sm:$0xff] }
  0x1e   : > { %v399_v13 = vld [vmem:[%s1638_s7 + $0x340] sm:$0xff]  ;;  %398 = vst [vmem:[%s1643_s8 + $0x60] sm:$0xff] %v397_v12 }
  0x1f   : > { %v401_v14 = vld [vmem:[%s1638_s7 + $0x380] sm:$0xff]  ;;  %400 = vst [vmem:[%s1643_s8 + $0x68] sm:$0xff] %v399_v13 }
  0x20   : > { %402 = vst [vmem:[%s1643_s8 + $0x70] sm:$0xff] %v401_v14  ;;  %v403_v15 = vld [vmem:[%s1638_s7 + $0x3c0] sm:$0xff] }
  0x21   : > { %v405_v16 = vld [vmem:[%s1638_s7 + $0x400] sm:$0xff]  ;;  %404 = vst [vmem:[%s1643_s8 + $0x78] sm:$0xff] %v403_v15 }
  0x22   : > { %v407_v17 = vld [vmem:[%s1638_s7 + $0x440] sm:$0xff]  ;;  %406 = vst [vmem:[%s1643_s8 + $0x80] sm:$0xff] %v405_v16 }
  0x23   : > { %408 = vst [vmem:[%s1643_s8 + $0x88] sm:$0xff] %v407_v17  ;;  %v409_v18 = vld [vmem:[%s1638_s7 + $0x480] sm:$0xff] }
  0x24   : > { %v411_v19 = vld [vmem:[%s1638_s7 + $0x4c0] sm:$0xff]  ;;  %410 = vst [vmem:[%s1643_s8 + $0x90] sm:$0xff] %v409_v18 }
  0x25   : > { %v413_v20 = vld [vmem:[%s1638_s7 + $0x500] sm:$0xff]  ;;  %412 = vst [vmem:[%s1643_s8 + $0x98] sm:$0xff] %v411_v19 }
  0x26   : > { %414 = vst [vmem:[%s1643_s8 + $0xa0] sm:$0xff] %v413_v20  ;;  %v415_v21 = vld [vmem:[%s1638_s7 + $0x540] sm:$0xff] }
  0x27   : > { %v417_v22 = vld [vmem:[%s1638_s7 + $0x580] sm:$0xff]  ;;  %416 = vst [vmem:[%s1643_s8 + $0xa8] sm:$0xff] %v415_v21 }
  0x28   : > { %v419_v23 = vld [vmem:[%s1638_s7 + $0x5c0] sm:$0xff]  ;;  %418 = vst [vmem:[%s1643_s8 + $0xb0] sm:$0xff] %v417_v22 }
  0x29   : > { %420 = vst [vmem:[%s1643_s8 + $0xb8] sm:$0xff] %v419_v23  ;;  %v421_v24 = vld [vmem:[%s1638_s7 + $0x600] sm:$0xff] }
  0x2a   : > { %v423_v25 = vld [vmem:[%s1638_s7 + $0x640] sm:$0xff]  ;;  %422 = vst [vmem:[%s1643_s8 + $0xc0] sm:$0xff] %v421_v24 }
  0x2b   : > { %v425_v26 = vld [vmem:[%s1638_s7 + $0x680] sm:$0xff]  ;;  %424 = vst [vmem:[%s1643_s8 + $0xc8] sm:$0xff] %v423_v25 }
  0x2c   : > { %426 = vst [vmem:[%s1643_s8 + $0xd0] sm:$0xff] %v425_v26  ;;  %v427_v27 = vld [vmem:[%s1638_s7 + $0x6c0] sm:$0xff] }
  0x2d   : > { %v429_v28 = vld [vmem:[%s1638_s7 + $0x700] sm:$0xff]  ;;  %428 = vst [vmem:[%s1643_s8 + $0xd8] sm:$0xff] %v427_v27 }
  0x2e   : > { %v431_v29 = vld [vmem:[%s1638_s7 + $0x740] sm:$0xff]  ;;  %430 = vst [vmem:[%s1643_s8 + $0xe0] sm:$0xff] %v429_v28 }
  0x2f   : > { %432 = vst [vmem:[%s1643_s8 + $0xe8] sm:$0xff] %v431_v29  ;;  %v433_v30 = vld [vmem:[%s1638_s7 + $0x780] sm:$0xff] }
  0x30   : > { %v435_v31 = vld [vmem:[%s1638_s7 + $0x7c0] sm:$0xff]  ;;  %434 = vst [vmem:[%s1643_s8 + $0xf0] sm:$0xff] %v433_v30 }
  0x31   : > { %v437_v32 = vld [vmem:[%s1638_s7 + $0x800] sm:$0xff]  ;;  %436 = vst [vmem:[%s1643_s8 + $0xf8] sm:$0xff] %v435_v31 }
  0x32   : > { %438 = vst [vmem:[%s1643_s8 + $0x100] sm:$0xff] %v437_v32  ;;  %v439_v33 = vld [vmem:[%s1638_s7 + $0x840] sm:$0xff] }
  0x33   : > { %v441_v34 = vld [vmem:[%s1638_s7 + $0x880] sm:$0xff]  ;;  %440 = vst [vmem:[%s1643_s8 + $0x108] sm:$0xff] %v439_v33 }
  0x34   : > { %v443_v35 = vld [vmem:[%s1638_s7 + $0x8c0] sm:$0xff]  ;;  %442 = vst [vmem:[%s1643_s8 + $0x110] sm:$0xff] %v441_v34 }
  0x35   : > { %444 = vst [vmem:[%s1643_s8 + $0x118] sm:$0xff] %v443_v35  ;;  %v445_v36 = vld [vmem:[%s1638_s7 + $0x900] sm:$0xff] }
  0x36   : > { %v447_v37 = vld [vmem:[%s1638_s7 + $0x940] sm:$0xff]  ;;  %446 = vst [vmem:[%s1643_s8 + $0x120] sm:$0xff] %v445_v36 }
  0x37   : > { %v449_v38 = vld [vmem:[%s1638_s7 + $0x980] sm:$0xff]  ;;  %448 = vst [vmem:[%s1643_s8 + $0x128] sm:$0xff] %v447_v37 }
  0x38   : > { %450 = vst [vmem:[%s1643_s8 + $0x130] sm:$0xff] %v449_v38  ;;  %v451_v39 = vld [vmem:[%s1638_s7 + $0x9c0] sm:$0xff] }
  0x39   : > { %v453_v40 = vld [vmem:[%s1638_s7 + $0xa00] sm:$0xff]  ;;  %452 = vst [vmem:[%s1643_s8 + $0x138] sm:$0xff] %v451_v39 }
  0x3a   : > { %v455_v41 = vld [vmem:[%s1638_s7 + $0xa40] sm:$0xff]  ;;  %454 = vst [vmem:[%s1643_s8 + $0x140] sm:$0xff] %v453_v40 }
  0x3b   : > { %456 = vst [vmem:[%s1643_s8 + $0x148] sm:$0xff] %v455_v41  ;;  %v457_v42 = vld [vmem:[%s1638_s7 + $0xa80] sm:$0xff] }
  0x3c   : > { %v459_v43 = vld [vmem:[%s1638_s7 + $0xac0] sm:$0xff]  ;;  %458 = vst [vmem:[%s1643_s8 + $0x150] sm:$0xff] %v457_v42 }
  0x3d   : > { %v461_v44 = vld [vmem:[%s1638_s7 + $0xb00] sm:$0xff]  ;;  %460 = vst [vmem:[%s1643_s8 + $0x158] sm:$0xff] %v459_v43 }
  0x3e   : > { %462 = vst [vmem:[%s1643_s8 + $0x160] sm:$0xff] %v461_v44  ;;  %v463_v45 = vld [vmem:[%s1638_s7 + $0xb40] sm:$0xff] }
  0x3f   : > { %v465_v46 = vld [vmem:[%s1638_s7 + $0xb80] sm:$0xff]  ;;  %464 = vst [vmem:[%s1643_s8 + $0x168] sm:$0xff] %v463_v45 }
  0x40   : > { %v467_v47 = vld [vmem:[%s1638_s7 + $0xbc0] sm:$0xff]  ;;  %466 = vst [vmem:[%s1643_s8 + $0x170] sm:$0xff] %v465_v46 }
  0x41   : > { %468 = vst [vmem:[%s1643_s8 + $0x178] sm:$0xff] %v467_v47  ;;  %v469_v48 = vld [vmem:[%s1638_s7 + $0xc00] sm:$0xff] }
  0x42   : > { %v471_v49 = vld [vmem:[%s1638_s7 + $0xc40] sm:$0xff]  ;;  %470 = vst [vmem:[%s1643_s8 + $0x180] sm:$0xff] %v469_v48 }
  0x43   : > { %v473_v50 = vld [vmem:[%s1638_s7 + $0xc80] sm:$0xff]  ;;  %472 = vst [vmem:[%s1643_s8 + $0x188] sm:$0xff] %v471_v49 }
  0x44   : > { %474 = vst [vmem:[%s1643_s8 + $0x190] sm:$0xff] %v473_v50  ;;  %v475_v51 = vld [vmem:[%s1638_s7 + $0xcc0] sm:$0xff] }
  0x45   : > { %v477_v52 = vld [vmem:[%s1638_s7 + $0xd00] sm:$0xff]  ;;  %476 = vst [vmem:[%s1643_s8 + $0x198] sm:$0xff] %v475_v51 }
  0x46   : > { %v479_v53 = vld [vmem:[%s1638_s7 + $0xd40] sm:$0xff]  ;;  %478 = vst [vmem:[%s1643_s8 + $0x1a0] sm:$0xff] %v477_v52 }
  0x47   : > { %480 = vst [vmem:[%s1643_s8 + $0x1a8] sm:$0xff] %v479_v53  ;;  %v481_v54 = vld [vmem:[%s1638_s7 + $0xd80] sm:$0xff] }
  0x48   : > { %v483_v55 = vld [vmem:[%s1638_s7 + $0xdc0] sm:$0xff]  ;;  %482 = vst [vmem:[%s1643_s8 + $0x1b0] sm:$0xff] %v481_v54 }
  0x49   : > { %v485_v56 = vld [vmem:[%s1638_s7 + $0xe00] sm:$0xff]  ;;  %484 = vst [vmem:[%s1643_s8 + $0x1b8] sm:$0xff] %v483_v55 }
  0x4a   : > { %486 = vst [vmem:[%s1643_s8 + $0x1c0] sm:$0xff] %v485_v56  ;;  %v487_v57 = vld [vmem:[%s1638_s7 + $0xe40] sm:$0xff] }
  0x4b   : > { %v489_v58 = vld [vmem:[%s1638_s7 + $0xe80] sm:$0xff]  ;;  %488 = vst [vmem:[%s1643_s8 + $0x1c8] sm:$0xff] %v487_v57 }
  0x4c   : > { %v491_v59 = vld [vmem:[%s1638_s7 + $0xec0] sm:$0xff]  ;;  %490 = vst [vmem:[%s1643_s8 + $0x1d0] sm:$0xff] %v489_v58 }
  0x4d   : > { %492 = vst [vmem:[%s1643_s8 + $0x1d8] sm:$0xff] %v491_v59  ;;  %v493_v60 = vld [vmem:[%s1638_s7 + $0xf00] sm:$0xff] }
  0x4e   : > { %v495_v61 = vld [vmem:[%s1638_s7 + $0xf40] sm:$0xff]  ;;  %494 = vst [vmem:[%s1643_s8 + $0x1e0] sm:$0xff] %v493_v60 }
  0x4f   : > { %v497_v62 = vld [vmem:[%s1638_s7 + $0xf80] sm:$0xff]  ;;  %496 = vst [vmem:[%s1643_s8 + $0x1e8] sm:$0xff] %v495_v61 }
  0x50   : > { %498 = vst [vmem:[%s1643_s8 + $0x1f0] sm:$0xff] %v497_v62  ;;  %v499_v63 = vld [vmem:[%s1638_s7 + $0xfc0] sm:$0xff] }
  0x51   : > { %500 = vst [vmem:[%s1643_s8 + $0x1f8] sm:$0xff] %v499_v63 }
  0x52 PF: > { %p1302_p6 = scmp.ge.s32.totalorder %s1563_s22, 1  ;;  %p534_p7 = scmp.lt.s32.totalorder %s1563_s22, 9 }
  0x54   : > { %p535_p8 = pnand %p1302_p6, %p534_p7 }
  0x55   : > { %s541_s9 = sand.u32 (!%p535_p8), 1, %s1547_s18   ;;  %v1776_v0 = vld [vmem:[%s1894_s0] sm:$0xff] (!%p535_p8)  ;;  %v1781_v1 = vld [vmem:[%s1894_s0 + $0x8] sm:$0xff] (!%p535_p8)  ;;  %s1304_s16 = sshll.u32 (!%p535_p8), %s1555_s20, 1 }
  0x56   : > { %538 = sbr.rel (%p535_p8) target bundleno = 380 (0x17c), region = 74  ;;  %s1303_s14 = sshll.u32 (!%p535_p8), %s541_s9, 9  ;;  %v1311_v2 = vcombine.high (!%p535_p8), %v1776_v0, %v1776_v0  ;;  %v1313_v3 = vcombine.high (!%p535_p8), %v1781_v1, %v1781_v1 }
  0x57   : > { %s1787_s15 = scalar_lea.vmem (!%p535_p8), [#allocation2], %s1303_s14  ;;  %p601_p9 = scmp.lt.s32.totalorder (!%p535_p8), %s1304_s16, 15 }
  0x58   : > { %v1425_v4 = vld [vmem:[%s1787_s15 + $0x4] ss:$8 sps:$4 sm:$0xff] (!%p535_p8)   ;;  %1062 = vmatprep.mubr.bf16.mxu1 (!%p535_p8), %v1311_v2  ;;  %1103 = vmatprep.mubr.bf16.mxu0 (!%p535_p8), %v1313_v3  ;;  %v1429_v6 = vld [vmem:[%s1787_s15] ss:$8 sps:$4 sm:$0xff] (!%p535_p8)   ;;  %v1431_v8 = vld [vmem:[%s1787_s15 + $0x14] ss:$8 sps:$4 sm:$0xff] (!%p535_p8)  }
  0x59   : > { %v1427_v5 = vld [vmem:[%s1787_s15 + $0x104] ss:$8 sps:$4 sm:$0xff] (!%p535_p8)   ;;  %1030 = vmatprep.subr.bf16.mxu1 (!%p535_p8), %v1425_v4  ;;  %v1430_v7 = vld [vmem:[%s1787_s15 + $0x100] ss:$8 sps:$4 sm:$0xff] (!%p535_p8)   ;;  %v1433_v9 = vld [vmem:[%s1787_s15 + $0x114] ss:$8 sps:$4 sm:$0xff] (!%p535_p8)  }
  0x5a   : > { %1071 = vmatprep.subr.bf16.mxu0 (!%p535_p8), %v1427_v5  ;;  %1031 = vmatpush1.bf16.msra.mxu1 (!%p535_p8), %v1429_v6  ;;  %v1435_v10 = vld [vmem:[%s1787_s15 + $0x10] ss:$8 sps:$4 sm:$0xff] (!%p535_p8)   ;;  %v1437_v12 = vld [vmem:[%s1787_s15 + $0x24] ss:$8 sps:$4 sm:$0xff] (!%p535_p8)   ;;  %v1441_v14 = vld [vmem:[%s1787_s15 + $0x20] ss:$8 sps:$4 sm:$0xff] (!%p535_p8)   ;;  %v1310_v6 = vcombine.low (!%p535_p8), %v1776_v0, %v1776_v0 }
  0x5b   : > { %1072 = vmatpush1.bf16.msra.mxu0 (!%p535_p8), %v1430_v7  ;;  %1032 = vmatprep.subr.bf16.mxu1 (!%p535_p8), %v1431_v8  ;;  %v1436_v11 = vld [vmem:[%s1787_s15 + $0x110] ss:$8 sps:$4 sm:$0xff] (!%p535_p8)   ;;  %v1439_v13 = vld [vmem:[%s1787_s15 + $0x124] ss:$8 sps:$4 sm:$0xff] (!%p535_p8)   ;;  %v1442_v15 = vld [vmem:[%s1787_s15 + $0x120] ss:$8 sps:$4 sm:$0xff] (!%p535_p8)   ;;  %v1312_v7 = vcombine.low (!%p535_p8), %v1781_v1, %v1781_v1  ;;  %v1114_v8 = vlaneseq (!%p535_p8) }
  0x5c   : > { %1073 = vmatprep.subr.bf16.mxu0 (!%p535_p8), %v1433_v9  ;;  %v1443_v16 = vld [vmem:[%s1787_s15 + $0x34] ss:$8 sps:$4 sm:$0xff] (!%p535_p8)   ;;  %v1447_v18 = vld [vmem:[%s1787_s15 + $0x30] ss:$8 sps:$4 sm:$0xff] (!%p535_p8)   ;;  %v1449_v20 = vld [vmem:[%s1787_s15 + $0x44] ss:$8 sps:$4 sm:$0xff] (!%p535_p8)  }
  0x5d   : > { %v1445_v17 = vld [vmem:[%s1787_s15 + $0x134] ss:$8 sps:$4 sm:$0xff]   ;;  %v1448_v19 = vld [vmem:[%s1787_s15 + $0x130] ss:$8 sps:$4 sm:$0xff]   ;;  %v1451_v21 = vld [vmem:[%s1787_s15 + $0x144] ss:$8 sps:$4 sm:$0xff]  }
  0x5e   : > { %1033 = vmatpush1.bf16.msra.mxu1 %v1435_v10  ;;  %v1453_v22 = vld [vmem:[%s1787_s15 + $0x40] ss:$8 sps:$4 sm:$0xff]   ;;  %v1455_v24 = vld [vmem:[%s1787_s15 + $0x54] ss:$8 sps:$4 sm:$0xff]   ;;  %v1459_v26 = vld [vmem:[%s1787_s15 + $0x50] ss:$8 sps:$4 sm:$0xff]  }
  0x5f   : > { %1074 = vmatpush1.bf16.msra.mxu0 %v1436_v11  ;;  %1034 = vmatprep.subr.bf16.mxu1 %v1437_v12  ;;  %v1454_v23 = vld [vmem:[%s1787_s15 + $0x140] ss:$8 sps:$4 sm:$0xff]   ;;  %v1457_v25 = vld [vmem:[%s1787_s15 + $0x154] ss:$8 sps:$4 sm:$0xff]   ;;  %v1460_v27 = vld [vmem:[%s1787_s15 + $0x150] ss:$8 sps:$4 sm:$0xff]  }
  0x60   : > { %1075 = vmatprep.subr.bf16.mxu0 %v1439_v13  ;;  %v1461_v28 = vld [vmem:[%s1787_s15 + $0x64] ss:$8 sps:$4 sm:$0xff]   ;;  %v1465_v30 = vld [vmem:[%s1787_s15 + $0x60] ss:$8 sps:$4 sm:$0xff]   ;;  %v1467_v32 = vld [vmem:[%s1787_s15 + $0x74] ss:$8 sps:$4 sm:$0xff]  }
  0x61   : > { %v1463_v29 = vld [vmem:[%s1787_s15 + $0x164] ss:$8 sps:$4 sm:$0xff]   ;;  %v1466_v31 = vld [vmem:[%s1787_s15 + $0x160] ss:$8 sps:$4 sm:$0xff]   ;;  %v1469_v33 = vld [vmem:[%s1787_s15 + $0x174] ss:$8 sps:$4 sm:$0xff]  }
  0x62   : > { %1035 = vmatpush1.bf16.msra.mxu1 %v1441_v14  ;;  %v1471_v34 = vld [vmem:[%s1787_s15 + $0x70] ss:$8 sps:$4 sm:$0xff]   ;;  %v1473_v36 = vld [vmem:[%s1787_s15 + $0x84] ss:$8 sps:$4 sm:$0xff]   ;;  %v1477_v38 = vld [vmem:[%s1787_s15 + $0x80] ss:$8 sps:$4 sm:$0xff]  }
  0x63   : > { %1076 = vmatpush1.bf16.msra.mxu0 %v1442_v15  ;;  %1036 = vmatprep.subr.bf16.mxu1 %v1443_v16  ;;  %v1472_v35 = vld [vmem:[%s1787_s15 + $0x170] ss:$8 sps:$4 sm:$0xff]   ;;  %v1475_v37 = vld [vmem:[%s1787_s15 + $0x184] ss:$8 sps:$4 sm:$0xff]   ;;  %v1478_v39 = vld [vmem:[%s1787_s15 + $0x180] ss:$8 sps:$4 sm:$0xff]  }
  0x64   : > { %1077 = vmatprep.subr.bf16.mxu0 %v1445_v17  ;;  %v1479_v40 = vld [vmem:[%s1787_s15 + $0x94] ss:$8 sps:$4 sm:$0xff]   ;;  %v1483_v42 = vld [vmem:[%s1787_s15 + $0x90] ss:$8 sps:$4 sm:$0xff]   ;;  %v1485_v44 = vld [vmem:[%s1787_s15 + $0xa4] ss:$8 sps:$4 sm:$0xff]  }
  0x65   : > { %v1481_v41 = vld [vmem:[%s1787_s15 + $0x194] ss:$8 sps:$4 sm:$0xff]   ;;  %v1484_v43 = vld [vmem:[%s1787_s15 + $0x190] ss:$8 sps:$4 sm:$0xff]   ;;  %v1487_v45 = vld [vmem:[%s1787_s15 + $0x1a4] ss:$8 sps:$4 sm:$0xff]  }
  0x66   : > { %1037 = vmatpush1.bf16.msra.mxu1 %v1447_v18  ;;  %v1489_v46 = vld [vmem:[%s1787_s15 + $0xa0] ss:$8 sps:$4 sm:$0xff]   ;;  %v1491_v48 = vld [vmem:[%s1787_s15 + $0xb4] ss:$8 sps:$4 sm:$0xff]   ;;  %v1495_v50 = vld [vmem:[%s1787_s15 + $0xb0] ss:$8 sps:$4 sm:$0xff]  }
  0x67   : > { %1078 = vmatpush1.bf16.msra.mxu0 %v1448_v19  ;;  %1038 = vmatprep.subr.bf16.mxu1 %v1449_v20  ;;  %v1490_v47 = vld [vmem:[%s1787_s15 + $0x1a0] ss:$8 sps:$4 sm:$0xff]   ;;  %v1493_v49 = vld [vmem:[%s1787_s15 + $0x1b4] ss:$8 sps:$4 sm:$0xff]   ;;  %v1496_v51 = vld [vmem:[%s1787_s15 + $0x1b0] ss:$8 sps:$4 sm:$0xff]  }
  0x68   : > { %1079 = vmatprep.subr.bf16.mxu0 %v1451_v21  ;;  %v1497_v52 = vld [vmem:[%s1787_s15 + $0xc4] ss:$8 sps:$4 sm:$0xff]   ;;  %v1501_v54 = vld [vmem:[%s1787_s15 + $0xc0] ss:$8 sps:$4 sm:$0xff]   ;;  %v1503_v56 = vld [vmem:[%s1787_s15 + $0xd4] ss:$8 sps:$4 sm:$0xff]  }
  0x69   : > { %v1499_v53 = vld [vmem:[%s1787_s15 + $0x1c4] ss:$8 sps:$4 sm:$0xff]   ;;  %v1502_v55 = vld [vmem:[%s1787_s15 + $0x1c0] ss:$8 sps:$4 sm:$0xff]   ;;  %v1505_v57 = vld [vmem:[%s1787_s15 + $0x1d4] ss:$8 sps:$4 sm:$0xff]  }
  0x6a   : > { %1039 = vmatpush1.bf16.msra.mxu1 %v1453_v22  ;;  %v1507_v58 = vld [vmem:[%s1787_s15 + $0xd0] ss:$8 sps:$4 sm:$0xff]   ;;  %v1509_v60 = vld [vmem:[%s1787_s15 + $0xe4] ss:$8 sps:$4 sm:$0xff]   ;;  %v1513_v62 = vld [vmem:[%s1787_s15 + $0xe0] ss:$8 sps:$4 sm:$0xff]  }
  0x6b   : > { %1080 = vmatpush1.bf16.msra.mxu0 %v1454_v23  ;;  %1040 = vmatprep.subr.bf16.mxu1 %v1455_v24  ;;  %v1508_v59 = vld [vmem:[%s1787_s15 + $0x1d0] ss:$8 sps:$4 sm:$0xff]   ;;  %v1511_v61 = vld [vmem:[%s1787_s15 + $0x1e4] ss:$8 sps:$4 sm:$0xff]   ;;  %v1514_v63 = vld [vmem:[%s1787_s15 + $0x1e0] ss:$8 sps:$4 sm:$0xff]  }
  0x6c   : > { %1081 = vmatprep.subr.bf16.mxu0 %v1457_v25  ;;  %v1515_v2 = vld [vmem:[%s1787_s15 + $0xf4] ss:$8 sps:$4 sm:$0xff]   ;;  %v1519_v4 = vld [vmem:[%s1787_s15 + $0xf0] ss:$8 sps:$4 sm:$0xff]   ;;  %s1907_s16 = smov (!%p601_p9, %s1304_s16), 15  ;;  %v1115_v9 = vshrl.u32 %v1114_v8, 7 }
  0x6d   : > { %v1517_v3 = vld [vmem:[%s1787_s15 + $0x1f4] ss:$8 sps:$4 sm:$0xff]   ;;  %v1520_v5 = vld [vmem:[%s1787_s15 + $0x1f0] ss:$8 sps:$4 sm:$0xff]   ;;  %s603_s24 = scalar_lea.vmem %s1896_s2, %s1907_s16  ;;  %s1307_s25 = sshll.u32 %s1907_s16, 2 }
  0x6e   : > { %1041 = vmatpush1.bf16.msra.mxu1 %v1459_v26  ;;  %s608_s29 = scalar_lea.vmem %s1897_s3, %s1907_s16  ;;  %v1116_v0 = vsub.s32 0, %v1115_v9  ;;  %v1112_v1 = vld [vmem:[%s603_s24] sm:$0x3]  ;;  %v1120_v10 = vsub.s32 1, %v1115_v9  ;;  %s618_s6 = scalar_lea.vmem %s1898_s4, %s1307_s25 }
  0x6f   : > { %1082 = vmatpush1.bf16.msra.mxu0 %v1460_v27  ;;  %1042 = vmatprep.subr.bf16.mxu1 %v1461_v28  ;;  %v1126_v11 = vld [vmem:[%s608_s29] sm:$0x3]  ;;  %s628_s9 = scalar_lea.vmem %s1899_s5, %s1307_s25 }
  0x70   : > { %1083 = vmatprep.subr.bf16.mxu0 %v1463_v29  ;;  %v1117_v12 = vrot.slane %v1112_v1, %v1116_v0  ;;  %v1140_v15 = vld [vmem:[%s618_s6] sm:$0xff]  ;;  %v1121_v16 = vrot.slane %v1112_v1, %v1120_v10  ;;  %v1131_v18 = vrot.slane %v1126_v11, %v1116_v0  ;;  %v1135_v22 = vrot.slane %v1126_v11, %v1120_v10 }
  0x71   : > { %v1141_v26 = vunpack.c.l.bf16 %v1140_v15 }
  0x72   : > { %1043 = vmatpush1.bf16.msra.mxu1 %v1465_v30  ;;  %v1142_v30 = vunpack.c.h.bf16 %v1140_v15 }
  0x73   : > { %1084 = vmatpush1.bf16.msra.mxu0 %v1466_v31  ;;  %1044 = vmatprep.subr.bf16.mxu1 %v1467_v32 }
  0x74   : > { %1085 = vmatprep.subr.bf16.mxu0 %v1469_v33 }
  0x76   : > { %1045 = vmatpush1.bf16.msra.mxu1 %v1471_v34 }
  0x77   : > { %1086 = vmatpush1.bf16.msra.mxu0 %v1472_v35  ;;  %1046 = vmatprep.subr.bf16.mxu1 %v1473_v36 }
  0x78   : > { %1087 = vmatprep.subr.bf16.mxu0 %v1475_v37 }
  0x7a   : > { %1047 = vmatpush1.bf16.msra.mxu1 %v1477_v38 }
  0x7b   : > { %1088 = vmatpush1.bf16.msra.mxu0 %v1478_v39  ;;  %1048 = vmatprep.subr.bf16.mxu1 %v1479_v40 }
  0x7c   : > { %1089 = vmatprep.subr.bf16.mxu0 %v1481_v41 }
  0x7e   : > { %1049 = vmatpush1.bf16.msra.mxu1 %v1483_v42 }
  0x7f   : > { %1090 = vmatpush1.bf16.msra.mxu0 %v1484_v43  ;;  %1050 = vmatprep.subr.bf16.mxu1 %v1485_v44 }
  0x80   : > { %1091 = vmatprep.subr.bf16.mxu0 %v1487_v45 }
  0x82   : > { %1051 = vmatpush1.bf16.msra.mxu1 %v1489_v46 }
  0x83   : > { %1092 = vmatpush1.bf16.msra.mxu0 %v1490_v47  ;;  %1052 = vmatprep.subr.bf16.mxu1 %v1491_v48 }
  0x84   : > { %1093 = vmatprep.subr.bf16.mxu0 %v1493_v49 }
  0x86   : > { %1053 = vmatpush1.bf16.msra.mxu1 %v1495_v50 }
  0x87   : > { %1094 = vmatpush1.bf16.msra.mxu0 %v1496_v51  ;;  %1054 = vmatprep.subr.bf16.mxu1 %v1497_v52 }
  0x88   : > { %1095 = vmatprep.subr.bf16.mxu0 %v1499_v53 }
  0x8a   : > { %1055 = vmatpush1.bf16.msra.mxu1 %v1501_v54 }
  0x8b   : > { %1096 = vmatpush1.bf16.msra.mxu0 %v1502_v55  ;;  %1056 = vmatprep.subr.bf16.mxu1 %v1503_v56 }
  0x8c   : > { %1097 = vmatprep.subr.bf16.mxu0 %v1505_v57 }
  0x8e   : > { %1057 = vmatpush1.bf16.msra.mxu1 %v1507_v58 }
  0x8f   : > { %1098 = vmatpush1.bf16.msra.mxu0 %v1508_v59  ;;  %1058 = vmatprep.subr.bf16.mxu1 %v1509_v60 }
  0x90   : > { %1099 = vmatprep.subr.bf16.mxu0 %v1511_v61 }
  0x92   : > { %1059 = vmatpush1.bf16.msra.mxu1 %v1513_v62 }
  0x93   : > { %1100 = vmatpush1.bf16.msra.mxu0 %v1514_v63  ;;  %1060 = vmatprep.subr.bf16.mxu1 %v1515_v2 }
  0x94   : > { %1101 = vmatprep.subr.bf16.mxu0 %v1517_v3 }
  0x96   : > { %1061 = vmatpush1.bf16.msra.mxu1 %v1519_v4 }
  0x97   : > { %1102 = vmatpush1.bf16.msra.mxu0 %v1520_v5 }
  0x99   : > { %1063 = vmatmul.mubr.bf16.vlgmr.msra.gmra.mrb[0].mxu1 %v1310_v6 }
  0x9a   : > { %1104 = vmatmul.mubr.bf16.vlgmr.msra.gmra.mrb[0].mxu0 %v1312_v7 }
 0x16c   : > { %v1064_v13 = vpop.f32.mrb[0].mxu1 }
 0x16d   : > { %v1105_v14 = vpop.f32.mrb[0].mxu0  ;;  %v1066_v19 = vpop.f32.mrb[1].mxu1 }
 0x16e   : > { %v1106_v17 = vadd.f32 %v1105_v14, %v1064_v13  ;;  %v1107_v20 = vpop.f32.mrb[1].mxu0  ;;  %v1068_v23 = vpop.f32.mrb[2].mxu1 }
 0x16f   : > { %v1108_v21 = vadd.f32 %v1107_v20, %v1066_v19  ;;  %v1109_v24 = vpop.f32.mrb[2].mxu0  ;;  %v1069_v27 = vpop.f32.mrb[3].mxu1 }
 0x170   : > { %v1124_v25 = vmul.f32 %v1117_v12, %v1106_v17  ;;  %v1110_v28 = vpop.f32.mrb[3].mxu0 }
 0x171   : > { %v1125_v29 = vmul.f32 %v1121_v16, %v1108_v21 }
 0x172   : > { %v1138_v31 = vadd.f32 %v1131_v18, %v1124_v25 }
 0x173   : > { %v1139_v32 = vadd.f32 %v1135_v22, %v1125_v29 }
 0x174   : > { %v1143_v33 = vadd.f32 %v1141_v26, %v1138_v31 }
 0x175   : > { %v1144_v34 = vadd.f32 %v1142_v30, %v1139_v32 }
 0x176   : > { %v1145_v35 = vmax.f32 %v1143_v33, 0.0 }
 0x177   : > { %v1146_v36 = vmax.f32 %v1144_v34, 0.0 }
 0x179   : > { %v1382_v37 = vpack.c.bf16 %v1146_v36, %v1145_v35 }
 0x17b   : > { %1155 = vst [vmem:[%s628_s9] sm:$0xff] %v1382_v37 }
 0x17c PF: > { %s15_s22 = sadd.s32 1, %s1563_s22   ;;  %s1900_s18 = smov %s1551_s19 }
 0x17d   : > { %p12_p10 = scmp.ge.s32.totalorder %s15_s22, 10   ;;  %s1901_s19 = smov %s1630_s26 }
 0x17e   : > { %s1902_s20 = smov %s1559_s21  ;;  %s1903_s21 = smov %s1905_s23 }
 0x17f   :  { %14 = sbr.rel (!%p12_p10) target bundleno = 3 (0x3), region = 125 }

// kernel: resnet50_forward.104
= control target key start
LH: loop header
LB: loop body
LE: loop exit
PB: predicated region body
PF: predicated region fallthrough
CT: control target
= control target key end

     0   :  { %s1598_s15 = smov 0   ;;  %s1600_s16 = smov 0   ;;  %s1918_s0 = inlined_call_operand.vmem [shape: bf16[8,2048], index: 0, kind: input, shape index: {}]   ;;  %s1919_s1 = inlined_call_operand.vmem [shape: bf16[2048,512], index: 1, kind: input, shape index: {}]   ;;  %s1920_s2 = inlined_call_operand.vmem [shape: f32[1,512], index: 2, kind: input, shape index: {}]   ;;  %s1921_s3 = inlined_call_operand.vmem [shape: f32[1,512], index: 3, kind: input, shape index: {}]   ;;  %s1922_s4 = inlined_call_operand.vmem [shape: bf16[8,512], index: 4, kind: output, shape index: {}]  }
   0x1   :  { %s1602_s17 = smov 0   ;;  %s1604_s18 = smov 0  }
   0x2   :  { %s1606_s19 = smov 0   ;;  %s1608_s20 = smov 0  }
   0x3   :  { %s1610_s21 = smov 0  }
   0x4 LB: > { %s26_s22 = sadd.s32 1, %s1562_s19  ;;  %s29_s23 = sadd.s32 1, %s1566_s20  ;;  %s1570_s21 = sphi %s1610_s21, %s14_s21   ;;  %s1566_s20 = sphi %s1608_s20, %s1928_s20   ;;  %s1562_s19 = sphi %s1606_s19, %s1927_s19   ;;  %s1558_s18 = sphi %s1604_s18, %s1926_s18   ;;  %s1554_s17 = sphi %s1602_s17, %s1925_s17   ;;  %s1550_s16 = sphi %s1600_s16, %s1924_s16   ;;  %s1546_s15 = sphi %s1598_s15, %s1923_s15  }
   0x5   : > { %p27_p0 = scmp.ge.s32.totalorder %s26_s22, 4  ;;  %p77_p1 = scmp.ne.s32.totalorder %s1550_s16, %s1546_s15 }
   0x6   : > { %p78_p2 = scmp.eq.s32.totalorder %s1570_s21, 0  ;;  %s70_s27 = sadd.s32 1, %s1550_s16 }
   0x7   : > { %s1930_s22 = smov (%p27_p0, %s26_s22), 0  ;;  %s1932_s23 = smov (!%p27_p0, %s29_s23), %s1566_s20 }
   0x8   : > { %p79_p3 = por %p78_p2, %p77_p1  ;;  %p31_p4 = scmp.ge.s32.totalorder %s1932_s23, 2 }
   0x9   : > { %s65_s24 = ssub.s32 %s1562_s19, %s1930_s22  ;;  %p1270_p6 = scmp.ge.s32.totalorder %s1570_s21, 8 }
   0xa   : > { %s1934_s23 = smov (%p31_p4, %s1932_s23), 0 }
   0xb   : > { %s66_s25 = ssub.s32 %s1566_s20, %s1934_s23  ;;  %183 = sbr.rel (%p1270_p6) target bundleno = 57 (0x39), region = 16 }
   0xc   : > { %s67_s26 = sor.u32 %s66_s25, %s65_s24 }
   0xd   : > { %p68_p5 = scmp.eq.s32.totalorder %s67_s26, 0 }
   0xf   : > { %s1649_s28 = scalar_select %p68_p5, %s1550_s16, %s70_s27  }
  0x12   : > { %199 = sbr.rel (!%p79_p3) target bundleno = 57 (0x39), region = 24  ;;  %s201_s29 = sand.u32 (%p79_p3), 1, %s1550_s16  }
  0x13   : > { %s1273_s30 = sshll.u32 (%p79_p3), %s1566_s20, 1  ;;  %s1271_s5 = sshll.u32 (%p79_p3), %s201_s29, 9 }
  0x14   : > { %s1357_s6 = sshll.u32 (%p79_p3), %s1562_s19, 8  ;;  %s1663_s12 = scalar_lea.vmem (%p79_p3), [#allocation3], %s1271_s5 }
  0x15   : > { %s207_s7 = sadd.s32 (%p79_p3), %s1357_s6, %s1273_s30 }
  0x16   : > { %s1275_s8 = sshll.u32 (%p79_p3), %s207_s7, 2 }
  0x17   : > { %s1658_s11 = scalar_lea.vmem (%p79_p3), %s1919_s1, %s1275_s8 }
  0x18   : > { %v363_v0 = vld [vmem:[%s1658_s11] sm:$0xff] (%p79_p3)  ;;  %v365_v1 = vld [vmem:[%s1658_s11 + $0x10] sm:$0xff] (%p79_p3) }
  0x19   : > { %v367_v2 = vld [vmem:[%s1658_s11 + $0x20] sm:$0xff]  ;;  %364 = vst [vmem:[%s1663_s12] sm:$0xff] %v363_v0  ;;  %366 = vst [vmem:[%s1663_s12 + $0x8] sm:$0xff] %v365_v1  ;;  %v369_v3 = vld [vmem:[%s1658_s11 + $0x30] sm:$0xff] }
  0x1a   : > { %368 = vst [vmem:[%s1663_s12 + $0x10] sm:$0xff] %v367_v2  ;;  %v371_v4 = vld [vmem:[%s1658_s11 + $0x40] sm:$0xff]  ;;  %v373_v5 = vld [vmem:[%s1658_s11 + $0x50] sm:$0xff]  ;;  %370 = vst [vmem:[%s1663_s12 + $0x18] sm:$0xff] %v369_v3 }
  0x1b   : > { %372 = vst [vmem:[%s1663_s12 + $0x20] sm:$0xff] %v371_v4  ;;  %374 = vst [vmem:[%s1663_s12 + $0x28] sm:$0xff] %v373_v5  ;;  %v375_v6 = vld [vmem:[%s1658_s11 + $0x60] sm:$0xff]  ;;  %v377_v7 = vld [vmem:[%s1658_s11 + $0x70] sm:$0xff] }
  0x1c   : > { %v379_v8 = vld [vmem:[%s1658_s11 + $0x80] sm:$0xff]  ;;  %376 = vst [vmem:[%s1663_s12 + $0x30] sm:$0xff] %v375_v6  ;;  %378 = vst [vmem:[%s1663_s12 + $0x38] sm:$0xff] %v377_v7  ;;  %v381_v9 = vld [vmem:[%s1658_s11 + $0x90] sm:$0xff] }
  0x1d   : > { %380 = vst [vmem:[%s1663_s12 + $0x40] sm:$0xff] %v379_v8  ;;  %v383_v10 = vld [vmem:[%s1658_s11 + $0xa0] sm:$0xff]  ;;  %v385_v11 = vld [vmem:[%s1658_s11 + $0xb0] sm:$0xff]  ;;  %382 = vst [vmem:[%s1663_s12 + $0x48] sm:$0xff] %v381_v9 }
  0x1e   : > { %384 = vst [vmem:[%s1663_s12 + $0x50] sm:$0xff] %v383_v10  ;;  %386 = vst [vmem:[%s1663_s12 + $0x58] sm:$0xff] %v385_v11  ;;  %v387_v12 = vld [vmem:[%s1658_s11 + $0xc0] sm:$0xff]  ;;  %v389_v13 = vld [vmem:[%s1658_s11 + $0xd0] sm:$0xff] }
  0x1f   : > { %v391_v14 = vld [vmem:[%s1658_s11 + $0xe0] sm:$0xff]  ;;  %388 = vst [vmem:[%s1663_s12 + $0x60] sm:$0xff] %v387_v12  ;;  %390 = vst [vmem:[%s1663_s12 + $0x68] sm:$0xff] %v389_v13  ;;  %v393_v15 = vld [vmem:[%s1658_s11 + $0xf0] sm:$0xff] }
  0x20   : > { %392 = vst [vmem:[%s1663_s12 + $0x70] sm:$0xff] %v391_v14  ;;  %v395_v16 = vld [vmem:[%s1658_s11 + $0x100] sm:$0xff]  ;;  %v397_v17 = vld [vmem:[%s1658_s11 + $0x110] sm:$0xff]  ;;  %394 = vst [vmem:[%s1663_s12 + $0x78] sm:$0xff] %v393_v15 }
  0x21   : > { %396 = vst [vmem:[%s1663_s12 + $0x80] sm:$0xff] %v395_v16  ;;  %398 = vst [vmem:[%s1663_s12 + $0x88] sm:$0xff] %v397_v17  ;;  %v399_v18 = vld [vmem:[%s1658_s11 + $0x120] sm:$0xff]  ;;  %v401_v19 = vld [vmem:[%s1658_s11 + $0x130] sm:$0xff] }
  0x22   : > { %v403_v20 = vld [vmem:[%s1658_s11 + $0x140] sm:$0xff]  ;;  %400 = vst [vmem:[%s1663_s12 + $0x90] sm:$0xff] %v399_v18  ;;  %402 = vst [vmem:[%s1663_s12 + $0x98] sm:$0xff] %v401_v19  ;;  %v405_v21 = vld [vmem:[%s1658_s11 + $0x150] sm:$0xff] }
  0x23   : > { %404 = vst [vmem:[%s1663_s12 + $0xa0] sm:$0xff] %v403_v20  ;;  %v407_v22 = vld [vmem:[%s1658_s11 + $0x160] sm:$0xff]  ;;  %v409_v23 = vld [vmem:[%s1658_s11 + $0x170] sm:$0xff]  ;;  %406 = vst [vmem:[%s1663_s12 + $0xa8] sm:$0xff] %v405_v21 }
  0x24   : > { %408 = vst [vmem:[%s1663_s12 + $0xb0] sm:$0xff] %v407_v22  ;;  %410 = vst [vmem:[%s1663_s12 + $0xb8] sm:$0xff] %v409_v23  ;;  %v411_v24 = vld [vmem:[%s1658_s11 + $0x180] sm:$0xff]  ;;  %v413_v25 = vld [vmem:[%s1658_s11 + $0x190] sm:$0xff] }
  0x25   : > { %v415_v26 = vld [vmem:[%s1658_s11 + $0x1a0] sm:$0xff]  ;;  %412 = vst [vmem:[%s1663_s12 + $0xc0] sm:$0xff] %v411_v24  ;;  %414 = vst [vmem:[%s1663_s12 + $0xc8] sm:$0xff] %v413_v25  ;;  %v417_v27 = vld [vmem:[%s1658_s11 + $0x1b0] sm:$0xff] }
  0x26   : > { %416 = vst [vmem:[%s1663_s12 + $0xd0] sm:$0xff] %v415_v26  ;;  %v419_v28 = vld [vmem:[%s1658_s11 + $0x1c0] sm:$0xff]  ;;  %v421_v29 = vld [vmem:[%s1658_s11 + $0x1d0] sm:$0xff]  ;;  %418 = vst [vmem:[%s1663_s12 + $0xd8] sm:$0xff] %v417_v27 }
  0x27   : > { %420 = vst [vmem:[%s1663_s12 + $0xe0] sm:$0xff] %v419_v28  ;;  %422 = vst [vmem:[%s1663_s12 + $0xe8] sm:$0xff] %v421_v29  ;;  %v423_v30 = vld [vmem:[%s1658_s11 + $0x1e0] sm:$0xff]  ;;  %v425_v31 = vld [vmem:[%s1658_s11 + $0x1f0] sm:$0xff] }
  0x28   : > { %v427_v32 = vld [vmem:[%s1658_s11 + $0x200] sm:$0xff]  ;;  %424 = vst [vmem:[%s1663_s12 + $0xf0] sm:$0xff] %v423_v30  ;;  %426 = vst [vmem:[%s1663_s12 + $0xf8] sm:$0xff] %v425_v31  ;;  %v429_v33 = vld [vmem:[%s1658_s11 + $0x210] sm:$0xff] }
  0x29   : > { %428 = vst [vmem:[%s1663_s12 + $0x100] sm:$0xff] %v427_v32  ;;  %v431_v34 = vld [vmem:[%s1658_s11 + $0x220] sm:$0xff]  ;;  %v433_v35 = vld [vmem:[%s1658_s11 + $0x230] sm:$0xff]  ;;  %430 = vst [vmem:[%s1663_s12 + $0x108] sm:$0xff] %v429_v33 }
  0x2a   : > { %432 = vst [vmem:[%s1663_s12 + $0x110] sm:$0xff] %v431_v34  ;;  %434 = vst [vmem:[%s1663_s12 + $0x118] sm:$0xff] %v433_v35  ;;  %v435_v36 = vld [vmem:[%s1658_s11 + $0x240] sm:$0xff]  ;;  %v437_v37 = vld [vmem:[%s1658_s11 + $0x250] sm:$0xff] }
  0x2b   : > { %v439_v38 = vld [vmem:[%s1658_s11 + $0x260] sm:$0xff]  ;;  %436 = vst [vmem:[%s1663_s12 + $0x120] sm:$0xff] %v435_v36  ;;  %438 = vst [vmem:[%s1663_s12 + $0x128] sm:$0xff] %v437_v37  ;;  %v441_v39 = vld [vmem:[%s1658_s11 + $0x270] sm:$0xff] }
  0x2c   : > { %440 = vst [vmem:[%s1663_s12 + $0x130] sm:$0xff] %v439_v38  ;;  %v443_v40 = vld [vmem:[%s1658_s11 + $0x280] sm:$0xff]  ;;  %v445_v41 = vld [vmem:[%s1658_s11 + $0x290] sm:$0xff]  ;;  %442 = vst [vmem:[%s1663_s12 + $0x138] sm:$0xff] %v441_v39 }
  0x2d   : > { %444 = vst [vmem:[%s1663_s12 + $0x140] sm:$0xff] %v443_v40  ;;  %446 = vst [vmem:[%s1663_s12 + $0x148] sm:$0xff] %v445_v41  ;;  %v447_v42 = vld [vmem:[%s1658_s11 + $0x2a0] sm:$0xff]  ;;  %v449_v43 = vld [vmem:[%s1658_s11 + $0x2b0] sm:$0xff] }
  0x2e   : > { %v451_v44 = vld [vmem:[%s1658_s11 + $0x2c0] sm:$0xff]  ;;  %448 = vst [vmem:[%s1663_s12 + $0x150] sm:$0xff] %v447_v42  ;;  %450 = vst [vmem:[%s1663_s12 + $0x158] sm:$0xff] %v449_v43  ;;  %v453_v45 = vld [vmem:[%s1658_s11 + $0x2d0] sm:$0xff] }
  0x2f   : > { %452 = vst [vmem:[%s1663_s12 + $0x160] sm:$0xff] %v451_v44  ;;  %v455_v46 = vld [vmem:[%s1658_s11 + $0x2e0] sm:$0xff]  ;;  %v457_v47 = vld [vmem:[%s1658_s11 + $0x2f0] sm:$0xff]  ;;  %454 = vst [vmem:[%s1663_s12 + $0x168] sm:$0xff] %v453_v45 }
  0x30   : > { %456 = vst [vmem:[%s1663_s12 + $0x170] sm:$0xff] %v455_v46  ;;  %458 = vst [vmem:[%s1663_s12 + $0x178] sm:$0xff] %v457_v47  ;;  %v459_v48 = vld [vmem:[%s1658_s11 + $0x300] sm:$0xff]  ;;  %v461_v49 = vld [vmem:[%s1658_s11 + $0x310] sm:$0xff] }
  0x31   : > { %v463_v50 = vld [vmem:[%s1658_s11 + $0x320] sm:$0xff]  ;;  %460 = vst [vmem:[%s1663_s12 + $0x180] sm:$0xff] %v459_v48  ;;  %462 = vst [vmem:[%s1663_s12 + $0x188] sm:$0xff] %v461_v49  ;;  %v465_v51 = vld [vmem:[%s1658_s11 + $0x330] sm:$0xff] }
  0x32   : > { %464 = vst [vmem:[%s1663_s12 + $0x190] sm:$0xff] %v463_v50  ;;  %v467_v52 = vld [vmem:[%s1658_s11 + $0x340] sm:$0xff]  ;;  %v469_v53 = vld [vmem:[%s1658_s11 + $0x350] sm:$0xff]  ;;  %466 = vst [vmem:[%s1663_s12 + $0x198] sm:$0xff] %v465_v51 }
  0x33   : > { %468 = vst [vmem:[%s1663_s12 + $0x1a0] sm:$0xff] %v467_v52  ;;  %470 = vst [vmem:[%s1663_s12 + $0x1a8] sm:$0xff] %v469_v53  ;;  %v471_v54 = vld [vmem:[%s1658_s11 + $0x360] sm:$0xff]  ;;  %v473_v55 = vld [vmem:[%s1658_s11 + $0x370] sm:$0xff] }
  0x34   : > { %v475_v56 = vld [vmem:[%s1658_s11 + $0x380] sm:$0xff]  ;;  %472 = vst [vmem:[%s1663_s12 + $0x1b0] sm:$0xff] %v471_v54  ;;  %474 = vst [vmem:[%s1663_s12 + $0x1b8] sm:$0xff] %v473_v55  ;;  %v477_v57 = vld [vmem:[%s1658_s11 + $0x390] sm:$0xff] }
  0x35   : > { %476 = vst [vmem:[%s1663_s12 + $0x1c0] sm:$0xff] %v475_v56  ;;  %v479_v58 = vld [vmem:[%s1658_s11 + $0x3a0] sm:$0xff]  ;;  %v481_v59 = vld [vmem:[%s1658_s11 + $0x3b0] sm:$0xff]  ;;  %478 = vst [vmem:[%s1663_s12 + $0x1c8] sm:$0xff] %v477_v57 }
  0x36   : > { %480 = vst [vmem:[%s1663_s12 + $0x1d0] sm:$0xff] %v479_v58  ;;  %482 = vst [vmem:[%s1663_s12 + $0x1d8] sm:$0xff] %v481_v59  ;;  %v483_v60 = vld [vmem:[%s1658_s11 + $0x3c0] sm:$0xff]  ;;  %v485_v61 = vld [vmem:[%s1658_s11 + $0x3d0] sm:$0xff] }
  0x37   : > { %v487_v62 = vld [vmem:[%s1658_s11 + $0x3e0] sm:$0xff]  ;;  %484 = vst [vmem:[%s1663_s12 + $0x1e0] sm:$0xff] %v483_v60  ;;  %486 = vst [vmem:[%s1663_s12 + $0x1e8] sm:$0xff] %v485_v61  ;;  %v489_v63 = vld [vmem:[%s1658_s11 + $0x3f0] sm:$0xff] }
  0x38   : > { %488 = vst [vmem:[%s1663_s12 + $0x1f0] sm:$0xff] %v487_v62  ;;  %490 = vst [vmem:[%s1663_s12 + $0x1f8] sm:$0xff] %v489_v63 }
  0x39 PF: > { %p1276_p7 = scmp.ge.s32.totalorder %s1570_s21, 1  ;;  %p511_p8 = scmp.lt.s32.totalorder %s1570_s21, 9 }
  0x3b   : > { %p512_p9 = pnand %p1276_p7, %p511_p8 }
  0x3c   : > { %s518_s13 = sand.u32 (!%p512_p9), 1, %s1546_s15   ;;  %s1278_s14 = sshll.u32 (!%p512_p9), %s1554_s17, 2 }
  0x3d   : > { %515 = sbr.rel (%p512_p9) target bundleno = 378 (0x17a), region = 70  ;;  %s1277_s24 = sshll.u32 (!%p512_p9), %s518_s13, 9 }
  0x3e   : > { %p567_p10 = scmp.lt.s32.totalorder (!%p512_p9), %s1278_s14, 15  ;;  %s1280_s25 = sshll.u32 (!%p512_p9), %s1558_s18, 1 }
  0x3f   : > { %p577_p11 = scmp.lt.s32.totalorder (!%p512_p9), %s1280_s25, 3  ;;  %s1816_s13 = scalar_lea.vmem (!%p512_p9), [#allocation3], %s1277_s24 }
  0x40   : > { %p1284_p12 = scmp.ne.s32.totalorder (!%p512_p9), %s1554_s17, 0 }
  0x44   : > { %s1936_s14 = smov (!%p567_p10, %s1278_s14), 15  ;;  %s1938_s25 = smov (!%p577_p11, %s1280_s25), 3 }
  0x45   : > { %s1279_s26 = sshll.u32 %s1936_s14, 2  ;;  %s579_s15 = scalar_lea.vmem %s1920_s2, %s1938_s25  ;;  %v1572_v0 = vmov (!%p1284_p12), 0.0  }
  0x46   : > { %s1798_s30 = scalar_lea.vmem %s1918_s0, %s1279_s26  ;;  %s584_s18 = scalar_lea.vmem %s1921_s3, %s1938_s25  ;;  %600 = vst [vmem:[#allocation2] sm:$0xff] (!%p1284_p12), %v1572_v0  ;;  %601 = vst [vmem:[#allocation2 + $0x8] sm:$0xff] (!%p1284_p12), %v1572_v0 }
  0x47   : > { %s1283_s9 = sshll.u32 %s1938_s25, 2  ;;  %599 = sbr.rel (%p1284_p12) target bundleno = 78 (0x4e), region = 78 }
  0x48   : > { %s1814_s12 = scalar_lea.vmem %s1922_s4, %s1283_s9 }
  0x4e PF: > { %v1416_v1 = vld [vmem:[%s1816_s13 + $0x4] ss:$8 sps:$4 sm:$0xff]   ;;  %v1420_v3 = vld [vmem:[%s1816_s13] ss:$8 sps:$4 sm:$0xff]   ;;  %v1422_v5 = vld [vmem:[%s1816_s13 + $0x14] ss:$8 sps:$4 sm:$0xff]  }
  0x4f   : > { %v1418_v2 = vld [vmem:[%s1816_s13 + $0x104] ss:$8 sps:$4 sm:$0xff]   ;;  %1004 = vmatprep.subr.bf16.mxu0 %v1416_v1  ;;  %v1421_v4 = vld [vmem:[%s1816_s13 + $0x100] ss:$8 sps:$4 sm:$0xff]   ;;  %v1424_v6 = vld [vmem:[%s1816_s13 + $0x114] ss:$8 sps:$4 sm:$0xff]  }
  0x50   : > { %1045 = vmatprep.subr.bf16.mxu1 %v1418_v2  ;;  %1005 = vmatpush1.bf16.msra.mxu0 %v1420_v3  ;;  %v1426_v7 = vld [vmem:[%s1816_s13 + $0x10] ss:$8 sps:$4 sm:$0xff]   ;;  %v1428_v9 = vld [vmem:[%s1816_s13 + $0x24] ss:$8 sps:$4 sm:$0xff]   ;;  %v1432_v11 = vld [vmem:[%s1816_s13 + $0x20] ss:$8 sps:$4 sm:$0xff]  }
  0x51   : > { %1046 = vmatpush1.bf16.msra.mxu1 %v1421_v4  ;;  %1006 = vmatprep.subr.bf16.mxu0 %v1422_v5  ;;  %v1427_v8 = vld [vmem:[%s1816_s13 + $0x110] ss:$8 sps:$4 sm:$0xff]   ;;  %v1430_v10 = vld [vmem:[%s1816_s13 + $0x124] ss:$8 sps:$4 sm:$0xff]   ;;  %v1433_v12 = vld [vmem:[%s1816_s13 + $0x120] ss:$8 sps:$4 sm:$0xff]  }
  0x52   : > { %1047 = vmatprep.subr.bf16.mxu1 %v1424_v6  ;;  %v1434_v13 = vld [vmem:[%s1816_s13 + $0x34] ss:$8 sps:$4 sm:$0xff]   ;;  %v1438_v15 = vld [vmem:[%s1816_s13 + $0x30] ss:$8 sps:$4 sm:$0xff]   ;;  %v1440_v17 = vld [vmem:[%s1816_s13 + $0x44] ss:$8 sps:$4 sm:$0xff]  }
  0x53   : > { %v1436_v14 = vld [vmem:[%s1816_s13 + $0x134] ss:$8 sps:$4 sm:$0xff]   ;;  %v1439_v16 = vld [vmem:[%s1816_s13 + $0x130] ss:$8 sps:$4 sm:$0xff]   ;;  %v1442_v18 = vld [vmem:[%s1816_s13 + $0x144] ss:$8 sps:$4 sm:$0xff]  }
  0x54   : > { %1007 = vmatpush1.bf16.msra.mxu0 %v1426_v7  ;;  %v1444_v19 = vld [vmem:[%s1816_s13 + $0x40] ss:$8 sps:$4 sm:$0xff]   ;;  %v1446_v21 = vld [vmem:[%s1816_s13 + $0x54] ss:$8 sps:$4 sm:$0xff]   ;;  %v1450_v23 = vld [vmem:[%s1816_s13 + $0x50] ss:$8 sps:$4 sm:$0xff]  }
  0x55   : > { %1048 = vmatpush1.bf16.msra.mxu1 %v1427_v8  ;;  %1008 = vmatprep.subr.bf16.mxu0 %v1428_v9  ;;  %v1445_v20 = vld [vmem:[%s1816_s13 + $0x140] ss:$8 sps:$4 sm:$0xff]   ;;  %v1448_v22 = vld [vmem:[%s1816_s13 + $0x154] ss:$8 sps:$4 sm:$0xff]   ;;  %v1451_v24 = vld [vmem:[%s1816_s13 + $0x150] ss:$8 sps:$4 sm:$0xff]  }
  0x56   : > { %1049 = vmatprep.subr.bf16.mxu1 %v1430_v10  ;;  %v1452_v25 = vld [vmem:[%s1816_s13 + $0x64] ss:$8 sps:$4 sm:$0xff]   ;;  %v1456_v27 = vld [vmem:[%s1816_s13 + $0x60] ss:$8 sps:$4 sm:$0xff]   ;;  %v1458_v29 = vld [vmem:[%s1816_s13 + $0x74] ss:$8 sps:$4 sm:$0xff]  }
  0x57   : > { %v1454_v26 = vld [vmem:[%s1816_s13 + $0x164] ss:$8 sps:$4 sm:$0xff]   ;;  %v1457_v28 = vld [vmem:[%s1816_s13 + $0x160] ss:$8 sps:$4 sm:$0xff]   ;;  %v1460_v30 = vld [vmem:[%s1816_s13 + $0x174] ss:$8 sps:$4 sm:$0xff]  }
  0x58   : > { %1009 = vmatpush1.bf16.msra.mxu0 %v1432_v11  ;;  %v1462_v31 = vld [vmem:[%s1816_s13 + $0x70] ss:$8 sps:$4 sm:$0xff]   ;;  %v1464_v33 = vld [vmem:[%s1816_s13 + $0x84] ss:$8 sps:$4 sm:$0xff]   ;;  %v1468_v35 = vld [vmem:[%s1816_s13 + $0x80] ss:$8 sps:$4 sm:$0xff]  }
  0x59   : > { %1050 = vmatpush1.bf16.msra.mxu1 %v1433_v12  ;;  %1010 = vmatprep.subr.bf16.mxu0 %v1434_v13  ;;  %v1463_v32 = vld [vmem:[%s1816_s13 + $0x170] ss:$8 sps:$4 sm:$0xff]   ;;  %v1466_v34 = vld [vmem:[%s1816_s13 + $0x184] ss:$8 sps:$4 sm:$0xff]   ;;  %v1469_v36 = vld [vmem:[%s1816_s13 + $0x180] ss:$8 sps:$4 sm:$0xff]  }
  0x5a   : > { %1051 = vmatprep.subr.bf16.mxu1 %v1436_v14  ;;  %v1470_v37 = vld [vmem:[%s1816_s13 + $0x94] ss:$8 sps:$4 sm:$0xff]   ;;  %v1474_v39 = vld [vmem:[%s1816_s13 + $0x90] ss:$8 sps:$4 sm:$0xff]   ;;  %v1476_v41 = vld [vmem:[%s1816_s13 + $0xa4] ss:$8 sps:$4 sm:$0xff]  }
  0x5b   : > { %v1472_v38 = vld [vmem:[%s1816_s13 + $0x194] ss:$8 sps:$4 sm:$0xff]   ;;  %v1475_v40 = vld [vmem:[%s1816_s13 + $0x190] ss:$8 sps:$4 sm:$0xff]   ;;  %v1478_v42 = vld [vmem:[%s1816_s13 + $0x1a4] ss:$8 sps:$4 sm:$0xff]  }
  0x5c   : > { %1011 = vmatpush1.bf16.msra.mxu0 %v1438_v15  ;;  %v1480_v43 = vld [vmem:[%s1816_s13 + $0xa0] ss:$8 sps:$4 sm:$0xff]   ;;  %v1482_v45 = vld [vmem:[%s1816_s13 + $0xb4] ss:$8 sps:$4 sm:$0xff]   ;;  %v1486_v50 = vld [vmem:[%s1816_s13 + $0xb0] ss:$8 sps:$4 sm:$0xff]  }
  0x5d   : > { %1052 = vmatpush1.bf16.msra.mxu1 %v1439_v16  ;;  %1012 = vmatprep.subr.bf16.mxu0 %v1440_v17  ;;  %v1481_v44 = vld [vmem:[%s1816_s13 + $0x1a0] ss:$8 sps:$4 sm:$0xff]   ;;  %v1484_v46 = vld [vmem:[%s1816_s13 + $0x1b4] ss:$8 sps:$4 sm:$0xff]   ;;  %v1487_v51 = vld [vmem:[%s1816_s13 + $0x1b0] ss:$8 sps:$4 sm:$0xff]  }
  0x5e   : > { %1053 = vmatprep.subr.bf16.mxu1 %v1442_v18  ;;  %v604_v47 = vld [vmem:[%s1798_s30] sm:$0xff]  ;;  %v605_v49 = vld [vmem:[%s1798_s30 + $0x8] sm:$0xff]  ;;  %v1488_v53 = vld [vmem:[%s1816_s13 + $0xc4] ss:$8 sps:$4 sm:$0xff]   ;;  %p1353_p13 = scmp.ne.s32.totalorder %s1554_s17, 3 }
  0x5f   : > { %v1286_v48 = vcombine.high %v604_v47, %v604_v47  ;;  %v1288_v52 = vcombine.high %v605_v49, %v605_v49  ;;  %v1490_v54 = vld [vmem:[%s1816_s13 + $0x1c4] ss:$8 sps:$4 sm:$0xff]   ;;  %v1492_v55 = vld [vmem:[%s1816_s13 + $0xc0] ss:$8 sps:$4 sm:$0xff]   ;;  %v1494_v57 = vld [vmem:[%s1816_s13 + $0xd4] ss:$8 sps:$4 sm:$0xff]   ;;  %v1285_v5 = vcombine.low %v604_v47, %v604_v47  ;;  %v1287_v6 = vcombine.low %v605_v49, %v605_v49 }
  0x60   : > { %1013 = vmatpush1.bf16.msra.mxu0 %v1444_v19  ;;  %v1493_v56 = vld [vmem:[%s1816_s13 + $0x1c0] ss:$8 sps:$4 sm:$0xff]   ;;  %v1496_v58 = vld [vmem:[%s1816_s13 + $0x1d4] ss:$8 sps:$4 sm:$0xff]   ;;  %v1498_v59 = vld [vmem:[%s1816_s13 + $0xd0] ss:$8 sps:$4 sm:$0xff]  }
  0x61   : > { %1054 = vmatpush1.bf16.msra.mxu1 %v1445_v20  ;;  %1014 = vmatprep.subr.bf16.mxu0 %v1446_v21  ;;  %v1499_v60 = vld [vmem:[%s1816_s13 + $0x1d0] ss:$8 sps:$4 sm:$0xff]   ;;  %v1500_v61 = vld [vmem:[%s1816_s13 + $0xe4] ss:$8 sps:$4 sm:$0xff]   ;;  %v1504_v63 = vld [vmem:[%s1816_s13 + $0xe0] ss:$8 sps:$4 sm:$0xff]   ;;  %v1098_v21 = vlaneseq (!%p1353_p13) }
  0x62   : > { %1055 = vmatprep.subr.bf16.mxu1 %v1448_v22  ;;  %1036 = vmatprep.mubr.bf16.mxu0 %v1286_v48  ;;  %v1502_v62 = vld [vmem:[%s1816_s13 + $0x1e4] ss:$8 sps:$4 sm:$0xff]   ;;  %v1505_v0 = vld [vmem:[%s1816_s13 + $0x1e0] ss:$8 sps:$4 sm:$0xff]   ;;  %v1506_v1 = vld [vmem:[%s1816_s13 + $0xf4] ss:$8 sps:$4 sm:$0xff]  }
  0x63   : > { %1077 = vmatprep.mubr.bf16.mxu1 %v1288_v52  ;;  %v1508_v2 = vld [vmem:[%s1816_s13 + $0x1f4] ss:$8 sps:$4 sm:$0xff]   ;;  %v1510_v3 = vld [vmem:[%s1816_s13 + $0xf0] ss:$8 sps:$4 sm:$0xff]   ;;  %v1099_v22 = vshrl.u32 (!%p1353_p13), %v1098_v21, 7 }
  0x64   : > { %1015 = vmatpush1.bf16.msra.mxu0 %v1450_v23  ;;  %v1511_v4 = vld [vmem:[%s1816_s13 + $0x1f0] ss:$8 sps:$4 sm:$0xff]  }
  0x65   : > { %1056 = vmatpush1.bf16.msra.mxu1 %v1451_v24  ;;  %1016 = vmatprep.subr.bf16.mxu0 %v1452_v25  ;;  %v602_v8 = vld [vmem:[#allocation2] sm:$0xff]  ;;  %v603_v12 = vld [vmem:[#allocation2 + $0x8] sm:$0xff]  ;;  %v1100_v25 = vsub.s32 (!%p1353_p13), 0, %v1099_v22 }
  0x66   : > { %1057 = vmatprep.subr.bf16.mxu1 %v1454_v26  ;;  %v1096_v23 = vld [vmem:[%s579_s15] sm:$0x3] (!%p1353_p13)  ;;  %v1104_v26 = vsub.s32 (!%p1353_p13), 1, %v1099_v22 }
  0x67   : > { %v1110_v24 = vld [vmem:[%s584_s18] sm:$0x3] (!%p1353_p13) }
  0x68   : > { %1017 = vmatpush1.bf16.msra.mxu0 %v1456_v27 }
  0x69   : > { %1058 = vmatpush1.bf16.msra.mxu1 %v1457_v28  ;;  %1018 = vmatprep.subr.bf16.mxu0 %v1458_v29  ;;  %v1101_v29 = vrot.slane (!%p1353_p13), %v1096_v23, %v1100_v25 }
  0x6a   : > { %1059 = vmatprep.subr.bf16.mxu1 %v1460_v30  ;;  %v1105_v30 = vrot.slane (!%p1353_p13), %v1096_v23, %v1104_v26 }
  0x6c   : > { %1019 = vmatpush1.bf16.msra.mxu0 %v1462_v31  ;;  %v1115_v31 = vrot.slane (!%p1353_p13), %v1110_v24, %v1100_v25 }
  0x6d   : > { %1060 = vmatpush1.bf16.msra.mxu1 %v1463_v32  ;;  %1020 = vmatprep.subr.bf16.mxu0 %v1464_v33  ;;  %v1119_v32 = vrot.slane (!%p1353_p13), %v1110_v24, %v1104_v26 }
  0x6e   : > { %1061 = vmatprep.subr.bf16.mxu1 %v1466_v34 }
  0x70   : > { %1021 = vmatpush1.bf16.msra.mxu0 %v1468_v35 }
  0x71   : > { %1062 = vmatpush1.bf16.msra.mxu1 %v1469_v36  ;;  %1022 = vmatprep.subr.bf16.mxu0 %v1470_v37 }
  0x72   : > { %1063 = vmatprep.subr.bf16.mxu1 %v1472_v38 }
  0x74   : > { %1023 = vmatpush1.bf16.msra.mxu0 %v1474_v39 }
  0x75   : > { %1064 = vmatpush1.bf16.msra.mxu1 %v1475_v40  ;;  %1024 = vmatprep.subr.bf16.mxu0 %v1476_v41 }
  0x76   : > { %1065 = vmatprep.subr.bf16.mxu1 %v1478_v42 }
  0x78   : > { %1025 = vmatpush1.bf16.msra.mxu0 %v1480_v43 }
  0x79   : > { %1066 = vmatpush1.bf16.msra.mxu1 %v1481_v44  ;;  %1026 = vmatprep.subr.bf16.mxu0 %v1482_v45 }
  0x7a   : > { %1067 = vmatprep.subr.bf16.mxu1 %v1484_v46 }
  0x7c   : > { %1027 = vmatpush1.bf16.msra.mxu0 %v1486_v50 }
  0x7d   : > { %1068 = vmatpush1.bf16.msra.mxu1 %v1487_v51  ;;  %1028 = vmatprep.subr.bf16.mxu0 %v1488_v53 }
  0x7e   : > { %1069 = vmatprep.subr.bf16.mxu1 %v1490_v54 }
  0x80   : > { %1029 = vmatpush1.bf16.msra.mxu0 %v1492_v55 }
  0x81   : > { %1070 = vmatpush1.bf16.msra.mxu1 %v1493_v56  ;;  %1030 = vmatprep.subr.bf16.mxu0 %v1494_v57 }
  0x82   : > { %1071 = vmatprep.subr.bf16.mxu1 %v1496_v58 }
  0x84   : > { %1031 = vmatpush1.bf16.msra.mxu0 %v1498_v59 }
  0x85   : > { %1072 = vmatpush1.bf16.msra.mxu1 %v1499_v60  ;;  %1032 = vmatprep.subr.bf16.mxu0 %v1500_v61 }
  0x86   : > { %1073 = vmatprep.subr.bf16.mxu1 %v1502_v62 }
  0x88   : > { %1033 = vmatpush1.bf16.msra.mxu0 %v1504_v63 }
  0x89   : > { %1074 = vmatpush1.bf16.msra.mxu1 %v1505_v0  ;;  %1034 = vmatprep.subr.bf16.mxu0 %v1506_v1 }
  0x8a   : > { %1075 = vmatprep.subr.bf16.mxu1 %v1508_v2 }
  0x8c   : > { %1035 = vmatpush1.bf16.msra.mxu0 %v1510_v3 }
  0x8d   : > { %1076 = vmatpush1.bf16.msra.mxu1 %v1511_v4 }
  0x8f   : > { %1037 = vmatmul.mubr.bf16.vlgmr.msra.gmra.mrb[0].mxu0 %v1285_v5 }
  0x90   : > { %1078 = vmatmul.mubr.bf16.vlgmr.msra.gmra.mrb[0].mxu1 %v1287_v6 }
 0x162   : > { %v1038_v7 = vpop.f32.mrb[0].mxu0 }
 0x163   : > { %v1079_v9 = vpop.f32.mrb[0].mxu1  ;;  %v1040_v11 = vpop.f32.mrb[1].mxu0  ;;  %1093 = sbr.rel (%p1353_p13) target bundleno = 378 (0x17a), region = 82 }
 0x164   : > { %v1080_v10 = vadd.f32 %v1079_v9, %v1038_v7  ;;  %v1081_v13 = vpop.f32.mrb[1].mxu1  ;;  %v1042_v15 = vpop.f32.mrb[2].mxu0 }
 0x165   : > { %v1082_v14 = vadd.f32 %v1081_v13, %v1040_v11  ;;  %v1083_v16 = vpop.f32.mrb[2].mxu1  ;;  %v1043_v18 = vpop.f32.mrb[3].mxu0 }
 0x166   : > { %v1086_v17 = vadd.f32 %v1080_v10, %v602_v8  ;;  %v1084_v19 = vpop.f32.mrb[3].mxu1 }
 0x167   : > { %v1087_v20 = vadd.f32 %v1082_v14, %v603_v12 }
 0x168   : > { %1088 = vst [vmem:[#allocation2] sm:$0xff] %v1086_v17 }
 0x169   : > { %1089 = vst [vmem:[#allocation2 + $0x8] sm:$0xff] %v1087_v20 }
 0x16f   : > { %v1094_v27 = vld [vmem:[#allocation2] sm:$0xff] }
 0x170   : > { %v1095_v28 = vld [vmem:[#allocation2 + $0x8] sm:$0xff]  ;;  %v1108_v33 = vmul.f32 %v1101_v29, %v1094_v27 }
 0x171   : > { %v1109_v34 = vmul.f32 %v1105_v30, %v1095_v28 }
 0x172   : > { %v1122_v35 = vadd.f32 %v1115_v31, %v1108_v33 }
 0x173   : > { %v1123_v36 = vadd.f32 %v1119_v32, %v1109_v34 }
 0x174   : > { %v1124_v37 = vmax.f32 %v1122_v35, 0.0 }
 0x175   : > { %v1125_v38 = vmax.f32 %v1123_v36, 0.0 }
 0x177   : > { %v1358_v39 = vpack.c.bf16 %v1125_v38, %v1124_v37 }
 0x179   : > { %1134 = vst [vmem:[%s1814_s12] sm:$0xff] %v1358_v39 }
 0x17a PF: > { %s14_s21 = sadd.s32 1, %s1570_s21   ;;  %s1923_s15 = smov %s1550_s16 }
 0x17b   : > { %p11_p0 = scmp.ge.s32.totalorder %s14_s21, 10   ;;  %s1924_s16 = smov %s1649_s28 }
 0x17c   : > { %s1925_s17 = smov %s1562_s19  ;;  %s1926_s18 = smov %s1566_s20 }
 0x17d   : > { %s1927_s19 = smov %s1930_s22  ;;  %s1928_s20 = smov %s1934_s23 }
 0x17e   :  { %13 = sbr.rel (!%p11_p0) target bundleno = 4 (0x4), region = 126 }

// kernel: resnet50_forward.110
= control target key start
LH: loop header
LB: loop body
LE: loop exit
PB: predicated region body
PF: predicated region fallthrough
CT: control target
= control target key end

     0   :  { %vm41_vm0 = vcmask 1041409   ;;  %vm43_vm1 = vcmask 1043459   ;;  %vm45_vm2 = vcmask 1045509   ;;  %vm47_vm3 = vcmask 1047559   ;;  %s132_s0 = inlined_call_operand.vmem [shape: bf16[2,1,2048], index: 0, kind: input, shape index: {}]   ;;  %s133_s1 = inlined_call_operand.vmem [shape: f32[2,2048], index: 1, kind: output, shape index: {}]  }
   0x1   :  { %v8_v0 = vld [vmem:[%s132_s0] sm:$0xff]  ;;  %v10_v1 = vld [vmem:[%s132_s0 + $0x10] sm:$0xff]  ;;  %v9_v2 = vld [vmem:[%s132_s0 + $0x8] sm:$0xff] }
   0x2   :  { %v12_v3 = vunpack.c.l.bf16 %v8_v0  ;;  %v16_v4 = vunpack.c.l.bf16 %v10_v1  ;;  %v13_v5 = vunpack.c.h.bf16 %v8_v0  ;;  %v17_v6 = vunpack.c.h.bf16 %v10_v1  ;;  %v11_v7 = vld [vmem:[%s132_s0 + $0x18] sm:$0xff] }
   0x3   :  { %v14_v8 = vunpack.c.l.bf16 %v9_v2  ;;  %v18_v9 = vunpack.c.l.bf16 %v11_v7  ;;  %v15_v10 = vunpack.c.h.bf16 %v9_v2  ;;  %v19_v11 = vunpack.c.h.bf16 %v11_v7 }
   0x4   :  { %v40_v12 = vrot.slane %v16_v4, 7  ;;  %v51_v13 = vrot.slane %v17_v6, 7 }
   0x5   :  { %v58_v14 = vrot.slane %v18_v9, 7  ;;  %v65_v15 = vrot.slane %v19_v11, 7 }
   0x6   :  { %v42_v16 = vsel %vm41_vm0, %v40_v12, %v12_v3  ;;  %v52_v17 = vsel %vm41_vm0, %v51_v13, %v13_v5 }
   0x7   :  { %v44_v18 = vsel %vm43_vm1, %v40_v12, %v42_v16  ;;  %v53_v19 = vsel %vm43_vm1, %v51_v13, %v52_v17  ;;  %v59_v20 = vsel %vm41_vm0, %v58_v14, %v14_v8  ;;  %v66_v21 = vsel %vm41_vm0, %v65_v15, %v15_v10 }
   0x8   :  { %v46_v22 = vsel %vm45_vm2, %v40_v12, %v44_v18  ;;  %v54_v23 = vsel %vm45_vm2, %v51_v13, %v53_v19  ;;  %v60_v24 = vsel %vm43_vm1, %v58_v14, %v59_v20  ;;  %v67_v25 = vsel %vm43_vm1, %v65_v15, %v66_v21 }
   0x9   :  { %v48_v26 = vsel %vm47_vm3, %v40_v12, %v46_v22  ;;  %v55_v27 = vsel %vm47_vm3, %v51_v13, %v54_v23  ;;  %v61_v28 = vsel %vm45_vm2, %v58_v14, %v60_v24  ;;  %v68_v29 = vsel %vm45_vm2, %v65_v15, %v67_v25 }
   0xa   :  { %74 = vst [vmem:[%s133_s1] sm:$0xff] %v48_v26  ;;  %75 = vst [vmem:[%s133_s1 + $0x8] sm:$0xff] %v55_v27  ;;  %v62_v30 = vsel %vm47_vm3, %v58_v14, %v61_v28  ;;  %v69_v31 = vsel %vm47_vm3, %v65_v15, %v68_v29 }
   0xb   :  { %76 = vst [vmem:[%s133_s1 + $0x10] sm:$0xff] %v62_v30  ;;  %77 = vst [vmem:[%s133_s1 + $0x18] sm:$0xff] %v69_v31 }

// kernel: resnet50_forward.111
= control target key start
LH: loop header
LB: loop body
LE: loop exit
PB: predicated region body
PF: predicated region fallthrough
CT: control target
= control target key end

     0   :  { %s1019_s15 = smov 0   ;;  %s1021_s16 = smov 0   ;;  %s1105_s0 = inlined_call_operand.vmem [shape: bf16[8,2048], index: 0, kind: input, shape index: {}]   ;;  %s1106_s1 = inlined_call_operand.vmem [shape: bf16[2048,128], index: 1, kind: input, shape index: {}]   ;;  %s1107_s2 = inlined_call_operand.vmem [shape: f32[1,128], index: 2, kind: input, shape index: {}]   ;;  %s1108_s3 = inlined_call_operand.vmem [shape: f32[1,128], index: 3, kind: input, shape index: {}]   ;;  %s1109_s4 = inlined_call_operand.vmem [shape: f32[8,128], index: 4, kind: output, shape index: {}]  }
   0x1   :  { %s1023_s17 = smov 0  }
   0x2 LB: > { %s26_s18 = sadd.s32 1, %s987_s16  ;;  %p811_p0 = scmp.ge.s32.totalorder %s991_s17, 1  ;;  %s991_s17 = sphi %s1023_s17, %s14_s17   ;;  %s987_s16 = sphi %s1021_s16, %s1111_s16   ;;  %s983_s15 = sphi %s1019_s15, %s1110_s15  }
   0x3   : > { %p27_p1 = scmp.ge.s32.totalorder %s26_s18, 4  ;;  %p222_p2 = scmp.lt.s32.totalorder %s991_s17, 5 }
   0x5   : > { %s1113_s18 = smov (%p27_p1, %s26_s18), 0  ;;  %p223_p3 = pnand %p811_p0, %p222_p2 }
   0x6   : > { %s812_s19 = sshll.u32 (!%p223_p3), %s983_s15, 2  ;;  %s814_s20 = sshll.u32 (!%p223_p3), %s983_s15, 6 }
   0x7   : > { %226 = sbr.rel (%p223_p3) target bundleno = 317 (0x13d), region = 36  ;;  %p271_p4 = scmp.lt.s32.totalorder (!%p223_p3), %s812_s19, 15 }
   0x8   : > { %p279_p5 = scmp.lt.s32.totalorder (!%p223_p3), %s814_s20, 255  ;;  %p816_p6 = scmp.ne.s32.totalorder (!%p223_p3), %s983_s15, 0 }
   0xe   : > { %s1115_s19 = smov (!%p271_p4, %s812_s19), 15  ;;  %s1117_s20 = smov (!%p279_p5, %s814_s20), 255 }
   0xf   : > { %s813_s21 = sshll.u32 %s1115_s19, 2  ;;  %s815_s25 = sshll.u32 %s1117_s20, 2  ;;  %v993_v0 = vmov (!%p816_p6), 0.0  }
  0x10   : > { %s1044_s24 = scalar_lea.vmem %s1105_s0, %s813_s21  ;;  %s1049_s28 = scalar_lea.vmem %s1106_s1, %s815_s25  ;;  %305 = vst [vmem:[#allocation2] sm:$0xff] (!%p816_p6), %v993_v0 }
  0x11   : > { %304 = sbr.rel (%p816_p6) target bundleno = 24 (0x18), region = 40 }
  0x18 PF: > { %v929_v1 = vld [vmem:[%s1049_s28 + $0x40] sm:$0xff]   ;;  %v933_v5 = vld [vmem:[%s1049_s28 + $0x48] sm:$0xff]   ;;  %v937_v9 = vld [vmem:[%s1049_s28 + $0x50] sm:$0xff]   ;;  %p853_p7 = scmp.ne.s32.totalorder %s983_s15, 3 }
  0x19   : > { %v930_v2 = vld [vmem:[%s1049_s28 + $0xc0] sm:$0xff]   ;;  %860 = vmatprep.subr.bf16.mxu0 %v929_v1  ;;  %v934_v6 = vld [vmem:[%s1049_s28 + $0xc8] sm:$0xff]   ;;  %v938_v10 = vld [vmem:[%s1049_s28 + $0xd0] sm:$0xff]  }
  0x1a   : > { %v931_v3 = vld [vmem:[%s1049_s28] sm:$0xff]   ;;  %882 = vmatprep.subr.bf16.mxu1 %v930_v2  ;;  %v935_v7 = vld [vmem:[%s1049_s28 + $0x8] sm:$0xff]   ;;  %v939_v11 = vld [vmem:[%s1049_s28 + $0x10] sm:$0xff]  }
  0x1b   : > { %v932_v4 = vld [vmem:[%s1049_s28 + $0x80] sm:$0xff]   ;;  %861 = vmatpush3.bf16.msra.mxu0 %v931_v3  ;;  %v936_v8 = vld [vmem:[%s1049_s28 + $0x88] sm:$0xff]   ;;  %v940_v12 = vld [vmem:[%s1049_s28 + $0x90] sm:$0xff]  }
  0x1c   : > { %883 = vmatpush3.bf16.msra.mxu1 %v932_v4  ;;  %862 = vmatprep.subr.bf16.mxu0 %v933_v5  ;;  %v941_v13 = vld [vmem:[%s1049_s28 + $0x58] sm:$0xff]   ;;  %v945_v17 = vld [vmem:[%s1049_s28 + $0x60] sm:$0xff]   ;;  %v949_v21 = vld [vmem:[%s1049_s28 + $0x68] sm:$0xff]  }
  0x1d   : > { %884 = vmatprep.subr.bf16.mxu1 %v934_v6  ;;  %v942_v14 = vld [vmem:[%s1049_s28 + $0xd8] sm:$0xff]   ;;  %v946_v18 = vld [vmem:[%s1049_s28 + $0xe0] sm:$0xff]   ;;  %v950_v22 = vld [vmem:[%s1049_s28 + $0xe8] sm:$0xff]  }
  0x1e   : > { %v943_v15 = vld [vmem:[%s1049_s28 + $0x18] sm:$0xff]   ;;  %v947_v19 = vld [vmem:[%s1049_s28 + $0x20] sm:$0xff]   ;;  %v951_v23 = vld [vmem:[%s1049_s28 + $0x28] sm:$0xff]  }
  0x1f   : > { %863 = vmatpush3.bf16.msra.mxu0 %v935_v7  ;;  %v944_v16 = vld [vmem:[%s1049_s28 + $0x98] sm:$0xff]   ;;  %v948_v20 = vld [vmem:[%s1049_s28 + $0xa0] sm:$0xff]   ;;  %v952_v24 = vld [vmem:[%s1049_s28 + $0xa8] sm:$0xff]  }
  0x20   : > { %885 = vmatpush3.bf16.msra.mxu1 %v936_v8  ;;  %864 = vmatprep.subr.bf16.mxu0 %v937_v9  ;;  %v953_v25 = vld [vmem:[%s1049_s28 + $0x70] sm:$0xff]   ;;  %v957_v29 = vld [vmem:[%s1049_s28 + $0x78] sm:$0xff]   ;;  %v307_v33 = vld [vmem:[%s1044_s24] sm:$0xff] }
  0x21   : > { %886 = vmatprep.subr.bf16.mxu1 %v938_v10  ;;  %v954_v26 = vld [vmem:[%s1049_s28 + $0xf0] sm:$0xff]   ;;  %v958_v30 = vld [vmem:[%s1049_s28 + $0xf8] sm:$0xff]   ;;  %v308_v34 = vld [vmem:[%s1044_s24 + $0x8] sm:$0xff]  ;;  %v817_v35 = vcombine.low %v307_v33, %v307_v33  ;;  %v818_v36 = vcombine.high %v307_v33, %v307_v33 }
  0x22   : > { %v955_v27 = vld [vmem:[%s1049_s28 + $0x30] sm:$0xff]   ;;  %v959_v31 = vld [vmem:[%s1049_s28 + $0x38] sm:$0xff]   ;;  %v819_v37 = vcombine.low %v308_v34, %v308_v34  ;;  %v820_v38 = vcombine.high %v308_v34, %v308_v34  ;;  %v306_v47 = vld [vmem:[#allocation2] sm:$0xff] }
  0x23   : > { %865 = vmatpush3.bf16.msra.mxu0 %v939_v11  ;;  %v956_v28 = vld [vmem:[%s1049_s28 + $0xb0] sm:$0xff]   ;;  %v960_v32 = vld [vmem:[%s1049_s28 + $0xb8] sm:$0xff]   ;;  %611 = vmatprep.mubr.bf16.mxu0 %v818_v36  ;;  %v854_v53 = vld [vmem:[%s1107_s2] ss:$0 sm:$0xff] (!%p853_p7) }
  0x24   : > { %887 = vmatpush3.bf16.msra.mxu1 %v940_v12  ;;  %866 = vmatprep.subr.bf16.mxu0 %v941_v13  ;;  %v855_v54 = vld [vmem:[%s1108_s3] ss:$0 sm:$0xff] (!%p853_p7) }
  0x25   : > { %888 = vmatprep.subr.bf16.mxu1 %v942_v14  ;;  %651 = vmatprep.mubr.bf16.mxu1 %v820_v38 }
  0x27   : > { %867 = vmatpush3.bf16.msra.mxu0 %v943_v15 }
  0x28   : > { %889 = vmatpush3.bf16.msra.mxu1 %v944_v16  ;;  %868 = vmatprep.subr.bf16.mxu0 %v945_v17 }
  0x29   : > { %890 = vmatprep.subr.bf16.mxu1 %v946_v18 }
  0x2b   : > { %869 = vmatpush3.bf16.msra.mxu0 %v947_v19 }
  0x2c   : > { %891 = vmatpush3.bf16.msra.mxu1 %v948_v20  ;;  %870 = vmatprep.subr.bf16.mxu0 %v949_v21 }
  0x2d   : > { %892 = vmatprep.subr.bf16.mxu1 %v950_v22 }
  0x2f   : > { %871 = vmatpush3.bf16.msra.mxu0 %v951_v23 }
  0x30   : > { %893 = vmatpush3.bf16.msra.mxu1 %v952_v24  ;;  %872 = vmatprep.subr.bf16.mxu0 %v953_v25 }
  0x31   : > { %894 = vmatprep.subr.bf16.mxu1 %v954_v26 }
  0x33   : > { %873 = vmatpush3.bf16.msra.mxu0 %v955_v27 }
  0x34   : > { %895 = vmatpush3.bf16.msra.mxu1 %v956_v28  ;;  %874 = vmatprep.subr.bf16.mxu0 %v957_v29 }
  0x35   : > { %896 = vmatprep.subr.bf16.mxu1 %v958_v30 }
  0x37   : > { %875 = vmatpush3.bf16.msra.mxu0 %v959_v31 }
  0x38   : > { %897 = vmatpush3.bf16.msra.mxu1 %v960_v32 }
  0x3a   : > { %612 = vmatmul.mubr.bf16.vlgmr.msra.gmra.mrb[0].mxu0 %v817_v35 }
  0x3b   : > { %652 = vmatmul.mubr.bf16.vlgmr.msra.gmra.mrb[0].mxu1 %v819_v37 }
 0x10d   : > { %v876_v39 = vpop.f32.mrb[0].mxu0 }
 0x10e   : > { %v898_v40 = vpop.f32.mrb[0].mxu1  ;;  %v877_v41 = vpop.f32.mrb[1].mxu0 }
 0x10f   : > { %v899_v42 = vpop.f32.mrb[1].mxu1  ;;  %v878_v43 = vadd.f32 %v877_v41, %v876_v39  ;;  %v879_v45 = vpop.f32.mrb[2].mxu0 }
 0x110   : > { %v900_v44 = vadd.f32 %v899_v42, %v898_v40  ;;  %v901_v46 = vpop.f32.mrb[2].mxu1  ;;  %v880_v48 = vpop.f32.mrb[3].mxu0  ;;  %664 = sbr.rel (%p853_p7) target bundleno = 317 (0x13d), region = 44 }
 0x111   : > { %v902_v49 = vpop.f32.mrb[3].mxu1 }
 0x112   : > { %v654_v50 = vadd.f32 %v900_v44, %v878_v43 }
 0x114   : > { %v659_v51 = vadd.f32 %v654_v50, %v306_v47 }
 0x116   : > { %660 = vst [vmem:[#allocation2] sm:$0xff] %v659_v51 }
 0x11d   : > { %v665_v52 = vld [vmem:[#allocation2] sm:$0xff] }
 0x11e   : > { %v673_v55 = vmul.f32 %v854_v53, %v665_v52 }
 0x120   : > { %v681_v56 = vadd.f32 %v855_v54, %v673_v55 }
 0x122   : > { %v856_v57 = vmul.f32 -1.442695, %v681_v56 }
 0x124   : > { %965 = vpow2.f32 %v856_v57 }
 0x12e   : > { %v966_v58 = vpop.eup %965 }
 0x12f   : > { %v685_v59 = vadd.f32 1.0, %v966_v58 }
 0x131   : > { %967 = vrcp.f32 %v685_v59 }
 0x13b   : > { %v968_v60 = vpop.eup %967 }
 0x13c   : > { %688 = vst [vmem:[%s1109_s4] sm:$0xff] %v968_v60 }
 0x13d PF: > { %s14_s17 = sadd.s32 1, %s991_s17   ;;  %s1110_s15 = smov %s987_s16 }
 0x13e   : > { %p11_p8 = scmp.ge.s32.totalorder %s14_s17, 6   ;;  %s1111_s16 = smov %s1113_s18 }
 0x140   :  { %13 = sbr.rel (!%p11_p8) target bundleno = 2 (0x2), region = 83 }

</bundles_post_ra>
